<compile_context>
chip_gen: v5e
topology: v5e:2x2
jax: 0.10.0
libtpu: 0.0.40
codegen_flags: <defaults>
</compile_context>

<pallas_src>
import functools
import numpy as np
import jax
import jax.numpy as jnp
from jax.experimental import pallas as pl
from jax.experimental.pallas import tpu as pltpu


# ----------------------------------------------------------------------------
# Pallas kernels
# ----------------------------------------------------------------------------

def dual_matmul_bias_kernel(x_ref, w_ref, b_ref, o1_ref, o2_ref, *, selu):
    """y = (SELU)(x @ W_fused + b_fused); split along lanes into two outputs.

    x_ref: (tile, Fi)      row tile of the input
    w_ref: (Fi, 2*Fo)      fused weight (resident in VMEM across row tiles)
    b_ref: (1, 2*Fo)       fused bias
    o1/o2: (tile, Fo)      the two halves of the fused output
    """
    x = x_ref[...].astype(jnp.bfloat16)
    w = w_ref[...].astype(jnp.bfloat16)
    y = jnp.dot(x, w, preferred_element_type=jnp.float32) + b_ref[...]
    if selu:
        alpha = 1.6732632423543772
        scale = 1.0507009873554805
        # exp only on the non-positive branch (clamp avoids overflow garbage).
        y = scale * jnp.where(y > 0, y, alpha * (jnp.exp(jnp.minimum(y, 0.0)) - 1.0))
    fo = o1_ref.shape[-1]
    o1_ref[...] = y[:, :fo].astype(o1_ref.dtype)
    o2_ref[...] = y[:, fo:].astype(o2_ref.dtype)


def bilstm_chunk_kernel(gxf_ref, gxb_ref, whh_f_ref, whh_b_ref,
                        yf_ref, yb_ref, h_sc, c_sc, *, kt, hid):
    """Kt fused bidirectional LSTM time steps per grid iteration.

    gxf_ref: (Kt, B, 4H)  precomputed x@Wih_f + b_f for times [i*Kt, (i+1)*Kt)
    gxb_ref: (Kt, B, 4H)  same for backward dir, time-reversed block
                          (reversal handled by the BlockSpec index_map)
    whh_*:   (H, 4H)      hidden->gate weights (VMEM-resident)
    yf_ref:  (Kt, B, H)   fwd outputs for this time block
    yb_ref:  (Kt, B, H)   bwd outputs, written to the mirrored time block
    h_sc/c_sc: (2, B, H)  recurrent state scratch, [0]=fwd, [1]=bwd
    Gate order matches PyTorch: i, f, g, o.
    """
    blk = pl.program_id(0)

    @pl.when(blk == 0)
    def _init():
        h_sc[...] = jnp.zeros_like(h_sc)
        c_sc[...] = jnp.zeros_like(c_sc)

    whh_f = whh_f_ref[...].astype(jnp.bfloat16)
    whh_b = whh_b_ref[...].astype(jnp.bfloat16)

    h_f, c_f = h_sc[0], c_sc[0]
    h_b, c_b = h_sc[1], c_sc[1]

    def gate_step(gx, h_prev, c_prev, whh):
        # Only the small hidden projection runs per step; x-proj was hoisted.
        gates = gx.astype(jnp.float32) + jnp.dot(
            h_prev.astype(jnp.bfloat16), whh, preferred_element_type=jnp.float32)
        i_g = jax.nn.sigmoid(gates[:, 0 * hid:1 * hid])
        f_g = jax.nn.sigmoid(gates[:, 1 * hid:2 * hid])
        g_g = jnp.tanh(gates[:, 2 * hid:3 * hid])
        o_g = jax.nn.sigmoid(gates[:, 3 * hid:4 * hid])
        c = f_g * c_prev + i_g * g_g
        h = o_g * jnp.tanh(c)
        return h, c

    # Static (fully unrolled) inner loop over the Kt time steps of this block.
    for s in range(kt):
        h_f, c_f = gate_step(gxf_ref[s], h_f, c_f, whh_f)
        yf_ref[s] = h_f.astype(yf_ref.dtype)
        sb = kt - 1 - s            # backward direction walks the block in reverse
        h_b, c_b = gate_step(gxb_ref[sb], h_b, c_b, whh_b)
        yb_ref[sb] = h_b.astype(yb_ref.dtype)

    h_sc[0] = h_f
    c_sc[0] = c_f
    h_sc[1] = h_b
    c_sc[1] = c_b


# ----------------------------------------------------------------------------
# Wrappers around pallas_call
# ----------------------------------------------------------------------------

def dual_matmul_bias(x2d, w_fused, b_fused, *, selu=False,
                     out_dtype=jnp.float32, row_tile=1024):
    """Row-tiled (o1, o2) = split((SELU)(x2d @ W_fused + b_fused), 2, axis=-1)."""
    N, Fi = x2d.shape
    Ftot = w_fused.shape[1]
    Fo = Ftot // 2
    tile = min(N, row_tile)
    n_pad = ((N + tile - 1) // tile) * tile     # pad rows -> no garbage partial tiles
    if n_pad != N:
        x2d = jnp.pad(x2d, ((0, n_pad - N), (0, 0)))
    grid = (n_pad // tile,)

    o1, o2 = pl.pallas_call(
        functools.partial(dual_matmul_bias_kernel, selu=selu),
        out_shape=(jax.ShapeDtypeStruct((n_pad, Fo), out_dtype),
                   jax.ShapeDtypeStruct((n_pad, Fo), out_dtype)),
        grid=grid,
        in_specs=[
            pl.BlockSpec((tile, Fi), lambda i: (i, 0)),
            pl.BlockSpec((Fi, Ftot), lambda i: (0, 0)),   # fused weight resident
            pl.BlockSpec((1, Ftot), lambda i: (0, 0)),
        ],
        out_specs=(pl.BlockSpec((tile, Fo), lambda i: (i, 0)),
                   pl.BlockSpec((tile, Fo), lambda i: (i, 0))),
        compiler_params=pltpu.CompilerParams(
            dimension_semantics=("parallel",)),
    )(x2d, w_fused, b_fused)

    if n_pad != N:
        o1 = o1[:N]
        o2 = o2[:N]
    return o1, o2


def bilstm_recurrence(gxf, gxb, whh_f, whh_b, *, kt_max=16):
    """Run the fused bidirectional recurrence, Kt time steps per grid iter.

    gxf, gxb: (T, B, 4H) precomputed input gate pre-activations (time-major).
    Returns yf, yb: (T, B, H), both in original time order.
    """
    T, B, G = gxf.shape
    H = G // 4
    kt = max(d for d in range(1, min(T, kt_max) + 1) if T % d == 0)
    nb = T // kt

    yf, yb = pl.pallas_call(
        functools.partial(bilstm_chunk_kernel, kt=kt, hid=H),
        out_shape=(jax.ShapeDtypeStruct((T, B, H), jnp.float32),
                   jax.ShapeDtypeStruct((T, B, H), jnp.float32)),
        grid=(nb,),
        in_specs=[
            pl.BlockSpec((kt, B, G), lambda i: (i, 0, 0)),
            pl.BlockSpec((kt, B, G), lambda i: (nb - 1 - i, 0, 0)),  # reversed read
            pl.BlockSpec((H, G), lambda i: (0, 0)),
            pl.BlockSpec((H, G), lambda i: (0, 0)),
        ],
        out_specs=(
            pl.BlockSpec((kt, B, H), lambda i: (i, 0, 0)),
            pl.BlockSpec((kt, B, H), lambda i: (nb - 1 - i, 0, 0)),  # reversed write
        ),
        scratch_shapes=[pltpu.VMEM((2, B, H), jnp.float32),
                        pltpu.VMEM((2, B, H), jnp.float32)],
        compiler_params=pltpu.CompilerParams(
            dimension_semantics=("arbitrary",)),   # sequential recurrence
    )(gxf, gxb, whh_f, whh_b)
    return yf, yb


def bilstm_layer(x_tm, p):
    """Bidirectional LSTM layer, time-major in/out.

    x_tm: (T, B, D).  Returns (y_tm (T, B, 2H), yf (T,B,H), yb (T,B,H)).
    """
    T, B, D = x_tm.shape
    H = p["whh_f"].shape[0]
    x2d = x_tm.reshape(T * B, D)
    # Hoisted + fused input projections: one MXU matmul over T*B rows, Fo=8H,
    # writing the fwd/bwd gate pre-activations as separate bf16 outputs.
    gxf2d, gxb2d = dual_matmul_bias(x2d, p["wih"], p["b_ih"],
                                    out_dtype=jnp.bfloat16)
    gxf = gxf2d.reshape(T, B, 4 * H)
    gxb = gxb2d.reshape(T, B, 4 * H)
    yf, yb = bilstm_recurrence(gxf, gxb, p["whh_f"], p["whh_b"])
    y = jnp.concatenate([yf, yb], axis=-1)        # (T, B, 2H)
    return y, yf, yb


# ----------------------------------------------------------------------------
# Encoder forward (glue in plain JAX, time-major throughout)
# ----------------------------------------------------------------------------

def stride2_tm(x_tm):
    """Pyramid reduction, time-major: drop odd tail, halve T, double features."""
    T, B, F = x_tm.shape
    T2 = (T // 2) * 2
    x_tm = x_tm[:T2]
    # LockedDropout(0.05) is identity in eval mode.
    return jnp.concatenate([x_tm[0:T2:2], x_tm[1:T2:2]], axis=-1)


def encoder_forward(params, x, seq_len):
    y = jnp.transpose(x, (1, 0, 2))               # (T, B, F) time-major once

    y, _, _ = bilstm_layer(y, params["lstm1"])
    y = stride2_tm(y)
    y, _, _ = bilstm_layer(y, params["lstm2"])
    y = stride2_tm(y)
    y, _, _ = bilstm_layer(y, params["lstm3"])
    y = stride2_tm(y)
    y, yf4, yb4 = bilstm_layer(y, params["lstm4"])

    T4, B, F2 = y.shape
    y2d = y.reshape(T4 * B, F2)
    # Fused fc1/fc2 (+SELU): one matmul over y2d, two outputs.
    key2d, val2d = dual_matmul_bias(y2d, params["fc"]["w"], params["fc"]["b"],
                                    selu=True, out_dtype=jnp.float32)
    key = jnp.transpose(key2d.reshape(T4, B, -1), (1, 0, 2))     # (B, T4, 2H)
    value = jnp.transpose(val2d.reshape(T4, B, -1), (1, 0, 2))

    # Final hidden states recovered from the outputs (fwd last step, bwd first).
    hidden = jnp.concatenate([yf4[T4 - 1], yb4[0]], axis=1)      # (B, 2H)
    return seq_len // 8, key, value, hidden


# ----------------------------------------------------------------------------
# Deterministic parameter init (PyTorch-style uniform ranges, pre-fused)
# ----------------------------------------------------------------------------

def init_bilstm_params(key, in_dim, hid):
    k = 1.0 / np.sqrt(hid)
    keys = jax.random.split(key, 8)

    def u(kk, shape):
        return jax.random.uniform(kk, shape, jnp.float32, -k, k)

    wih_f = u(keys[0], (in_dim, 4 * hid))
    whh_f = u(keys[1], (hid, 4 * hid))
    b_f = u(keys[2], (1, 4 * hid)) + u(keys[3], (1, 4 * hid))     # b_ih + b_hh
    wih_b = u(keys[4], (in_dim, 4 * hid))
    whh_b = u(keys[5], (hid, 4 * hid))
    b_b = u(keys[6], (1, 4 * hid)) + u(keys[7], (1, 4 * hid))

    return dict(
        wih=jnp.concatenate([wih_f, wih_b], axis=1),    # (in_dim, 8H) fused
        b_ih=jnp.concatenate([b_f, b_b], axis=1),       # (1, 8H) fused
        whh_f=whh_f,
        whh_b=whh_b,
    )


def init_fc_params(key, in_dim, out_dim):
    k = 1.0 / np.sqrt(in_dim)
    k1, k2, k3, k4 = jax.random.split(key, 4)

    def u(kk, shape):
        return jax.random.uniform(kk, shape, jnp.float32, -k, k)

    w1 = u(k1, (in_dim, out_dim))
    b1 = u(k2, (1, out_dim))
    w2 = u(k3, (in_dim, out_dim))
    b2 = u(k4, (1, out_dim))
    return dict(
        w=jnp.concatenate([w1, w2], axis=1),            # (in_dim, 2*out_dim)
        b=jnp.concatenate([b1, b2], axis=1),
    )


def init_encoder_params(key, base):
    ks = jax.random.split(key, 5)
    return dict(
        lstm1=init_bilstm_params(ks[0], 40, base),
        lstm2=init_bilstm_params(ks[1], base * 4, base),
        lstm3=init_bilstm_params(ks[2], base * 4, base),
        lstm4=init_bilstm_params(ks[3], base * 4, base),
        fc=init_fc_params(ks[4], base * 2, base * 2),   # fc1 | fc2 fused
    )


# ----------------------------------------------------------------------------

if __name__ == "__main__":
    BASE = 32                 # small analogue of the default base=64 (4H = 128 lanes)
    B, T, FEAT = 8, 16, 40    # B multiple of 8; T divisible by 8 (three halvings)

    root = jax.random.PRNGKey(0)
    k_params, k_x = jax.random.split(root)

    params = init_encoder_params(k_params, BASE)
    x = jax.random.normal(k_x, (B, T, FEAT), jnp.float32)
    seq_len = jnp.full((B,), T, dtype=jnp.int32)

    fwd = jax.jit(functools.partial(encoder_forward, params))
    out_len, key_t, value_t, hidden_t = fwd(x, seq_len)
    jax.block_until_ready((out_len, key_t, value_t, hidden_t))

    assert out_len.shape == (B,)
    assert key_t.shape == (B, T // 8, 2 * BASE)
    assert value_t.shape == (B, T // 8, 2 * BASE)
    assert hidden_t.shape == (B, 2 * BASE)
    print("KERNEL_OK")
</pallas_src>

<mosaic_0001>
module attributes {stable_mosaic.version = 11 : i64} {
  func.func @dual_matmul_bias_kernel(%arg0: i32, %arg1: memref<128x40xf32, #tpu.memory_space<vmem>>, %arg2: memref<40x256xf32, #tpu.memory_space<vmem>>, %arg3: memref<1x256xf32, #tpu.memory_space<vmem>>, %arg4: memref<128x128xbf16, #tpu.memory_space<vmem>>, %arg5: memref<128x128xbf16, #tpu.memory_space<vmem>>) attributes {dimension_semantics = [#tpu.dimension_semantics<parallel>], iteration_bounds = array<i64: 1>, scalar_prefetch = 0 : i64, scratch_operands = 0 : i64, tpu.core_type = #tpu.core_type<tc>, window_params = [{transform_indices = @transform_0, window_bounds = array<i64: 128, 40>}, {pipeline_mode = #tpu.pipeline_mode<synchronous>, transform_indices = @transform_1, window_bounds = array<i64: 40, 256>}, {pipeline_mode = #tpu.pipeline_mode<synchronous>, transform_indices = @transform_2, window_bounds = array<i64: 1, 256>}, {transform_indices = @transform_3, window_bounds = array<i64: 128, 128>}, {transform_indices = @transform_4, window_bounds = array<i64: 128, 128>}]} {
    %c0 = arith.constant 0 : index
    %c0_0 = arith.constant 0 : index
    %0 = vector.load %arg1[%c0, %c0_0] : memref<128x40xf32, #tpu.memory_space<vmem>>, vector<128x40xf32>
    %1 = arith.truncf %0 : vector<128x40xf32> to vector<128x40xbf16>
    %c0_1 = arith.constant 0 : index
    %c0_2 = arith.constant 0 : index
    %2 = vector.load %arg2[%c0_1, %c0_2] : memref<40x256xf32, #tpu.memory_space<vmem>>, vector<40x256xf32>
    %3 = arith.truncf %2 : vector<40x256xf32> to vector<40x256xbf16>
    %cst = arith.constant dense<0.000000e+00> : vector<128x256xf32>
    %4 = tpu.matmul %1, %3, %cst {dimension_numbers = #tpu.dot_dimension_numbers<[1], [0], [0], [1], [0, 0, 1, 1], [], []>} : vector<128x40xbf16>, vector<40x256xbf16>, vector<128x256xf32> -> vector<128x256xf32>
    %c0_3 = arith.constant 0 : index
    %c0_4 = arith.constant 0 : index
    %5 = vector.load %arg3[%c0_3, %c0_4] : memref<1x256xf32, #tpu.memory_space<vmem>>, vector<1x256xf32>
    %6 = vector.broadcast %5 : vector<1x256xf32> to vector<128x256xf32>
    %7 = arith.addf %4, %6 : vector<128x256xf32>
    %8 = vector.extract_strided_slice %7 {offsets = [0, 0], sizes = [128, 128], strides = [1, 1]} : vector<128x256xf32> to vector<128x128xf32>
    %9 = arith.truncf %8 : vector<128x128xf32> to vector<128x128xbf16>
    %c0_5 = arith.constant 0 : index
    %c0_6 = arith.constant 0 : index
    %10 = vector.load %arg4[%c0_5, %c0_6] : memref<128x128xbf16, #tpu.memory_space<vmem>>, vector<128x128xbf16>
    tpu.vector_store %arg4[%c0_5, %c0_6], %9 {strides = array<i32>} : memref<128x128xbf16, #tpu.memory_space<vmem>>, vector<128x128xbf16>,
    %11 = vector.extract_strided_slice %7 {offsets = [0, 128], sizes = [128, 128], strides = [1, 1]} : vector<128x256xf32> to vector<128x128xf32>
    %12 = arith.truncf %11 : vector<128x128xf32> to vector<128x128xbf16>
    %c0_7 = arith.constant 0 : index
    %c0_8 = arith.constant 0 : index
    %13 = vector.load %arg5[%c0_7, %c0_8] : memref<128x128xbf16, #tpu.memory_space<vmem>>, vector<128x128xbf16>
    tpu.vector_store %arg5[%c0_7, %c0_8], %12 {strides = array<i32>} : memref<128x128xbf16, #tpu.memory_space<vmem>>, vector<128x128xbf16>,
    return
  }
  func.func @transform_0(%arg0: i32) -> (i32, i32) {
    %c0_i32 = arith.constant 0 : i32
    %c0_i32_0 = arith.constant 0 : i32
    return %arg0, %c0_i32 : i32, i32
  }
  func.func @transform_1(%arg0: i32) -> (i32, i32) {
    %c0_i32 = arith.constant 0 : i32
    %c0_i32_0 = arith.constant 0 : i32
    %c0_i32_1 = arith.constant 0 : i32
    return %c0_i32, %c0_i32_0 : i32, i32
  }
  func.func @transform_2(%arg0: i32) -> (i32, i32) {
    %c0_i32 = arith.constant 0 : i32
    %c0_i32_0 = arith.constant 0 : i32
    %c0_i32_1 = arith.constant 0 : i32
    return %c0_i32, %c0_i32_0 : i32, i32
  }
  func.func @transform_3(%arg0: i32) -> (i32, i32) {
    %c0_i32 = arith.constant 0 : i32
    %c0_i32_0 = arith.constant 0 : i32
    return %arg0, %c0_i32 : i32, i32
  }
  func.func @transform_4(%arg0: i32) -> (i32, i32) {
    %c0_i32 = arith.constant 0 : i32
    %c0_i32_0 = arith.constant 0 : i32
    return %arg0, %c0_i32 : i32, i32
  }
}

module attributes {stable_mosaic.version = 11 : i64} {
  func.func @bilstm_chunk_kernel(%arg0: i32, %arg1: memref<16x8x128xbf16, #tpu.memory_space<vmem>>, %arg2: memref<16x8x128xbf16, #tpu.memory_space<vmem>>, %arg3: memref<32x128xf32, #tpu.memory_space<vmem>>, %arg4: memref<32x128xf32, #tpu.memory_space<vmem>>, %arg5: memref<16x8x32xf32, #tpu.memory_space<vmem>>, %arg6: memref<16x8x32xf32, #tpu.memory_space<vmem>>, %arg7: memref<2x8x32xf32, #tpu.memory_space<vmem>>, %arg8: memref<2x8x32xf32, #tpu.memory_space<vmem>>) attributes {dimension_semantics = [#tpu.dimension_semantics<arbitrary>], iteration_bounds = array<i64: 1>, scalar_prefetch = 0 : i64, scratch_operands = 2 : i64, tpu.core_type = #tpu.core_type<tc>, window_params = [{transform_indices = @transform_0, window_bounds = array<i64: 16, 8, 128>}, {transform_indices = @transform_1, window_bounds = array<i64: 16, 8, 128>}, {pipeline_mode = #tpu.pipeline_mode<synchronous>, transform_indices = @transform_2, window_bounds = array<i64: 32, 128>}, {pipeline_mode = #tpu.pipeline_mode<synchronous>, transform_indices = @transform_3, window_bounds = array<i64: 32, 128>}, {transform_indices = @transform_4, window_bounds = array<i64: 16, 8, 32>}, {transform_indices = @transform_5, window_bounds = array<i64: 16, 8, 32>}]} {
    %c0_i32 = arith.constant 0 : i32
    %0 = arith.cmpi eq, %arg0, %c0_i32 : i32
    %1 = arith.extui %0 : i1 to i32
    %c0_i32_0 = arith.constant 0 : i32
    %2 = arith.cmpi ne, %1, %c0_i32_0 : i32
    scf.if %2 {
      %cst_332 = arith.constant 0.000000e+00 : f32
      %1115 = vector.broadcast %cst_332 : f32 to vector<2x8x32xf32>
      %c0_333 = arith.constant 0 : index
      %c0_334 = arith.constant 0 : index
      %c0_335 = arith.constant 0 : index
      %1116 = vector.load %arg7[%c0_333, %c0_334, %c0_335] : memref<2x8x32xf32, #tpu.memory_space<vmem>>, vector<2x8x32xf32>
      tpu.vector_store %arg7[%c0_333, %c0_334, %c0_335], %1115 {strides = array<i32>} : memref<2x8x32xf32, #tpu.memory_space<vmem>>, vector<2x8x32xf32>,
      %cst_336 = arith.constant 0.000000e+00 : f32
      %1117 = vector.broadcast %cst_336 : f32 to vector<2x8x32xf32>
      %c0_337 = arith.constant 0 : index
      %c0_338 = arith.constant 0 : index
      %c0_339 = arith.constant 0 : index
      %1118 = vector.load %arg8[%c0_337, %c0_338, %c0_339] : memref<2x8x32xf32, #tpu.memory_space<vmem>>, vector<2x8x32xf32>
      tpu.vector_store %arg8[%c0_337, %c0_338, %c0_339], %1117 {strides = array<i32>} : memref<2x8x32xf32, #tpu.memory_space<vmem>>, vector<2x8x32xf32>,
    } else {
    }
    %c0 = arith.constant 0 : index
    %c0_1 = arith.constant 0 : index
    %3 = vector.load %arg3[%c0, %c0_1] : memref<32x128xf32, #tpu.memory_space<vmem>>, vector<32x128xf32>
    %4 = arith.truncf %3 : vector<32x128xf32> to vector<32x128xbf16>
    %c0_2 = arith.constant 0 : index
    %c0_3 = arith.constant 0 : index
    %5 = vector.load %arg4[%c0_2, %c0_3] : memref<32x128xf32, #tpu.memory_space<vmem>>, vector<32x128xf32>
    %6 = arith.truncf %5 : vector<32x128xf32> to vector<32x128xbf16>
    %c0_4 = arith.constant 0 : index
    %c0_5 = arith.constant 0 : index
    %c0_6 = arith.constant 0 : index
    %7 = vector.load %arg7[%c0_4, %c0_5, %c0_6] : memref<2x8x32xf32, #tpu.memory_space<vmem>>, vector<1x8x32xf32>
    %8 = vector.shape_cast %7 : vector<1x8x32xf32> to vector<8x32xf32>
    %c0_7 = arith.constant 0 : index
    %c0_8 = arith.constant 0 : index
    %c0_9 = arith.constant 0 : index
    %9 = vector.load %arg8[%c0_7, %c0_8, %c0_9] : memref<2x8x32xf32, #tpu.memory_space<vmem>>, vector<1x8x32xf32>
    %10 = vector.shape_cast %9 : vector<1x8x32xf32> to vector<8x32xf32>
    %c1 = arith.constant 1 : index
    %c0_10 = arith.constant 0 : index
    %c0_11 = arith.constant 0 : index
    %11 = vector.load %arg7[%c1, %c0_10, %c0_11] : memref<2x8x32xf32, #tpu.memory_space<vmem>>, vector<1x8x32xf32>
    %12 = vector.shape_cast %11 : vector<1x8x32xf32> to vector<8x32xf32>
    %c1_12 = arith.constant 1 : index
    %c0_13 = arith.constant 0 : index
    %c0_14 = arith.constant 0 : index
    %13 = vector.load %arg8[%c1_12, %c0_13, %c0_14] : memref<2x8x32xf32, #tpu.memory_space<vmem>>, vector<1x8x32xf32>
    %14 = vector.shape_cast %13 : vector<1x8x32xf32> to vector<8x32xf32>
    %c0_15 = arith.constant 0 : index
    %c0_16 = arith.constant 0 : index
    %c0_17 = arith.constant 0 : index
    %15 = vector.load %arg1[%c0_15, %c0_16, %c0_17] : memref<16x8x128xbf16, #tpu.memory_space<vmem>>, vector<1x8x128xbf16>
    %16 = vector.shape_cast %15 : vector<1x8x128xbf16> to vector<8x128xbf16>
    %17 = arith.extf %16 : vector<8x128xbf16> to vector<8x128xf32>
    %18 = arith.truncf %8 : vector<8x32xf32> to vector<8x32xbf16>
    %cst = arith.constant dense<0.000000e+00> : vector<8x128xf32>
    %19 = tpu.matmul %18, %4, %cst {dimension_numbers = #tpu.dot_dimension_numbers<[1], [0], [0], [1], [0, 0, 1, 1], [], []>} : vector<8x32xbf16>, vector<32x128xbf16>, vector<8x128xf32> -> vector<8x128xf32>
    %20 = arith.addf %17, %19 : vector<8x128xf32>
    %21 = vector.extract_strided_slice %20 {offsets = [0, 0], sizes = [8, 32], strides = [1, 1]} : vector<8x128xf32> to vector<8x32xf32>
    %22 = arith.negf %21 : vector<8x32xf32>
    %23 = math.exp %22 : vector<8x32xf32>
    %cst_18 = arith.constant 1.000000e+00 : f32
    %24 = vector.broadcast %cst_18 : f32 to vector<8x32xf32>
    %25 = arith.addf %24, %23 : vector<8x32xf32>
    %26 = arith.divf %24, %25 : vector<8x32xf32>
    %27 = vector.extract_strided_slice %20 {offsets = [0, 32], sizes = [8, 32], strides = [1, 1]} : vector<8x128xf32> to vector<8x32xf32>
    %28 = arith.negf %27 : vector<8x32xf32>
    %29 = math.exp %28 : vector<8x32xf32>
    %cst_19 = arith.constant 1.000000e+00 : f32
    %30 = vector.broadcast %cst_19 : f32 to vector<8x32xf32>
    %31 = arith.addf %30, %29 : vector<8x32xf32>
    %32 = arith.divf %30, %31 : vector<8x32xf32>
    %33 = vector.extract_strided_slice %20 {offsets = [0, 64], sizes = [8, 32], strides = [1, 1]} : vector<8x128xf32> to vector<8x32xf32>
    %34 = math.tanh %33 : vector<8x32xf32>
    %35 = vector.extract_strided_slice %20 {offsets = [0, 96], sizes = [8, 32], strides = [1, 1]} : vector<8x128xf32> to vector<8x32xf32>
    %36 = arith.negf %35 : vector<8x32xf32>
    %37 = math.exp %36 : vector<8x32xf32>
    %cst_20 = arith.constant 1.000000e+00 : f32
    %38 = vector.broadcast %cst_20 : f32 to vector<8x32xf32>
    %39 = arith.addf %38, %37 : vector<8x32xf32>
    %40 = arith.divf %38, %39 : vector<8x32xf32>
    %41 = arith.mulf %32, %10 : vector<8x32xf32>
    %42 = arith.mulf %26, %34 : vector<8x32xf32>
    %43 = arith.addf %41, %42 : vector<8x32xf32>
    %44 = math.tanh %43 : vector<8x32xf32>
    %45 = arith.mulf %40, %44 : vector<8x32xf32>
    %c0_21 = arith.constant 0 : index
    %c0_22 = arith.constant 0 : index
    %c0_23 = arith.constant 0 : index
    %46 = vector.load %arg5[%c0_21, %c0_22, %c0_23] : memref<16x8x32xf32, #tpu.memory_space<vmem>>, vector<1x8x32xf32>
    %47 = vector.shape_cast %46 : vector<1x8x32xf32> to vector<8x32xf32>
    %48 = vector.shape_cast %45 : vector<8x32xf32> to vector<1x8x32xf32>
    tpu.vector_store %arg5[%c0_21, %c0_22, %c0_23], %48 {strides = array<i32>} : memref<16x8x32xf32, #tpu.memory_space<vmem>>, vector<1x8x32xf32>,
    %c15 = arith.constant 15 : index
    %c0_24 = arith.constant 0 : index
    %c0_25 = arith.constant 0 : index
    %49 = vector.load %arg2[%c15, %c0_24, %c0_25] : memref<16x8x128xbf16, #tpu.memory_space<vmem>>, vector<1x8x128xbf16>
    %50 = vector.shape_cast %49 : vector<1x8x128xbf16> to vector<8x128xbf16>
    %51 = arith.extf %50 : vector<8x128xbf16> to vector<8x128xf32>
    %52 = arith.truncf %12 : vector<8x32xf32> to vector<8x32xbf16>
    %cst_26 = arith.constant dense<0.000000e+00> : vector<8x128xf32>
    %53 = tpu.matmul %52, %6, %cst_26 {dimension_numbers = #tpu.dot_dimension_numbers<[1], [0], [0], [1], [0, 0, 1, 1], [], []>} : vector<8x32xbf16>, vector<32x128xbf16>, vector<8x128xf32> -> vector<8x128xf32>
    %54 = arith.addf %51, %53 : vector<8x128xf32>
    %55 = vector.extract_strided_slice %54 {offsets = [0, 0], sizes = [8, 32], strides = [1, 1]} : vector<8x128xf32> to vector<8x32xf32>
    %56 = arith.negf %55 : vector<8x32xf32>
    %57 = math.exp %56 : vector<8x32xf32>
    %cst_27 = arith.constant 1.000000e+00 : f32
    %58 = vector.broadcast %cst_27 : f32 to vector<8x32xf32>
    %59 = arith.addf %58, %57 : vector<8x32xf32>
    %60 = arith.divf %58, %59 : vector<8x32xf32>
    %61 = vector.extract_strided_slice %54 {offsets = [0, 32], sizes = [8, 32], strides = [1, 1]} : vector<8x128xf32> to vector<8x32xf32>
    %62 = arith.negf %61 : vector<8x32xf32>
    %63 = math.exp %62 : vector<8x32xf32>
    %cst_28 = arith.constant 1.000000e+00 : f32
    %64 = vector.broadcast %cst_28 : f32 to vector<8x32xf32>
    %65 = arith.addf %64, %63 : vector<8x32xf32>
    %66 = arith.divf %64, %65 : vector<8x32xf32>
    %67 = vector.extract_strided_slice %54 {offsets = [0, 64], sizes = [8, 32], strides = [1, 1]} : vector<8x128xf32> to vector<8x32xf32>
    %68 = math.tanh %67 : vector<8x32xf32>
    %69 = vector.extract_strided_slice %54 {offsets = [0, 96], sizes = [8, 32], strides = [1, 1]} : vector<8x128xf32> to vector<8x32xf32>
    %70 = arith.negf %69 : vector<8x32xf32>
    %71 = math.exp %70 : vector<8x32xf32>
    %cst_29 = arith.constant 1.000000e+00 : f32
    %72 = vector.broadcast %cst_29 : f32 to vector<8x32xf32>
    %73 = arith.addf %72, %71 : vector<8x32xf32>
    %74 = arith.divf %72, %73 : vector<8x32xf32>
    %75 = arith.mulf %66, %14 : vector<8x32xf32>
    %76 = arith.mulf %60, %68 : vector<8x32xf32>
    %77 = arith.addf %75, %76 : vector<8x32xf32>
    %78 = math.tanh %77 : vector<8x32xf32>
    %79 = arith.mulf %74, %78 : vector<8x32xf32>
    %c15_30 = arith.constant 15 : index
    %c0_31 = arith.constant 0 : index
    %c0_32 = arith.constant 0 : index
    %80 = vector.load %arg6[%c15_30, %c0_31, %c0_32] : memref<16x8x32xf32, #tpu.memory_space<vmem>>, vector<1x8x32xf32>
    %81 = vector.shape_cast %80 : vector<1x8x32xf32> to vector<8x32xf32>
    %82 = vector.shape_cast %79 : vector<8x32xf32> to vector<1x8x32xf32>
    tpu.vector_store %arg6[%c15_30, %c0_31, %c0_32], %82 {strides = array<i32>} : memref<16x8x32xf32, #tpu.memory_space<vmem>>, vector<1x8x32xf32>,
    %c1_33 = arith.constant 1 : index
    %c0_34 = arith.constant 0 : index
    %c0_35 = arith.constant 0 : index
    %83 = vector.load %arg1[%c1_33, %c0_34, %c0_35] : memref<16x8x128xbf16, #tpu.memory_space<vmem>>, vector<1x8x128xbf16>
    %84 = vector.shape_cast %83 : vector<1x8x128xbf16> to vector<8x128xbf16>
    %85 = arith.extf %84 : vector<8x128xbf16> to vector<8x128xf32>
    %86 = arith.truncf %45 : vector<8x32xf32> to vector<8x32xbf16>
    %cst_36 = arith.constant dense<0.000000e+00> : vector<8x128xf32>
    %87 = tpu.matmul %86, %4, %cst_36 {dimension_numbers = #tpu.dot_dimension_numbers<[1], [0], [0], [1], [0, 0, 1, 1], [], []>} : vector<8x32xbf16>, vector<32x128xbf16>, vector<8x128xf32> -> vector<8x128xf32>
    %88 = arith.addf %85, %87 : vector<8x128xf32>
    %89 = vector.extract_strided_slice %88 {offsets = [0, 0], sizes = [8, 32], strides = [1, 1]} : vector<8x128xf32> to vector<8x32xf32>
    %90 = arith.negf %89 : vector<8x32xf32>
    %91 = math.exp %90 : vector<8x32xf32>
    %cst_37 = arith.constant 1.000000e+00 : f32
    %92 = vector.broadcast %cst_37 : f32 to vector<8x32xf32>
    %93 = arith.addf %92, %91 : vector<8x32xf32>
    %94 = arith.divf %92, %93 : vector<8x32xf32>
    %95 = vector.extract_strided_slice %88 {offsets = [0, 32], sizes = [8, 32], strides = [1, 1]} : vector<8x128xf32> to vector<8x32xf32>
    %96 = arith.negf %95 : vector<8x32xf32>
    %97 = math.exp %96 : vector<8x32xf32>
    %cst_38 = arith.constant 1.000000e+00 : f32
    %98 = vector.broadcast %cst_38 : f32 to vector<8x32xf32>
    %99 = arith.addf %98, %97 : vector<8x32xf32>
    %100 = arith.divf %98, %99 : vector<8x32xf32>
    %101 = vector.extract_strided_slice %88 {offsets = [0, 64], sizes = [8, 32], strides = [1, 1]} : vector<8x128xf32> to vector<8x32xf32>
    %102 = math.tanh %101 : vector<8x32xf32>
    %103 = vector.extract_strided_slice %88 {offsets = [0, 96], sizes = [8, 32], strides = [1, 1]} : vector<8x128xf32> to vector<8x32xf32>
    %104 = arith.negf %103 : vector<8x32xf32>
    %105 = math.exp %104 : vector<8x32xf32>
    %cst_39 = arith.constant 1.000000e+00 : f32
    %106 = vector.broadcast %cst_39 : f32 to vector<8x32xf32>
    %107 = arith.addf %106, %105 : vector<8x32xf32>
    %108 = arith.divf %106, %107 : vector<8x32xf32>
    %109 = arith.mulf %100, %43 : vector<8x32xf32>
    %110 = arith.mulf %94, %102 : vector<8x32xf32>
    %111 = arith.addf %109, %110 : vector<8x32xf32>
    %112 = math.tanh %111 : vector<8x32xf32>
    %113 = arith.mulf %108, %112 : vector<8x32xf32>
    %c1_40 = arith.constant 1 : index
    %c0_41 = arith.constant 0 : index
    %c0_42 = arith.constant 0 : index
    %114 = vector.load %arg5[%c1_40, %c0_41, %c0_42] : memref<16x8x32xf32, #tpu.memory_space<vmem>>, vector<1x8x32xf32>
    %115 = vector.shape_cast %114 : vector<1x8x32xf32> to vector<8x32xf32>
    %116 = vector.shape_cast %113 : vector<8x32xf32> to vector<1x8x32xf32>
    tpu.vector_store %arg5[%c1_40, %c0_41, %c0_42], %116 {strides = array<i32>} : memref<16x8x32xf32, #tpu.memory_space<vmem>>, vector<1x8x32xf32>,
    %c14 = arith.constant 14 : index
    %c0_43 = arith.constant 0 : index
    %c0_44 = arith.constant 0 : index
    %117 = vector.load %arg2[%c14, %c0_43, %c0_44] : memref<16x8x128xbf16, #tpu.memory_space<vmem>>, vector<1x8x128xbf16>
    %118 = vector.shape_cast %117 : vector<1x8x128xbf16> to vector<8x128xbf16>
    %119 = arith.extf %118 : vector<8x128xbf16> to vector<8x128xf32>
    %120 = arith.truncf %79 : vector<8x32xf32> to vector<8x32xbf16>
    %cst_45 = arith.constant dense<0.000000e+00> : vector<8x128xf32>
    %121 = tpu.matmul %120, %6, %cst_45 {dimension_numbers = #tpu.dot_dimension_numbers<[1], [0], [0], [1], [0, 0, 1, 1], [], []>} : vector<8x32xbf16>, vector<32x128xbf16>, vector<8x128xf32> -> vector<8x128xf32>
    %122 = arith.addf %119, %121 : vector<8x128xf32>
    %123 = vector.extract_strided_slice %122 {offsets = [0, 0], sizes = [8, 32], strides = [1, 1]} : vector<8x128xf32> to vector<8x32xf32>
    %124 = arith.negf %123 : vector<8x32xf32>
    %125 = math.exp %124 : vector<8x32xf32>
    %cst_46 = arith.constant 1.000000e+00 : f32
    %126 = vector.broadcast %cst_46 : f32 to vector<8x32xf32>
    %127 = arith.addf %126, %125 : vector<8x32xf32>
    %128 = arith.divf %126, %127 : vector<8x32xf32>
    %129 = vector.extract_strided_slice %122 {offsets = [0, 32], sizes = [8, 32], strides = [1, 1]} : vector<8x128xf32> to vector<8x32xf32>
    %130 = arith.negf %129 : vector<8x32xf32>
    %131 = math.exp %130 : vector<8x32xf32>
    %cst_47 = arith.constant 1.000000e+00 : f32
    %132 = vector.broadcast %cst_47 : f32 to vector<8x32xf32>
    %133 = arith.addf %132, %131 : vector<8x32xf32>
    %134 = arith.divf %132, %133 : vector<8x32xf32>
    %135 = vector.extract_strided_slice %122 {offsets = [0, 64], sizes = [8, 32], strides = [1, 1]} : vector<8x128xf32> to vector<8x32xf32>
    %136 = math.tanh %135 : vector<8x32xf32>
    %137 = vector.extract_strided_slice %122 {offsets = [0, 96], sizes = [8, 32], strides = [1, 1]} : vector<8x128xf32> to vector<8x32xf32>
    %138 = arith.negf %137 : vector<8x32xf32>
    %139 = math.exp %138 : vector<8x32xf32>
    %cst_48 = arith.constant 1.000000e+00 : f32
    %140 = vector.broadcast %cst_48 : f32 to vector<8x32xf32>
    %141 = arith.addf %140, %139 : vector<8x32xf32>
    %142 = arith.divf %140, %141 : vector<8x32xf32>
    %143 = arith.mulf %134, %77 : vector<8x32xf32>
    %144 = arith.mulf %128, %136 : vector<8x32xf32>
    %145 = arith.addf %143, %144 : vector<8x32xf32>
    %146 = math.tanh %145 : vector<8x32xf32>
    %147 = arith.mulf %142, %146 : vector<8x32xf32>
    %c14_49 = arith.constant 14 : index
    %c0_50 = arith.constant 0 : index
    %c0_51 = arith.constant 0 : index
    %148 = vector.load %arg6[%c14_49, %c0_50, %c0_51] : memref<16x8x32xf32, #tpu.memory_space<vmem>>, vector<1x8x32xf32>
    %149 = vector.shape_cast %148 : vector<1x8x32xf32> to vector<8x32xf32>
    %150 = vector.shape_cast %147 : vector<8x32xf32> to vector<1x8x32xf32>
    tpu.vector_store %arg6[%c14_49, %c0_50, %c0_51], %150 {strides = array<i32>} : memref<16x8x32xf32, #tpu.memory_space<vmem>>, vector<1x8x32xf32>,
    %c2 = arith.constant 2 : index
    %c0_52 = arith.constant 0 : index
    %c0_53 = arith.constant 0 : index
    %151 = vector.load %arg1[%c2, %c0_52, %c0_53] : memref<16x8x128xbf16, #tpu.memory_space<vmem>>, vector<1x8x128xbf16>
    %152 = vector.shape_cast %151 : vector<1x8x128xbf16> to vector<8x128xbf16>
    %153 = arith.extf %152 : vector<8x128xbf16> to vector<8x128xf32>
    %154 = arith.truncf %113 : vector<8x32xf32> to vector<8x32xbf16>
    %cst_54 = arith.constant dense<0.000000e+00> : vector<8x128xf32>
    %155 = tpu.matmul %154, %4, %cst_54 {dimension_numbers = #tpu.dot_dimension_numbers<[1], [0], [0], [1], [0, 0, 1, 1], [], []>} : vector<8x32xbf16>, vector<32x128xbf16>, vector<8x128xf32> -> vector<8x128xf32>
    %156 = arith.addf %153, %155 : vector<8x128xf32>
    %157 = vector.extract_strided_slice %156 {offsets = [0, 0], sizes = [8, 32], strides = [1, 1]} : vector<8x128xf32> to vector<8x32xf32>
    %158 = arith.negf %157 : vector<8x32xf32>
    %159 = math.exp %158 : vector<8x32xf32>
    %cst_55 = arith.constant 1.000000e+00 : f32
    %160 = vector.broadcast %cst_55 : f32 to vector<8x32xf32>
    %161 = arith.addf %160, %159 : vector<8x32xf32>
    %162 = arith.divf %160, %161 : vector<8x32xf32>
    %163 = vector.extract_strided_slice %156 {offsets = [0, 32], sizes = [8, 32], strides = [1, 1]} : vector<8x128xf32> to vector<8x32xf32>
    %164 = arith.negf %163 : vector<8x32xf32>
    %165 = math.exp %164 : vector<8x32xf32>
    %cst_56 = arith.constant 1.000000e+00 : f32
    %166 = vector.broadcast %cst_56 : f32 to vector<8x32xf32>
    %167 = arith.addf %166, %165 : vector<8x32xf32>
    %168 = arith.divf %166, %167 : vector<8x32xf32>
    %169 = vector.extract_strided_slice %156 {offsets = [0, 64], sizes = [8, 32], strides = [1, 1]} : vector<8x128xf32> to vector<8x32xf32>
    %170 = math.tanh %169 : vector<8x32xf32>
    %171 = vector.extract_strided_slice %156 {offsets = [0, 96], sizes = [8, 32], strides = [1, 1]} : vector<8x128xf32> to vector<8x32xf32>
    %172 = arith.negf %171 : vector<8x32xf32>
    %173 = math.exp %172 : vector<8x32xf32>
    %cst_57 = arith.constant 1.000000e+00 : f32
    %174 = vector.broadcast %cst_57 : f32 to vector<8x32xf32>
    %175 = arith.addf %174, %173 : vector<8x32xf32>
    %176 = arith.divf %174, %175 : vector<8x32xf32>
    %177 = arith.mulf %168, %111 : vector<8x32xf32>
    %178 = arith.mulf %162, %170 : vector<8x32xf32>
    %179 = arith.addf %177, %178 : vector<8x32xf32>
    %180 = math.tanh %179 : vector<8x32xf32>
    %181 = arith.mulf %176, %180 : vector<8x32xf32>
    %c2_58 = arith.constant 2 : index
    %c0_59 = arith.constant 0 : index
    %c0_60 = arith.constant 0 : index
    %182 = vector.load %arg5[%c2_58, %c0_59, %c0_60] : memref<16x8x32xf32, #tpu.memory_space<vmem>>, vector<1x8x32xf32>
    %183 = vector.shape_cast %182 : vector<1x8x32xf32> to vector<8x32xf32>
    %184 = vector.shape_cast %181 : vector<8x32xf32> to vector<1x8x32xf32>
    tpu.vector_store %arg5[%c2_58, %c0_59, %c0_60], %184 {strides = array<i32>} : memref<16x8x32xf32, #tpu.memory_space<vmem>>, vector<1x8x32xf32>,
    %c13 = arith.constant 13 : index
    %c0_61 = arith.constant 0 : index
    %c0_62 = arith.constant 0 : index
    %185 = vector.load %arg2[%c13, %c0_61, %c0_62] : memref<16x8x128xbf16, #tpu.memory_space<vmem>>, vector<1x8x128xbf16>
    %186 = vector.shape_cast %185 : vector<1x8x128xbf16> to vector<8x128xbf16>
    %187 = arith.extf %186 : vector<8x128xbf16> to vector<8x128xf32>
    %188 = arith.truncf %147 : vector<8x32xf32> to vector<8x32xbf16>
    %cst_63 = arith.constant dense<0.000000e+00> : vector<8x128xf32>
    %189 = tpu.matmul %188, %6, %cst_63 {dimension_numbers = #tpu.dot_dimension_numbers<[1], [0], [0], [1], [0, 0, 1, 1], [], []>} : vector<8x32xbf16>, vector<32x128xbf16>, vector<8x128xf32> -> vector<8x128xf32>
    %190 = arith.addf %187, %189 : vector<8x128xf32>
    %191 = vector.extract_strided_slice %190 {offsets = [0, 0], sizes = [8, 32], strides = [1, 1]} : vector<8x128xf32> to vector<8x32xf32>
    %192 = arith.negf %191 : vector<8x32xf32>
    %193 = math.exp %192 : vector<8x32xf32>
    %cst_64 = arith.constant 1.000000e+00 : f32
    %194 = vector.broadcast %cst_64 : f32 to vector<8x32xf32>
    %195 = arith.addf %194, %193 : vector<8x32xf32>
    %196 = arith.divf %194, %195 : vector<8x32xf32>
    %197 = vector.extract_strided_slice %190 {offsets = [0, 32], sizes = [8, 32], strides = [1, 1]} : vector<8x128xf32> to vector<8x32xf32>
    %198 = arith.negf %197 : vector<8x32xf32>
    %199 = math.exp %198 : vector<8x32xf32>
    %cst_65 = arith.constant 1.000000e+00 : f32
    %200 = vector.broadcast %cst_65 : f32 to vector<8x32xf32>
    %201 = arith.addf %200, %199 : vector<8x32xf32>
    %202 = arith.divf %200, %201 : vector<8x32xf32>
    %203 = vector.extract_strided_slice %190 {offsets = [0, 64], sizes = [8, 32], strides = [1, 1]} : vector<8x128xf32> to vector<8x32xf32>
    %204 = math.tanh %203 : vector<8x32xf32>
    %205 = vector.extract_strided_slice %190 {offsets = [0, 96], sizes = [8, 32], strides = [1, 1]} : vector<8x128xf32> to vector<8x32xf32>
    %206 = arith.negf %205 : vector<8x32xf32>
    %207 = math.exp %206 : vector<8x32xf32>
    %cst_66 = arith.constant 1.000000e+00 : f32
    %208 = vector.broadcast %cst_66 : f32 to vector<8x32xf32>
    %209 = arith.addf %208, %207 : vector<8x32xf32>
    %210 = arith.divf %208, %209 : vector<8x32xf32>
    %211 = arith.mulf %202, %145 : vector<8x32xf32>
    %212 = arith.mulf %196, %204 : vector<8x32xf32>
    %213 = arith.addf %211, %212 : vector<8x32xf32>
    %214 = math.tanh %213 : vector<8x32xf32>
    %215 = arith.mulf %210, %214 : vector<8x32xf32>
    %c13_67 = arith.constant 13 : index
    %c0_68 = arith.constant 0 : index
    %c0_69 = arith.constant 0 : index
    %216 = vector.load %arg6[%c13_67, %c0_68, %c0_69] : memref<16x8x32xf32, #tpu.memory_space<vmem>>, vector<1x8x32xf32>
    %217 = vector.shape_cast %216 : vector<1x8x32xf32> to vector<8x32xf32>
    %218 = vector.shape_cast %215 : vector<8x32xf32> to vector<1x8x32xf32>
    tpu.vector_store %arg6[%c13_67, %c0_68, %c0_69], %218 {strides = array<i32>} : memref<16x8x32xf32, #tpu.memory_space<vmem>>, vector<1x8x32xf32>,
    %c3 = arith.constant 3 : index
    %c0_70 = arith.constant 0 : index
    %c0_71 = arith.constant 0 : index
    %219 = vector.load %arg1[%c3, %c0_70, %c0_71] : memref<16x8x128xbf16, #tpu.memory_space<vmem>>, vector<1x8x128xbf16>
    %220 = vector.shape_cast %219 : vector<1x8x128xbf16> to vector<8x128xbf16>
    %221 = arith.extf %220 : vector<8x128xbf16> to vector<8x128xf32>
    %222 = arith.truncf %181 : vector<8x32xf32> to vector<8x32xbf16>
    %cst_72 = arith.constant dense<0.000000e+00> : vector<8x128xf32>
    %223 = tpu.matmul %222, %4, %cst_72 {dimension_numbers = #tpu.dot_dimension_numbers<[1], [0], [0], [1], [0, 0, 1, 1], [], []>} : vector<8x32xbf16>, vector<32x128xbf16>, vector<8x128xf32> -> vector<8x128xf32>
    %224 = arith.addf %221, %223 : vector<8x128xf32>
    %225 = vector.extract_strided_slice %224 {offsets = [0, 0], sizes = [8, 32], strides = [1, 1]} : vector<8x128xf32> to vector<8x32xf32>
    %226 = arith.negf %225 : vector<8x32xf32>
    %227 = math.exp %226 : vector<8x32xf32>
    %cst_73 = arith.constant 1.000000e+00 : f32
    %228 = vector.broadcast %cst_73 : f32 to vector<8x32xf32>
    %229 = arith.addf %228, %227 : vector<8x32xf32>
    %230 = arith.divf %228, %229 : vector<8x32xf32>
    %231 = vector.extract_strided_slice %224 {offsets = [0, 32], sizes = [8, 32], strides = [1, 1]} : vector<8x128xf32> to vector<8x32xf32>
    %232 = arith.negf %231 : vector<8x32xf32>
    %233 = math.exp %232 : vector<8x32xf32>
    %cst_74 = arith.constant 1.000000e+00 : f32
    %234 = vector.broadcast %cst_74 : f32 to vector<8x32xf32>
    %235 = arith.addf %234, %233 : vector<8x32xf32>
    %236 = arith.divf %234, %235 : vector<8x32xf32>
    %237 = vector.extract_strided_slice %224 {offsets = [0, 64], sizes = [8, 32], strides = [1, 1]} : vector<8x128xf32> to vector<8x32xf32>
    %238 = math.tanh %237 : vector<8x32xf32>
    %239 = vector.extract_strided_slice %224 {offsets = [0, 96], sizes = [8, 32], strides = [1, 1]} : vector<8x128xf32> to vector<8x32xf32>
    %240 = arith.negf %239 : vector<8x32xf32>
    %241 = math.exp %240 : vector<8x32xf32>
    %cst_75 = arith.constant 1.000000e+00 : f32
    %242 = vector.broadcast %cst_75 : f32 to vector<8x32xf32>
    %243 = arith.addf %242, %241 : vector<8x32xf32>
    %244 = arith.divf %242, %243 : vector<8x32xf32>
    %245 = arith.mulf %236, %179 : vector<8x32xf32>
    %246 = arith.mulf %230, %238 : vector<8x32xf32>
    %247 = arith.addf %245, %246 : vector<8x32xf32>
    %248 = math.tanh %247 : vector<8x32xf32>
    %249 = arith.mulf %244, %248 : vector<8x32xf32>
    %c3_76 = arith.constant 3 : index
    %c0_77 = arith.constant 0 : index
    %c0_78 = arith.constant 0 : index
    %250 = vector.load %arg5[%c3_76, %c0_77, %c0_78] : memref<16x8x32xf32, #tpu.memory_space<vmem>>, vector<1x8x32xf32>
    %251 = vector.shape_cast %250 : vector<1x8x32xf32> to vector<8x32xf32>
    %252 = vector.shape_cast %249 : vector<8x32xf32> to vector<1x8x32xf32>
    tpu.vector_store %arg5[%c3_76, %c0_77, %c0_78], %252 {strides = array<i32>} : memref<16x8x32xf32, #tpu.memory_space<vmem>>, vector<1x8x32xf32>,
    %c12 = arith.constant 12 : index
    %c0_79 = arith.constant 0 : index
    %c0_80 = arith.constant 0 : index
    %253 = vector.load %arg2[%c12, %c0_79, %c0_80] : memref<16x8x128xbf16, #tpu.memory_space<vmem>>, vector<1x8x128xbf16>
    %254 = vector.shape_cast %253 : vector<1x8x128xbf16> to vector<8x128xbf16>
    %255 = arith.extf %254 : vector<8x128xbf16> to vector<8x128xf32>
    %256 = arith.truncf %215 : vector<8x32xf32> to vector<8x32xbf16>
    %cst_81 = arith.constant dense<0.000000e+00> : vector<8x128xf32>
    %257 = tpu.matmul %256, %6, %cst_81 {dimension_numbers = #tpu.dot_dimension_numbers<[1], [0], [0], [1], [0, 0, 1, 1], [], []>} : vector<8x32xbf16>, vector<32x128xbf16>, vector<8x128xf32> -> vector<8x128xf32>
    %258 = arith.addf %255, %257 : vector<8x128xf32>
    %259 = vector.extract_strided_slice %258 {offsets = [0, 0], sizes = [8, 32], strides = [1, 1]} : vector<8x128xf32> to vector<8x32xf32>
    %260 = arith.negf %259 : vector<8x32xf32>
    %261 = math.exp %260 : vector<8x32xf32>
    %cst_82 = arith.constant 1.000000e+00 : f32
    %262 = vector.broadcast %cst_82 : f32 to vector<8x32xf32>
    %263 = arith.addf %262, %261 : vector<8x32xf32>
    %264 = arith.divf %262, %263 : vector<8x32xf32>
    %265 = vector.extract_strided_slice %258 {offsets = [0, 32], sizes = [8, 32], strides = [1, 1]} : vector<8x128xf32> to vector<8x32xf32>
    %266 = arith.negf %265 : vector<8x32xf32>
    %267 = math.exp %266 : vector<8x32xf32>
    %cst_83 = arith.constant 1.000000e+00 : f32
    %268 = vector.broadcast %cst_83 : f32 to vector<8x32xf32>
    %269 = arith.addf %268, %267 : vector<8x32xf32>
    %270 = arith.divf %268, %269 : vector<8x32xf32>
    %271 = vector.extract_strided_slice %258 {offsets = [0, 64], sizes = [8, 32], strides = [1, 1]} : vector<8x128xf32> to vector<8x32xf32>
    %272 = math.tanh %271 : vector<8x32xf32>
    %273 = vector.extract_strided_slice %258 {offsets = [0, 96], sizes = [8, 32], strides = [1, 1]} : vector<8x128xf32> to vector<8x32xf32>
    %274 = arith.negf %273 : vector<8x32xf32>
    %275 = math.exp %274 : vector<8x32xf32>
    %cst_84 = arith.constant 1.000000e+00 : f32
    %276 = vector.broadcast %cst_84 : f32 to vector<8x32xf32>
    %277 = arith.addf %276, %275 : vector<8x32xf32>
    %278 = arith.divf %276, %277 : vector<8x32xf32>
    %279 = arith.mulf %270, %213 : vector<8x32xf32>
    %280 = arith.mulf %264, %272 : vector<8x32xf32>
    %281 = arith.addf %279, %280 : vector<8x32xf32>
    %282 = math.tanh %281 : vector<8x32xf32>
    %283 = arith.mulf %278, %282 : vector<8x32xf32>
    %c12_85 = arith.constant 12 : index
    %c0_86 = arith.constant 0 : index
    %c0_87 = arith.constant 0 : index
    %284 = vector.load %arg6[%c12_85, %c0_86, %c0_87] : memref<16x8x32xf32, #tpu.memory_space<vmem>>, vector<1x8x32xf32>
    %285 = vector.shape_cast %284 : vector<1x8x32xf32> to vector<8x32xf32>
    %286 = vector.shape_cast %283 : vector<8x32xf32> to vector<1x8x32xf32>
    tpu.vector_store %arg6[%c12_85, %c0_86, %c0_87], %286 {strides = array<i32>} : memref<16x8x32xf32, #tpu.memory_space<vmem>>, vector<1x8x32xf32>,
    %c4 = arith.constant 4 : index
    %c0_88 = arith.constant 0 : index
    %c0_89 = arith.constant 0 : index
    %287 = vector.load %arg1[%c4, %c0_88, %c0_89] : memref<16x8x128xbf16, #tpu.memory_space<vmem>>, vector<1x8x128xbf16>
    %288 = vector.shape_cast %287 : vector<1x8x128xbf16> to vector<8x128xbf16>
    %289 = arith.extf %288 : vector<8x128xbf16> to vector<8x128xf32>
    %290 = arith.truncf %249 : vector<8x32xf32> to vector<8x32xbf16>
    %cst_90 = arith.constant dense<0.000000e+00> : vector<8x128xf32>
    %291 = tpu.matmul %290, %4, %cst_90 {dimension_numbers = #tpu.dot_dimension_numbers<[1], [0], [0], [1], [0, 0, 1, 1], [], []>} : vector<8x32xbf16>, vector<32x128xbf16>, vector<8x128xf32> -> vector<8x128xf32>
    %292 = arith.addf %289, %291 : vector<8x128xf32>
    %293 = vector.extract_strided_slice %292 {offsets = [0, 0], sizes = [8, 32], strides = [1, 1]} : vector<8x128xf32> to vector<8x32xf32>
    %294 = arith.negf %293 : vector<8x32xf32>
    %295 = math.exp %294 : vector<8x32xf32>
    %cst_91 = arith.constant 1.000000e+00 : f32
    %296 = vector.broadcast %cst_91 : f32 to vector<8x32xf32>
    %297 = arith.addf %296, %295 : vector<8x32xf32>
    %298 = arith.divf %296, %297 : vector<8x32xf32>
    %299 = vector.extract_strided_slice %292 {offsets = [0, 32], sizes = [8, 32], strides = [1, 1]} : vector<8x128xf32> to vector<8x32xf32>
    %300 = arith.negf %299 : vector<8x32xf32>
    %301 = math.exp %300 : vector<8x32xf32>
    %cst_92 = arith.constant 1.000000e+00 : f32
    %302 = vector.broadcast %cst_92 : f32 to vector<8x32xf32>
    %303 = arith.addf %302, %301 : vector<8x32xf32>
    %304 = arith.divf %302, %303 : vector<8x32xf32>
    %305 = vector.extract_strided_slice %292 {offsets = [0, 64], sizes = [8, 32], strides = [1, 1]} : vector<8x128xf32> to vector<8x32xf32>
    %306 = math.tanh %305 : vector<8x32xf32>
    %307 = vector.extract_strided_slice %292 {offsets = [0, 96], sizes = [8, 32], strides = [1, 1]} : vector<8x128xf32> to vector<8x32xf32>
    %308 = arith.negf %307 : vector<8x32xf32>
    %309 = math.exp %308 : vector<8x32xf32>
    %cst_93 = arith.constant 1.000000e+00 : f32
    %310 = vector.broadcast %cst_93 : f32 to vector<8x32xf32>
    %311 = arith.addf %310, %309 : vector<8x32xf32>
    %312 = arith.divf %310, %311 : vector<8x32xf32>
    %313 = arith.mulf %304, %247 : vector<8x32xf32>
    %314 = arith.mulf %298, %306 : vector<8x32xf32>
    %315 = arith.addf %313, %314 : vector<8x32xf32>
    %316 = math.tanh %315 : vector<8x32xf32>
    %317 = arith.mulf %312, %316 : vector<8x32xf32>
    %c4_94 = arith.constant 4 : index
    %c0_95 = arith.constant 0 : index
    %c0_96 = arith.constant 0 : index
    %318 = vector.load %arg5[%c4_94, %c0_95, %c0_96] : memref<16x8x32xf32, #tpu.memory_space<vmem>>, vector<1x8x32xf32>
    %319 = vector.shape_cast %318 : vector<1x8x32xf32> to vector<8x32xf32>
    %320 = vector.shape_cast %317 : vector<8x32xf32> to vector<1x8x32xf32>
    tpu.vector_store %arg5[%c4_94, %c0_95, %c0_96], %320 {strides = array<i32>} : memref<16x8x32xf32, #tpu.memory_space<vmem>>, vector<1x8x32xf32>,
    %c11 = arith.constant 11 : index
    %c0_97 = arith.constant 0 : index
    %c0_98 = arith.constant 0 : index
    %321 = vector.load %arg2[%c11, %c0_97, %c0_98] : memref<16x8x128xbf16, #tpu.memory_space<vmem>>, vector<1x8x128xbf16>
    %322 = vector.shape_cast %321 : vector<1x8x128xbf16> to vector<8x128xbf16>
    %323 = arith.extf %322 : vector<8x128xbf16> to vector<8x128xf32>
    %324 = arith.truncf %283 : vector<8x32xf32> to vector<8x32xbf16>
    %cst_99 = arith.constant dense<0.000000e+00> : vector<8x128xf32>
    %325 = tpu.matmul %324, %6, %cst_99 {dimension_numbers = #tpu.dot_dimension_numbers<[1], [0], [0], [1], [0, 0, 1, 1], [], []>} : vector<8x32xbf16>, vector<32x128xbf16>, vector<8x128xf32> -> vector<8x128xf32>
    %326 = arith.addf %323, %325 : vector<8x128xf32>
    %327 = vector.extract_strided_slice %326 {offsets = [0, 0], sizes = [8, 32], strides = [1, 1]} : vector<8x128xf32> to vector<8x32xf32>
    %328 = arith.negf %327 : vector<8x32xf32>
    %329 = math.exp %328 : vector<8x32xf32>
    %cst_100 = arith.constant 1.000000e+00 : f32
    %330 = vector.broadcast %cst_100 : f32 to vector<8x32xf32>
    %331 = arith.addf %330, %329 : vector<8x32xf32>
    %332 = arith.divf %330, %331 : vector<8x32xf32>
    %333 = vector.extract_strided_slice %326 {offsets = [0, 32], sizes = [8, 32], strides = [1, 1]} : vector<8x128xf32> to vector<8x32xf32>
    %334 = arith.negf %333 : vector<8x32xf32>
    %335 = math.exp %334 : vector<8x32xf32>
    %cst_101 = arith.constant 1.000000e+00 : f32
    %336 = vector.broadcast %cst_101 : f32 to vector<8x32xf32>
    %337 = arith.addf %336, %335 : vector<8x32xf32>
    %338 = arith.divf %336, %337 : vector<8x32xf32>
    %339 = vector.extract_strided_slice %326 {offsets = [0, 64], sizes = [8, 32], strides = [1, 1]} : vector<8x128xf32> to vector<8x32xf32>
    %340 = math.tanh %339 : vector<8x32xf32>
    %341 = vector.extract_strided_slice %326 {offsets = [0, 96], sizes = [8, 32], strides = [1, 1]} : vector<8x128xf32> to vector<8x32xf32>
    %342 = arith.negf %341 : vector<8x32xf32>
    %343 = math.exp %342 : vector<8x32xf32>
    %cst_102 = arith.constant 1.000000e+00 : f32
    %344 = vector.broadcast %cst_102 : f32 to vector<8x32xf32>
    %345 = arith.addf %344, %343 : vector<8x32xf32>
    %346 = arith.divf %344, %345 : vector<8x32xf32>
    %347 = arith.mulf %338, %281 : vector<8x32xf32>
    %348 = arith.mulf %332, %340 : vector<8x32xf32>
    %349 = arith.addf %347, %348 : vector<8x32xf32>
    %350 = math.tanh %349 : vector<8x32xf32>
    %351 = arith.mulf %346, %350 : vector<8x32xf32>
    %c11_103 = arith.constant 11 : index
    %c0_104 = arith.constant 0 : index
    %c0_105 = arith.constant 0 : index
    %352 = vector.load %arg6[%c11_103, %c0_104, %c0_105] : memref<16x8x32xf32, #tpu.memory_space<vmem>>, vector<1x8x32xf32>
    %353 = vector.shape_cast %352 : vector<1x8x32xf32> to vector<8x32xf32>
    %354 = vector.shape_cast %351 : vector<8x32xf32> to vector<1x8x32xf32>
    tpu.vector_store %arg6[%c11_103, %c0_104, %c0_105], %354 {strides = array<i32>} : memref<16x8x32xf32, #tpu.memory_space<vmem>>, vector<1x8x32xf32>,
    %c5 = arith.constant 5 : index
    %c0_106 = arith.constant 0 : index
    %c0_107 = arith.constant 0 : index
    %355 = vector.load %arg1[%c5, %c0_106, %c0_107] : memref<16x8x128xbf16, #tpu.memory_space<vmem>>, vector<1x8x128xbf16>
    %356 = vector.shape_cast %355 : vector<1x8x128xbf16> to vector<8x128xbf16>
    %357 = arith.extf %356 : vector<8x128xbf16> to vector<8x128xf32>
    %358 = arith.truncf %317 : vector<8x32xf32> to vector<8x32xbf16>
    %cst_108 = arith.constant dense<0.000000e+00> : vector<8x128xf32>
    %359 = tpu.matmul %358, %4, %cst_108 {dimension_numbers = #tpu.dot_dimension_numbers<[1], [0], [0], [1], [0, 0, 1, 1], [], []>} : vector<8x32xbf16>, vector<32x128xbf16>, vector<8x128xf32> -> vector<8x128xf32>
    %360 = arith.addf %357, %359 : vector<8x128xf32>
    %361 = vector.extract_strided_slice %360 {offsets = [0, 0], sizes = [8, 32], strides = [1, 1]} : vector<8x128xf32> to vector<8x32xf32>
    %362 = arith.negf %361 : vector<8x32xf32>
    %363 = math.exp %362 : vector<8x32xf32>
    %cst_109 = arith.constant 1.000000e+00 : f32
    %364 = vector.broadcast %cst_109 : f32 to vector<8x32xf32>
    %365 = arith.addf %364, %363 : vector<8x32xf32>
    %366 = arith.divf %364, %365 : vector<8x32xf32>
    %367 = vector.extract_strided_slice %360 {offsets = [0, 32], sizes = [8, 32], strides = [1, 1]} : vector<8x128xf32> to vector<8x32xf32>
    %368 = arith.negf %367 : vector<8x32xf32>
    %369 = math.exp %368 : vector<8x32xf32>
    %cst_110 = arith.constant 1.000000e+00 : f32
    %370 = vector.broadcast %cst_110 : f32 to vector<8x32xf32>
    %371 = arith.addf %370, %369 : vector<8x32xf32>
    %372 = arith.divf %370, %371 : vector<8x32xf32>
    %373 = vector.extract_strided_slice %360 {offsets = [0, 64], sizes = [8, 32], strides = [1, 1]} : vector<8x128xf32> to vector<8x32xf32>
    %374 = math.tanh %373 : vector<8x32xf32>
    %375 = vector.extract_strided_slice %360 {offsets = [0, 96], sizes = [8, 32], strides = [1, 1]} : vector<8x128xf32> to vector<8x32xf32>
    %376 = arith.negf %375 : vector<8x32xf32>
    %377 = math.exp %376 : vector<8x32xf32>
    %cst_111 = arith.constant 1.000000e+00 : f32
    %378 = vector.broadcast %cst_111 : f32 to vector<8x32xf32>
    %379 = arith.addf %378, %377 : vector<8x32xf32>
    %380 = arith.divf %378, %379 : vector<8x32xf32>
    %381 = arith.mulf %372, %315 : vector<8x32xf32>
    %382 = arith.mulf %366, %374 : vector<8x32xf32>
    %383 = arith.addf %381, %382 : vector<8x32xf32>
    %384 = math.tanh %383 : vector<8x32xf32>
    %385 = arith.mulf %380, %384 : vector<8x32xf32>
    %c5_112 = arith.constant 5 : index
    %c0_113 = arith.constant 0 : index
    %c0_114 = arith.constant 0 : index
    %386 = vector.load %arg5[%c5_112, %c0_113, %c0_114] : memref<16x8x32xf32, #tpu.memory_space<vmem>>, vector<1x8x32xf32>
    %387 = vector.shape_cast %386 : vector<1x8x32xf32> to vector<8x32xf32>
    %388 = vector.shape_cast %385 : vector<8x32xf32> to vector<1x8x32xf32>
    tpu.vector_store %arg5[%c5_112, %c0_113, %c0_114], %388 {strides = array<i32>} : memref<16x8x32xf32, #tpu.memory_space<vmem>>, vector<1x8x32xf32>,
    %c10 = arith.constant 10 : index
    %c0_115 = arith.constant 0 : index
    %c0_116 = arith.constant 0 : index
    %389 = vector.load %arg2[%c10, %c0_115, %c0_116] : memref<16x8x128xbf16, #tpu.memory_space<vmem>>, vector<1x8x128xbf16>
    %390 = vector.shape_cast %389 : vector<1x8x128xbf16> to vector<8x128xbf16>
    %391 = arith.extf %390 : vector<8x128xbf16> to vector<8x128xf32>
    %392 = arith.truncf %351 : vector<8x32xf32> to vector<8x32xbf16>
    %cst_117 = arith.constant dense<0.000000e+00> : vector<8x128xf32>
    %393 = tpu.matmul %392, %6, %cst_117 {dimension_numbers = #tpu.dot_dimension_numbers<[1], [0], [0], [1], [0, 0, 1, 1], [], []>} : vector<8x32xbf16>, vector<32x128xbf16>, vector<8x128xf32> -> vector<8x128xf32>
    %394 = arith.addf %391, %393 : vector<8x128xf32>
    %395 = vector.extract_strided_slice %394 {offsets = [0, 0], sizes = [8, 32], strides = [1, 1]} : vector<8x128xf32> to vector<8x32xf32>
    %396 = arith.negf %395 : vector<8x32xf32>
    %397 = math.exp %396 : vector<8x32xf32>
    %cst_118 = arith.constant 1.000000e+00 : f32
    %398 = vector.broadcast %cst_118 : f32 to vector<8x32xf32>
    %399 = arith.addf %398, %397 : vector<8x32xf32>
    %400 = arith.divf %398, %399 : vector<8x32xf32>
    %401 = vector.extract_strided_slice %394 {offsets = [0, 32], sizes = [8, 32], strides = [1, 1]} : vector<8x128xf32> to vector<8x32xf32>
    %402 = arith.negf %401 : vector<8x32xf32>
    %403 = math.exp %402 : vector<8x32xf32>
    %cst_119 = arith.constant 1.000000e+00 : f32
    %404 = vector.broadcast %cst_119 : f32 to vector<8x32xf32>
    %405 = arith.addf %404, %403 : vector<8x32xf32>
    %406 = arith.divf %404, %405 : vector<8x32xf32>
    %407 = vector.extract_strided_slice %394 {offsets = [0, 64], sizes = [8, 32], strides = [1, 1]} : vector<8x128xf32> to vector<8x32xf32>
    %408 = math.tanh %407 : vector<8x32xf32>
    %409 = vector.extract_strided_slice %394 {offsets = [0, 96], sizes = [8, 32], strides = [1, 1]} : vector<8x128xf32> to vector<8x32xf32>
    %410 = arith.negf %409 : vector<8x32xf32>
    %411 = math.exp %410 : vector<8x32xf32>
    %cst_120 = arith.constant 1.000000e+00 : f32
    %412 = vector.broadcast %cst_120 : f32 to vector<8x32xf32>
    %413 = arith.addf %412, %411 : vector<8x32xf32>
    %414 = arith.divf %412, %413 : vector<8x32xf32>
    %415 = arith.mulf %406, %349 : vector<8x32xf32>
    %416 = arith.mulf %400, %408 : vector<8x32xf32>
    %417 = arith.addf %415, %416 : vector<8x32xf32>
    %418 = math.tanh %417 : vector<8x32xf32>
    %419 = arith.mulf %414, %418 : vector<8x32xf32>
    %c10_121 = arith.constant 10 : index
    %c0_122 = arith.constant 0 : index
    %c0_123 = arith.constant 0 : index
    %420 = vector.load %arg6[%c10_121, %c0_122, %c0_123] : memref<16x8x32xf32, #tpu.memory_space<vmem>>, vector<1x8x32xf32>
    %421 = vector.shape_cast %420 : vector<1x8x32xf32> to vector<8x32xf32>
    %422 = vector.shape_cast %419 : vector<8x32xf32> to vector<1x8x32xf32>
    tpu.vector_store %arg6[%c10_121, %c0_122, %c0_123], %422 {strides = array<i32>} : memref<16x8x32xf32, #tpu.memory_space<vmem>>, vector<1x8x32xf32>,
    %c6 = arith.constant 6 : index
    %c0_124 = arith.constant 0 : index
    %c0_125 = arith.constant 0 : index
    %423 = vector.load %arg1[%c6, %c0_124, %c0_125] : memref<16x8x128xbf16, #tpu.memory_space<vmem>>, vector<1x8x128xbf16>
    %424 = vector.shape_cast %423 : vector<1x8x128xbf16> to vector<8x128xbf16>
    %425 = arith.extf %424 : vector<8x128xbf16> to vector<8x128xf32>
    %426 = arith.truncf %385 : vector<8x32xf32> to vector<8x32xbf16>
    %cst_126 = arith.constant dense<0.000000e+00> : vector<8x128xf32>
    %427 = tpu.matmul %426, %4, %cst_126 {dimension_numbers = #tpu.dot_dimension_numbers<[1], [0], [0], [1], [0, 0, 1, 1], [], []>} : vector<8x32xbf16>, vector<32x128xbf16>, vector<8x128xf32> -> vector<8x128xf32>
    %428 = arith.addf %425, %427 : vector<8x128xf32>
    %429 = vector.extract_strided_slice %428 {offsets = [0, 0], sizes = [8, 32], strides = [1, 1]} : vector<8x128xf32> to vector<8x32xf32>
    %430 = arith.negf %429 : vector<8x32xf32>
    %431 = math.exp %430 : vector<8x32xf32>
    %cst_127 = arith.constant 1.000000e+00 : f32
    %432 = vector.broadcast %cst_127 : f32 to vector<8x32xf32>
    %433 = arith.addf %432, %431 : vector<8x32xf32>
    %434 = arith.divf %432, %433 : vector<8x32xf32>
    %435 = vector.extract_strided_slice %428 {offsets = [0, 32], sizes = [8, 32], strides = [1, 1]} : vector<8x128xf32> to vector<8x32xf32>
    %436 = arith.negf %435 : vector<8x32xf32>
    %437 = math.exp %436 : vector<8x32xf32>
    %cst_128 = arith.constant 1.000000e+00 : f32
    %438 = vector.broadcast %cst_128 : f32 to vector<8x32xf32>
    %439 = arith.addf %438, %437 : vector<8x32xf32>
    %440 = arith.divf %438, %439 : vector<8x32xf32>
    %441 = vector.extract_strided_slice %428 {offsets = [0, 64], sizes = [8, 32], strides = [1, 1]} : vector<8x128xf32> to vector<8x32xf32>
    %442 = math.tanh %441 : vector<8x32xf32>
    %443 = vector.extract_strided_slice %428 {offsets = [0, 96], sizes = [8, 32], strides = [1, 1]} : vector<8x128xf32> to vector<8x32xf32>
    %444 = arith.negf %443 : vector<8x32xf32>
    %445 = math.exp %444 : vector<8x32xf32>
    %cst_129 = arith.constant 1.000000e+00 : f32
    %446 = vector.broadcast %cst_129 : f32 to vector<8x32xf32>
    %447 = arith.addf %446, %445 : vector<8x32xf32>
    %448 = arith.divf %446, %447 : vector<8x32xf32>
    %449 = arith.mulf %440, %383 : vector<8x32xf32>
    %450 = arith.mulf %434, %442 : vector<8x32xf32>
    %451 = arith.addf %449, %450 : vector<8x32xf32>
    %452 = math.tanh %451 : vector<8x32xf32>
    %453 = arith.mulf %448, %452 : vector<8x32xf32>
    %c6_130 = arith.constant 6 : index
    %c0_131 = arith.constant 0 : index
    %c0_132 = arith.constant 0 : index
    %454 = vector.load %arg5[%c6_130, %c0_131, %c0_132] : memref<16x8x32xf32, #tpu.memory_space<vmem>>, vector<1x8x32xf32>
    %455 = vector.shape_cast %454 : vector<1x8x32xf32> to vector<8x32xf32>
    %456 = vector.shape_cast %453 : vector<8x32xf32> to vector<1x8x32xf32>
    tpu.vector_store %arg5[%c6_130, %c0_131, %c0_132], %456 {strides = array<i32>} : memref<16x8x32xf32, #tpu.memory_space<vmem>>, vector<1x8x32xf32>,
    %c9 = arith.constant 9 : index
    %c0_133 = arith.constant 0 : index
    %c0_134 = arith.constant 0 : index
    %457 = vector.load %arg2[%c9, %c0_133, %c0_134] : memref<16x8x128xbf16, #tpu.memory_space<vmem>>, vector<1x8x128xbf16>
    %458 = vector.shape_cast %457 : vector<1x8x128xbf16> to vector<8x128xbf16>
    %459 = arith.extf %458 : vector<8x128xbf16> to vector<8x128xf32>
    %460 = arith.truncf %419 : vector<8x32xf32> to vector<8x32xbf16>
    %cst_135 = arith.constant dense<0.000000e+00> : vector<8x128xf32>
    %461 = tpu.matmul %460, %6, %cst_135 {dimension_numbers = #tpu.dot_dimension_numbers<[1], [0], [0], [1], [0, 0, 1, 1], [], []>} : vector<8x32xbf16>, vector<32x128xbf16>, vector<8x128xf32> -> vector<8x128xf32>
    %462 = arith.addf %459, %461 : vector<8x128xf32>
    %463 = vector.extract_strided_slice %462 {offsets = [0, 0], sizes = [8, 32], strides = [1, 1]} : vector<8x128xf32> to vector<8x32xf32>
    %464 = arith.negf %463 : vector<8x32xf32>
    %465 = math.exp %464 : vector<8x32xf32>
    %cst_136 = arith.constant 1.000000e+00 : f32
    %466 = vector.broadcast %cst_136 : f32 to vector<8x32xf32>
    %467 = arith.addf %466, %465 : vector<8x32xf32>
    %468 = arith.divf %466, %467 : vector<8x32xf32>
    %469 = vector.extract_strided_slice %462 {offsets = [0, 32], sizes = [8, 32], strides = [1, 1]} : vector<8x128xf32> to vector<8x32xf32>
    %470 = arith.negf %469 : vector<8x32xf32>
    %471 = math.exp %470 : vector<8x32xf32>
    %cst_137 = arith.constant 1.000000e+00 : f32
    %472 = vector.broadcast %cst_137 : f32 to vector<8x32xf32>
    %473 = arith.addf %472, %471 : vector<8x32xf32>
    %474 = arith.divf %472, %473 : vector<8x32xf32>
    %475 = vector.extract_strided_slice %462 {offsets = [0, 64], sizes = [8, 32], strides = [1, 1]} : vector<8x128xf32> to vector<8x32xf32>
    %476 = math.tanh %475 : vector<8x32xf32>
    %477 = vector.extract_strided_slice %462 {offsets = [0, 96], sizes = [8, 32], strides = [1, 1]} : vector<8x128xf32> to vector<8x32xf32>
    %478 = arith.negf %477 : vector<8x32xf32>
    %479 = math.exp %478 : vector<8x32xf32>
    %cst_138 = arith.constant 1.000000e+00 : f32
    %480 = vector.broadcast %cst_138 : f32 to vector<8x32xf32>
    %481 = arith.addf %480, %479 : vector<8x32xf32>
    %482 = arith.divf %480, %481 : vector<8x32xf32>
    %483 = arith.mulf %474, %417 : vector<8x32xf32>
    %484 = arith.mulf %468, %476 : vector<8x32xf32>
    %485 = arith.addf %483, %484 : vector<8x32xf32>
    %486 = math.tanh %485 : vector<8x32xf32>
    %487 = arith.mulf %482, %486 : vector<8x32xf32>
    %c9_139 = arith.constant 9 : index
    %c0_140 = arith.constant 0 : index
    %c0_141 = arith.constant 0 : index
    %488 = vector.load %arg6[%c9_139, %c0_140, %c0_141] : memref<16x8x32xf32, #tpu.memory_space<vmem>>, vector<1x8x32xf32>
    %489 = vector.shape_cast %488 : vector<1x8x32xf32> to vector<8x32xf32>
    %490 = vector.shape_cast %487 : vector<8x32xf32> to vector<1x8x32xf32>
    tpu.vector_store %arg6[%c9_139, %c0_140, %c0_141], %490 {strides = array<i32>} : memref<16x8x32xf32, #tpu.memory_space<vmem>>, vector<1x8x32xf32>,
    %c7 = arith.constant 7 : index
    %c0_142 = arith.constant 0 : index
    %c0_143 = arith.constant 0 : index
    %491 = vector.load %arg1[%c7, %c0_142, %c0_143] : memref<16x8x128xbf16, #tpu.memory_space<vmem>>, vector<1x8x128xbf16>
    %492 = vector.shape_cast %491 : vector<1x8x128xbf16> to vector<8x128xbf16>
    %493 = arith.extf %492 : vector<8x128xbf16> to vector<8x128xf32>
    %494 = arith.truncf %453 : vector<8x32xf32> to vector<8x32xbf16>
    %cst_144 = arith.constant dense<0.000000e+00> : vector<8x128xf32>
    %495 = tpu.matmul %494, %4, %cst_144 {dimension_numbers = #tpu.dot_dimension_numbers<[1], [0], [0], [1], [0, 0, 1, 1], [], []>} : vector<8x32xbf16>, vector<32x128xbf16>, vector<8x128xf32> -> vector<8x128xf32>
    %496 = arith.addf %493, %495 : vector<8x128xf32>
    %497 = vector.extract_strided_slice %496 {offsets = [0, 0], sizes = [8, 32], strides = [1, 1]} : vector<8x128xf32> to vector<8x32xf32>
    %498 = arith.negf %497 : vector<8x32xf32>
    %499 = math.exp %498 : vector<8x32xf32>
    %cst_145 = arith.constant 1.000000e+00 : f32
    %500 = vector.broadcast %cst_145 : f32 to vector<8x32xf32>
    %501 = arith.addf %500, %499 : vector<8x32xf32>
    %502 = arith.divf %500, %501 : vector<8x32xf32>
    %503 = vector.extract_strided_slice %496 {offsets = [0, 32], sizes = [8, 32], strides = [1, 1]} : vector<8x128xf32> to vector<8x32xf32>
    %504 = arith.negf %503 : vector<8x32xf32>
    %505 = math.exp %504 : vector<8x32xf32>
    %cst_146 = arith.constant 1.000000e+00 : f32
    %506 = vector.broadcast %cst_146 : f32 to vector<8x32xf32>
    %507 = arith.addf %506, %505 : vector<8x32xf32>
    %508 = arith.divf %506, %507 : vector<8x32xf32>
    %509 = vector.extract_strided_slice %496 {offsets = [0, 64], sizes = [8, 32], strides = [1, 1]} : vector<8x128xf32> to vector<8x32xf32>
    %510 = math.tanh %509 : vector<8x32xf32>
    %511 = vector.extract_strided_slice %496 {offsets = [0, 96], sizes = [8, 32], strides = [1, 1]} : vector<8x128xf32> to vector<8x32xf32>
    %512 = arith.negf %511 : vector<8x32xf32>
    %513 = math.exp %512 : vector<8x32xf32>
    %cst_147 = arith.constant 1.000000e+00 : f32
    %514 = vector.broadcast %cst_147 : f32 to vector<8x32xf32>
    %515 = arith.addf %514, %513 : vector<8x32xf32>
    %516 = arith.divf %514, %515 : vector<8x32xf32>
    %517 = arith.mulf %508, %451 : vector<8x32xf32>
    %518 = arith.mulf %502, %510 : vector<8x32xf32>
    %519 = arith.addf %517, %518 : vector<8x32xf32>
    %520 = math.tanh %519 : vector<8x32xf32>
    %521 = arith.mulf %516, %520 : vector<8x32xf32>
    %c7_148 = arith.constant 7 : index
    %c0_149 = arith.constant 0 : index
    %c0_150 = arith.constant 0 : index
    %522 = vector.load %arg5[%c7_148, %c0_149, %c0_150] : memref<16x8x32xf32, #tpu.memory_space<vmem>>, vector<1x8x32xf32>
    %523 = vector.shape_cast %522 : vector<1x8x32xf32> to vector<8x32xf32>
    %524 = vector.shape_cast %521 : vector<8x32xf32> to vector<1x8x32xf32>
    tpu.vector_store %arg5[%c7_148, %c0_149, %c0_150], %524 {strides = array<i32>} : memref<16x8x32xf32, #tpu.memory_space<vmem>>, vector<1x8x32xf32>,
    %c8 = arith.constant 8 : index
    %c0_151 = arith.constant 0 : index
    %c0_152 = arith.constant 0 : index
    %525 = vector.load %arg2[%c8, %c0_151, %c0_152] : memref<16x8x128xbf16, #tpu.memory_space<vmem>>, vector<1x8x128xbf16>
    %526 = vector.shape_cast %525 : vector<1x8x128xbf16> to vector<8x128xbf16>
    %527 = arith.extf %526 : vector<8x128xbf16> to vector<8x128xf32>
    %528 = arith.truncf %487 : vector<8x32xf32> to vector<8x32xbf16>
    %cst_153 = arith.constant dense<0.000000e+00> : vector<8x128xf32>
    %529 = tpu.matmul %528, %6, %cst_153 {dimension_numbers = #tpu.dot_dimension_numbers<[1], [0], [0], [1], [0, 0, 1, 1], [], []>} : vector<8x32xbf16>, vector<32x128xbf16>, vector<8x128xf32> -> vector<8x128xf32>
    %530 = arith.addf %527, %529 : vector<8x128xf32>
    %531 = vector.extract_strided_slice %530 {offsets = [0, 0], sizes = [8, 32], strides = [1, 1]} : vector<8x128xf32> to vector<8x32xf32>
    %532 = arith.negf %531 : vector<8x32xf32>
    %533 = math.exp %532 : vector<8x32xf32>
    %cst_154 = arith.constant 1.000000e+00 : f32
    %534 = vector.broadcast %cst_154 : f32 to vector<8x32xf32>
    %535 = arith.addf %534, %533 : vector<8x32xf32>
    %536 = arith.divf %534, %535 : vector<8x32xf32>
    %537 = vector.extract_strided_slice %530 {offsets = [0, 32], sizes = [8, 32], strides = [1, 1]} : vector<8x128xf32> to vector<8x32xf32>
    %538 = arith.negf %537 : vector<8x32xf32>
    %539 = math.exp %538 : vector<8x32xf32>
    %cst_155 = arith.constant 1.000000e+00 : f32
    %540 = vector.broadcast %cst_155 : f32 to vector<8x32xf32>
    %541 = arith.addf %540, %539 : vector<8x32xf32>
    %542 = arith.divf %540, %541 : vector<8x32xf32>
    %543 = vector.extract_strided_slice %530 {offsets = [0, 64], sizes = [8, 32], strides = [1, 1]} : vector<8x128xf32> to vector<8x32xf32>
    %544 = math.tanh %543 : vector<8x32xf32>
    %545 = vector.extract_strided_slice %530 {offsets = [0, 96], sizes = [8, 32], strides = [1, 1]} : vector<8x128xf32> to vector<8x32xf32>
    %546 = arith.negf %545 : vector<8x32xf32>
    %547 = math.exp %546 : vector<8x32xf32>
    %cst_156 = arith.constant 1.000000e+00 : f32
    %548 = vector.broadcast %cst_156 : f32 to vector<8x32xf32>
    %549 = arith.addf %548, %547 : vector<8x32xf32>
    %550 = arith.divf %548, %549 : vector<8x32xf32>
    %551 = arith.mulf %542, %485 : vector<8x32xf32>
    %552 = arith.mulf %536, %544 : vector<8x32xf32>
    %553 = arith.addf %551, %552 : vector<8x32xf32>
    %554 = math.tanh %553 : vector<8x32xf32>
    %555 = arith.mulf %550, %554 : vector<8x32xf32>
    %c8_157 = arith.constant 8 : index
    %c0_158 = arith.constant 0 : index
    %c0_159 = arith.constant 0 : index
    %556 = vector.load %arg6[%c8_157, %c0_158, %c0_159] : memref<16x8x32xf32, #tpu.memory_space<vmem>>, vector<1x8x32xf32>
    %557 = vector.shape_cast %556 : vector<1x8x32xf32> to vector<8x32xf32>
    %558 = vector.shape_cast %555 : vector<8x32xf32> to vector<1x8x32xf32>
    tpu.vector_store %arg6[%c8_157, %c0_158, %c0_159], %558 {strides = array<i32>} : memref<16x8x32xf32, #tpu.memory_space<vmem>>, vector<1x8x32xf32>,
    %c8_160 = arith.constant 8 : index
    %c0_161 = arith.constant 0 : index
    %c0_162 = arith.constant 0 : index
    %559 = vector.load %arg1[%c8_160, %c0_161, %c0_162] : memref<16x8x128xbf16, #tpu.memory_space<vmem>>, vector<1x8x128xbf16>
    %560 = vector.shape_cast %559 : vector<1x8x128xbf16> to vector<8x128xbf16>
    %561 = arith.extf %560 : vector<8x128xbf16> to vector<8x128xf32>
    %562 = arith.truncf %521 : vector<8x32xf32> to vector<8x32xbf16>
    %cst_163 = arith.constant dense<0.000000e+00> : vector<8x128xf32>
    %563 = tpu.matmul %562, %4, %cst_163 {dimension_numbers = #tpu.dot_dimension_numbers<[1], [0], [0], [1], [0, 0, 1, 1], [], []>} : vector<8x32xbf16>, vector<32x128xbf16>, vector<8x128xf32> -> vector<8x128xf32>
    %564 = arith.addf %561, %563 : vector<8x128xf32>
    %565 = vector.extract_strided_slice %564 {offsets = [0, 0], sizes = [8, 32], strides = [1, 1]} : vector<8x128xf32> to vector<8x32xf32>
    %566 = arith.negf %565 : vector<8x32xf32>
    %567 = math.exp %566 : vector<8x32xf32>
    %cst_164 = arith.constant 1.000000e+00 : f32
    %568 = vector.broadcast %cst_164 : f32 to vector<8x32xf32>
    %569 = arith.addf %568, %567 : vector<8x32xf32>
    %570 = arith.divf %568, %569 : vector<8x32xf32>
    %571 = vector.extract_strided_slice %564 {offsets = [0, 32], sizes = [8, 32], strides = [1, 1]} : vector<8x128xf32> to vector<8x32xf32>
    %572 = arith.negf %571 : vector<8x32xf32>
    %573 = math.exp %572 : vector<8x32xf32>
    %cst_165 = arith.constant 1.000000e+00 : f32
    %574 = vector.broadcast %cst_165 : f32 to vector<8x32xf32>
    %575 = arith.addf %574, %573 : vector<8x32xf32>
    %576 = arith.divf %574, %575 : vector<8x32xf32>
    %577 = vector.extract_strided_slice %564 {offsets = [0, 64], sizes = [8, 32], strides = [1, 1]} : vector<8x128xf32> to vector<8x32xf32>
    %578 = math.tanh %577 : vector<8x32xf32>
    %579 = vector.extract_strided_slice %564 {offsets = [0, 96], sizes = [8, 32], strides = [1, 1]} : vector<8x128xf32> to vector<8x32xf32>
    %580 = arith.negf %579 : vector<8x32xf32>
    %581 = math.exp %580 : vector<8x32xf32>
    %cst_166 = arith.constant 1.000000e+00 : f32
    %582 = vector.broadcast %cst_166 : f32 to vector<8x32xf32>
    %583 = arith.addf %582, %581 : vector<8x32xf32>
    %584 = arith.divf %582, %583 : vector<8x32xf32>
    %585 = arith.mulf %576, %519 : vector<8x32xf32>
    %586 = arith.mulf %570, %578 : vector<8x32xf32>
    %587 = arith.addf %585, %586 : vector<8x32xf32>
    %588 = math.tanh %587 : vector<8x32xf32>
    %589 = arith.mulf %584, %588 : vector<8x32xf32>
    %c8_167 = arith.constant 8 : index
    %c0_168 = arith.constant 0 : index
    %c0_169 = arith.constant 0 : index
    %590 = vector.load %arg5[%c8_167, %c0_168, %c0_169] : memref<16x8x32xf32, #tpu.memory_space<vmem>>, vector<1x8x32xf32>
    %591 = vector.shape_cast %590 : vector<1x8x32xf32> to vector<8x32xf32>
    %592 = vector.shape_cast %589 : vector<8x32xf32> to vector<1x8x32xf32>
    tpu.vector_store %arg5[%c8_167, %c0_168, %c0_169], %592 {strides = array<i32>} : memref<16x8x32xf32, #tpu.memory_space<vmem>>, vector<1x8x32xf32>,
    %c7_170 = arith.constant 7 : index
    %c0_171 = arith.constant 0 : index
    %c0_172 = arith.constant 0 : index
    %593 = vector.load %arg2[%c7_170, %c0_171, %c0_172] : memref<16x8x128xbf16, #tpu.memory_space<vmem>>, vector<1x8x128xbf16>
    %594 = vector.shape_cast %593 : vector<1x8x128xbf16> to vector<8x128xbf16>
    %595 = arith.extf %594 : vector<8x128xbf16> to vector<8x128xf32>
    %596 = arith.truncf %555 : vector<8x32xf32> to vector<8x32xbf16>
    %cst_173 = arith.constant dense<0.000000e+00> : vector<8x128xf32>
    %597 = tpu.matmul %596, %6, %cst_173 {dimension_numbers = #tpu.dot_dimension_numbers<[1], [0], [0], [1], [0, 0, 1, 1], [], []>} : vector<8x32xbf16>, vector<32x128xbf16>, vector<8x128xf32> -> vector<8x128xf32>
    %598 = arith.addf %595, %597 : vector<8x128xf32>
    %599 = vector.extract_strided_slice %598 {offsets = [0, 0], sizes = [8, 32], strides = [1, 1]} : vector<8x128xf32> to vector<8x32xf32>
    %600 = arith.negf %599 : vector<8x32xf32>
    %601 = math.exp %600 : vector<8x32xf32>
    %cst_174 = arith.constant 1.000000e+00 : f32
    %602 = vector.broadcast %cst_174 : f32 to vector<8x32xf32>
    %603 = arith.addf %602, %601 : vector<8x32xf32>
    %604 = arith.divf %602, %603 : vector<8x32xf32>
    %605 = vector.extract_strided_slice %598 {offsets = [0, 32], sizes = [8, 32], strides = [1, 1]} : vector<8x128xf32> to vector<8x32xf32>
    %606 = arith.negf %605 : vector<8x32xf32>
    %607 = math.exp %606 : vector<8x32xf32>
    %cst_175 = arith.constant 1.000000e+00 : f32
    %608 = vector.broadcast %cst_175 : f32 to vector<8x32xf32>
    %609 = arith.addf %608, %607 : vector<8x32xf32>
    %610 = arith.divf %608, %609 : vector<8x32xf32>
    %611 = vector.extract_strided_slice %598 {offsets = [0, 64], sizes = [8, 32], strides = [1, 1]} : vector<8x128xf32> to vector<8x32xf32>
    %612 = math.tanh %611 : vector<8x32xf32>
    %613 = vector.extract_strided_slice %598 {offsets = [0, 96], sizes = [8, 32], strides = [1, 1]} : vector<8x128xf32> to vector<8x32xf32>
    %614 = arith.negf %613 : vector<8x32xf32>
    %615 = math.exp %614 : vector<8x32xf32>
    %cst_176 = arith.constant 1.000000e+00 : f32
    %616 = vector.broadcast %cst_176 : f32 to vector<8x32xf32>
    %617 = arith.addf %616, %615 : vector<8x32xf32>
    %618 = arith.divf %616, %617 : vector<8x32xf32>
    %619 = arith.mulf %610, %553 : vector<8x32xf32>
    %620 = arith.mulf %604, %612 : vector<8x32xf32>
    %621 = arith.addf %619, %620 : vector<8x32xf32>
    %622 = math.tanh %621 : vector<8x32xf32>
    %623 = arith.mulf %618, %622 : vector<8x32xf32>
    %c7_177 = arith.constant 7 : index
    %c0_178 = arith.constant 0 : index
    %c0_179 = arith.constant 0 : index
    %624 = vector.load %arg6[%c7_177, %c0_178, %c0_179] : memref<16x8x32xf32, #tpu.memory_space<vmem>>, vector<1x8x32xf32>
    %625 = vector.shape_cast %624 : vector<1x8x32xf32> to vector<8x32xf32>
    %626 = vector.shape_cast %623 : vector<8x32xf32> to vector<1x8x32xf32>
    tpu.vector_store %arg6[%c7_177, %c0_178, %c0_179], %626 {strides = array<i32>} : memref<16x8x32xf32, #tpu.memory_space<vmem>>, vector<1x8x32xf32>,
    %c9_180 = arith.constant 9 : index
    %c0_181 = arith.constant 0 : index
    %c0_182 = arith.constant 0 : index
    %627 = vector.load %arg1[%c9_180, %c0_181, %c0_182] : memref<16x8x128xbf16, #tpu.memory_space<vmem>>, vector<1x8x128xbf16>
    %628 = vector.shape_cast %627 : vector<1x8x128xbf16> to vector<8x128xbf16>
    %629 = arith.extf %628 : vector<8x128xbf16> to vector<8x128xf32>
    %630 = arith.truncf %589 : vector<8x32xf32> to vector<8x32xbf16>
    %cst_183 = arith.constant dense<0.000000e+00> : vector<8x128xf32>
    %631 = tpu.matmul %630, %4, %cst_183 {dimension_numbers = #tpu.dot_dimension_numbers<[1], [0], [0], [1], [0, 0, 1, 1], [], []>} : vector<8x32xbf16>, vector<32x128xbf16>, vector<8x128xf32> -> vector<8x128xf32>
    %632 = arith.addf %629, %631 : vector<8x128xf32>
    %633 = vector.extract_strided_slice %632 {offsets = [0, 0], sizes = [8, 32], strides = [1, 1]} : vector<8x128xf32> to vector<8x32xf32>
    %634 = arith.negf %633 : vector<8x32xf32>
    %635 = math.exp %634 : vector<8x32xf32>
    %cst_184 = arith.constant 1.000000e+00 : f32
    %636 = vector.broadcast %cst_184 : f32 to vector<8x32xf32>
    %637 = arith.addf %636, %635 : vector<8x32xf32>
    %638 = arith.divf %636, %637 : vector<8x32xf32>
    %639 = vector.extract_strided_slice %632 {offsets = [0, 32], sizes = [8, 32], strides = [1, 1]} : vector<8x128xf32> to vector<8x32xf32>
    %640 = arith.negf %639 : vector<8x32xf32>
    %641 = math.exp %640 : vector<8x32xf32>
    %cst_185 = arith.constant 1.000000e+00 : f32
    %642 = vector.broadcast %cst_185 : f32 to vector<8x32xf32>
    %643 = arith.addf %642, %641 : vector<8x32xf32>
    %644 = arith.divf %642, %643 : vector<8x32xf32>
    %645 = vector.extract_strided_slice %632 {offsets = [0, 64], sizes = [8, 32], strides = [1, 1]} : vector<8x128xf32> to vector<8x32xf32>
    %646 = math.tanh %645 : vector<8x32xf32>
    %647 = vector.extract_strided_slice %632 {offsets = [0, 96], sizes = [8, 32], strides = [1, 1]} : vector<8x128xf32> to vector<8x32xf32>
    %648 = arith.negf %647 : vector<8x32xf32>
    %649 = math.exp %648 : vector<8x32xf32>
    %cst_186 = arith.constant 1.000000e+00 : f32
    %650 = vector.broadcast %cst_186 : f32 to vector<8x32xf32>
    %651 = arith.addf %650, %649 : vector<8x32xf32>
    %652 = arith.divf %650, %651 : vector<8x32xf32>
    %653 = arith.mulf %644, %587 : vector<8x32xf32>
    %654 = arith.mulf %638, %646 : vector<8x32xf32>
    %655 = arith.addf %653, %654 : vector<8x32xf32>
    %656 = math.tanh %655 : vector<8x32xf32>
    %657 = arith.mulf %652, %656 : vector<8x32xf32>
    %c9_187 = arith.constant 9 : index
    %c0_188 = arith.constant 0 : index
    %c0_189 = arith.constant 0 : index
    %658 = vector.load %arg5[%c9_187, %c0_188, %c0_189] : memref<16x8x32xf32, #tpu.memory_space<vmem>>, vector<1x8x32xf32>
    %659 = vector.shape_cast %658 : vector<1x8x32xf32> to vector<8x32xf32>
    %660 = vector.shape_cast %657 : vector<8x32xf32> to vector<1x8x32xf32>
    tpu.vector_store %arg5[%c9_187, %c0_188, %c0_189], %660 {strides = array<i32>} : memref<16x8x32xf32, #tpu.memory_space<vmem>>, vector<1x8x32xf32>,
    %c6_190 = arith.constant 6 : index
    %c0_191 = arith.constant 0 : index
    %c0_192 = arith.constant 0 : index
    %661 = vector.load %arg2[%c6_190, %c0_191, %c0_192] : memref<16x8x128xbf16, #tpu.memory_space<vmem>>, vector<1x8x128xbf16>
    %662 = vector.shape_cast %661 : vector<1x8x128xbf16> to vector<8x128xbf16>
    %663 = arith.extf %662 : vector<8x128xbf16> to vector<8x128xf32>
    %664 = arith.truncf %623 : vector<8x32xf32> to vector<8x32xbf16>
    %cst_193 = arith.constant dense<0.000000e+00> : vector<8x128xf32>
    %665 = tpu.matmul %664, %6, %cst_193 {dimension_numbers = #tpu.dot_dimension_numbers<[1], [0], [0], [1], [0, 0, 1, 1], [], []>} : vector<8x32xbf16>, vector<32x128xbf16>, vector<8x128xf32> -> vector<8x128xf32>
    %666 = arith.addf %663, %665 : vector<8x128xf32>
    %667 = vector.extract_strided_slice %666 {offsets = [0, 0], sizes = [8, 32], strides = [1, 1]} : vector<8x128xf32> to vector<8x32xf32>
    %668 = arith.negf %667 : vector<8x32xf32>
    %669 = math.exp %668 : vector<8x32xf32>
    %cst_194 = arith.constant 1.000000e+00 : f32
    %670 = vector.broadcast %cst_194 : f32 to vector<8x32xf32>
    %671 = arith.addf %670, %669 : vector<8x32xf32>
    %672 = arith.divf %670, %671 : vector<8x32xf32>
    %673 = vector.extract_strided_slice %666 {offsets = [0, 32], sizes = [8, 32], strides = [1, 1]} : vector<8x128xf32> to vector<8x32xf32>
    %674 = arith.negf %673 : vector<8x32xf32>
    %675 = math.exp %674 : vector<8x32xf32>
    %cst_195 = arith.constant 1.000000e+00 : f32
    %676 = vector.broadcast %cst_195 : f32 to vector<8x32xf32>
    %677 = arith.addf %676, %675 : vector<8x32xf32>
    %678 = arith.divf %676, %677 : vector<8x32xf32>
    %679 = vector.extract_strided_slice %666 {offsets = [0, 64], sizes = [8, 32], strides = [1, 1]} : vector<8x128xf32> to vector<8x32xf32>
    %680 = math.tanh %679 : vector<8x32xf32>
    %681 = vector.extract_strided_slice %666 {offsets = [0, 96], sizes = [8, 32], strides = [1, 1]} : vector<8x128xf32> to vector<8x32xf32>
    %682 = arith.negf %681 : vector<8x32xf32>
    %683 = math.exp %682 : vector<8x32xf32>
    %cst_196 = arith.constant 1.000000e+00 : f32
    %684 = vector.broadcast %cst_196 : f32 to vector<8x32xf32>
    %685 = arith.addf %684, %683 : vector<8x32xf32>
    %686 = arith.divf %684, %685 : vector<8x32xf32>
    %687 = arith.mulf %678, %621 : vector<8x32xf32>
    %688 = arith.mulf %672, %680 : vector<8x32xf32>
    %689 = arith.addf %687, %688 : vector<8x32xf32>
    %690 = math.tanh %689 : vector<8x32xf32>
    %691 = arith.mulf %686, %690 : vector<8x32xf32>
    %c6_197 = arith.constant 6 : index
    %c0_198 = arith.constant 0 : index
    %c0_199 = arith.constant 0 : index
    %692 = vector.load %arg6[%c6_197, %c0_198, %c0_199] : memref<16x8x32xf32, #tpu.memory_space<vmem>>, vector<1x8x32xf32>
    %693 = vector.shape_cast %692 : vector<1x8x32xf32> to vector<8x32xf32>
    %694 = vector.shape_cast %691 : vector<8x32xf32> to vector<1x8x32xf32>
    tpu.vector_store %arg6[%c6_197, %c0_198, %c0_199], %694 {strides = array<i32>} : memref<16x8x32xf32, #tpu.memory_space<vmem>>, vector<1x8x32xf32>,
    %c10_200 = arith.constant 10 : index
    %c0_201 = arith.constant 0 : index
    %c0_202 = arith.constant 0 : index
    %695 = vector.load %arg1[%c10_200, %c0_201, %c0_202] : memref<16x8x128xbf16, #tpu.memory_space<vmem>>, vector<1x8x128xbf16>
    %696 = vector.shape_cast %695 : vector<1x8x128xbf16> to vector<8x128xbf16>
    %697 = arith.extf %696 : vector<8x128xbf16> to vector<8x128xf32>
    %698 = arith.truncf %657 : vector<8x32xf32> to vector<8x32xbf16>
    %cst_203 = arith.constant dense<0.000000e+00> : vector<8x128xf32>
    %699 = tpu.matmul %698, %4, %cst_203 {dimension_numbers = #tpu.dot_dimension_numbers<[1], [0], [0], [1], [0, 0, 1, 1], [], []>} : vector<8x32xbf16>, vector<32x128xbf16>, vector<8x128xf32> -> vector<8x128xf32>
    %700 = arith.addf %697, %699 : vector<8x128xf32>
    %701 = vector.extract_strided_slice %700 {offsets = [0, 0], sizes = [8, 32], strides = [1, 1]} : vector<8x128xf32> to vector<8x32xf32>
    %702 = arith.negf %701 : vector<8x32xf32>
    %703 = math.exp %702 : vector<8x32xf32>
    %cst_204 = arith.constant 1.000000e+00 : f32
    %704 = vector.broadcast %cst_204 : f32 to vector<8x32xf32>
    %705 = arith.addf %704, %703 : vector<8x32xf32>
    %706 = arith.divf %704, %705 : vector<8x32xf32>
    %707 = vector.extract_strided_slice %700 {offsets = [0, 32], sizes = [8, 32], strides = [1, 1]} : vector<8x128xf32> to vector<8x32xf32>
    %708 = arith.negf %707 : vector<8x32xf32>
    %709 = math.exp %708 : vector<8x32xf32>
    %cst_205 = arith.constant 1.000000e+00 : f32
    %710 = vector.broadcast %cst_205 : f32 to vector<8x32xf32>
    %711 = arith.addf %710, %709 : vector<8x32xf32>
    %712 = arith.divf %710, %711 : vector<8x32xf32>
    %713 = vector.extract_strided_slice %700 {offsets = [0, 64], sizes = [8, 32], strides = [1, 1]} : vector<8x128xf32> to vector<8x32xf32>
    %714 = math.tanh %713 : vector<8x32xf32>
    %715 = vector.extract_strided_slice %700 {offsets = [0, 96], sizes = [8, 32], strides = [1, 1]} : vector<8x128xf32> to vector<8x32xf32>
    %716 = arith.negf %715 : vector<8x32xf32>
    %717 = math.exp %716 : vector<8x32xf32>
    %cst_206 = arith.constant 1.000000e+00 : f32
    %718 = vector.broadcast %cst_206 : f32 to vector<8x32xf32>
    %719 = arith.addf %718, %717 : vector<8x32xf32>
    %720 = arith.divf %718, %719 : vector<8x32xf32>
    %721 = arith.mulf %712, %655 : vector<8x32xf32>
    %722 = arith.mulf %706, %714 : vector<8x32xf32>
    %723 = arith.addf %721, %722 : vector<8x32xf32>
    %724 = math.tanh %723 : vector<8x32xf32>
    %725 = arith.mulf %720, %724 : vector<8x32xf32>
    %c10_207 = arith.constant 10 : index
    %c0_208 = arith.constant 0 : index
    %c0_209 = arith.constant 0 : index
    %726 = vector.load %arg5[%c10_207, %c0_208, %c0_209] : memref<16x8x32xf32, #tpu.memory_space<vmem>>, vector<1x8x32xf32>
    %727 = vector.shape_cast %726 : vector<1x8x32xf32> to vector<8x32xf32>
    %728 = vector.shape_cast %725 : vector<8x32xf32> to vector<1x8x32xf32>
    tpu.vector_store %arg5[%c10_207, %c0_208, %c0_209], %728 {strides = array<i32>} : memref<16x8x32xf32, #tpu.memory_space<vmem>>, vector<1x8x32xf32>,
    %c5_210 = arith.constant 5 : index
    %c0_211 = arith.constant 0 : index
    %c0_212 = arith.constant 0 : index
    %729 = vector.load %arg2[%c5_210, %c0_211, %c0_212] : memref<16x8x128xbf16, #tpu.memory_space<vmem>>, vector<1x8x128xbf16>
    %730 = vector.shape_cast %729 : vector<1x8x128xbf16> to vector<8x128xbf16>
    %731 = arith.extf %730 : vector<8x128xbf16> to vector<8x128xf32>
    %732 = arith.truncf %691 : vector<8x32xf32> to vector<8x32xbf16>
    %cst_213 = arith.constant dense<0.000000e+00> : vector<8x128xf32>
    %733 = tpu.matmul %732, %6, %cst_213 {dimension_numbers = #tpu.dot_dimension_numbers<[1], [0], [0], [1], [0, 0, 1, 1], [], []>} : vector<8x32xbf16>, vector<32x128xbf16>, vector<8x128xf32> -> vector<8x128xf32>
    %734 = arith.addf %731, %733 : vector<8x128xf32>
    %735 = vector.extract_strided_slice %734 {offsets = [0, 0], sizes = [8, 32], strides = [1, 1]} : vector<8x128xf32> to vector<8x32xf32>
    %736 = arith.negf %735 : vector<8x32xf32>
    %737 = math.exp %736 : vector<8x32xf32>
    %cst_214 = arith.constant 1.000000e+00 : f32
    %738 = vector.broadcast %cst_214 : f32 to vector<8x32xf32>
    %739 = arith.addf %738, %737 : vector<8x32xf32>
    %740 = arith.divf %738, %739 : vector<8x32xf32>
    %741 = vector.extract_strided_slice %734 {offsets = [0, 32], sizes = [8, 32], strides = [1, 1]} : vector<8x128xf32> to vector<8x32xf32>
    %742 = arith.negf %741 : vector<8x32xf32>
    %743 = math.exp %742 : vector<8x32xf32>
    %cst_215 = arith.constant 1.000000e+00 : f32
    %744 = vector.broadcast %cst_215 : f32 to vector<8x32xf32>
    %745 = arith.addf %744, %743 : vector<8x32xf32>
    %746 = arith.divf %744, %745 : vector<8x32xf32>
    %747 = vector.extract_strided_slice %734 {offsets = [0, 64], sizes = [8, 32], strides = [1, 1]} : vector<8x128xf32> to vector<8x32xf32>
    %748 = math.tanh %747 : vector<8x32xf32>
    %749 = vector.extract_strided_slice %734 {offsets = [0, 96], sizes = [8, 32], strides = [1, 1]} : vector<8x128xf32> to vector<8x32xf32>
    %750 = arith.negf %749 : vector<8x32xf32>
    %751 = math.exp %750 : vector<8x32xf32>
    %cst_216 = arith.constant 1.000000e+00 : f32
    %752 = vector.broadcast %cst_216 : f32 to vector<8x32xf32>
    %753 = arith.addf %752, %751 : vector<8x32xf32>
    %754 = arith.divf %752, %753 : vector<8x32xf32>
    %755 = arith.mulf %746, %689 : vector<8x32xf32>
    %756 = arith.mulf %740, %748 : vector<8x32xf32>
    %757 = arith.addf %755, %756 : vector<8x32xf32>
    %758 = math.tanh %757 : vector<8x32xf32>
    %759 = arith.mulf %754, %758 : vector<8x32xf32>
    %c5_217 = arith.constant 5 : index
    %c0_218 = arith.constant 0 : index
    %c0_219 = arith.constant 0 : index
    %760 = vector.load %arg6[%c5_217, %c0_218, %c0_219] : memref<16x8x32xf32, #tpu.memory_space<vmem>>, vector<1x8x32xf32>
    %761 = vector.shape_cast %760 : vector<1x8x32xf32> to vector<8x32xf32>
    %762 = vector.shape_cast %759 : vector<8x32xf32> to vector<1x8x32xf32>
    tpu.vector_store %arg6[%c5_217, %c0_218, %c0_219], %762 {strides = array<i32>} : memref<16x8x32xf32, #tpu.memory_space<vmem>>, vector<1x8x32xf32>,
    %c11_220 = arith.constant 11 : index
    %c0_221 = arith.constant 0 : index
    %c0_222 = arith.constant 0 : index
    %763 = vector.load %arg1[%c11_220, %c0_221, %c0_222] : memref<16x8x128xbf16, #tpu.memory_space<vmem>>, vector<1x8x128xbf16>
    %764 = vector.shape_cast %763 : vector<1x8x128xbf16> to vector<8x128xbf16>
    %765 = arith.extf %764 : vector<8x128xbf16> to vector<8x128xf32>
    %766 = arith.truncf %725 : vector<8x32xf32> to vector<8x32xbf16>
    %cst_223 = arith.constant dense<0.000000e+00> : vector<8x128xf32>
    %767 = tpu.matmul %766, %4, %cst_223 {dimension_numbers = #tpu.dot_dimension_numbers<[1], [0], [0], [1], [0, 0, 1, 1], [], []>} : vector<8x32xbf16>, vector<32x128xbf16>, vector<8x128xf32> -> vector<8x128xf32>
    %768 = arith.addf %765, %767 : vector<8x128xf32>
    %769 = vector.extract_strided_slice %768 {offsets = [0, 0], sizes = [8, 32], strides = [1, 1]} : vector<8x128xf32> to vector<8x32xf32>
    %770 = arith.negf %769 : vector<8x32xf32>
    %771 = math.exp %770 : vector<8x32xf32>
    %cst_224 = arith.constant 1.000000e+00 : f32
    %772 = vector.broadcast %cst_224 : f32 to vector<8x32xf32>
    %773 = arith.addf %772, %771 : vector<8x32xf32>
    %774 = arith.divf %772, %773 : vector<8x32xf32>
    %775 = vector.extract_strided_slice %768 {offsets = [0, 32], sizes = [8, 32], strides = [1, 1]} : vector<8x128xf32> to vector<8x32xf32>
    %776 = arith.negf %775 : vector<8x32xf32>
    %777 = math.exp %776 : vector<8x32xf32>
    %cst_225 = arith.constant 1.000000e+00 : f32
    %778 = vector.broadcast %cst_225 : f32 to vector<8x32xf32>
    %779 = arith.addf %778, %777 : vector<8x32xf32>
    %780 = arith.divf %778, %779 : vector<8x32xf32>
    %781 = vector.extract_strided_slice %768 {offsets = [0, 64], sizes = [8, 32], strides = [1, 1]} : vector<8x128xf32> to vector<8x32xf32>
    %782 = math.tanh %781 : vector<8x32xf32>
    %783 = vector.extract_strided_slice %768 {offsets = [0, 96], sizes = [8, 32], strides = [1, 1]} : vector<8x128xf32> to vector<8x32xf32>
    %784 = arith.negf %783 : vector<8x32xf32>
    %785 = math.exp %784 : vector<8x32xf32>
    %cst_226 = arith.constant 1.000000e+00 : f32
    %786 = vector.broadcast %cst_226 : f32 to vector<8x32xf32>
    %787 = arith.addf %786, %785 : vector<8x32xf32>
    %788 = arith.divf %786, %787 : vector<8x32xf32>
    %789 = arith.mulf %780, %723 : vector<8x32xf32>
    %790 = arith.mulf %774, %782 : vector<8x32xf32>
    %791 = arith.addf %789, %790 : vector<8x32xf32>
    %792 = math.tanh %791 : vector<8x32xf32>
    %793 = arith.mulf %788, %792 : vector<8x32xf32>
    %c11_227 = arith.constant 11 : index
    %c0_228 = arith.constant 0 : index
    %c0_229 = arith.constant 0 : index
    %794 = vector.load %arg5[%c11_227, %c0_228, %c0_229] : memref<16x8x32xf32, #tpu.memory_space<vmem>>, vector<1x8x32xf32>
    %795 = vector.shape_cast %794 : vector<1x8x32xf32> to vector<8x32xf32>
    %796 = vector.shape_cast %793 : vector<8x32xf32> to vector<1x8x32xf32>
    tpu.vector_store %arg5[%c11_227, %c0_228, %c0_229], %796 {strides = array<i32>} : memref<16x8x32xf32, #tpu.memory_space<vmem>>, vector<1x8x32xf32>,
    %c4_230 = arith.constant 4 : index
    %c0_231 = arith.constant 0 : index
    %c0_232 = arith.constant 0 : index
    %797 = vector.load %arg2[%c4_230, %c0_231, %c0_232] : memref<16x8x128xbf16, #tpu.memory_space<vmem>>, vector<1x8x128xbf16>
    %798 = vector.shape_cast %797 : vector<1x8x128xbf16> to vector<8x128xbf16>
    %799 = arith.extf %798 : vector<8x128xbf16> to vector<8x128xf32>
    %800 = arith.truncf %759 : vector<8x32xf32> to vector<8x32xbf16>
    %cst_233 = arith.constant dense<0.000000e+00> : vector<8x128xf32>
    %801 = tpu.matmul %800, %6, %cst_233 {dimension_numbers = #tpu.dot_dimension_numbers<[1], [0], [0], [1], [0, 0, 1, 1], [], []>} : vector<8x32xbf16>, vector<32x128xbf16>, vector<8x128xf32> -> vector<8x128xf32>
    %802 = arith.addf %799, %801 : vector<8x128xf32>
    %803 = vector.extract_strided_slice %802 {offsets = [0, 0], sizes = [8, 32], strides = [1, 1]} : vector<8x128xf32> to vector<8x32xf32>
    %804 = arith.negf %803 : vector<8x32xf32>
    %805 = math.exp %804 : vector<8x32xf32>
    %cst_234 = arith.constant 1.000000e+00 : f32
    %806 = vector.broadcast %cst_234 : f32 to vector<8x32xf32>
    %807 = arith.addf %806, %805 : vector<8x32xf32>
    %808 = arith.divf %806, %807 : vector<8x32xf32>
    %809 = vector.extract_strided_slice %802 {offsets = [0, 32], sizes = [8, 32], strides = [1, 1]} : vector<8x128xf32> to vector<8x32xf32>
    %810 = arith.negf %809 : vector<8x32xf32>
    %811 = math.exp %810 : vector<8x32xf32>
    %cst_235 = arith.constant 1.000000e+00 : f32
    %812 = vector.broadcast %cst_235 : f32 to vector<8x32xf32>
    %813 = arith.addf %812, %811 : vector<8x32xf32>
    %814 = arith.divf %812, %813 : vector<8x32xf32>
    %815 = vector.extract_strided_slice %802 {offsets = [0, 64], sizes = [8, 32], strides = [1, 1]} : vector<8x128xf32> to vector<8x32xf32>
    %816 = math.tanh %815 : vector<8x32xf32>
    %817 = vector.extract_strided_slice %802 {offsets = [0, 96], sizes = [8, 32], strides = [1, 1]} : vector<8x128xf32> to vector<8x32xf32>
    %818 = arith.negf %817 : vector<8x32xf32>
    %819 = math.exp %818 : vector<8x32xf32>
    %cst_236 = arith.constant 1.000000e+00 : f32
    %820 = vector.broadcast %cst_236 : f32 to vector<8x32xf32>
    %821 = arith.addf %820, %819 : vector<8x32xf32>
    %822 = arith.divf %820, %821 : vector<8x32xf32>
    %823 = arith.mulf %814, %757 : vector<8x32xf32>
    %824 = arith.mulf %808, %816 : vector<8x32xf32>
    %825 = arith.addf %823, %824 : vector<8x32xf32>
    %826 = math.tanh %825 : vector<8x32xf32>
    %827 = arith.mulf %822, %826 : vector<8x32xf32>
    %c4_237 = arith.constant 4 : index
    %c0_238 = arith.constant 0 : index
    %c0_239 = arith.constant 0 : index
    %828 = vector.load %arg6[%c4_237, %c0_238, %c0_239] : memref<16x8x32xf32, #tpu.memory_space<vmem>>, vector<1x8x32xf32>
    %829 = vector.shape_cast %828 : vector<1x8x32xf32> to vector<8x32xf32>
    %830 = vector.shape_cast %827 : vector<8x32xf32> to vector<1x8x32xf32>
    tpu.vector_store %arg6[%c4_237, %c0_238, %c0_239], %830 {strides = array<i32>} : memref<16x8x32xf32, #tpu.memory_space<vmem>>, vector<1x8x32xf32>,
    %c12_240 = arith.constant 12 : index
    %c0_241 = arith.constant 0 : index
    %c0_242 = arith.constant 0 : index
    %831 = vector.load %arg1[%c12_240, %c0_241, %c0_242] : memref<16x8x128xbf16, #tpu.memory_space<vmem>>, vector<1x8x128xbf16>
    %832 = vector.shape_cast %831 : vector<1x8x128xbf16> to vector<8x128xbf16>
    %833 = arith.extf %832 : vector<8x128xbf16> to vector<8x128xf32>
    %834 = arith.truncf %793 : vector<8x32xf32> to vector<8x32xbf16>
    %cst_243 = arith.constant dense<0.000000e+00> : vector<8x128xf32>
    %835 = tpu.matmul %834, %4, %cst_243 {dimension_numbers = #tpu.dot_dimension_numbers<[1], [0], [0], [1], [0, 0, 1, 1], [], []>} : vector<8x32xbf16>, vector<32x128xbf16>, vector<8x128xf32> -> vector<8x128xf32>
    %836 = arith.addf %833, %835 : vector<8x128xf32>
    %837 = vector.extract_strided_slice %836 {offsets = [0, 0], sizes = [8, 32], strides = [1, 1]} : vector<8x128xf32> to vector<8x32xf32>
    %838 = arith.negf %837 : vector<8x32xf32>
    %839 = math.exp %838 : vector<8x32xf32>
    %cst_244 = arith.constant 1.000000e+00 : f32
    %840 = vector.broadcast %cst_244 : f32 to vector<8x32xf32>
    %841 = arith.addf %840, %839 : vector<8x32xf32>
    %842 = arith.divf %840, %841 : vector<8x32xf32>
    %843 = vector.extract_strided_slice %836 {offsets = [0, 32], sizes = [8, 32], strides = [1, 1]} : vector<8x128xf32> to vector<8x32xf32>
    %844 = arith.negf %843 : vector<8x32xf32>
    %845 = math.exp %844 : vector<8x32xf32>
    %cst_245 = arith.constant 1.000000e+00 : f32
    %846 = vector.broadcast %cst_245 : f32 to vector<8x32xf32>
    %847 = arith.addf %846, %845 : vector<8x32xf32>
    %848 = arith.divf %846, %847 : vector<8x32xf32>
    %849 = vector.extract_strided_slice %836 {offsets = [0, 64], sizes = [8, 32], strides = [1, 1]} : vector<8x128xf32> to vector<8x32xf32>
    %850 = math.tanh %849 : vector<8x32xf32>
    %851 = vector.extract_strided_slice %836 {offsets = [0, 96], sizes = [8, 32], strides = [1, 1]} : vector<8x128xf32> to vector<8x32xf32>
    %852 = arith.negf %851 : vector<8x32xf32>
    %853 = math.exp %852 : vector<8x32xf32>
    %cst_246 = arith.constant 1.000000e+00 : f32
    %854 = vector.broadcast %cst_246 : f32 to vector<8x32xf32>
    %855 = arith.addf %854, %853 : vector<8x32xf32>
    %856 = arith.divf %854, %855 : vector<8x32xf32>
    %857 = arith.mulf %848, %791 : vector<8x32xf32>
    %858 = arith.mulf %842, %850 : vector<8x32xf32>
    %859 = arith.addf %857, %858 : vector<8x32xf32>
    %860 = math.tanh %859 : vector<8x32xf32>
    %861 = arith.mulf %856, %860 : vector<8x32xf32>
    %c12_247 = arith.constant 12 : index
    %c0_248 = arith.constant 0 : index
    %c0_249 = arith.constant 0 : index
    %862 = vector.load %arg5[%c12_247, %c0_248, %c0_249] : memref<16x8x32xf32, #tpu.memory_space<vmem>>, vector<1x8x32xf32>
    %863 = vector.shape_cast %862 : vector<1x8x32xf32> to vector<8x32xf32>
    %864 = vector.shape_cast %861 : vector<8x32xf32> to vector<1x8x32xf32>
    tpu.vector_store %arg5[%c12_247, %c0_248, %c0_249], %864 {strides = array<i32>} : memref<16x8x32xf32, #tpu.memory_space<vmem>>, vector<1x8x32xf32>,
    %c3_250 = arith.constant 3 : index
    %c0_251 = arith.constant 0 : index
    %c0_252 = arith.constant 0 : index
    %865 = vector.load %arg2[%c3_250, %c0_251, %c0_252] : memref<16x8x128xbf16, #tpu.memory_space<vmem>>, vector<1x8x128xbf16>
    %866 = vector.shape_cast %865 : vector<1x8x128xbf16> to vector<8x128xbf16>
    %867 = arith.extf %866 : vector<8x128xbf16> to vector<8x128xf32>
    %868 = arith.truncf %827 : vector<8x32xf32> to vector<8x32xbf16>
    %cst_253 = arith.constant dense<0.000000e+00> : vector<8x128xf32>
    %869 = tpu.matmul %868, %6, %cst_253 {dimension_numbers = #tpu.dot_dimension_numbers<[1], [0], [0], [1], [0, 0, 1, 1], [], []>} : vector<8x32xbf16>, vector<32x128xbf16>, vector<8x128xf32> -> vector<8x128xf32>
    %870 = arith.addf %867, %869 : vector<8x128xf32>
    %871 = vector.extract_strided_slice %870 {offsets = [0, 0], sizes = [8, 32], strides = [1, 1]} : vector<8x128xf32> to vector<8x32xf32>
    %872 = arith.negf %871 : vector<8x32xf32>
    %873 = math.exp %872 : vector<8x32xf32>
    %cst_254 = arith.constant 1.000000e+00 : f32
    %874 = vector.broadcast %cst_254 : f32 to vector<8x32xf32>
    %875 = arith.addf %874, %873 : vector<8x32xf32>
    %876 = arith.divf %874, %875 : vector<8x32xf32>
    %877 = vector.extract_strided_slice %870 {offsets = [0, 32], sizes = [8, 32], strides = [1, 1]} : vector<8x128xf32> to vector<8x32xf32>
    %878 = arith.negf %877 : vector<8x32xf32>
    %879 = math.exp %878 : vector<8x32xf32>
    %cst_255 = arith.constant 1.000000e+00 : f32
    %880 = vector.broadcast %cst_255 : f32 to vector<8x32xf32>
    %881 = arith.addf %880, %879 : vector<8x32xf32>
    %882 = arith.divf %880, %881 : vector<8x32xf32>
    %883 = vector.extract_strided_slice %870 {offsets = [0, 64], sizes = [8, 32], strides = [1, 1]} : vector<8x128xf32> to vector<8x32xf32>
    %884 = math.tanh %883 : vector<8x32xf32>
    %885 = vector.extract_strided_slice %870 {offsets = [0, 96], sizes = [8, 32], strides = [1, 1]} : vector<8x128xf32> to vector<8x32xf32>
    %886 = arith.negf %885 : vector<8x32xf32>
    %887 = math.exp %886 : vector<8x32xf32>
    %cst_256 = arith.constant 1.000000e+00 : f32
    %888 = vector.broadcast %cst_256 : f32 to vector<8x32xf32>
    %889 = arith.addf %888, %887 : vector<8x32xf32>
    %890 = arith.divf %888, %889 : vector<8x32xf32>
    %891 = arith.mulf %882, %825 : vector<8x32xf32>
    %892 = arith.mulf %876, %884 : vector<8x32xf32>
    %893 = arith.addf %891, %892 : vector<8x32xf32>
    %894 = math.tanh %893 : vector<8x32xf32>
    %895 = arith.mulf %890, %894 : vector<8x32xf32>
    %c3_257 = arith.constant 3 : index
    %c0_258 = arith.constant 0 : index
    %c0_259 = arith.constant 0 : index
    %896 = vector.load %arg6[%c3_257, %c0_258, %c0_259] : memref<16x8x32xf32, #tpu.memory_space<vmem>>, vector<1x8x32xf32>
    %897 = vector.shape_cast %896 : vector<1x8x32xf32> to vector<8x32xf32>
    %898 = vector.shape_cast %895 : vector<8x32xf32> to vector<1x8x32xf32>
    tpu.vector_store %arg6[%c3_257, %c0_258, %c0_259], %898 {strides = array<i32>} : memref<16x8x32xf32, #tpu.memory_space<vmem>>, vector<1x8x32xf32>,
    %c13_260 = arith.constant 13 : index
    %c0_261 = arith.constant 0 : index
    %c0_262 = arith.constant 0 : index
    %899 = vector.load %arg1[%c13_260, %c0_261, %c0_262] : memref<16x8x128xbf16, #tpu.memory_space<vmem>>, vector<1x8x128xbf16>
    %900 = vector.shape_cast %899 : vector<1x8x128xbf16> to vector<8x128xbf16>
    %901 = arith.extf %900 : vector<8x128xbf16> to vector<8x128xf32>
    %902 = arith.truncf %861 : vector<8x32xf32> to vector<8x32xbf16>
    %cst_263 = arith.constant dense<0.000000e+00> : vector<8x128xf32>
    %903 = tpu.matmul %902, %4, %cst_263 {dimension_numbers = #tpu.dot_dimension_numbers<[1], [0], [0], [1], [0, 0, 1, 1], [], []>} : vector<8x32xbf16>, vector<32x128xbf16>, vector<8x128xf32> -> vector<8x128xf32>
    %904 = arith.addf %901, %903 : vector<8x128xf32>
    %905 = vector.extract_strided_slice %904 {offsets = [0, 0], sizes = [8, 32], strides = [1, 1]} : vector<8x128xf32> to vector<8x32xf32>
    %906 = arith.negf %905 : vector<8x32xf32>
    %907 = math.exp %906 : vector<8x32xf32>
    %cst_264 = arith.constant 1.000000e+00 : f32
    %908 = vector.broadcast %cst_264 : f32 to vector<8x32xf32>
    %909 = arith.addf %908, %907 : vector<8x32xf32>
    %910 = arith.divf %908, %909 : vector<8x32xf32>
    %911 = vector.extract_strided_slice %904 {offsets = [0, 32], sizes = [8, 32], strides = [1, 1]} : vector<8x128xf32> to vector<8x32xf32>
    %912 = arith.negf %911 : vector<8x32xf32>
    %913 = math.exp %912 : vector<8x32xf32>
    %cst_265 = arith.constant 1.000000e+00 : f32
    %914 = vector.broadcast %cst_265 : f32 to vector<8x32xf32>
    %915 = arith.addf %914, %913 : vector<8x32xf32>
    %916 = arith.divf %914, %915 : vector<8x32xf32>
    %917 = vector.extract_strided_slice %904 {offsets = [0, 64], sizes = [8, 32], strides = [1, 1]} : vector<8x128xf32> to vector<8x32xf32>
    %918 = math.tanh %917 : vector<8x32xf32>
    %919 = vector.extract_strided_slice %904 {offsets = [0, 96], sizes = [8, 32], strides = [1, 1]} : vector<8x128xf32> to vector<8x32xf32>
    %920 = arith.negf %919 : vector<8x32xf32>
    %921 = math.exp %920 : vector<8x32xf32>
    %cst_266 = arith.constant 1.000000e+00 : f32
    %922 = vector.broadcast %cst_266 : f32 to vector<8x32xf32>
    %923 = arith.addf %922, %921 : vector<8x32xf32>
    %924 = arith.divf %922, %923 : vector<8x32xf32>
    %925 = arith.mulf %916, %859 : vector<8x32xf32>
    %926 = arith.mulf %910, %918 : vector<8x32xf32>
    %927 = arith.addf %925, %926 : vector<8x32xf32>
    %928 = math.tanh %927 : vector<8x32xf32>
    %929 = arith.mulf %924, %928 : vector<8x32xf32>
    %c13_267 = arith.constant 13 : index
    %c0_268 = arith.constant 0 : index
    %c0_269 = arith.constant 0 : index
    %930 = vector.load %arg5[%c13_267, %c0_268, %c0_269] : memref<16x8x32xf32, #tpu.memory_space<vmem>>, vector<1x8x32xf32>
    %931 = vector.shape_cast %930 : vector<1x8x32xf32> to vector<8x32xf32>
    %932 = vector.shape_cast %929 : vector<8x32xf32> to vector<1x8x32xf32>
    tpu.vector_store %arg5[%c13_267, %c0_268, %c0_269], %932 {strides = array<i32>} : memref<16x8x32xf32, #tpu.memory_space<vmem>>, vector<1x8x32xf32>,
    %c2_270 = arith.constant 2 : index
    %c0_271 = arith.constant 0 : index
    %c0_272 = arith.constant 0 : index
    %933 = vector.load %arg2[%c2_270, %c0_271, %c0_272] : memref<16x8x128xbf16, #tpu.memory_space<vmem>>, vector<1x8x128xbf16>
    %934 = vector.shape_cast %933 : vector<1x8x128xbf16> to vector<8x128xbf16>
    %935 = arith.extf %934 : vector<8x128xbf16> to vector<8x128xf32>
    %936 = arith.truncf %895 : vector<8x32xf32> to vector<8x32xbf16>
    %cst_273 = arith.constant dense<0.000000e+00> : vector<8x128xf32>
    %937 = tpu.matmul %936, %6, %cst_273 {dimension_numbers = #tpu.dot_dimension_numbers<[1], [0], [0], [1], [0, 0, 1, 1], [], []>} : vector<8x32xbf16>, vector<32x128xbf16>, vector<8x128xf32> -> vector<8x128xf32>
    %938 = arith.addf %935, %937 : vector<8x128xf32>
    %939 = vector.extract_strided_slice %938 {offsets = [0, 0], sizes = [8, 32], strides = [1, 1]} : vector<8x128xf32> to vector<8x32xf32>
    %940 = arith.negf %939 : vector<8x32xf32>
    %941 = math.exp %940 : vector<8x32xf32>
    %cst_274 = arith.constant 1.000000e+00 : f32
    %942 = vector.broadcast %cst_274 : f32 to vector<8x32xf32>
    %943 = arith.addf %942, %941 : vector<8x32xf32>
    %944 = arith.divf %942, %943 : vector<8x32xf32>
    %945 = vector.extract_strided_slice %938 {offsets = [0, 32], sizes = [8, 32], strides = [1, 1]} : vector<8x128xf32> to vector<8x32xf32>
    %946 = arith.negf %945 : vector<8x32xf32>
    %947 = math.exp %946 : vector<8x32xf32>
    %cst_275 = arith.constant 1.000000e+00 : f32
    %948 = vector.broadcast %cst_275 : f32 to vector<8x32xf32>
    %949 = arith.addf %948, %947 : vector<8x32xf32>
    %950 = arith.divf %948, %949 : vector<8x32xf32>
    %951 = vector.extract_strided_slice %938 {offsets = [0, 64], sizes = [8, 32], strides = [1, 1]} : vector<8x128xf32> to vector<8x32xf32>
    %952 = math.tanh %951 : vector<8x32xf32>
    %953 = vector.extract_strided_slice %938 {offsets = [0, 96], sizes = [8, 32], strides = [1, 1]} : vector<8x128xf32> to vector<8x32xf32>
    %954 = arith.negf %953 : vector<8x32xf32>
    %955 = math.exp %954 : vector<8x32xf32>
    %cst_276 = arith.constant 1.000000e+00 : f32
    %956 = vector.broadcast %cst_276 : f32 to vector<8x32xf32>
    %957 = arith.addf %956, %955 : vector<8x32xf32>
    %958 = arith.divf %956, %957 : vector<8x32xf32>
    %959 = arith.mulf %950, %893 : vector<8x32xf32>
    %960 = arith.mulf %944, %952 : vector<8x32xf32>
    %961 = arith.addf %959, %960 : vector<8x32xf32>
    %962 = math.tanh %961 : vector<8x32xf32>
    %963 = arith.mulf %958, %962 : vector<8x32xf32>
    %c2_277 = arith.constant 2 : index
    %c0_278 = arith.constant 0 : index
    %c0_279 = arith.constant 0 : index
    %964 = vector.load %arg6[%c2_277, %c0_278, %c0_279] : memref<16x8x32xf32, #tpu.memory_space<vmem>>, vector<1x8x32xf32>
    %965 = vector.shape_cast %964 : vector<1x8x32xf32> to vector<8x32xf32>
    %966 = vector.shape_cast %963 : vector<8x32xf32> to vector<1x8x32xf32>
    tpu.vector_store %arg6[%c2_277, %c0_278, %c0_279], %966 {strides = array<i32>} : memref<16x8x32xf32, #tpu.memory_space<vmem>>, vector<1x8x32xf32>,
    %c14_280 = arith.constant 14 : index
    %c0_281 = arith.constant 0 : index
    %c0_282 = arith.constant 0 : index
    %967 = vector.load %arg1[%c14_280, %c0_281, %c0_282] : memref<16x8x128xbf16, #tpu.memory_space<vmem>>, vector<1x8x128xbf16>
    %968 = vector.shape_cast %967 : vector<1x8x128xbf16> to vector<8x128xbf16>
    %969 = arith.extf %968 : vector<8x128xbf16> to vector<8x128xf32>
    %970 = arith.truncf %929 : vector<8x32xf32> to vector<8x32xbf16>
    %cst_283 = arith.constant dense<0.000000e+00> : vector<8x128xf32>
    %971 = tpu.matmul %970, %4, %cst_283 {dimension_numbers = #tpu.dot_dimension_numbers<[1], [0], [0], [1], [0, 0, 1, 1], [], []>} : vector<8x32xbf16>, vector<32x128xbf16>, vector<8x128xf32> -> vector<8x128xf32>
    %972 = arith.addf %969, %971 : vector<8x128xf32>
    %973 = vector.extract_strided_slice %972 {offsets = [0, 0], sizes = [8, 32], strides = [1, 1]} : vector<8x128xf32> to vector<8x32xf32>
    %974 = arith.negf %973 : vector<8x32xf32>
    %975 = math.exp %974 : vector<8x32xf32>
    %cst_284 = arith.constant 1.000000e+00 : f32
    %976 = vector.broadcast %cst_284 : f32 to vector<8x32xf32>
    %977 = arith.addf %976, %975 : vector<8x32xf32>
    %978 = arith.divf %976, %977 : vector<8x32xf32>
    %979 = vector.extract_strided_slice %972 {offsets = [0, 32], sizes = [8, 32], strides = [1, 1]} : vector<8x128xf32> to vector<8x32xf32>
    %980 = arith.negf %979 : vector<8x32xf32>
    %981 = math.exp %980 : vector<8x32xf32>
    %cst_285 = arith.constant 1.000000e+00 : f32
    %982 = vector.broadcast %cst_285 : f32 to vector<8x32xf32>
    %983 = arith.addf %982, %981 : vector<8x32xf32>
    %984 = arith.divf %982, %983 : vector<8x32xf32>
    %985 = vector.extract_strided_slice %972 {offsets = [0, 64], sizes = [8, 32], strides = [1, 1]} : vector<8x128xf32> to vector<8x32xf32>
    %986 = math.tanh %985 : vector<8x32xf32>
    %987 = vector.extract_strided_slice %972 {offsets = [0, 96], sizes = [8, 32], strides = [1, 1]} : vector<8x128xf32> to vector<8x32xf32>
    %988 = arith.negf %987 : vector<8x32xf32>
    %989 = math.exp %988 : vector<8x32xf32>
    %cst_286 = arith.constant 1.000000e+00 : f32
    %990 = vector.broadcast %cst_286 : f32 to vector<8x32xf32>
    %991 = arith.addf %990, %989 : vector<8x32xf32>
    %992 = arith.divf %990, %991 : vector<8x32xf32>
    %993 = arith.mulf %984, %927 : vector<8x32xf32>
    %994 = arith.mulf %978, %986 : vector<8x32xf32>
    %995 = arith.addf %993, %994 : vector<8x32xf32>
    %996 = math.tanh %995 : vector<8x32xf32>
    %997 = arith.mulf %992, %996 : vector<8x32xf32>
    %c14_287 = arith.constant 14 : index
    %c0_288 = arith.constant 0 : index
    %c0_289 = arith.constant 0 : index
    %998 = vector.load %arg5[%c14_287, %c0_288, %c0_289] : memref<16x8x32xf32, #tpu.memory_space<vmem>>, vector<1x8x32xf32>
    %999 = vector.shape_cast %998 : vector<1x8x32xf32> to vector<8x32xf32>
    %1000 = vector.shape_cast %997 : vector<8x32xf32> to vector<1x8x32xf32>
    tpu.vector_store %arg5[%c14_287, %c0_288, %c0_289], %1000 {strides = array<i32>} : memref<16x8x32xf32, #tpu.memory_space<vmem>>, vector<1x8x32xf32>,
    %c1_290 = arith.constant 1 : index
    %c0_291 = arith.constant 0 : index
    %c0_292 = arith.constant 0 : index
    %1001 = vector.load %arg2[%c1_290, %c0_291, %c0_292] : memref<16x8x128xbf16, #tpu.memory_space<vmem>>, vector<1x8x128xbf16>
    %1002 = vector.shape_cast %1001 : vector<1x8x128xbf16> to vector<8x128xbf16>
    %1003 = arith.extf %1002 : vector<8x128xbf16> to vector<8x128xf32>
    %1004 = arith.truncf %963 : vector<8x32xf32> to vector<8x32xbf16>
    %cst_293 = arith.constant dense<0.000000e+00> : vector<8x128xf32>
    %1005 = tpu.matmul %1004, %6, %cst_293 {dimension_numbers = #tpu.dot_dimension_numbers<[1], [0], [0], [1], [0, 0, 1, 1], [], []>} : vector<8x32xbf16>, vector<32x128xbf16>, vector<8x128xf32> -> vector<8x128xf32>
    %1006 = arith.addf %1003, %1005 : vector<8x128xf32>
    %1007 = vector.extract_strided_slice %1006 {offsets = [0, 0], sizes = [8, 32], strides = [1, 1]} : vector<8x128xf32> to vector<8x32xf32>
    %1008 = arith.negf %1007 : vector<8x32xf32>
    %1009 = math.exp %1008 : vector<8x32xf32>
    %cst_294 = arith.constant 1.000000e+00 : f32
    %1010 = vector.broadcast %cst_294 : f32 to vector<8x32xf32>
    %1011 = arith.addf %1010, %1009 : vector<8x32xf32>
    %1012 = arith.divf %1010, %1011 : vector<8x32xf32>
    %1013 = vector.extract_strided_slice %1006 {offsets = [0, 32], sizes = [8, 32], strides = [1, 1]} : vector<8x128xf32> to vector<8x32xf32>
    %1014 = arith.negf %1013 : vector<8x32xf32>
    %1015 = math.exp %1014 : vector<8x32xf32>
    %cst_295 = arith.constant 1.000000e+00 : f32
    %1016 = vector.broadcast %cst_295 : f32 to vector<8x32xf32>
    %1017 = arith.addf %1016, %1015 : vector<8x32xf32>
    %1018 = arith.divf %1016, %1017 : vector<8x32xf32>
    %1019 = vector.extract_strided_slice %1006 {offsets = [0, 64], sizes = [8, 32], strides = [1, 1]} : vector<8x128xf32> to vector<8x32xf32>
    %1020 = math.tanh %1019 : vector<8x32xf32>
    %1021 = vector.extract_strided_slice %1006 {offsets = [0, 96], sizes = [8, 32], strides = [1, 1]} : vector<8x128xf32> to vector<8x32xf32>
    %1022 = arith.negf %1021 : vector<8x32xf32>
    %1023 = math.exp %1022 : vector<8x32xf32>
    %cst_296 = arith.constant 1.000000e+00 : f32
    %1024 = vector.broadcast %cst_296 : f32 to vector<8x32xf32>
    %1025 = arith.addf %1024, %1023 : vector<8x32xf32>
    %1026 = arith.divf %1024, %1025 : vector<8x32xf32>
    %1027 = arith.mulf %1018, %961 : vector<8x32xf32>
    %1028 = arith.mulf %1012, %1020 : vector<8x32xf32>
    %1029 = arith.addf %1027, %1028 : vector<8x32xf32>
    %1030 = math.tanh %1029 : vector<8x32xf32>
    %1031 = arith.mulf %1026, %1030 : vector<8x32xf32>
    %c1_297 = arith.constant 1 : index
    %c0_298 = arith.constant 0 : index
    %c0_299 = arith.constant 0 : index
    %1032 = vector.load %arg6[%c1_297, %c0_298, %c0_299] : memref<16x8x32xf32, #tpu.memory_space<vmem>>, vector<1x8x32xf32>
    %1033 = vector.shape_cast %1032 : vector<1x8x32xf32> to vector<8x32xf32>
    %1034 = vector.shape_cast %1031 : vector<8x32xf32> to vector<1x8x32xf32>
    tpu.vector_store %arg6[%c1_297, %c0_298, %c0_299], %1034 {strides = array<i32>} : memref<16x8x32xf32, #tpu.memory_space<vmem>>, vector<1x8x32xf32>,
    %c15_300 = arith.constant 15 : index
    %c0_301 = arith.constant 0 : index
    %c0_302 = arith.constant 0 : index
    %1035 = vector.load %arg1[%c15_300, %c0_301, %c0_302] : memref<16x8x128xbf16, #tpu.memory_space<vmem>>, vector<1x8x128xbf16>
    %1036 = vector.shape_cast %1035 : vector<1x8x128xbf16> to vector<8x128xbf16>
    %1037 = arith.extf %1036 : vector<8x128xbf16> to vector<8x128xf32>
    %1038 = arith.truncf %997 : vector<8x32xf32> to vector<8x32xbf16>
    %cst_303 = arith.constant dense<0.000000e+00> : vector<8x128xf32>
    %1039 = tpu.matmul %1038, %4, %cst_303 {dimension_numbers = #tpu.dot_dimension_numbers<[1], [0], [0], [1], [0, 0, 1, 1], [], []>} : vector<8x32xbf16>, vector<32x128xbf16>, vector<8x128xf32> -> vector<8x128xf32>
    %1040 = arith.addf %1037, %1039 : vector<8x128xf32>
    %1041 = vector.extract_strided_slice %1040 {offsets = [0, 0], sizes = [8, 32], strides = [1, 1]} : vector<8x128xf32> to vector<8x32xf32>
    %1042 = arith.negf %1041 : vector<8x32xf32>
    %1043 = math.exp %1042 : vector<8x32xf32>
    %cst_304 = arith.constant 1.000000e+00 : f32
    %1044 = vector.broadcast %cst_304 : f32 to vector<8x32xf32>
    %1045 = arith.addf %1044, %1043 : vector<8x32xf32>
    %1046 = arith.divf %1044, %1045 : vector<8x32xf32>
    %1047 = vector.extract_strided_slice %1040 {offsets = [0, 32], sizes = [8, 32], strides = [1, 1]} : vector<8x128xf32> to vector<8x32xf32>
    %1048 = arith.negf %1047 : vector<8x32xf32>
    %1049 = math.exp %1048 : vector<8x32xf32>
    %cst_305 = arith.constant 1.000000e+00 : f32
    %1050 = vector.broadcast %cst_305 : f32 to vector<8x32xf32>
    %1051 = arith.addf %1050, %1049 : vector<8x32xf32>
    %1052 = arith.divf %1050, %1051 : vector<8x32xf32>
    %1053 = vector.extract_strided_slice %1040 {offsets = [0, 64], sizes = [8, 32], strides = [1, 1]} : vector<8x128xf32> to vector<8x32xf32>
    %1054 = math.tanh %1053 : vector<8x32xf32>
    %1055 = vector.extract_strided_slice %1040 {offsets = [0, 96], sizes = [8, 32], strides = [1, 1]} : vector<8x128xf32> to vector<8x32xf32>
    %1056 = arith.negf %1055 : vector<8x32xf32>
    %1057 = math.exp %1056 : vector<8x32xf32>
    %cst_306 = arith.constant 1.000000e+00 : f32
    %1058 = vector.broadcast %cst_306 : f32 to vector<8x32xf32>
    %1059 = arith.addf %1058, %1057 : vector<8x32xf32>
    %1060 = arith.divf %1058, %1059 : vector<8x32xf32>
    %1061 = arith.mulf %1052, %995 : vector<8x32xf32>
    %1062 = arith.mulf %1046, %1054 : vector<8x32xf32>
    %1063 = arith.addf %1061, %1062 : vector<8x32xf32>
    %1064 = math.tanh %1063 : vector<8x32xf32>
    %1065 = arith.mulf %1060, %1064 : vector<8x32xf32>
    %c15_307 = arith.constant 15 : index
    %c0_308 = arith.constant 0 : index
    %c0_309 = arith.constant 0 : index
    %1066 = vector.load %arg5[%c15_307, %c0_308, %c0_309] : memref<16x8x32xf32, #tpu.memory_space<vmem>>, vector<1x8x32xf32>
    %1067 = vector.shape_cast %1066 : vector<1x8x32xf32> to vector<8x32xf32>
    %1068 = vector.shape_cast %1065 : vector<8x32xf32> to vector<1x8x32xf32>
    tpu.vector_store %arg5[%c15_307, %c0_308, %c0_309], %1068 {strides = array<i32>} : memref<16x8x32xf32, #tpu.memory_space<vmem>>, vector<1x8x32xf32>,
    %c0_310 = arith.constant 0 : index
    %c0_311 = arith.constant 0 : index
    %c0_312 = arith.constant 0 : index
    %1069 = vector.load %arg2[%c0_310, %c0_311, %c0_312] : memref<16x8x128xbf16, #tpu.memory_space<vmem>>, vector<1x8x128xbf16>
    %1070 = vector.shape_cast %1069 : vector<1x8x128xbf16> to vector<8x128xbf16>
    %1071 = arith.extf %1070 : vector<8x128xbf16> to vector<8x128xf32>
    %1072 = arith.truncf %1031 : vector<8x32xf32> to vector<8x32xbf16>
    %cst_313 = arith.constant dense<0.000000e+00> : vector<8x128xf32>
    %1073 = tpu.matmul %1072, %6, %cst_313 {dimension_numbers = #tpu.dot_dimension_numbers<[1], [0], [0], [1], [0, 0, 1, 1], [], []>} : vector<8x32xbf16>, vector<32x128xbf16>, vector<8x128xf32> -> vector<8x128xf32>
    %1074 = arith.addf %1071, %1073 : vector<8x128xf32>
    %1075 = vector.extract_strided_slice %1074 {offsets = [0, 0], sizes = [8, 32], strides = [1, 1]} : vector<8x128xf32> to vector<8x32xf32>
    %1076 = arith.negf %1075 : vector<8x32xf32>
    %1077 = math.exp %1076 : vector<8x32xf32>
    %cst_314 = arith.constant 1.000000e+00 : f32
    %1078 = vector.broadcast %cst_314 : f32 to vector<8x32xf32>
    %1079 = arith.addf %1078, %1077 : vector<8x32xf32>
    %1080 = arith.divf %1078, %1079 : vector<8x32xf32>
    %1081 = vector.extract_strided_slice %1074 {offsets = [0, 32], sizes = [8, 32], strides = [1, 1]} : vector<8x128xf32> to vector<8x32xf32>
    %1082 = arith.negf %1081 : vector<8x32xf32>
    %1083 = math.exp %1082 : vector<8x32xf32>
    %cst_315 = arith.constant 1.000000e+00 : f32
    %1084 = vector.broadcast %cst_315 : f32 to vector<8x32xf32>
    %1085 = arith.addf %1084, %1083 : vector<8x32xf32>
    %1086 = arith.divf %1084, %1085 : vector<8x32xf32>
    %1087 = vector.extract_strided_slice %1074 {offsets = [0, 64], sizes = [8, 32], strides = [1, 1]} : vector<8x128xf32> to vector<8x32xf32>
    %1088 = math.tanh %1087 : vector<8x32xf32>
    %1089 = vector.extract_strided_slice %1074 {offsets = [0, 96], sizes = [8, 32], strides = [1, 1]} : vector<8x128xf32> to vector<8x32xf32>
    %1090 = arith.negf %1089 : vector<8x32xf32>
    %1091 = math.exp %1090 : vector<8x32xf32>
    %cst_316 = arith.constant 1.000000e+00 : f32
    %1092 = vector.broadcast %cst_316 : f32 to vector<8x32xf32>
    %1093 = arith.addf %1092, %1091 : vector<8x32xf32>
    %1094 = arith.divf %1092, %1093 : vector<8x32xf32>
    %1095 = arith.mulf %1086, %1029 : vector<8x32xf32>
    %1096 = arith.mulf %1080, %1088 : vector<8x32xf32>
    %1097 = arith.addf %1095, %1096 : vector<8x32xf32>
    %1098 = math.tanh %1097 : vector<8x32xf32>
    %1099 = arith.mulf %1094, %1098 : vector<8x32xf32>
    %c0_317 = arith.constant 0 : index
    %c0_318 = arith.constant 0 : index
    %c0_319 = arith.constant 0 : index
    %1100 = vector.load %arg6[%c0_317, %c0_318, %c0_319] : memref<16x8x32xf32, #tpu.memory_space<vmem>>, vector<1x8x32xf32>
    %1101 = vector.shape_cast %1100 : vector<1x8x32xf32> to vector<8x32xf32>
    %1102 = vector.shape_cast %1099 : vector<8x32xf32> to vector<1x8x32xf32>
    tpu.vector_store %arg6[%c0_317, %c0_318, %c0_319], %1102 {strides = array<i32>} : memref<16x8x32xf32, #tpu.memory_space<vmem>>, vector<1x8x32xf32>,
    %c0_320 = arith.constant 0 : index
    %c0_321 = arith.constant 0 : index
    %c0_322 = arith.constant 0 : index
    %1103 = vector.load %arg7[%c0_320, %c0_321, %c0_322] : memref<2x8x32xf32, #tpu.memory_space<vmem>>, vector<1x8x32xf32>
    %1104 = vector.shape_cast %1103 : vector<1x8x32xf32> to vector<8x32xf32>
    %1105 = vector.shape_cast %1065 : vector<8x32xf32> to vector<1x8x32xf32>
    tpu.vector_store %arg7[%c0_320, %c0_321, %c0_322], %1105 {strides = array<i32>} : memref<2x8x32xf32, #tpu.memory_space<vmem>>, vector<1x8x32xf32>,
    %c0_323 = arith.constant 0 : index
    %c0_324 = arith.constant 0 : index
    %c0_325 = arith.constant 0 : index
    %1106 = vector.load %arg8[%c0_323, %c0_324, %c0_325] : memref<2x8x32xf32, #tpu.memory_space<vmem>>, vector<1x8x32xf32>
    %1107 = vector.shape_cast %1106 : vector<1x8x32xf32> to vector<8x32xf32>
    %1108 = vector.shape_cast %1063 : vector<8x32xf32> to vector<1x8x32xf32>
    tpu.vector_store %arg8[%c0_323, %c0_324, %c0_325], %1108 {strides = array<i32>} : memref<2x8x32xf32, #tpu.memory_space<vmem>>, vector<1x8x32xf32>,
    %c1_326 = arith.constant 1 : index
    %c0_327 = arith.constant 0 : index
    %c0_328 = arith.constant 0 : index
    %1109 = vector.load %arg7[%c1_326, %c0_327, %c0_328] : memref<2x8x32xf32, #tpu.memory_space<vmem>>, vector<1x8x32xf32>
    %1110 = vector.shape_cast %1109 : vector<1x8x32xf32> to vector<8x32xf32>
    %1111 = vector.shape_cast %1099 : vector<8x32xf32> to vector<1x8x32xf32>
    tpu.vector_store %arg7[%c1_326, %c0_327, %c0_328], %1111 {strides = array<i32>} : memref<2x8x32xf32, #tpu.memory_space<vmem>>, vector<1x8x32xf32>,
    %c1_329 = arith.constant 1 : index
    %c0_330 = arith.constant 0 : index
    %c0_331 = arith.constant 0 : index
    %1112 = vector.load %arg8[%c1_329, %c0_330, %c0_331] : memref<2x8x32xf32, #tpu.memory_space<vmem>>, vector<1x8x32xf32>
    %1113 = vector.shape_cast %1112 : vector<1x8x32xf32> to vector<8x32xf32>
    %1114 = vector.shape_cast %1097 : vector<8x32xf32> to vector<1x8x32xf32>
    tpu.vector_store %arg8[%c1_329, %c0_330, %c0_331], %1114 {strides = array<i32>} : memref<2x8x32xf32, #tpu.memory_space<vmem>>, vector<1x8x32xf32>,
    return
  }
  func.func @transform_0(%arg0: i32) -> (i32, i32, i32) {
    %c0_i32 = arith.constant 0 : i32
    %c0_i32_0 = arith.constant 0 : i32
    %c0_i32_1 = arith.constant 0 : i32
    return %arg0, %c0_i32, %c0_i32_0 : i32, i32, i32
  }
  func.func @transform_1(%arg0: i32) -> (i32, i32, i32) {
    %c0_i32 = arith.constant 0 : i32
    %0 = arith.subi %c0_i32, %arg0 : i32
    %c0_i32_0 = arith.constant 0 : i32
    %c0_i32_1 = arith.constant 0 : i32
    %c0_i32_2 = arith.constant 0 : i32
    return %0, %c0_i32_0, %c0_i32_1 : i32, i32, i32
  }
  func.func @transform_2(%arg0: i32) -> (i32, i32) {
    %c0_i32 = arith.constant 0 : i32
    %c0_i32_0 = arith.constant 0 : i32
    %c0_i32_1 = arith.constant 0 : i32
    return %c0_i32, %c0_i32_0 : i32, i32
  }
  func.func @transform_3(%arg0: i32) -> (i32, i32) {
    %c0_i32 = arith.constant 0 : i32
    %c0_i32_0 = arith.constant 0 : i32
    %c0_i32_1 = arith.constant 0 : i32
    return %c0_i32, %c0_i32_0 : i32, i32
  }
  func.func @transform_4(%arg0: i32) -> (i32, i32, i32) {
    %c0_i32 = arith.constant 0 : i32
    %c0_i32_0 = arith.constant 0 : i32
    %c0_i32_1 = arith.constant 0 : i32
    return %arg0, %c0_i32, %c0_i32_0 : i32, i32, i32
  }
  func.func @transform_5(%arg0: i32) -> (i32, i32, i32) {
    %c0_i32 = arith.constant 0 : i32
    %0 = arith.subi %c0_i32, %arg0 : i32
    %c0_i32_0 = arith.constant 0 : i32
    %c0_i32_1 = arith.constant 0 : i32
    %c0_i32_2 = arith.constant 0 : i32
    return %0, %c0_i32_0, %c0_i32_1 : i32, i32, i32
  }
}

module attributes {stable_mosaic.version = 11 : i64} {
  func.func @dual_matmul_bias_kernel(%arg0: i32, %arg1: memref<64x128xf32, #tpu.memory_space<vmem>>, %arg2: memref<128x256xf32, #tpu.memory_space<vmem>>, %arg3: memref<1x256xf32, #tpu.memory_space<vmem>>, %arg4: memref<64x128xbf16, #tpu.memory_space<vmem>>, %arg5: memref<64x128xbf16, #tpu.memory_space<vmem>>) attributes {dimension_semantics = [#tpu.dimension_semantics<parallel>], iteration_bounds = array<i64: 1>, scalar_prefetch = 0 : i64, scratch_operands = 0 : i64, tpu.core_type = #tpu.core_type<tc>, window_params = [{transform_indices = @transform_0, window_bounds = array<i64: 64, 128>}, {pipeline_mode = #tpu.pipeline_mode<synchronous>, transform_indices = @transform_1, window_bounds = array<i64: 128, 256>}, {pipeline_mode = #tpu.pipeline_mode<synchronous>, transform_indices = @transform_2, window_bounds = array<i64: 1, 256>}, {transform_indices = @transform_3, window_bounds = array<i64: 64, 128>}, {transform_indices = @transform_4, window_bounds = array<i64: 64, 128>}]} {
    %c0 = arith.constant 0 : index
    %c0_0 = arith.constant 0 : index
    %0 = vector.load %arg1[%c0, %c0_0] : memref<64x128xf32, #tpu.memory_space<vmem>>, vector<64x128xf32>
    %1 = arith.truncf %0 : vector<64x128xf32> to vector<64x128xbf16>
    %c0_1 = arith.constant 0 : index
    %c0_2 = arith.constant 0 : index
    %2 = vector.load %arg2[%c0_1, %c0_2] : memref<128x256xf32, #tpu.memory_space<vmem>>, vector<128x256xf32>
    %3 = arith.truncf %2 : vector<128x256xf32> to vector<128x256xbf16>
    %cst = arith.constant dense<0.000000e+00> : vector<64x256xf32>
    %4 = tpu.matmul %1, %3, %cst {dimension_numbers = #tpu.dot_dimension_numbers<[1], [0], [0], [1], [0, 0, 1, 1], [], []>} : vector<64x128xbf16>, vector<128x256xbf16>, vector<64x256xf32> -> vector<64x256xf32>
    %c0_3 = arith.constant 0 : index
    %c0_4 = arith.constant 0 : index
    %5 = vector.load %arg3[%c0_3, %c0_4] : memref<1x256xf32, #tpu.memory_space<vmem>>, vector<1x256xf32>
    %6 = vector.broadcast %5 : vector<1x256xf32> to vector<64x256xf32>
    %7 = arith.addf %4, %6 : vector<64x256xf32>
    %8 = vector.extract_strided_slice %7 {offsets = [0, 0], sizes = [64, 128], strides = [1, 1]} : vector<64x256xf32> to vector<64x128xf32>
    %9 = arith.truncf %8 : vector<64x128xf32> to vector<64x128xbf16>
    %c0_5 = arith.constant 0 : index
    %c0_6 = arith.constant 0 : index
    %10 = vector.load %arg4[%c0_5, %c0_6] : memref<64x128xbf16, #tpu.memory_space<vmem>>, vector<64x128xbf16>
    tpu.vector_store %arg4[%c0_5, %c0_6], %9 {strides = array<i32>} : memref<64x128xbf16, #tpu.memory_space<vmem>>, vector<64x128xbf16>,
    %11 = vector.extract_strided_slice %7 {offsets = [0, 128], sizes = [64, 128], strides = [1, 1]} : vector<64x256xf32> to vector<64x128xf32>
    %12 = arith.truncf %11 : vector<64x128xf32> to vector<64x128xbf16>
    %c0_7 = arith.constant 0 : index
    %c0_8 = arith.constant 0 : index
    %13 = vector.load %arg5[%c0_7, %c0_8] : memref<64x128xbf16, #tpu.memory_space<vmem>>, vector<64x128xbf16>
    tpu.vector_store %arg5[%c0_7, %c0_8], %12 {strides = array<i32>} : memref<64x128xbf16, #tpu.memory_space<vmem>>, vector<64x128xbf16>,
    return
  }
  func.func @transform_0(%arg0: i32) -> (i32, i32) {
    %c0_i32 = arith.constant 0 : i32
    %c0_i32_0 = arith.constant 0 : i32
    return %arg0, %c0_i32 : i32, i32
  }
  func.func @transform_1(%arg0: i32) -> (i32, i32) {
    %c0_i32 = arith.constant 0 : i32
    %c0_i32_0 = arith.constant 0 : i32
    %c0_i32_1 = arith.constant 0 : i32
    return %c0_i32, %c0_i32_0 : i32, i32
  }
  func.func @transform_2(%arg0: i32) -> (i32, i32) {
    %c0_i32 = arith.constant 0 : i32
    %c0_i32_0 = arith.constant 0 : i32
    %c0_i32_1 = arith.constant 0 : i32
    return %c0_i32, %c0_i32_0 : i32, i32
  }
  func.func @transform_3(%arg0: i32) -> (i32, i32) {
    %c0_i32 = arith.constant 0 : i32
    %c0_i32_0 = arith.constant 0 : i32
    return %arg0, %c0_i32 : i32, i32
  }
  func.func @transform_4(%arg0: i32) -> (i32, i32) {
    %c0_i32 = arith.constant 0 : i32
    %c0_i32_0 = arith.constant 0 : i32
    return %arg0, %c0_i32 : i32, i32
  }
}

module attributes {stable_mosaic.version = 11 : i64} {
  func.func @bilstm_chunk_kernel(%arg0: i32, %arg1: memref<8x8x128xbf16, #tpu.memory_space<vmem>>, %arg2: memref<8x8x128xbf16, #tpu.memory_space<vmem>>, %arg3: memref<32x128xf32, #tpu.memory_space<vmem>>, %arg4: memref<32x128xf32, #tpu.memory_space<vmem>>, %arg5: memref<8x8x32xf32, #tpu.memory_space<vmem>>, %arg6: memref<8x8x32xf32, #tpu.memory_space<vmem>>, %arg7: memref<2x8x32xf32, #tpu.memory_space<vmem>>, %arg8: memref<2x8x32xf32, #tpu.memory_space<vmem>>) attributes {dimension_semantics = [#tpu.dimension_semantics<arbitrary>], iteration_bounds = array<i64: 1>, scalar_prefetch = 0 : i64, scratch_operands = 2 : i64, tpu.core_type = #tpu.core_type<tc>, window_params = [{transform_indices = @transform_0, window_bounds = array<i64: 8, 8, 128>}, {transform_indices = @transform_1, window_bounds = array<i64: 8, 8, 128>}, {pipeline_mode = #tpu.pipeline_mode<synchronous>, transform_indices = @transform_2, window_bounds = array<i64: 32, 128>}, {pipeline_mode = #tpu.pipeline_mode<synchronous>, transform_indices = @transform_3, window_bounds = array<i64: 32, 128>}, {transform_indices = @transform_4, window_bounds = array<i64: 8, 8, 32>}, {transform_indices = @transform_5, window_bounds = array<i64: 8, 8, 32>}]} {
    %c0_i32 = arith.constant 0 : i32
    %0 = arith.cmpi eq, %arg0, %c0_i32 : i32
    %1 = arith.extui %0 : i1 to i32
    %c0_i32_0 = arith.constant 0 : i32
    %2 = arith.cmpi ne, %1, %c0_i32_0 : i32
    scf.if %2 {
      %cst_180 = arith.constant 0.000000e+00 : f32
      %571 = vector.broadcast %cst_180 : f32 to vector<2x8x32xf32>
      %c0_181 = arith.constant 0 : index
      %c0_182 = arith.constant 0 : index
      %c0_183 = arith.constant 0 : index
      %572 = vector.load %arg7[%c0_181, %c0_182, %c0_183] : memref<2x8x32xf32, #tpu.memory_space<vmem>>, vector<2x8x32xf32>
      tpu.vector_store %arg7[%c0_181, %c0_182, %c0_183], %571 {strides = array<i32>} : memref<2x8x32xf32, #tpu.memory_space<vmem>>, vector<2x8x32xf32>,
      %cst_184 = arith.constant 0.000000e+00 : f32
      %573 = vector.broadcast %cst_184 : f32 to vector<2x8x32xf32>
      %c0_185 = arith.constant 0 : index
      %c0_186 = arith.constant 0 : index
      %c0_187 = arith.constant 0 : index
      %574 = vector.load %arg8[%c0_185, %c0_186, %c0_187] : memref<2x8x32xf32, #tpu.memory_space<vmem>>, vector<2x8x32xf32>
      tpu.vector_store %arg8[%c0_185, %c0_186, %c0_187], %573 {strides = array<i32>} : memref<2x8x32xf32, #tpu.memory_space<vmem>>, vector<2x8x32xf32>,
    } else {
    }
    %c0 = arith.constant 0 : index
    %c0_1 = arith.constant 0 : index
    %3 = vector.load %arg3[%c0, %c0_1] : memref<32x128xf32, #tpu.memory_space<vmem>>, vector<32x128xf32>
    %4 = arith.truncf %3 : vector<32x128xf32> to vector<32x128xbf16>
    %c0_2 = arith.constant 0 : index
    %c0_3 = arith.constant 0 : index
    %5 = vector.load %arg4[%c0_2, %c0_3] : memref<32x128xf32, #tpu.memory_space<vmem>>, vector<32x128xf32>
    %6 = arith.truncf %5 : vector<32x128xf32> to vector<32x128xbf16>
    %c0_4 = arith.constant 0 : index
    %c0_5 = arith.constant 0 : index
    %c0_6 = arith.constant 0 : index
    %7 = vector.load %arg7[%c0_4, %c0_5, %c0_6] : memref<2x8x32xf32, #tpu.memory_space<vmem>>, vector<1x8x32xf32>
    %8 = vector.shape_cast %7 : vector<1x8x32xf32> to vector<8x32xf32>
    %c0_7 = arith.constant 0 : index
    %c0_8 = arith.constant 0 : index
    %c0_9 = arith.constant 0 : index
    %9 = vector.load %arg8[%c0_7, %c0_8, %c0_9] : memref<2x8x32xf32, #tpu.memory_space<vmem>>, vector<1x8x32xf32>
    %10 = vector.shape_cast %9 : vector<1x8x32xf32> to vector<8x32xf32>
    %c1 = arith.constant 1 : index
    %c0_10 = arith.constant 0 : index
    %c0_11 = arith.constant 0 : index
    %11 = vector.load %arg7[%c1, %c0_10, %c0_11] : memref<2x8x32xf32, #tpu.memory_space<vmem>>, vector<1x8x32xf32>
    %12 = vector.shape_cast %11 : vector<1x8x32xf32> to vector<8x32xf32>
    %c1_12 = arith.constant 1 : index
    %c0_13 = arith.constant 0 : index
    %c0_14 = arith.constant 0 : index
    %13 = vector.load %arg8[%c1_12, %c0_13, %c0_14] : memref<2x8x32xf32, #tpu.memory_space<vmem>>, vector<1x8x32xf32>
    %14 = vector.shape_cast %13 : vector<1x8x32xf32> to vector<8x32xf32>
    %c0_15 = arith.constant 0 : index
    %c0_16 = arith.constant 0 : index
    %c0_17 = arith.constant 0 : index
    %15 = vector.load %arg1[%c0_15, %c0_16, %c0_17] : memref<8x8x128xbf16, #tpu.memory_space<vmem>>, vector<1x8x128xbf16>
    %16 = vector.shape_cast %15 : vector<1x8x128xbf16> to vector<8x128xbf16>
    %17 = arith.extf %16 : vector<8x128xbf16> to vector<8x128xf32>
    %18 = arith.truncf %8 : vector<8x32xf32> to vector<8x32xbf16>
    %cst = arith.constant dense<0.000000e+00> : vector<8x128xf32>
    %19 = tpu.matmul %18, %4, %cst {dimension_numbers = #tpu.dot_dimension_numbers<[1], [0], [0], [1], [0, 0, 1, 1], [], []>} : vector<8x32xbf16>, vector<32x128xbf16>, vector<8x128xf32> -> vector<8x128xf32>
    %20 = arith.addf %17, %19 : vector<8x128xf32>
    %21 = vector.extract_strided_slice %20 {offsets = [0, 0], sizes = [8, 32], strides = [1, 1]} : vector<8x128xf32> to vector<8x32xf32>
    %22 = arith.negf %21 : vector<8x32xf32>
    %23 = math.exp %22 : vector<8x32xf32>
    %cst_18 = arith.constant 1.000000e+00 : f32
    %24 = vector.broadcast %cst_18 : f32 to vector<8x32xf32>
    %25 = arith.addf %24, %23 : vector<8x32xf32>
    %26 = arith.divf %24, %25 : vector<8x32xf32>
    %27 = vector.extract_strided_slice %20 {offsets = [0, 32], sizes = [8, 32], strides = [1, 1]} : vector<8x128xf32> to vector<8x32xf32>
    %28 = arith.negf %27 : vector<8x32xf32>
    %29 = math.exp %28 : vector<8x32xf32>
    %cst_19 = arith.constant 1.000000e+00 : f32
    %30 = vector.broadcast %cst_19 : f32 to vector<8x32xf32>
    %31 = arith.addf %30, %29 : vector<8x32xf32>
    %32 = arith.divf %30, %31 : vector<8x32xf32>
    %33 = vector.extract_strided_slice %20 {offsets = [0, 64], sizes = [8, 32], strides = [1, 1]} : vector<8x128xf32> to vector<8x32xf32>
    %34 = math.tanh %33 : vector<8x32xf32>
    %35 = vector.extract_strided_slice %20 {offsets = [0, 96], sizes = [8, 32], strides = [1, 1]} : vector<8x128xf32> to vector<8x32xf32>
    %36 = arith.negf %35 : vector<8x32xf32>
    %37 = math.exp %36 : vector<8x32xf32>
    %cst_20 = arith.constant 1.000000e+00 : f32
    %38 = vector.broadcast %cst_20 : f32 to vector<8x32xf32>
    %39 = arith.addf %38, %37 : vector<8x32xf32>
    %40 = arith.divf %38, %39 : vector<8x32xf32>
    %41 = arith.mulf %32, %10 : vector<8x32xf32>
    %42 = arith.mulf %26, %34 : vector<8x32xf32>
    %43 = arith.addf %41, %42 : vector<8x32xf32>
    %44 = math.tanh %43 : vector<8x32xf32>
    %45 = arith.mulf %40, %44 : vector<8x32xf32>
    %c0_21 = arith.constant 0 : index
    %c0_22 = arith.constant 0 : index
    %c0_23 = arith.constant 0 : index
    %46 = vector.load %arg5[%c0_21, %c0_22, %c0_23] : memref<8x8x32xf32, #tpu.memory_space<vmem>>, vector<1x8x32xf32>
    %47 = vector.shape_cast %46 : vector<1x8x32xf32> to vector<8x32xf32>
    %48 = vector.shape_cast %45 : vector<8x32xf32> to vector<1x8x32xf32>
    tpu.vector_store %arg5[%c0_21, %c0_22, %c0_23], %48 {strides = array<i32>} : memref<8x8x32xf32, #tpu.memory_space<vmem>>, vector<1x8x32xf32>,
    %c7 = arith.constant 7 : index
    %c0_24 = arith.constant 0 : index
    %c0_25 = arith.constant 0 : index
    %49 = vector.load %arg2[%c7, %c0_24, %c0_25] : memref<8x8x128xbf16, #tpu.memory_space<vmem>>, vector<1x8x128xbf16>
    %50 = vector.shape_cast %49 : vector<1x8x128xbf16> to vector<8x128xbf16>
    %51 = arith.extf %50 : vector<8x128xbf16> to vector<8x128xf32>
    %52 = arith.truncf %12 : vector<8x32xf32> to vector<8x32xbf16>
    %cst_26 = arith.constant dense<0.000000e+00> : vector<8x128xf32>
    %53 = tpu.matmul %52, %6, %cst_26 {dimension_numbers = #tpu.dot_dimension_numbers<[1], [0], [0], [1], [0, 0, 1, 1], [], []>} : vector<8x32xbf16>, vector<32x128xbf16>, vector<8x128xf32> -> vector<8x128xf32>
    %54 = arith.addf %51, %53 : vector<8x128xf32>
    %55 = vector.extract_strided_slice %54 {offsets = [0, 0], sizes = [8, 32], strides = [1, 1]} : vector<8x128xf32> to vector<8x32xf32>
    %56 = arith.negf %55 : vector<8x32xf32>
    %57 = math.exp %56 : vector<8x32xf32>
    %cst_27 = arith.constant 1.000000e+00 : f32
    %58 = vector.broadcast %cst_27 : f32 to vector<8x32xf32>
    %59 = arith.addf %58, %57 : vector<8x32xf32>
    %60 = arith.divf %58, %59 : vector<8x32xf32>
    %61 = vector.extract_strided_slice %54 {offsets = [0, 32], sizes = [8, 32], strides = [1, 1]} : vector<8x128xf32> to vector<8x32xf32>
    %62 = arith.negf %61 : vector<8x32xf32>
    %63 = math.exp %62 : vector<8x32xf32>
    %cst_28 = arith.constant 1.000000e+00 : f32
    %64 = vector.broadcast %cst_28 : f32 to vector<8x32xf32>
    %65 = arith.addf %64, %63 : vector<8x32xf32>
    %66 = arith.divf %64, %65 : vector<8x32xf32>
    %67 = vector.extract_strided_slice %54 {offsets = [0, 64], sizes = [8, 32], strides = [1, 1]} : vector<8x128xf32> to vector<8x32xf32>
    %68 = math.tanh %67 : vector<8x32xf32>
    %69 = vector.extract_strided_slice %54 {offsets = [0, 96], sizes = [8, 32], strides = [1, 1]} : vector<8x128xf32> to vector<8x32xf32>
    %70 = arith.negf %69 : vector<8x32xf32>
    %71 = math.exp %70 : vector<8x32xf32>
    %cst_29 = arith.constant 1.000000e+00 : f32
    %72 = vector.broadcast %cst_29 : f32 to vector<8x32xf32>
    %73 = arith.addf %72, %71 : vector<8x32xf32>
    %74 = arith.divf %72, %73 : vector<8x32xf32>
    %75 = arith.mulf %66, %14 : vector<8x32xf32>
    %76 = arith.mulf %60, %68 : vector<8x32xf32>
    %77 = arith.addf %75, %76 : vector<8x32xf32>
    %78 = math.tanh %77 : vector<8x32xf32>
    %79 = arith.mulf %74, %78 : vector<8x32xf32>
    %c7_30 = arith.constant 7 : index
    %c0_31 = arith.constant 0 : index
    %c0_32 = arith.constant 0 : index
    %80 = vector.load %arg6[%c7_30, %c0_31, %c0_32] : memref<8x8x32xf32, #tpu.memory_space<vmem>>, vector<1x8x32xf32>
    %81 = vector.shape_cast %80 : vector<1x8x32xf32> to vector<8x32xf32>
    %82 = vector.shape_cast %79 : vector<8x32xf32> to vector<1x8x32xf32>
    tpu.vector_store %arg6[%c7_30, %c0_31, %c0_32], %82 {strides = array<i32>} : memref<8x8x32xf32, #tpu.memory_space<vmem>>, vector<1x8x32xf32>,
    %c1_33 = arith.constant 1 : index
    %c0_34 = arith.constant 0 : index
    %c0_35 = arith.constant 0 : index
    %83 = vector.load %arg1[%c1_33, %c0_34, %c0_35] : memref<8x8x128xbf16, #tpu.memory_space<vmem>>, vector<1x8x128xbf16>
    %84 = vector.shape_cast %83 : vector<1x8x128xbf16> to vector<8x128xbf16>
    %85 = arith.extf %84 : vector<8x128xbf16> to vector<8x128xf32>
    %86 = arith.truncf %45 : vector<8x32xf32> to vector<8x32xbf16>
    %cst_36 = arith.constant dense<0.000000e+00> : vector<8x128xf32>
    %87 = tpu.matmul %86, %4, %cst_36 {dimension_numbers = #tpu.dot_dimension_numbers<[1], [0], [0], [1], [0, 0, 1, 1], [], []>} : vector<8x32xbf16>, vector<32x128xbf16>, vector<8x128xf32> -> vector<8x128xf32>
    %88 = arith.addf %85, %87 : vector<8x128xf32>
    %89 = vector.extract_strided_slice %88 {offsets = [0, 0], sizes = [8, 32], strides = [1, 1]} : vector<8x128xf32> to vector<8x32xf32>
    %90 = arith.negf %89 : vector<8x32xf32>
    %91 = math.exp %90 : vector<8x32xf32>
    %cst_37 = arith.constant 1.000000e+00 : f32
    %92 = vector.broadcast %cst_37 : f32 to vector<8x32xf32>
    %93 = arith.addf %92, %91 : vector<8x32xf32>
    %94 = arith.divf %92, %93 : vector<8x32xf32>
    %95 = vector.extract_strided_slice %88 {offsets = [0, 32], sizes = [8, 32], strides = [1, 1]} : vector<8x128xf32> to vector<8x32xf32>
    %96 = arith.negf %95 : vector<8x32xf32>
    %97 = math.exp %96 : vector<8x32xf32>
    %cst_38 = arith.constant 1.000000e+00 : f32
    %98 = vector.broadcast %cst_38 : f32 to vector<8x32xf32>
    %99 = arith.addf %98, %97 : vector<8x32xf32>
    %100 = arith.divf %98, %99 : vector<8x32xf32>
    %101 = vector.extract_strided_slice %88 {offsets = [0, 64], sizes = [8, 32], strides = [1, 1]} : vector<8x128xf32> to vector<8x32xf32>
    %102 = math.tanh %101 : vector<8x32xf32>
    %103 = vector.extract_strided_slice %88 {offsets = [0, 96], sizes = [8, 32], strides = [1, 1]} : vector<8x128xf32> to vector<8x32xf32>
    %104 = arith.negf %103 : vector<8x32xf32>
    %105 = math.exp %104 : vector<8x32xf32>
    %cst_39 = arith.constant 1.000000e+00 : f32
    %106 = vector.broadcast %cst_39 : f32 to vector<8x32xf32>
    %107 = arith.addf %106, %105 : vector<8x32xf32>
    %108 = arith.divf %106, %107 : vector<8x32xf32>
    %109 = arith.mulf %100, %43 : vector<8x32xf32>
    %110 = arith.mulf %94, %102 : vector<8x32xf32>
    %111 = arith.addf %109, %110 : vector<8x32xf32>
    %112 = math.tanh %111 : vector<8x32xf32>
    %113 = arith.mulf %108, %112 : vector<8x32xf32>
    %c1_40 = arith.constant 1 : index
    %c0_41 = arith.constant 0 : index
    %c0_42 = arith.constant 0 : index
    %114 = vector.load %arg5[%c1_40, %c0_41, %c0_42] : memref<8x8x32xf32, #tpu.memory_space<vmem>>, vector<1x8x32xf32>
    %115 = vector.shape_cast %114 : vector<1x8x32xf32> to vector<8x32xf32>
    %116 = vector.shape_cast %113 : vector<8x32xf32> to vector<1x8x32xf32>
    tpu.vector_store %arg5[%c1_40, %c0_41, %c0_42], %116 {strides = array<i32>} : memref<8x8x32xf32, #tpu.memory_space<vmem>>, vector<1x8x32xf32>,
    %c6 = arith.constant 6 : index
    %c0_43 = arith.constant 0 : index
    %c0_44 = arith.constant 0 : index
    %117 = vector.load %arg2[%c6, %c0_43, %c0_44] : memref<8x8x128xbf16, #tpu.memory_space<vmem>>, vector<1x8x128xbf16>
    %118 = vector.shape_cast %117 : vector<1x8x128xbf16> to vector<8x128xbf16>
    %119 = arith.extf %118 : vector<8x128xbf16> to vector<8x128xf32>
    %120 = arith.truncf %79 : vector<8x32xf32> to vector<8x32xbf16>
    %cst_45 = arith.constant dense<0.000000e+00> : vector<8x128xf32>
    %121 = tpu.matmul %120, %6, %cst_45 {dimension_numbers = #tpu.dot_dimension_numbers<[1], [0], [0], [1], [0, 0, 1, 1], [], []>} : vector<8x32xbf16>, vector<32x128xbf16>, vector<8x128xf32> -> vector<8x128xf32>
    %122 = arith.addf %119, %121 : vector<8x128xf32>
    %123 = vector.extract_strided_slice %122 {offsets = [0, 0], sizes = [8, 32], strides = [1, 1]} : vector<8x128xf32> to vector<8x32xf32>
    %124 = arith.negf %123 : vector<8x32xf32>
    %125 = math.exp %124 : vector<8x32xf32>
    %cst_46 = arith.constant 1.000000e+00 : f32
    %126 = vector.broadcast %cst_46 : f32 to vector<8x32xf32>
    %127 = arith.addf %126, %125 : vector<8x32xf32>
    %128 = arith.divf %126, %127 : vector<8x32xf32>
    %129 = vector.extract_strided_slice %122 {offsets = [0, 32], sizes = [8, 32], strides = [1, 1]} : vector<8x128xf32> to vector<8x32xf32>
    %130 = arith.negf %129 : vector<8x32xf32>
    %131 = math.exp %130 : vector<8x32xf32>
    %cst_47 = arith.constant 1.000000e+00 : f32
    %132 = vector.broadcast %cst_47 : f32 to vector<8x32xf32>
    %133 = arith.addf %132, %131 : vector<8x32xf32>
    %134 = arith.divf %132, %133 : vector<8x32xf32>
    %135 = vector.extract_strided_slice %122 {offsets = [0, 64], sizes = [8, 32], strides = [1, 1]} : vector<8x128xf32> to vector<8x32xf32>
    %136 = math.tanh %135 : vector<8x32xf32>
    %137 = vector.extract_strided_slice %122 {offsets = [0, 96], sizes = [8, 32], strides = [1, 1]} : vector<8x128xf32> to vector<8x32xf32>
    %138 = arith.negf %137 : vector<8x32xf32>
    %139 = math.exp %138 : vector<8x32xf32>
    %cst_48 = arith.constant 1.000000e+00 : f32
    %140 = vector.broadcast %cst_48 : f32 to vector<8x32xf32>
    %141 = arith.addf %140, %139 : vector<8x32xf32>
    %142 = arith.divf %140, %141 : vector<8x32xf32>
    %143 = arith.mulf %134, %77 : vector<8x32xf32>
    %144 = arith.mulf %128, %136 : vector<8x32xf32>
    %145 = arith.addf %143, %144 : vector<8x32xf32>
    %146 = math.tanh %145 : vector<8x32xf32>
    %147 = arith.mulf %142, %146 : vector<8x32xf32>
    %c6_49 = arith.constant 6 : index
    %c0_50 = arith.constant 0 : index
    %c0_51 = arith.constant 0 : index
    %148 = vector.load %arg6[%c6_49, %c0_50, %c0_51] : memref<8x8x32xf32, #tpu.memory_space<vmem>>, vector<1x8x32xf32>
    %149 = vector.shape_cast %148 : vector<1x8x32xf32> to vector<8x32xf32>
    %150 = vector.shape_cast %147 : vector<8x32xf32> to vector<1x8x32xf32>
    tpu.vector_store %arg6[%c6_49, %c0_50, %c0_51], %150 {strides = array<i32>} : memref<8x8x32xf32, #tpu.memory_space<vmem>>, vector<1x8x32xf32>,
    %c2 = arith.constant 2 : index
    %c0_52 = arith.constant 0 : index
    %c0_53 = arith.constant 0 : index
    %151 = vector.load %arg1[%c2, %c0_52, %c0_53] : memref<8x8x128xbf16, #tpu.memory_space<vmem>>, vector<1x8x128xbf16>
    %152 = vector.shape_cast %151 : vector<1x8x128xbf16> to vector<8x128xbf16>
    %153 = arith.extf %152 : vector<8x128xbf16> to vector<8x128xf32>
    %154 = arith.truncf %113 : vector<8x32xf32> to vector<8x32xbf16>
    %cst_54 = arith.constant dense<0.000000e+00> : vector<8x128xf32>
    %155 = tpu.matmul %154, %4, %cst_54 {dimension_numbers = #tpu.dot_dimension_numbers<[1], [0], [0], [1], [0, 0, 1, 1], [], []>} : vector<8x32xbf16>, vector<32x128xbf16>, vector<8x128xf32> -> vector<8x128xf32>
    %156 = arith.addf %153, %155 : vector<8x128xf32>
    %157 = vector.extract_strided_slice %156 {offsets = [0, 0], sizes = [8, 32], strides = [1, 1]} : vector<8x128xf32> to vector<8x32xf32>
    %158 = arith.negf %157 : vector<8x32xf32>
    %159 = math.exp %158 : vector<8x32xf32>
    %cst_55 = arith.constant 1.000000e+00 : f32
    %160 = vector.broadcast %cst_55 : f32 to vector<8x32xf32>
    %161 = arith.addf %160, %159 : vector<8x32xf32>
    %162 = arith.divf %160, %161 : vector<8x32xf32>
    %163 = vector.extract_strided_slice %156 {offsets = [0, 32], sizes = [8, 32], strides = [1, 1]} : vector<8x128xf32> to vector<8x32xf32>
    %164 = arith.negf %163 : vector<8x32xf32>
    %165 = math.exp %164 : vector<8x32xf32>
    %cst_56 = arith.constant 1.000000e+00 : f32
    %166 = vector.broadcast %cst_56 : f32 to vector<8x32xf32>
    %167 = arith.addf %166, %165 : vector<8x32xf32>
    %168 = arith.divf %166, %167 : vector<8x32xf32>
    %169 = vector.extract_strided_slice %156 {offsets = [0, 64], sizes = [8, 32], strides = [1, 1]} : vector<8x128xf32> to vector<8x32xf32>
    %170 = math.tanh %169 : vector<8x32xf32>
    %171 = vector.extract_strided_slice %156 {offsets = [0, 96], sizes = [8, 32], strides = [1, 1]} : vector<8x128xf32> to vector<8x32xf32>
    %172 = arith.negf %171 : vector<8x32xf32>
    %173 = math.exp %172 : vector<8x32xf32>
    %cst_57 = arith.constant 1.000000e+00 : f32
    %174 = vector.broadcast %cst_57 : f32 to vector<8x32xf32>
    %175 = arith.addf %174, %173 : vector<8x32xf32>
    %176 = arith.divf %174, %175 : vector<8x32xf32>
    %177 = arith.mulf %168, %111 : vector<8x32xf32>
    %178 = arith.mulf %162, %170 : vector<8x32xf32>
    %179 = arith.addf %177, %178 : vector<8x32xf32>
    %180 = math.tanh %179 : vector<8x32xf32>
    %181 = arith.mulf %176, %180 : vector<8x32xf32>
    %c2_58 = arith.constant 2 : index
    %c0_59 = arith.constant 0 : index
    %c0_60 = arith.constant 0 : index
    %182 = vector.load %arg5[%c2_58, %c0_59, %c0_60] : memref<8x8x32xf32, #tpu.memory_space<vmem>>, vector<1x8x32xf32>
    %183 = vector.shape_cast %182 : vector<1x8x32xf32> to vector<8x32xf32>
    %184 = vector.shape_cast %181 : vector<8x32xf32> to vector<1x8x32xf32>
    tpu.vector_store %arg5[%c2_58, %c0_59, %c0_60], %184 {strides = array<i32>} : memref<8x8x32xf32, #tpu.memory_space<vmem>>, vector<1x8x32xf32>,
    %c5 = arith.constant 5 : index
    %c0_61 = arith.constant 0 : index
    %c0_62 = arith.constant 0 : index
    %185 = vector.load %arg2[%c5, %c0_61, %c0_62] : memref<8x8x128xbf16, #tpu.memory_space<vmem>>, vector<1x8x128xbf16>
    %186 = vector.shape_cast %185 : vector<1x8x128xbf16> to vector<8x128xbf16>
    %187 = arith.extf %186 : vector<8x128xbf16> to vector<8x128xf32>
    %188 = arith.truncf %147 : vector<8x32xf32> to vector<8x32xbf16>
    %cst_63 = arith.constant dense<0.000000e+00> : vector<8x128xf32>
    %189 = tpu.matmul %188, %6, %cst_63 {dimension_numbers = #tpu.dot_dimension_numbers<[1], [0], [0], [1], [0, 0, 1, 1], [], []>} : vector<8x32xbf16>, vector<32x128xbf16>, vector<8x128xf32> -> vector<8x128xf32>
    %190 = arith.addf %187, %189 : vector<8x128xf32>
    %191 = vector.extract_strided_slice %190 {offsets = [0, 0], sizes = [8, 32], strides = [1, 1]} : vector<8x128xf32> to vector<8x32xf32>
    %192 = arith.negf %191 : vector<8x32xf32>
    %193 = math.exp %192 : vector<8x32xf32>
    %cst_64 = arith.constant 1.000000e+00 : f32
    %194 = vector.broadcast %cst_64 : f32 to vector<8x32xf32>
    %195 = arith.addf %194, %193 : vector<8x32xf32>
    %196 = arith.divf %194, %195 : vector<8x32xf32>
    %197 = vector.extract_strided_slice %190 {offsets = [0, 32], sizes = [8, 32], strides = [1, 1]} : vector<8x128xf32> to vector<8x32xf32>
    %198 = arith.negf %197 : vector<8x32xf32>
    %199 = math.exp %198 : vector<8x32xf32>
    %cst_65 = arith.constant 1.000000e+00 : f32
    %200 = vector.broadcast %cst_65 : f32 to vector<8x32xf32>
    %201 = arith.addf %200, %199 : vector<8x32xf32>
    %202 = arith.divf %200, %201 : vector<8x32xf32>
    %203 = vector.extract_strided_slice %190 {offsets = [0, 64], sizes = [8, 32], strides = [1, 1]} : vector<8x128xf32> to vector<8x32xf32>
    %204 = math.tanh %203 : vector<8x32xf32>
    %205 = vector.extract_strided_slice %190 {offsets = [0, 96], sizes = [8, 32], strides = [1, 1]} : vector<8x128xf32> to vector<8x32xf32>
    %206 = arith.negf %205 : vector<8x32xf32>
    %207 = math.exp %206 : vector<8x32xf32>
    %cst_66 = arith.constant 1.000000e+00 : f32
    %208 = vector.broadcast %cst_66 : f32 to vector<8x32xf32>
    %209 = arith.addf %208, %207 : vector<8x32xf32>
    %210 = arith.divf %208, %209 : vector<8x32xf32>
    %211 = arith.mulf %202, %145 : vector<8x32xf32>
    %212 = arith.mulf %196, %204 : vector<8x32xf32>
    %213 = arith.addf %211, %212 : vector<8x32xf32>
    %214 = math.tanh %213 : vector<8x32xf32>
    %215 = arith.mulf %210, %214 : vector<8x32xf32>
    %c5_67 = arith.constant 5 : index
    %c0_68 = arith.constant 0 : index
    %c0_69 = arith.constant 0 : index
    %216 = vector.load %arg6[%c5_67, %c0_68, %c0_69] : memref<8x8x32xf32, #tpu.memory_space<vmem>>, vector<1x8x32xf32>
    %217 = vector.shape_cast %216 : vector<1x8x32xf32> to vector<8x32xf32>
    %218 = vector.shape_cast %215 : vector<8x32xf32> to vector<1x8x32xf32>
    tpu.vector_store %arg6[%c5_67, %c0_68, %c0_69], %218 {strides = array<i32>} : memref<8x8x32xf32, #tpu.memory_space<vmem>>, vector<1x8x32xf32>,
    %c3 = arith.constant 3 : index
    %c0_70 = arith.constant 0 : index
    %c0_71 = arith.constant 0 : index
    %219 = vector.load %arg1[%c3, %c0_70, %c0_71] : memref<8x8x128xbf16, #tpu.memory_space<vmem>>, vector<1x8x128xbf16>
    %220 = vector.shape_cast %219 : vector<1x8x128xbf16> to vector<8x128xbf16>
    %221 = arith.extf %220 : vector<8x128xbf16> to vector<8x128xf32>
    %222 = arith.truncf %181 : vector<8x32xf32> to vector<8x32xbf16>
    %cst_72 = arith.constant dense<0.000000e+00> : vector<8x128xf32>
    %223 = tpu.matmul %222, %4, %cst_72 {dimension_numbers = #tpu.dot_dimension_numbers<[1], [0], [0], [1], [0, 0, 1, 1], [], []>} : vector<8x32xbf16>, vector<32x128xbf16>, vector<8x128xf32> -> vector<8x128xf32>
    %224 = arith.addf %221, %223 : vector<8x128xf32>
    %225 = vector.extract_strided_slice %224 {offsets = [0, 0], sizes = [8, 32], strides = [1, 1]} : vector<8x128xf32> to vector<8x32xf32>
    %226 = arith.negf %225 : vector<8x32xf32>
    %227 = math.exp %226 : vector<8x32xf32>
    %cst_73 = arith.constant 1.000000e+00 : f32
    %228 = vector.broadcast %cst_73 : f32 to vector<8x32xf32>
    %229 = arith.addf %228, %227 : vector<8x32xf32>
    %230 = arith.divf %228, %229 : vector<8x32xf32>
    %231 = vector.extract_strided_slice %224 {offsets = [0, 32], sizes = [8, 32], strides = [1, 1]} : vector<8x128xf32> to vector<8x32xf32>
    %232 = arith.negf %231 : vector<8x32xf32>
    %233 = math.exp %232 : vector<8x32xf32>
    %cst_74 = arith.constant 1.000000e+00 : f32
    %234 = vector.broadcast %cst_74 : f32 to vector<8x32xf32>
    %235 = arith.addf %234, %233 : vector<8x32xf32>
    %236 = arith.divf %234, %235 : vector<8x32xf32>
    %237 = vector.extract_strided_slice %224 {offsets = [0, 64], sizes = [8, 32], strides = [1, 1]} : vector<8x128xf32> to vector<8x32xf32>
    %238 = math.tanh %237 : vector<8x32xf32>
    %239 = vector.extract_strided_slice %224 {offsets = [0, 96], sizes = [8, 32], strides = [1, 1]} : vector<8x128xf32> to vector<8x32xf32>
    %240 = arith.negf %239 : vector<8x32xf32>
    %241 = math.exp %240 : vector<8x32xf32>
    %cst_75 = arith.constant 1.000000e+00 : f32
    %242 = vector.broadcast %cst_75 : f32 to vector<8x32xf32>
    %243 = arith.addf %242, %241 : vector<8x32xf32>
    %244 = arith.divf %242, %243 : vector<8x32xf32>
    %245 = arith.mulf %236, %179 : vector<8x32xf32>
    %246 = arith.mulf %230, %238 : vector<8x32xf32>
    %247 = arith.addf %245, %246 : vector<8x32xf32>
    %248 = math.tanh %247 : vector<8x32xf32>
    %249 = arith.mulf %244, %248 : vector<8x32xf32>
    %c3_76 = arith.constant 3 : index
    %c0_77 = arith.constant 0 : index
    %c0_78 = arith.constant 0 : index
    %250 = vector.load %arg5[%c3_76, %c0_77, %c0_78] : memref<8x8x32xf32, #tpu.memory_space<vmem>>, vector<1x8x32xf32>
    %251 = vector.shape_cast %250 : vector<1x8x32xf32> to vector<8x32xf32>
    %252 = vector.shape_cast %249 : vector<8x32xf32> to vector<1x8x32xf32>
    tpu.vector_store %arg5[%c3_76, %c0_77, %c0_78], %252 {strides = array<i32>} : memref<8x8x32xf32, #tpu.memory_space<vmem>>, vector<1x8x32xf32>,
    %c4 = arith.constant 4 : index
    %c0_79 = arith.constant 0 : index
    %c0_80 = arith.constant 0 : index
    %253 = vector.load %arg2[%c4, %c0_79, %c0_80] : memref<8x8x128xbf16, #tpu.memory_space<vmem>>, vector<1x8x128xbf16>
    %254 = vector.shape_cast %253 : vector<1x8x128xbf16> to vector<8x128xbf16>
    %255 = arith.extf %254 : vector<8x128xbf16> to vector<8x128xf32>
    %256 = arith.truncf %215 : vector<8x32xf32> to vector<8x32xbf16>
    %cst_81 = arith.constant dense<0.000000e+00> : vector<8x128xf32>
    %257 = tpu.matmul %256, %6, %cst_81 {dimension_numbers = #tpu.dot_dimension_numbers<[1], [0], [0], [1], [0, 0, 1, 1], [], []>} : vector<8x32xbf16>, vector<32x128xbf16>, vector<8x128xf32> -> vector<8x128xf32>
    %258 = arith.addf %255, %257 : vector<8x128xf32>
    %259 = vector.extract_strided_slice %258 {offsets = [0, 0], sizes = [8, 32], strides = [1, 1]} : vector<8x128xf32> to vector<8x32xf32>
    %260 = arith.negf %259 : vector<8x32xf32>
    %261 = math.exp %260 : vector<8x32xf32>
    %cst_82 = arith.constant 1.000000e+00 : f32
    %262 = vector.broadcast %cst_82 : f32 to vector<8x32xf32>
    %263 = arith.addf %262, %261 : vector<8x32xf32>
    %264 = arith.divf %262, %263 : vector<8x32xf32>
    %265 = vector.extract_strided_slice %258 {offsets = [0, 32], sizes = [8, 32], strides = [1, 1]} : vector<8x128xf32> to vector<8x32xf32>
    %266 = arith.negf %265 : vector<8x32xf32>
    %267 = math.exp %266 : vector<8x32xf32>
    %cst_83 = arith.constant 1.000000e+00 : f32
    %268 = vector.broadcast %cst_83 : f32 to vector<8x32xf32>
    %269 = arith.addf %268, %267 : vector<8x32xf32>
    %270 = arith.divf %268, %269 : vector<8x32xf32>
    %271 = vector.extract_strided_slice %258 {offsets = [0, 64], sizes = [8, 32], strides = [1, 1]} : vector<8x128xf32> to vector<8x32xf32>
    %272 = math.tanh %271 : vector<8x32xf32>
    %273 = vector.extract_strided_slice %258 {offsets = [0, 96], sizes = [8, 32], strides = [1, 1]} : vector<8x128xf32> to vector<8x32xf32>
    %274 = arith.negf %273 : vector<8x32xf32>
    %275 = math.exp %274 : vector<8x32xf32>
    %cst_84 = arith.constant 1.000000e+00 : f32
    %276 = vector.broadcast %cst_84 : f32 to vector<8x32xf32>
    %277 = arith.addf %276, %275 : vector<8x32xf32>
    %278 = arith.divf %276, %277 : vector<8x32xf32>
    %279 = arith.mulf %270, %213 : vector<8x32xf32>
    %280 = arith.mulf %264, %272 : vector<8x32xf32>
    %281 = arith.addf %279, %280 : vector<8x32xf32>
    %282 = math.tanh %281 : vector<8x32xf32>
    %283 = arith.mulf %278, %282 : vector<8x32xf32>
    %c4_85 = arith.constant 4 : index
    %c0_86 = arith.constant 0 : index
    %c0_87 = arith.constant 0 : index
    %284 = vector.load %arg6[%c4_85, %c0_86, %c0_87] : memref<8x8x32xf32, #tpu.memory_space<vmem>>, vector<1x8x32xf32>
    %285 = vector.shape_cast %284 : vector<1x8x32xf32> to vector<8x32xf32>
    %286 = vector.shape_cast %283 : vector<8x32xf32> to vector<1x8x32xf32>
    tpu.vector_store %arg6[%c4_85, %c0_86, %c0_87], %286 {strides = array<i32>} : memref<8x8x32xf32, #tpu.memory_space<vmem>>, vector<1x8x32xf32>,
    %c4_88 = arith.constant 4 : index
    %c0_89 = arith.constant 0 : index
    %c0_90 = arith.constant 0 : index
    %287 = vector.load %arg1[%c4_88, %c0_89, %c0_90] : memref<8x8x128xbf16, #tpu.memory_space<vmem>>, vector<1x8x128xbf16>
    %288 = vector.shape_cast %287 : vector<1x8x128xbf16> to vector<8x128xbf16>
    %289 = arith.extf %288 : vector<8x128xbf16> to vector<8x128xf32>
    %290 = arith.truncf %249 : vector<8x32xf32> to vector<8x32xbf16>
    %cst_91 = arith.constant dense<0.000000e+00> : vector<8x128xf32>
    %291 = tpu.matmul %290, %4, %cst_91 {dimension_numbers = #tpu.dot_dimension_numbers<[1], [0], [0], [1], [0, 0, 1, 1], [], []>} : vector<8x32xbf16>, vector<32x128xbf16>, vector<8x128xf32> -> vector<8x128xf32>
    %292 = arith.addf %289, %291 : vector<8x128xf32>
    %293 = vector.extract_strided_slice %292 {offsets = [0, 0], sizes = [8, 32], strides = [1, 1]} : vector<8x128xf32> to vector<8x32xf32>
    %294 = arith.negf %293 : vector<8x32xf32>
    %295 = math.exp %294 : vector<8x32xf32>
    %cst_92 = arith.constant 1.000000e+00 : f32
    %296 = vector.broadcast %cst_92 : f32 to vector<8x32xf32>
    %297 = arith.addf %296, %295 : vector<8x32xf32>
    %298 = arith.divf %296, %297 : vector<8x32xf32>
    %299 = vector.extract_strided_slice %292 {offsets = [0, 32], sizes = [8, 32], strides = [1, 1]} : vector<8x128xf32> to vector<8x32xf32>
    %300 = arith.negf %299 : vector<8x32xf32>
    %301 = math.exp %300 : vector<8x32xf32>
    %cst_93 = arith.constant 1.000000e+00 : f32
    %302 = vector.broadcast %cst_93 : f32 to vector<8x32xf32>
    %303 = arith.addf %302, %301 : vector<8x32xf32>
    %304 = arith.divf %302, %303 : vector<8x32xf32>
    %305 = vector.extract_strided_slice %292 {offsets = [0, 64], sizes = [8, 32], strides = [1, 1]} : vector<8x128xf32> to vector<8x32xf32>
    %306 = math.tanh %305 : vector<8x32xf32>
    %307 = vector.extract_strided_slice %292 {offsets = [0, 96], sizes = [8, 32], strides = [1, 1]} : vector<8x128xf32> to vector<8x32xf32>
    %308 = arith.negf %307 : vector<8x32xf32>
    %309 = math.exp %308 : vector<8x32xf32>
    %cst_94 = arith.constant 1.000000e+00 : f32
    %310 = vector.broadcast %cst_94 : f32 to vector<8x32xf32>
    %311 = arith.addf %310, %309 : vector<8x32xf32>
    %312 = arith.divf %310, %311 : vector<8x32xf32>
    %313 = arith.mulf %304, %247 : vector<8x32xf32>
    %314 = arith.mulf %298, %306 : vector<8x32xf32>
    %315 = arith.addf %313, %314 : vector<8x32xf32>
    %316 = math.tanh %315 : vector<8x32xf32>
    %317 = arith.mulf %312, %316 : vector<8x32xf32>
    %c4_95 = arith.constant 4 : index
    %c0_96 = arith.constant 0 : index
    %c0_97 = arith.constant 0 : index
    %318 = vector.load %arg5[%c4_95, %c0_96, %c0_97] : memref<8x8x32xf32, #tpu.memory_space<vmem>>, vector<1x8x32xf32>
    %319 = vector.shape_cast %318 : vector<1x8x32xf32> to vector<8x32xf32>
    %320 = vector.shape_cast %317 : vector<8x32xf32> to vector<1x8x32xf32>
    tpu.vector_store %arg5[%c4_95, %c0_96, %c0_97], %320 {strides = array<i32>} : memref<8x8x32xf32, #tpu.memory_space<vmem>>, vector<1x8x32xf32>,
    %c3_98 = arith.constant 3 : index
    %c0_99 = arith.constant 0 : index
    %c0_100 = arith.constant 0 : index
    %321 = vector.load %arg2[%c3_98, %c0_99, %c0_100] : memref<8x8x128xbf16, #tpu.memory_space<vmem>>, vector<1x8x128xbf16>
    %322 = vector.shape_cast %321 : vector<1x8x128xbf16> to vector<8x128xbf16>
    %323 = arith.extf %322 : vector<8x128xbf16> to vector<8x128xf32>
    %324 = arith.truncf %283 : vector<8x32xf32> to vector<8x32xbf16>
    %cst_101 = arith.constant dense<0.000000e+00> : vector<8x128xf32>
    %325 = tpu.matmul %324, %6, %cst_101 {dimension_numbers = #tpu.dot_dimension_numbers<[1], [0], [0], [1], [0, 0, 1, 1], [], []>} : vector<8x32xbf16>, vector<32x128xbf16>, vector<8x128xf32> -> vector<8x128xf32>
    %326 = arith.addf %323, %325 : vector<8x128xf32>
    %327 = vector.extract_strided_slice %326 {offsets = [0, 0], sizes = [8, 32], strides = [1, 1]} : vector<8x128xf32> to vector<8x32xf32>
    %328 = arith.negf %327 : vector<8x32xf32>
    %329 = math.exp %328 : vector<8x32xf32>
    %cst_102 = arith.constant 1.000000e+00 : f32
    %330 = vector.broadcast %cst_102 : f32 to vector<8x32xf32>
    %331 = arith.addf %330, %329 : vector<8x32xf32>
    %332 = arith.divf %330, %331 : vector<8x32xf32>
    %333 = vector.extract_strided_slice %326 {offsets = [0, 32], sizes = [8, 32], strides = [1, 1]} : vector<8x128xf32> to vector<8x32xf32>
    %334 = arith.negf %333 : vector<8x32xf32>
    %335 = math.exp %334 : vector<8x32xf32>
    %cst_103 = arith.constant 1.000000e+00 : f32
    %336 = vector.broadcast %cst_103 : f32 to vector<8x32xf32>
    %337 = arith.addf %336, %335 : vector<8x32xf32>
    %338 = arith.divf %336, %337 : vector<8x32xf32>
    %339 = vector.extract_strided_slice %326 {offsets = [0, 64], sizes = [8, 32], strides = [1, 1]} : vector<8x128xf32> to vector<8x32xf32>
    %340 = math.tanh %339 : vector<8x32xf32>
    %341 = vector.extract_strided_slice %326 {offsets = [0, 96], sizes = [8, 32], strides = [1, 1]} : vector<8x128xf32> to vector<8x32xf32>
    %342 = arith.negf %341 : vector<8x32xf32>
    %343 = math.exp %342 : vector<8x32xf32>
    %cst_104 = arith.constant 1.000000e+00 : f32
    %344 = vector.broadcast %cst_104 : f32 to vector<8x32xf32>
    %345 = arith.addf %344, %343 : vector<8x32xf32>
    %346 = arith.divf %344, %345 : vector<8x32xf32>
    %347 = arith.mulf %338, %281 : vector<8x32xf32>
    %348 = arith.mulf %332, %340 : vector<8x32xf32>
    %349 = arith.addf %347, %348 : vector<8x32xf32>
    %350 = math.tanh %349 : vector<8x32xf32>
    %351 = arith.mulf %346, %350 : vector<8x32xf32>
    %c3_105 = arith.constant 3 : index
    %c0_106 = arith.constant 0 : index
    %c0_107 = arith.constant 0 : index
    %352 = vector.load %arg6[%c3_105, %c0_106, %c0_107] : memref<8x8x32xf32, #tpu.memory_space<vmem>>, vector<1x8x32xf32>
    %353 = vector.shape_cast %352 : vector<1x8x32xf32> to vector<8x32xf32>
    %354 = vector.shape_cast %351 : vector<8x32xf32> to vector<1x8x32xf32>
    tpu.vector_store %arg6[%c3_105, %c0_106, %c0_107], %354 {strides = array<i32>} : memref<8x8x32xf32, #tpu.memory_space<vmem>>, vector<1x8x32xf32>,
    %c5_108 = arith.constant 5 : index
    %c0_109 = arith.constant 0 : index
    %c0_110 = arith.constant 0 : index
    %355 = vector.load %arg1[%c5_108, %c0_109, %c0_110] : memref<8x8x128xbf16, #tpu.memory_space<vmem>>, vector<1x8x128xbf16>
    %356 = vector.shape_cast %355 : vector<1x8x128xbf16> to vector<8x128xbf16>
    %357 = arith.extf %356 : vector<8x128xbf16> to vector<8x128xf32>
    %358 = arith.truncf %317 : vector<8x32xf32> to vector<8x32xbf16>
    %cst_111 = arith.constant dense<0.000000e+00> : vector<8x128xf32>
    %359 = tpu.matmul %358, %4, %cst_111 {dimension_numbers = #tpu.dot_dimension_numbers<[1], [0], [0], [1], [0, 0, 1, 1], [], []>} : vector<8x32xbf16>, vector<32x128xbf16>, vector<8x128xf32> -> vector<8x128xf32>
    %360 = arith.addf %357, %359 : vector<8x128xf32>
    %361 = vector.extract_strided_slice %360 {offsets = [0, 0], sizes = [8, 32], strides = [1, 1]} : vector<8x128xf32> to vector<8x32xf32>
    %362 = arith.negf %361 : vector<8x32xf32>
    %363 = math.exp %362 : vector<8x32xf32>
    %cst_112 = arith.constant 1.000000e+00 : f32
    %364 = vector.broadcast %cst_112 : f32 to vector<8x32xf32>
    %365 = arith.addf %364, %363 : vector<8x32xf32>
    %366 = arith.divf %364, %365 : vector<8x32xf32>
    %367 = vector.extract_strided_slice %360 {offsets = [0, 32], sizes = [8, 32], strides = [1, 1]} : vector<8x128xf32> to vector<8x32xf32>
    %368 = arith.negf %367 : vector<8x32xf32>
    %369 = math.exp %368 : vector<8x32xf32>
    %cst_113 = arith.constant 1.000000e+00 : f32
    %370 = vector.broadcast %cst_113 : f32 to vector<8x32xf32>
    %371 = arith.addf %370, %369 : vector<8x32xf32>
    %372 = arith.divf %370, %371 : vector<8x32xf32>
    %373 = vector.extract_strided_slice %360 {offsets = [0, 64], sizes = [8, 32], strides = [1, 1]} : vector<8x128xf32> to vector<8x32xf32>
    %374 = math.tanh %373 : vector<8x32xf32>
    %375 = vector.extract_strided_slice %360 {offsets = [0, 96], sizes = [8, 32], strides = [1, 1]} : vector<8x128xf32> to vector<8x32xf32>
    %376 = arith.negf %375 : vector<8x32xf32>
    %377 = math.exp %376 : vector<8x32xf32>
    %cst_114 = arith.constant 1.000000e+00 : f32
    %378 = vector.broadcast %cst_114 : f32 to vector<8x32xf32>
    %379 = arith.addf %378, %377 : vector<8x32xf32>
    %380 = arith.divf %378, %379 : vector<8x32xf32>
    %381 = arith.mulf %372, %315 : vector<8x32xf32>
    %382 = arith.mulf %366, %374 : vector<8x32xf32>
    %383 = arith.addf %381, %382 : vector<8x32xf32>
    %384 = math.tanh %383 : vector<8x32xf32>
    %385 = arith.mulf %380, %384 : vector<8x32xf32>
    %c5_115 = arith.constant 5 : index
    %c0_116 = arith.constant 0 : index
    %c0_117 = arith.constant 0 : index
    %386 = vector.load %arg5[%c5_115, %c0_116, %c0_117] : memref<8x8x32xf32, #tpu.memory_space<vmem>>, vector<1x8x32xf32>
    %387 = vector.shape_cast %386 : vector<1x8x32xf32> to vector<8x32xf32>
    %388 = vector.shape_cast %385 : vector<8x32xf32> to vector<1x8x32xf32>
    tpu.vector_store %arg5[%c5_115, %c0_116, %c0_117], %388 {strides = array<i32>} : memref<8x8x32xf32, #tpu.memory_space<vmem>>, vector<1x8x32xf32>,
    %c2_118 = arith.constant 2 : index
    %c0_119 = arith.constant 0 : index
    %c0_120 = arith.constant 0 : index
    %389 = vector.load %arg2[%c2_118, %c0_119, %c0_120] : memref<8x8x128xbf16, #tpu.memory_space<vmem>>, vector<1x8x128xbf16>
    %390 = vector.shape_cast %389 : vector<1x8x128xbf16> to vector<8x128xbf16>
    %391 = arith.extf %390 : vector<8x128xbf16> to vector<8x128xf32>
    %392 = arith.truncf %351 : vector<8x32xf32> to vector<8x32xbf16>
    %cst_121 = arith.constant dense<0.000000e+00> : vector<8x128xf32>
    %393 = tpu.matmul %392, %6, %cst_121 {dimension_numbers = #tpu.dot_dimension_numbers<[1], [0], [0], [1], [0, 0, 1, 1], [], []>} : vector<8x32xbf16>, vector<32x128xbf16>, vector<8x128xf32> -> vector<8x128xf32>
    %394 = arith.addf %391, %393 : vector<8x128xf32>
    %395 = vector.extract_strided_slice %394 {offsets = [0, 0], sizes = [8, 32], strides = [1, 1]} : vector<8x128xf32> to vector<8x32xf32>
    %396 = arith.negf %395 : vector<8x32xf32>
    %397 = math.exp %396 : vector<8x32xf32>
    %cst_122 = arith.constant 1.000000e+00 : f32
    %398 = vector.broadcast %cst_122 : f32 to vector<8x32xf32>
    %399 = arith.addf %398, %397 : vector<8x32xf32>
    %400 = arith.divf %398, %399 : vector<8x32xf32>
    %401 = vector.extract_strided_slice %394 {offsets = [0, 32], sizes = [8, 32], strides = [1, 1]} : vector<8x128xf32> to vector<8x32xf32>
    %402 = arith.negf %401 : vector<8x32xf32>
    %403 = math.exp %402 : vector<8x32xf32>
    %cst_123 = arith.constant 1.000000e+00 : f32
    %404 = vector.broadcast %cst_123 : f32 to vector<8x32xf32>
    %405 = arith.addf %404, %403 : vector<8x32xf32>
    %406 = arith.divf %404, %405 : vector<8x32xf32>
    %407 = vector.extract_strided_slice %394 {offsets = [0, 64], sizes = [8, 32], strides = [1, 1]} : vector<8x128xf32> to vector<8x32xf32>
    %408 = math.tanh %407 : vector<8x32xf32>
    %409 = vector.extract_strided_slice %394 {offsets = [0, 96], sizes = [8, 32], strides = [1, 1]} : vector<8x128xf32> to vector<8x32xf32>
    %410 = arith.negf %409 : vector<8x32xf32>
    %411 = math.exp %410 : vector<8x32xf32>
    %cst_124 = arith.constant 1.000000e+00 : f32
    %412 = vector.broadcast %cst_124 : f32 to vector<8x32xf32>
    %413 = arith.addf %412, %411 : vector<8x32xf32>
    %414 = arith.divf %412, %413 : vector<8x32xf32>
    %415 = arith.mulf %406, %349 : vector<8x32xf32>
    %416 = arith.mulf %400, %408 : vector<8x32xf32>
    %417 = arith.addf %415, %416 : vector<8x32xf32>
    %418 = math.tanh %417 : vector<8x32xf32>
    %419 = arith.mulf %414, %418 : vector<8x32xf32>
    %c2_125 = arith.constant 2 : index
    %c0_126 = arith.constant 0 : index
    %c0_127 = arith.constant 0 : index
    %420 = vector.load %arg6[%c2_125, %c0_126, %c0_127] : memref<8x8x32xf32, #tpu.memory_space<vmem>>, vector<1x8x32xf32>
    %421 = vector.shape_cast %420 : vector<1x8x32xf32> to vector<8x32xf32>
    %422 = vector.shape_cast %419 : vector<8x32xf32> to vector<1x8x32xf32>
    tpu.vector_store %arg6[%c2_125, %c0_126, %c0_127], %422 {strides = array<i32>} : memref<8x8x32xf32, #tpu.memory_space<vmem>>, vector<1x8x32xf32>,
    %c6_128 = arith.constant 6 : index
    %c0_129 = arith.constant 0 : index
    %c0_130 = arith.constant 0 : index
    %423 = vector.load %arg1[%c6_128, %c0_129, %c0_130] : memref<8x8x128xbf16, #tpu.memory_space<vmem>>, vector<1x8x128xbf16>
    %424 = vector.shape_cast %423 : vector<1x8x128xbf16> to vector<8x128xbf16>
    %425 = arith.extf %424 : vector<8x128xbf16> to vector<8x128xf32>
    %426 = arith.truncf %385 : vector<8x32xf32> to vector<8x32xbf16>
    %cst_131 = arith.constant dense<0.000000e+00> : vector<8x128xf32>
    %427 = tpu.matmul %426, %4, %cst_131 {dimension_numbers = #tpu.dot_dimension_numbers<[1], [0], [0], [1], [0, 0, 1, 1], [], []>} : vector<8x32xbf16>, vector<32x128xbf16>, vector<8x128xf32> -> vector<8x128xf32>
    %428 = arith.addf %425, %427 : vector<8x128xf32>
    %429 = vector.extract_strided_slice %428 {offsets = [0, 0], sizes = [8, 32], strides = [1, 1]} : vector<8x128xf32> to vector<8x32xf32>
    %430 = arith.negf %429 : vector<8x32xf32>
    %431 = math.exp %430 : vector<8x32xf32>
    %cst_132 = arith.constant 1.000000e+00 : f32
    %432 = vector.broadcast %cst_132 : f32 to vector<8x32xf32>
    %433 = arith.addf %432, %431 : vector<8x32xf32>
    %434 = arith.divf %432, %433 : vector<8x32xf32>
    %435 = vector.extract_strided_slice %428 {offsets = [0, 32], sizes = [8, 32], strides = [1, 1]} : vector<8x128xf32> to vector<8x32xf32>
    %436 = arith.negf %435 : vector<8x32xf32>
    %437 = math.exp %436 : vector<8x32xf32>
    %cst_133 = arith.constant 1.000000e+00 : f32
    %438 = vector.broadcast %cst_133 : f32 to vector<8x32xf32>
    %439 = arith.addf %438, %437 : vector<8x32xf32>
    %440 = arith.divf %438, %439 : vector<8x32xf32>
    %441 = vector.extract_strided_slice %428 {offsets = [0, 64], sizes = [8, 32], strides = [1, 1]} : vector<8x128xf32> to vector<8x32xf32>
    %442 = math.tanh %441 : vector<8x32xf32>
    %443 = vector.extract_strided_slice %428 {offsets = [0, 96], sizes = [8, 32], strides = [1, 1]} : vector<8x128xf32> to vector<8x32xf32>
    %444 = arith.negf %443 : vector<8x32xf32>
    %445 = math.exp %444 : vector<8x32xf32>
    %cst_134 = arith.constant 1.000000e+00 : f32
    %446 = vector.broadcast %cst_134 : f32 to vector<8x32xf32>
    %447 = arith.addf %446, %445 : vector<8x32xf32>
    %448 = arith.divf %446, %447 : vector<8x32xf32>
    %449 = arith.mulf %440, %383 : vector<8x32xf32>
    %450 = arith.mulf %434, %442 : vector<8x32xf32>
    %451 = arith.addf %449, %450 : vector<8x32xf32>
    %452 = math.tanh %451 : vector<8x32xf32>
    %453 = arith.mulf %448, %452 : vector<8x32xf32>
    %c6_135 = arith.constant 6 : index
    %c0_136 = arith.constant 0 : index
    %c0_137 = arith.constant 0 : index
    %454 = vector.load %arg5[%c6_135, %c0_136, %c0_137] : memref<8x8x32xf32, #tpu.memory_space<vmem>>, vector<1x8x32xf32>
    %455 = vector.shape_cast %454 : vector<1x8x32xf32> to vector<8x32xf32>
    %456 = vector.shape_cast %453 : vector<8x32xf32> to vector<1x8x32xf32>
    tpu.vector_store %arg5[%c6_135, %c0_136, %c0_137], %456 {strides = array<i32>} : memref<8x8x32xf32, #tpu.memory_space<vmem>>, vector<1x8x32xf32>,
    %c1_138 = arith.constant 1 : index
    %c0_139 = arith.constant 0 : index
    %c0_140 = arith.constant 0 : index
    %457 = vector.load %arg2[%c1_138, %c0_139, %c0_140] : memref<8x8x128xbf16, #tpu.memory_space<vmem>>, vector<1x8x128xbf16>
    %458 = vector.shape_cast %457 : vector<1x8x128xbf16> to vector<8x128xbf16>
    %459 = arith.extf %458 : vector<8x128xbf16> to vector<8x128xf32>
    %460 = arith.truncf %419 : vector<8x32xf32> to vector<8x32xbf16>
    %cst_141 = arith.constant dense<0.000000e+00> : vector<8x128xf32>
    %461 = tpu.matmul %460, %6, %cst_141 {dimension_numbers = #tpu.dot_dimension_numbers<[1], [0], [0], [1], [0, 0, 1, 1], [], []>} : vector<8x32xbf16>, vector<32x128xbf16>, vector<8x128xf32> -> vector<8x128xf32>
    %462 = arith.addf %459, %461 : vector<8x128xf32>
    %463 = vector.extract_strided_slice %462 {offsets = [0, 0], sizes = [8, 32], strides = [1, 1]} : vector<8x128xf32> to vector<8x32xf32>
    %464 = arith.negf %463 : vector<8x32xf32>
    %465 = math.exp %464 : vector<8x32xf32>
    %cst_142 = arith.constant 1.000000e+00 : f32
    %466 = vector.broadcast %cst_142 : f32 to vector<8x32xf32>
    %467 = arith.addf %466, %465 : vector<8x32xf32>
    %468 = arith.divf %466, %467 : vector<8x32xf32>
    %469 = vector.extract_strided_slice %462 {offsets = [0, 32], sizes = [8, 32], strides = [1, 1]} : vector<8x128xf32> to vector<8x32xf32>
    %470 = arith.negf %469 : vector<8x32xf32>
    %471 = math.exp %470 : vector<8x32xf32>
    %cst_143 = arith.constant 1.000000e+00 : f32
    %472 = vector.broadcast %cst_143 : f32 to vector<8x32xf32>
    %473 = arith.addf %472, %471 : vector<8x32xf32>
    %474 = arith.divf %472, %473 : vector<8x32xf32>
    %475 = vector.extract_strided_slice %462 {offsets = [0, 64], sizes = [8, 32], strides = [1, 1]} : vector<8x128xf32> to vector<8x32xf32>
    %476 = math.tanh %475 : vector<8x32xf32>
    %477 = vector.extract_strided_slice %462 {offsets = [0, 96], sizes = [8, 32], strides = [1, 1]} : vector<8x128xf32> to vector<8x32xf32>
    %478 = arith.negf %477 : vector<8x32xf32>
    %479 = math.exp %478 : vector<8x32xf32>
    %cst_144 = arith.constant 1.000000e+00 : f32
    %480 = vector.broadcast %cst_144 : f32 to vector<8x32xf32>
    %481 = arith.addf %480, %479 : vector<8x32xf32>
    %482 = arith.divf %480, %481 : vector<8x32xf32>
    %483 = arith.mulf %474, %417 : vector<8x32xf32>
    %484 = arith.mulf %468, %476 : vector<8x32xf32>
    %485 = arith.addf %483, %484 : vector<8x32xf32>
    %486 = math.tanh %485 : vector<8x32xf32>
    %487 = arith.mulf %482, %486 : vector<8x32xf32>
    %c1_145 = arith.constant 1 : index
    %c0_146 = arith.constant 0 : index
    %c0_147 = arith.constant 0 : index
    %488 = vector.load %arg6[%c1_145, %c0_146, %c0_147] : memref<8x8x32xf32, #tpu.memory_space<vmem>>, vector<1x8x32xf32>
    %489 = vector.shape_cast %488 : vector<1x8x32xf32> to vector<8x32xf32>
    %490 = vector.shape_cast %487 : vector<8x32xf32> to vector<1x8x32xf32>
    tpu.vector_store %arg6[%c1_145, %c0_146, %c0_147], %490 {strides = array<i32>} : memref<8x8x32xf32, #tpu.memory_space<vmem>>, vector<1x8x32xf32>,
    %c7_148 = arith.constant 7 : index
    %c0_149 = arith.constant 0 : index
    %c0_150 = arith.constant 0 : index
    %491 = vector.load %arg1[%c7_148, %c0_149, %c0_150] : memref<8x8x128xbf16, #tpu.memory_space<vmem>>, vector<1x8x128xbf16>
    %492 = vector.shape_cast %491 : vector<1x8x128xbf16> to vector<8x128xbf16>
    %493 = arith.extf %492 : vector<8x128xbf16> to vector<8x128xf32>
    %494 = arith.truncf %453 : vector<8x32xf32> to vector<8x32xbf16>
    %cst_151 = arith.constant dense<0.000000e+00> : vector<8x128xf32>
    %495 = tpu.matmul %494, %4, %cst_151 {dimension_numbers = #tpu.dot_dimension_numbers<[1], [0], [0], [1], [0, 0, 1, 1], [], []>} : vector<8x32xbf16>, vector<32x128xbf16>, vector<8x128xf32> -> vector<8x128xf32>
    %496 = arith.addf %493, %495 : vector<8x128xf32>
    %497 = vector.extract_strided_slice %496 {offsets = [0, 0], sizes = [8, 32], strides = [1, 1]} : vector<8x128xf32> to vector<8x32xf32>
    %498 = arith.negf %497 : vector<8x32xf32>
    %499 = math.exp %498 : vector<8x32xf32>
    %cst_152 = arith.constant 1.000000e+00 : f32
    %500 = vector.broadcast %cst_152 : f32 to vector<8x32xf32>
    %501 = arith.addf %500, %499 : vector<8x32xf32>
    %502 = arith.divf %500, %501 : vector<8x32xf32>
    %503 = vector.extract_strided_slice %496 {offsets = [0, 32], sizes = [8, 32], strides = [1, 1]} : vector<8x128xf32> to vector<8x32xf32>
    %504 = arith.negf %503 : vector<8x32xf32>
    %505 = math.exp %504 : vector<8x32xf32>
    %cst_153 = arith.constant 1.000000e+00 : f32
    %506 = vector.broadcast %cst_153 : f32 to vector<8x32xf32>
    %507 = arith.addf %506, %505 : vector<8x32xf32>
    %508 = arith.divf %506, %507 : vector<8x32xf32>
    %509 = vector.extract_strided_slice %496 {offsets = [0, 64], sizes = [8, 32], strides = [1, 1]} : vector<8x128xf32> to vector<8x32xf32>
    %510 = math.tanh %509 : vector<8x32xf32>
    %511 = vector.extract_strided_slice %496 {offsets = [0, 96], sizes = [8, 32], strides = [1, 1]} : vector<8x128xf32> to vector<8x32xf32>
    %512 = arith.negf %511 : vector<8x32xf32>
    %513 = math.exp %512 : vector<8x32xf32>
    %cst_154 = arith.constant 1.000000e+00 : f32
    %514 = vector.broadcast %cst_154 : f32 to vector<8x32xf32>
    %515 = arith.addf %514, %513 : vector<8x32xf32>
    %516 = arith.divf %514, %515 : vector<8x32xf32>
    %517 = arith.mulf %508, %451 : vector<8x32xf32>
    %518 = arith.mulf %502, %510 : vector<8x32xf32>
    %519 = arith.addf %517, %518 : vector<8x32xf32>
    %520 = math.tanh %519 : vector<8x32xf32>
    %521 = arith.mulf %516, %520 : vector<8x32xf32>
    %c7_155 = arith.constant 7 : index
    %c0_156 = arith.constant 0 : index
    %c0_157 = arith.constant 0 : index
    %522 = vector.load %arg5[%c7_155, %c0_156, %c0_157] : memref<8x8x32xf32, #tpu.memory_space<vmem>>, vector<1x8x32xf32>
    %523 = vector.shape_cast %522 : vector<1x8x32xf32> to vector<8x32xf32>
    %524 = vector.shape_cast %521 : vector<8x32xf32> to vector<1x8x32xf32>
    tpu.vector_store %arg5[%c7_155, %c0_156, %c0_157], %524 {strides = array<i32>} : memref<8x8x32xf32, #tpu.memory_space<vmem>>, vector<1x8x32xf32>,
    %c0_158 = arith.constant 0 : index
    %c0_159 = arith.constant 0 : index
    %c0_160 = arith.constant 0 : index
    %525 = vector.load %arg2[%c0_158, %c0_159, %c0_160] : memref<8x8x128xbf16, #tpu.memory_space<vmem>>, vector<1x8x128xbf16>
    %526 = vector.shape_cast %525 : vector<1x8x128xbf16> to vector<8x128xbf16>
    %527 = arith.extf %526 : vector<8x128xbf16> to vector<8x128xf32>
    %528 = arith.truncf %487 : vector<8x32xf32> to vector<8x32xbf16>
    %cst_161 = arith.constant dense<0.000000e+00> : vector<8x128xf32>
    %529 = tpu.matmul %528, %6, %cst_161 {dimension_numbers = #tpu.dot_dimension_numbers<[1], [0], [0], [1], [0, 0, 1, 1], [], []>} : vector<8x32xbf16>, vector<32x128xbf16>, vector<8x128xf32> -> vector<8x128xf32>
    %530 = arith.addf %527, %529 : vector<8x128xf32>
    %531 = vector.extract_strided_slice %530 {offsets = [0, 0], sizes = [8, 32], strides = [1, 1]} : vector<8x128xf32> to vector<8x32xf32>
    %532 = arith.negf %531 : vector<8x32xf32>
    %533 = math.exp %532 : vector<8x32xf32>
    %cst_162 = arith.constant 1.000000e+00 : f32
    %534 = vector.broadcast %cst_162 : f32 to vector<8x32xf32>
    %535 = arith.addf %534, %533 : vector<8x32xf32>
    %536 = arith.divf %534, %535 : vector<8x32xf32>
    %537 = vector.extract_strided_slice %530 {offsets = [0, 32], sizes = [8, 32], strides = [1, 1]} : vector<8x128xf32> to vector<8x32xf32>
    %538 = arith.negf %537 : vector<8x32xf32>
    %539 = math.exp %538 : vector<8x32xf32>
    %cst_163 = arith.constant 1.000000e+00 : f32
    %540 = vector.broadcast %cst_163 : f32 to vector<8x32xf32>
    %541 = arith.addf %540, %539 : vector<8x32xf32>
    %542 = arith.divf %540, %541 : vector<8x32xf32>
    %543 = vector.extract_strided_slice %530 {offsets = [0, 64], sizes = [8, 32], strides = [1, 1]} : vector<8x128xf32> to vector<8x32xf32>
    %544 = math.tanh %543 : vector<8x32xf32>
    %545 = vector.extract_strided_slice %530 {offsets = [0, 96], sizes = [8, 32], strides = [1, 1]} : vector<8x128xf32> to vector<8x32xf32>
    %546 = arith.negf %545 : vector<8x32xf32>
    %547 = math.exp %546 : vector<8x32xf32>
    %cst_164 = arith.constant 1.000000e+00 : f32
    %548 = vector.broadcast %cst_164 : f32 to vector<8x32xf32>
    %549 = arith.addf %548, %547 : vector<8x32xf32>
    %550 = arith.divf %548, %549 : vector<8x32xf32>
    %551 = arith.mulf %542, %485 : vector<8x32xf32>
    %552 = arith.mulf %536, %544 : vector<8x32xf32>
    %553 = arith.addf %551, %552 : vector<8x32xf32>
    %554 = math.tanh %553 : vector<8x32xf32>
    %555 = arith.mulf %550, %554 : vector<8x32xf32>
    %c0_165 = arith.constant 0 : index
    %c0_166 = arith.constant 0 : index
    %c0_167 = arith.constant 0 : index
    %556 = vector.load %arg6[%c0_165, %c0_166, %c0_167] : memref<8x8x32xf32, #tpu.memory_space<vmem>>, vector<1x8x32xf32>
    %557 = vector.shape_cast %556 : vector<1x8x32xf32> to vector<8x32xf32>
    %558 = vector.shape_cast %555 : vector<8x32xf32> to vector<1x8x32xf32>
    tpu.vector_store %arg6[%c0_165, %c0_166, %c0_167], %558 {strides = array<i32>} : memref<8x8x32xf32, #tpu.memory_space<vmem>>, vector<1x8x32xf32>,
    %c0_168 = arith.constant 0 : index
    %c0_169 = arith.constant 0 : index
    %c0_170 = arith.constant 0 : index
    %559 = vector.load %arg7[%c0_168, %c0_169, %c0_170] : memref<2x8x32xf32, #tpu.memory_space<vmem>>, vector<1x8x32xf32>
    %560 = vector.shape_cast %559 : vector<1x8x32xf32> to vector<8x32xf32>
    %561 = vector.shape_cast %521 : vector<8x32xf32> to vector<1x8x32xf32>
    tpu.vector_store %arg7[%c0_168, %c0_169, %c0_170], %561 {strides = array<i32>} : memref<2x8x32xf32, #tpu.memory_space<vmem>>, vector<1x8x32xf32>,
    %c0_171 = arith.constant 0 : index
    %c0_172 = arith.constant 0 : index
    %c0_173 = arith.constant 0 : index
    %562 = vector.load %arg8[%c0_171, %c0_172, %c0_173] : memref<2x8x32xf32, #tpu.memory_space<vmem>>, vector<1x8x32xf32>
    %563 = vector.shape_cast %562 : vector<1x8x32xf32> to vector<8x32xf32>
    %564 = vector.shape_cast %519 : vector<8x32xf32> to vector<1x8x32xf32>
    tpu.vector_store %arg8[%c0_171, %c0_172, %c0_173], %564 {strides = array<i32>} : memref<2x8x32xf32, #tpu.memory_space<vmem>>, vector<1x8x32xf32>,
    %c1_174 = arith.constant 1 : index
    %c0_175 = arith.constant 0 : index
    %c0_176 = arith.constant 0 : index
    %565 = vector.load %arg7[%c1_174, %c0_175, %c0_176] : memref<2x8x32xf32, #tpu.memory_space<vmem>>, vector<1x8x32xf32>
    %566 = vector.shape_cast %565 : vector<1x8x32xf32> to vector<8x32xf32>
    %567 = vector.shape_cast %555 : vector<8x32xf32> to vector<1x8x32xf32>
    tpu.vector_store %arg7[%c1_174, %c0_175, %c0_176], %567 {strides = array<i32>} : memref<2x8x32xf32, #tpu.memory_space<vmem>>, vector<1x8x32xf32>,
    %c1_177 = arith.constant 1 : index
    %c0_178 = arith.constant 0 : index
    %c0_179 = arith.constant 0 : index
    %568 = vector.load %arg8[%c1_177, %c0_178, %c0_179] : memref<2x8x32xf32, #tpu.memory_space<vmem>>, vector<1x8x32xf32>
    %569 = vector.shape_cast %568 : vector<1x8x32xf32> to vector<8x32xf32>
    %570 = vector.shape_cast %553 : vector<8x32xf32> to vector<1x8x32xf32>
    tpu.vector_store %arg8[%c1_177, %c0_178, %c0_179], %570 {strides = array<i32>} : memref<2x8x32xf32, #tpu.memory_space<vmem>>, vector<1x8x32xf32>,
    return
  }
  func.func @transform_0(%arg0: i32) -> (i32, i32, i32) {
    %c0_i32 = arith.constant 0 : i32
    %c0_i32_0 = arith.constant 0 : i32
    %c0_i32_1 = arith.constant 0 : i32
    return %arg0, %c0_i32, %c0_i32_0 : i32, i32, i32
  }
  func.func @transform_1(%arg0: i32) -> (i32, i32, i32) {
    %c0_i32 = arith.constant 0 : i32
    %0 = arith.subi %c0_i32, %arg0 : i32
    %c0_i32_0 = arith.constant 0 : i32
    %c0_i32_1 = arith.constant 0 : i32
    %c0_i32_2 = arith.constant 0 : i32
    return %0, %c0_i32_0, %c0_i32_1 : i32, i32, i32
  }
  func.func @transform_2(%arg0: i32) -> (i32, i32) {
    %c0_i32 = arith.constant 0 : i32
    %c0_i32_0 = arith.constant 0 : i32
    %c0_i32_1 = arith.constant 0 : i32
    return %c0_i32, %c0_i32_0 : i32, i32
  }
  func.func @transform_3(%arg0: i32) -> (i32, i32) {
    %c0_i32 = arith.constant 0 : i32
    %c0_i32_0 = arith.constant 0 : i32
    %c0_i32_1 = arith.constant 0 : i32
    return %c0_i32, %c0_i32_0 : i32, i32
  }
  func.func @transform_4(%arg0: i32) -> (i32, i32, i32) {
    %c0_i32 = arith.constant 0 : i32
    %c0_i32_0 = arith.constant 0 : i32
    %c0_i32_1 = arith.constant 0 : i32
    return %arg0, %c0_i32, %c0_i32_0 : i32, i32, i32
  }
  func.func @transform_5(%arg0: i32) -> (i32, i32, i32) {
    %c0_i32 = arith.constant 0 : i32
    %0 = arith.subi %c0_i32, %arg0 : i32
    %c0_i32_0 = arith.constant 0 : i32
    %c0_i32_1 = arith.constant 0 : i32
    %c0_i32_2 = arith.constant 0 : i32
    return %0, %c0_i32_0, %c0_i32_1 : i32, i32, i32
  }
}

module attributes {stable_mosaic.version = 11 : i64} {
  func.func @dual_matmul_bias_kernel(%arg0: i32, %arg1: memref<32x128xf32, #tpu.memory_space<vmem>>, %arg2: memref<128x256xf32, #tpu.memory_space<vmem>>, %arg3: memref<1x256xf32, #tpu.memory_space<vmem>>, %arg4: memref<32x128xbf16, #tpu.memory_space<vmem>>, %arg5: memref<32x128xbf16, #tpu.memory_space<vmem>>) attributes {dimension_semantics = [#tpu.dimension_semantics<parallel>], iteration_bounds = array<i64: 1>, scalar_prefetch = 0 : i64, scratch_operands = 0 : i64, tpu.core_type = #tpu.core_type<tc>, window_params = [{transform_indices = @transform_0, window_bounds = array<i64: 32, 128>}, {pipeline_mode = #tpu.pipeline_mode<synchronous>, transform_indices = @transform_1, window_bounds = array<i64: 128, 256>}, {pipeline_mode = #tpu.pipeline_mode<synchronous>, transform_indices = @transform_2, window_bounds = array<i64: 1, 256>}, {transform_indices = @transform_3, window_bounds = array<i64: 32, 128>}, {transform_indices = @transform_4, window_bounds = array<i64: 32, 128>}]} {
    %c0 = arith.constant 0 : index
    %c0_0 = arith.constant 0 : index
    %0 = vector.load %arg1[%c0, %c0_0] : memref<32x128xf32, #tpu.memory_space<vmem>>, vector<32x128xf32>
    %1 = arith.truncf %0 : vector<32x128xf32> to vector<32x128xbf16>
    %c0_1 = arith.constant 0 : index
    %c0_2 = arith.constant 0 : index
    %2 = vector.load %arg2[%c0_1, %c0_2] : memref<128x256xf32, #tpu.memory_space<vmem>>, vector<128x256xf32>
    %3 = arith.truncf %2 : vector<128x256xf32> to vector<128x256xbf16>
    %cst = arith.constant dense<0.000000e+00> : vector<32x256xf32>
    %4 = tpu.matmul %1, %3, %cst {dimension_numbers = #tpu.dot_dimension_numbers<[1], [0], [0], [1], [0, 0, 1, 1], [], []>} : vector<32x128xbf16>, vector<128x256xbf16>, vector<32x256xf32> -> vector<32x256xf32>
    %c0_3 = arith.constant 0 : index
    %c0_4 = arith.constant 0 : index
    %5 = vector.load %arg3[%c0_3, %c0_4] : memref<1x256xf32, #tpu.memory_space<vmem>>, vector<1x256xf32>
    %6 = vector.broadcast %5 : vector<1x256xf32> to vector<32x256xf32>
    %7 = arith.addf %4, %6 : vector<32x256xf32>
    %8 = vector.extract_strided_slice %7 {offsets = [0, 0], sizes = [32, 128], strides = [1, 1]} : vector<32x256xf32> to vector<32x128xf32>
    %9 = arith.truncf %8 : vector<32x128xf32> to vector<32x128xbf16>
    %c0_5 = arith.constant 0 : index
    %c0_6 = arith.constant 0 : index
    %10 = vector.load %arg4[%c0_5, %c0_6] : memref<32x128xbf16, #tpu.memory_space<vmem>>, vector<32x128xbf16>
    tpu.vector_store %arg4[%c0_5, %c0_6], %9 {strides = array<i32>} : memref<32x128xbf16, #tpu.memory_space<vmem>>, vector<32x128xbf16>,
    %11 = vector.extract_strided_slice %7 {offsets = [0, 128], sizes = [32, 128], strides = [1, 1]} : vector<32x256xf32> to vector<32x128xf32>
    %12 = arith.truncf %11 : vector<32x128xf32> to vector<32x128xbf16>
    %c0_7 = arith.constant 0 : index
    %c0_8 = arith.constant 0 : index
    %13 = vector.load %arg5[%c0_7, %c0_8] : memref<32x128xbf16, #tpu.memory_space<vmem>>, vector<32x128xbf16>
    tpu.vector_store %arg5[%c0_7, %c0_8], %12 {strides = array<i32>} : memref<32x128xbf16, #tpu.memory_space<vmem>>, vector<32x128xbf16>,
    return
  }
  func.func @transform_0(%arg0: i32) -> (i32, i32) {
    %c0_i32 = arith.constant 0 : i32
    %c0_i32_0 = arith.constant 0 : i32
    return %arg0, %c0_i32 : i32, i32
  }
  func.func @transform_1(%arg0: i32) -> (i32, i32) {
    %c0_i32 = arith.constant 0 : i32
    %c0_i32_0 = arith.constant 0 : i32
    %c0_i32_1 = arith.constant 0 : i32
    return %c0_i32, %c0_i32_0 : i32, i32
  }
  func.func @transform_2(%arg0: i32) -> (i32, i32) {
    %c0_i32 = arith.constant 0 : i32
    %c0_i32_0 = arith.constant 0 : i32
    %c0_i32_1 = arith.constant 0 : i32
    return %c0_i32, %c0_i32_0 : i32, i32
  }
  func.func @transform_3(%arg0: i32) -> (i32, i32) {
    %c0_i32 = arith.constant 0 : i32
    %c0_i32_0 = arith.constant 0 : i32
    return %arg0, %c0_i32 : i32, i32
  }
  func.func @transform_4(%arg0: i32) -> (i32, i32) {
    %c0_i32 = arith.constant 0 : i32
    %c0_i32_0 = arith.constant 0 : i32
    return %arg0, %c0_i32 : i32, i32
  }
}

module attributes {stable_mosaic.version = 11 : i64} {
  func.func @bilstm_chunk_kernel(%arg0: i32, %arg1: memref<4x8x128xbf16, #tpu.memory_space<vmem>>, %arg2: memref<4x8x128xbf16, #tpu.memory_space<vmem>>, %arg3: memref<32x128xf32, #tpu.memory_space<vmem>>, %arg4: memref<32x128xf32, #tpu.memory_space<vmem>>, %arg5: memref<4x8x32xf32, #tpu.memory_space<vmem>>, %arg6: memref<4x8x32xf32, #tpu.memory_space<vmem>>, %arg7: memref<2x8x32xf32, #tpu.memory_space<vmem>>, %arg8: memref<2x8x32xf32, #tpu.memory_space<vmem>>) attributes {dimension_semantics = [#tpu.dimension_semantics<arbitrary>], iteration_bounds = array<i64: 1>, scalar_prefetch = 0 : i64, scratch_operands = 2 : i64, tpu.core_type = #tpu.core_type<tc>, window_params = [{transform_indices = @transform_0, window_bounds = array<i64: 4, 8, 128>}, {transform_indices = @transform_1, window_bounds = array<i64: 4, 8, 128>}, {pipeline_mode = #tpu.pipeline_mode<synchronous>, transform_indices = @transform_2, window_bounds = array<i64: 32, 128>}, {pipeline_mode = #tpu.pipeline_mode<synchronous>, transform_indices = @transform_3, window_bounds = array<i64: 32, 128>}, {transform_indices = @transform_4, window_bounds = array<i64: 4, 8, 32>}, {transform_indices = @transform_5, window_bounds = array<i64: 4, 8, 32>}]} {
    %c0_i32 = arith.constant 0 : i32
    %0 = arith.cmpi eq, %arg0, %c0_i32 : i32
    %1 = arith.extui %0 : i1 to i32
    %c0_i32_0 = arith.constant 0 : i32
    %2 = arith.cmpi ne, %1, %c0_i32_0 : i32
    scf.if %2 {
      %cst_104 = arith.constant 0.000000e+00 : f32
      %299 = vector.broadcast %cst_104 : f32 to vector<2x8x32xf32>
      %c0_105 = arith.constant 0 : index
      %c0_106 = arith.constant 0 : index
      %c0_107 = arith.constant 0 : index
      %300 = vector.load %arg7[%c0_105, %c0_106, %c0_107] : memref<2x8x32xf32, #tpu.memory_space<vmem>>, vector<2x8x32xf32>
      tpu.vector_store %arg7[%c0_105, %c0_106, %c0_107], %299 {strides = array<i32>} : memref<2x8x32xf32, #tpu.memory_space<vmem>>, vector<2x8x32xf32>,
      %cst_108 = arith.constant 0.000000e+00 : f32
      %301 = vector.broadcast %cst_108 : f32 to vector<2x8x32xf32>
      %c0_109 = arith.constant 0 : index
      %c0_110 = arith.constant 0 : index
      %c0_111 = arith.constant 0 : index
      %302 = vector.load %arg8[%c0_109, %c0_110, %c0_111] : memref<2x8x32xf32, #tpu.memory_space<vmem>>, vector<2x8x32xf32>
      tpu.vector_store %arg8[%c0_109, %c0_110, %c0_111], %301 {strides = array<i32>} : memref<2x8x32xf32, #tpu.memory_space<vmem>>, vector<2x8x32xf32>,
    } else {
    }
    %c0 = arith.constant 0 : index
    %c0_1 = arith.constant 0 : index
    %3 = vector.load %arg3[%c0, %c0_1] : memref<32x128xf32, #tpu.memory_space<vmem>>, vector<32x128xf32>
    %4 = arith.truncf %3 : vector<32x128xf32> to vector<32x128xbf16>
    %c0_2 = arith.constant 0 : index
    %c0_3 = arith.constant 0 : index
    %5 = vector.load %arg4[%c0_2, %c0_3] : memref<32x128xf32, #tpu.memory_space<vmem>>, vector<32x128xf32>
    %6 = arith.truncf %5 : vector<32x128xf32> to vector<32x128xbf16>
    %c0_4 = arith.constant 0 : index
    %c0_5 = arith.constant 0 : index
    %c0_6 = arith.constant 0 : index
    %7 = vector.load %arg7[%c0_4, %c0_5, %c0_6] : memref<2x8x32xf32, #tpu.memory_space<vmem>>, vector<1x8x32xf32>
    %8 = vector.shape_cast %7 : vector<1x8x32xf32> to vector<8x32xf32>
    %c0_7 = arith.constant 0 : index
    %c0_8 = arith.constant 0 : index
    %c0_9 = arith.constant 0 : index
    %9 = vector.load %arg8[%c0_7, %c0_8, %c0_9] : memref<2x8x32xf32, #tpu.memory_space<vmem>>, vector<1x8x32xf32>
    %10 = vector.shape_cast %9 : vector<1x8x32xf32> to vector<8x32xf32>
    %c1 = arith.constant 1 : index
    %c0_10 = arith.constant 0 : index
    %c0_11 = arith.constant 0 : index
    %11 = vector.load %arg7[%c1, %c0_10, %c0_11] : memref<2x8x32xf32, #tpu.memory_space<vmem>>, vector<1x8x32xf32>
    %12 = vector.shape_cast %11 : vector<1x8x32xf32> to vector<8x32xf32>
    %c1_12 = arith.constant 1 : index
    %c0_13 = arith.constant 0 : index
    %c0_14 = arith.constant 0 : index
    %13 = vector.load %arg8[%c1_12, %c0_13, %c0_14] : memref<2x8x32xf32, #tpu.memory_space<vmem>>, vector<1x8x32xf32>
    %14 = vector.shape_cast %13 : vector<1x8x32xf32> to vector<8x32xf32>
    %c0_15 = arith.constant 0 : index
    %c0_16 = arith.constant 0 : index
    %c0_17 = arith.constant 0 : index
    %15 = vector.load %arg1[%c0_15, %c0_16, %c0_17] : memref<4x8x128xbf16, #tpu.memory_space<vmem>>, vector<1x8x128xbf16>
    %16 = vector.shape_cast %15 : vector<1x8x128xbf16> to vector<8x128xbf16>
    %17 = arith.extf %16 : vector<8x128xbf16> to vector<8x128xf32>
    %18 = arith.truncf %8 : vector<8x32xf32> to vector<8x32xbf16>
    %cst = arith.constant dense<0.000000e+00> : vector<8x128xf32>
    %19 = tpu.matmul %18, %4, %cst {dimension_numbers = #tpu.dot_dimension_numbers<[1], [0], [0], [1], [0, 0, 1, 1], [], []>} : vector<8x32xbf16>, vector<32x128xbf16>, vector<8x128xf32> -> vector<8x128xf32>
    %20 = arith.addf %17, %19 : vector<8x128xf32>
    %21 = vector.extract_strided_slice %20 {offsets = [0, 0], sizes = [8, 32], strides = [1, 1]} : vector<8x128xf32> to vector<8x32xf32>
    %22 = arith.negf %21 : vector<8x32xf32>
    %23 = math.exp %22 : vector<8x32xf32>
    %cst_18 = arith.constant 1.000000e+00 : f32
    %24 = vector.broadcast %cst_18 : f32 to vector<8x32xf32>
    %25 = arith.addf %24, %23 : vector<8x32xf32>
    %26 = arith.divf %24, %25 : vector<8x32xf32>
    %27 = vector.extract_strided_slice %20 {offsets = [0, 32], sizes = [8, 32], strides = [1, 1]} : vector<8x128xf32> to vector<8x32xf32>
    %28 = arith.negf %27 : vector<8x32xf32>
    %29 = math.exp %28 : vector<8x32xf32>
    %cst_19 = arith.constant 1.000000e+00 : f32
    %30 = vector.broadcast %cst_19 : f32 to vector<8x32xf32>
    %31 = arith.addf %30, %29 : vector<8x32xf32>
    %32 = arith.divf %30, %31 : vector<8x32xf32>
    %33 = vector.extract_strided_slice %20 {offsets = [0, 64], sizes = [8, 32], strides = [1, 1]} : vector<8x128xf32> to vector<8x32xf32>
    %34 = math.tanh %33 : vector<8x32xf32>
    %35 = vector.extract_strided_slice %20 {offsets = [0, 96], sizes = [8, 32], strides = [1, 1]} : vector<8x128xf32> to vector<8x32xf32>
    %36 = arith.negf %35 : vector<8x32xf32>
    %37 = math.exp %36 : vector<8x32xf32>
    %cst_20 = arith.constant 1.000000e+00 : f32
    %38 = vector.broadcast %cst_20 : f32 to vector<8x32xf32>
    %39 = arith.addf %38, %37 : vector<8x32xf32>
    %40 = arith.divf %38, %39 : vector<8x32xf32>
    %41 = arith.mulf %32, %10 : vector<8x32xf32>
    %42 = arith.mulf %26, %34 : vector<8x32xf32>
    %43 = arith.addf %41, %42 : vector<8x32xf32>
    %44 = math.tanh %43 : vector<8x32xf32>
    %45 = arith.mulf %40, %44 : vector<8x32xf32>
    %c0_21 = arith.constant 0 : index
    %c0_22 = arith.constant 0 : index
    %c0_23 = arith.constant 0 : index
    %46 = vector.load %arg5[%c0_21, %c0_22, %c0_23] : memref<4x8x32xf32, #tpu.memory_space<vmem>>, vector<1x8x32xf32>
    %47 = vector.shape_cast %46 : vector<1x8x32xf32> to vector<8x32xf32>
    %48 = vector.shape_cast %45 : vector<8x32xf32> to vector<1x8x32xf32>
    tpu.vector_store %arg5[%c0_21, %c0_22, %c0_23], %48 {strides = array<i32>} : memref<4x8x32xf32, #tpu.memory_space<vmem>>, vector<1x8x32xf32>,
    %c3 = arith.constant 3 : index
    %c0_24 = arith.constant 0 : index
    %c0_25 = arith.constant 0 : index
    %49 = vector.load %arg2[%c3, %c0_24, %c0_25] : memref<4x8x128xbf16, #tpu.memory_space<vmem>>, vector<1x8x128xbf16>
    %50 = vector.shape_cast %49 : vector<1x8x128xbf16> to vector<8x128xbf16>
    %51 = arith.extf %50 : vector<8x128xbf16> to vector<8x128xf32>
    %52 = arith.truncf %12 : vector<8x32xf32> to vector<8x32xbf16>
    %cst_26 = arith.constant dense<0.000000e+00> : vector<8x128xf32>
    %53 = tpu.matmul %52, %6, %cst_26 {dimension_numbers = #tpu.dot_dimension_numbers<[1], [0], [0], [1], [0, 0, 1, 1], [], []>} : vector<8x32xbf16>, vector<32x128xbf16>, vector<8x128xf32> -> vector<8x128xf32>
    %54 = arith.addf %51, %53 : vector<8x128xf32>
    %55 = vector.extract_strided_slice %54 {offsets = [0, 0], sizes = [8, 32], strides = [1, 1]} : vector<8x128xf32> to vector<8x32xf32>
    %56 = arith.negf %55 : vector<8x32xf32>
    %57 = math.exp %56 : vector<8x32xf32>
    %cst_27 = arith.constant 1.000000e+00 : f32
    %58 = vector.broadcast %cst_27 : f32 to vector<8x32xf32>
    %59 = arith.addf %58, %57 : vector<8x32xf32>
    %60 = arith.divf %58, %59 : vector<8x32xf32>
    %61 = vector.extract_strided_slice %54 {offsets = [0, 32], sizes = [8, 32], strides = [1, 1]} : vector<8x128xf32> to vector<8x32xf32>
    %62 = arith.negf %61 : vector<8x32xf32>
    %63 = math.exp %62 : vector<8x32xf32>
    %cst_28 = arith.constant 1.000000e+00 : f32
    %64 = vector.broadcast %cst_28 : f32 to vector<8x32xf32>
    %65 = arith.addf %64, %63 : vector<8x32xf32>
    %66 = arith.divf %64, %65 : vector<8x32xf32>
    %67 = vector.extract_strided_slice %54 {offsets = [0, 64], sizes = [8, 32], strides = [1, 1]} : vector<8x128xf32> to vector<8x32xf32>
    %68 = math.tanh %67 : vector<8x32xf32>
    %69 = vector.extract_strided_slice %54 {offsets = [0, 96], sizes = [8, 32], strides = [1, 1]} : vector<8x128xf32> to vector<8x32xf32>
    %70 = arith.negf %69 : vector<8x32xf32>
    %71 = math.exp %70 : vector<8x32xf32>
    %cst_29 = arith.constant 1.000000e+00 : f32
    %72 = vector.broadcast %cst_29 : f32 to vector<8x32xf32>
    %73 = arith.addf %72, %71 : vector<8x32xf32>
    %74 = arith.divf %72, %73 : vector<8x32xf32>
    %75 = arith.mulf %66, %14 : vector<8x32xf32>
    %76 = arith.mulf %60, %68 : vector<8x32xf32>
    %77 = arith.addf %75, %76 : vector<8x32xf32>
    %78 = math.tanh %77 : vector<8x32xf32>
    %79 = arith.mulf %74, %78 : vector<8x32xf32>
    %c3_30 = arith.constant 3 : index
    %c0_31 = arith.constant 0 : index
    %c0_32 = arith.constant 0 : index
    %80 = vector.load %arg6[%c3_30, %c0_31, %c0_32] : memref<4x8x32xf32, #tpu.memory_space<vmem>>, vector<1x8x32xf32>
    %81 = vector.shape_cast %80 : vector<1x8x32xf32> to vector<8x32xf32>
    %82 = vector.shape_cast %79 : vector<8x32xf32> to vector<1x8x32xf32>
    tpu.vector_store %arg6[%c3_30, %c0_31, %c0_32], %82 {strides = array<i32>} : memref<4x8x32xf32, #tpu.memory_space<vmem>>, vector<1x8x32xf32>,
    %c1_33 = arith.constant 1 : index
    %c0_34 = arith.constant 0 : index
    %c0_35 = arith.constant 0 : index
    %83 = vector.load %arg1[%c1_33, %c0_34, %c0_35] : memref<4x8x128xbf16, #tpu.memory_space<vmem>>, vector<1x8x128xbf16>
    %84 = vector.shape_cast %83 : vector<1x8x128xbf16> to vector<8x128xbf16>
    %85 = arith.extf %84 : vector<8x128xbf16> to vector<8x128xf32>
    %86 = arith.truncf %45 : vector<8x32xf32> to vector<8x32xbf16>
    %cst_36 = arith.constant dense<0.000000e+00> : vector<8x128xf32>
    %87 = tpu.matmul %86, %4, %cst_36 {dimension_numbers = #tpu.dot_dimension_numbers<[1], [0], [0], [1], [0, 0, 1, 1], [], []>} : vector<8x32xbf16>, vector<32x128xbf16>, vector<8x128xf32> -> vector<8x128xf32>
    %88 = arith.addf %85, %87 : vector<8x128xf32>
    %89 = vector.extract_strided_slice %88 {offsets = [0, 0], sizes = [8, 32], strides = [1, 1]} : vector<8x128xf32> to vector<8x32xf32>
    %90 = arith.negf %89 : vector<8x32xf32>
    %91 = math.exp %90 : vector<8x32xf32>
    %cst_37 = arith.constant 1.000000e+00 : f32
    %92 = vector.broadcast %cst_37 : f32 to vector<8x32xf32>
    %93 = arith.addf %92, %91 : vector<8x32xf32>
    %94 = arith.divf %92, %93 : vector<8x32xf32>
    %95 = vector.extract_strided_slice %88 {offsets = [0, 32], sizes = [8, 32], strides = [1, 1]} : vector<8x128xf32> to vector<8x32xf32>
    %96 = arith.negf %95 : vector<8x32xf32>
    %97 = math.exp %96 : vector<8x32xf32>
    %cst_38 = arith.constant 1.000000e+00 : f32
    %98 = vector.broadcast %cst_38 : f32 to vector<8x32xf32>
    %99 = arith.addf %98, %97 : vector<8x32xf32>
    %100 = arith.divf %98, %99 : vector<8x32xf32>
    %101 = vector.extract_strided_slice %88 {offsets = [0, 64], sizes = [8, 32], strides = [1, 1]} : vector<8x128xf32> to vector<8x32xf32>
    %102 = math.tanh %101 : vector<8x32xf32>
    %103 = vector.extract_strided_slice %88 {offsets = [0, 96], sizes = [8, 32], strides = [1, 1]} : vector<8x128xf32> to vector<8x32xf32>
    %104 = arith.negf %103 : vector<8x32xf32>
    %105 = math.exp %104 : vector<8x32xf32>
    %cst_39 = arith.constant 1.000000e+00 : f32
    %106 = vector.broadcast %cst_39 : f32 to vector<8x32xf32>
    %107 = arith.addf %106, %105 : vector<8x32xf32>
    %108 = arith.divf %106, %107 : vector<8x32xf32>
    %109 = arith.mulf %100, %43 : vector<8x32xf32>
    %110 = arith.mulf %94, %102 : vector<8x32xf32>
    %111 = arith.addf %109, %110 : vector<8x32xf32>
    %112 = math.tanh %111 : vector<8x32xf32>
    %113 = arith.mulf %108, %112 : vector<8x32xf32>
    %c1_40 = arith.constant 1 : index
    %c0_41 = arith.constant 0 : index
    %c0_42 = arith.constant 0 : index
    %114 = vector.load %arg5[%c1_40, %c0_41, %c0_42] : memref<4x8x32xf32, #tpu.memory_space<vmem>>, vector<1x8x32xf32>
    %115 = vector.shape_cast %114 : vector<1x8x32xf32> to vector<8x32xf32>
    %116 = vector.shape_cast %113 : vector<8x32xf32> to vector<1x8x32xf32>
    tpu.vector_store %arg5[%c1_40, %c0_41, %c0_42], %116 {strides = array<i32>} : memref<4x8x32xf32, #tpu.memory_space<vmem>>, vector<1x8x32xf32>,
    %c2 = arith.constant 2 : index
    %c0_43 = arith.constant 0 : index
    %c0_44 = arith.constant 0 : index
    %117 = vector.load %arg2[%c2, %c0_43, %c0_44] : memref<4x8x128xbf16, #tpu.memory_space<vmem>>, vector<1x8x128xbf16>
    %118 = vector.shape_cast %117 : vector<1x8x128xbf16> to vector<8x128xbf16>
    %119 = arith.extf %118 : vector<8x128xbf16> to vector<8x128xf32>
    %120 = arith.truncf %79 : vector<8x32xf32> to vector<8x32xbf16>
    %cst_45 = arith.constant dense<0.000000e+00> : vector<8x128xf32>
    %121 = tpu.matmul %120, %6, %cst_45 {dimension_numbers = #tpu.dot_dimension_numbers<[1], [0], [0], [1], [0, 0, 1, 1], [], []>} : vector<8x32xbf16>, vector<32x128xbf16>, vector<8x128xf32> -> vector<8x128xf32>
    %122 = arith.addf %119, %121 : vector<8x128xf32>
    %123 = vector.extract_strided_slice %122 {offsets = [0, 0], sizes = [8, 32], strides = [1, 1]} : vector<8x128xf32> to vector<8x32xf32>
    %124 = arith.negf %123 : vector<8x32xf32>
    %125 = math.exp %124 : vector<8x32xf32>
    %cst_46 = arith.constant 1.000000e+00 : f32
    %126 = vector.broadcast %cst_46 : f32 to vector<8x32xf32>
    %127 = arith.addf %126, %125 : vector<8x32xf32>
    %128 = arith.divf %126, %127 : vector<8x32xf32>
    %129 = vector.extract_strided_slice %122 {offsets = [0, 32], sizes = [8, 32], strides = [1, 1]} : vector<8x128xf32> to vector<8x32xf32>
    %130 = arith.negf %129 : vector<8x32xf32>
    %131 = math.exp %130 : vector<8x32xf32>
    %cst_47 = arith.constant 1.000000e+00 : f32
    %132 = vector.broadcast %cst_47 : f32 to vector<8x32xf32>
    %133 = arith.addf %132, %131 : vector<8x32xf32>
    %134 = arith.divf %132, %133 : vector<8x32xf32>
    %135 = vector.extract_strided_slice %122 {offsets = [0, 64], sizes = [8, 32], strides = [1, 1]} : vector<8x128xf32> to vector<8x32xf32>
    %136 = math.tanh %135 : vector<8x32xf32>
    %137 = vector.extract_strided_slice %122 {offsets = [0, 96], sizes = [8, 32], strides = [1, 1]} : vector<8x128xf32> to vector<8x32xf32>
    %138 = arith.negf %137 : vector<8x32xf32>
    %139 = math.exp %138 : vector<8x32xf32>
    %cst_48 = arith.constant 1.000000e+00 : f32
    %140 = vector.broadcast %cst_48 : f32 to vector<8x32xf32>
    %141 = arith.addf %140, %139 : vector<8x32xf32>
    %142 = arith.divf %140, %141 : vector<8x32xf32>
    %143 = arith.mulf %134, %77 : vector<8x32xf32>
    %144 = arith.mulf %128, %136 : vector<8x32xf32>
    %145 = arith.addf %143, %144 : vector<8x32xf32>
    %146 = math.tanh %145 : vector<8x32xf32>
    %147 = arith.mulf %142, %146 : vector<8x32xf32>
    %c2_49 = arith.constant 2 : index
    %c0_50 = arith.constant 0 : index
    %c0_51 = arith.constant 0 : index
    %148 = vector.load %arg6[%c2_49, %c0_50, %c0_51] : memref<4x8x32xf32, #tpu.memory_space<vmem>>, vector<1x8x32xf32>
    %149 = vector.shape_cast %148 : vector<1x8x32xf32> to vector<8x32xf32>
    %150 = vector.shape_cast %147 : vector<8x32xf32> to vector<1x8x32xf32>
    tpu.vector_store %arg6[%c2_49, %c0_50, %c0_51], %150 {strides = array<i32>} : memref<4x8x32xf32, #tpu.memory_space<vmem>>, vector<1x8x32xf32>,
    %c2_52 = arith.constant 2 : index
    %c0_53 = arith.constant 0 : index
    %c0_54 = arith.constant 0 : index
    %151 = vector.load %arg1[%c2_52, %c0_53, %c0_54] : memref<4x8x128xbf16, #tpu.memory_space<vmem>>, vector<1x8x128xbf16>
    %152 = vector.shape_cast %151 : vector<1x8x128xbf16> to vector<8x128xbf16>
    %153 = arith.extf %152 : vector<8x128xbf16> to vector<8x128xf32>
    %154 = arith.truncf %113 : vector<8x32xf32> to vector<8x32xbf16>
    %cst_55 = arith.constant dense<0.000000e+00> : vector<8x128xf32>
    %155 = tpu.matmul %154, %4, %cst_55 {dimension_numbers = #tpu.dot_dimension_numbers<[1], [0], [0], [1], [0, 0, 1, 1], [], []>} : vector<8x32xbf16>, vector<32x128xbf16>, vector<8x128xf32> -> vector<8x128xf32>
    %156 = arith.addf %153, %155 : vector<8x128xf32>
    %157 = vector.extract_strided_slice %156 {offsets = [0, 0], sizes = [8, 32], strides = [1, 1]} : vector<8x128xf32> to vector<8x32xf32>
    %158 = arith.negf %157 : vector<8x32xf32>
    %159 = math.exp %158 : vector<8x32xf32>
    %cst_56 = arith.constant 1.000000e+00 : f32
    %160 = vector.broadcast %cst_56 : f32 to vector<8x32xf32>
    %161 = arith.addf %160, %159 : vector<8x32xf32>
    %162 = arith.divf %160, %161 : vector<8x32xf32>
    %163 = vector.extract_strided_slice %156 {offsets = [0, 32], sizes = [8, 32], strides = [1, 1]} : vector<8x128xf32> to vector<8x32xf32>
    %164 = arith.negf %163 : vector<8x32xf32>
    %165 = math.exp %164 : vector<8x32xf32>
    %cst_57 = arith.constant 1.000000e+00 : f32
    %166 = vector.broadcast %cst_57 : f32 to vector<8x32xf32>
    %167 = arith.addf %166, %165 : vector<8x32xf32>
    %168 = arith.divf %166, %167 : vector<8x32xf32>
    %169 = vector.extract_strided_slice %156 {offsets = [0, 64], sizes = [8, 32], strides = [1, 1]} : vector<8x128xf32> to vector<8x32xf32>
    %170 = math.tanh %169 : vector<8x32xf32>
    %171 = vector.extract_strided_slice %156 {offsets = [0, 96], sizes = [8, 32], strides = [1, 1]} : vector<8x128xf32> to vector<8x32xf32>
    %172 = arith.negf %171 : vector<8x32xf32>
    %173 = math.exp %172 : vector<8x32xf32>
    %cst_58 = arith.constant 1.000000e+00 : f32
    %174 = vector.broadcast %cst_58 : f32 to vector<8x32xf32>
    %175 = arith.addf %174, %173 : vector<8x32xf32>
    %176 = arith.divf %174, %175 : vector<8x32xf32>
    %177 = arith.mulf %168, %111 : vector<8x32xf32>
    %178 = arith.mulf %162, %170 : vector<8x32xf32>
    %179 = arith.addf %177, %178 : vector<8x32xf32>
    %180 = math.tanh %179 : vector<8x32xf32>
    %181 = arith.mulf %176, %180 : vector<8x32xf32>
    %c2_59 = arith.constant 2 : index
    %c0_60 = arith.constant 0 : index
    %c0_61 = arith.constant 0 : index
    %182 = vector.load %arg5[%c2_59, %c0_60, %c0_61] : memref<4x8x32xf32, #tpu.memory_space<vmem>>, vector<1x8x32xf32>
    %183 = vector.shape_cast %182 : vector<1x8x32xf32> to vector<8x32xf32>
    %184 = vector.shape_cast %181 : vector<8x32xf32> to vector<1x8x32xf32>
    tpu.vector_store %arg5[%c2_59, %c0_60, %c0_61], %184 {strides = array<i32>} : memref<4x8x32xf32, #tpu.memory_space<vmem>>, vector<1x8x32xf32>,
    %c1_62 = arith.constant 1 : index
    %c0_63 = arith.constant 0 : index
    %c0_64 = arith.constant 0 : index
    %185 = vector.load %arg2[%c1_62, %c0_63, %c0_64] : memref<4x8x128xbf16, #tpu.memory_space<vmem>>, vector<1x8x128xbf16>
    %186 = vector.shape_cast %185 : vector<1x8x128xbf16> to vector<8x128xbf16>
    %187 = arith.extf %186 : vector<8x128xbf16> to vector<8x128xf32>
    %188 = arith.truncf %147 : vector<8x32xf32> to vector<8x32xbf16>
    %cst_65 = arith.constant dense<0.000000e+00> : vector<8x128xf32>
    %189 = tpu.matmul %188, %6, %cst_65 {dimension_numbers = #tpu.dot_dimension_numbers<[1], [0], [0], [1], [0, 0, 1, 1], [], []>} : vector<8x32xbf16>, vector<32x128xbf16>, vector<8x128xf32> -> vector<8x128xf32>
    %190 = arith.addf %187, %189 : vector<8x128xf32>
    %191 = vector.extract_strided_slice %190 {offsets = [0, 0], sizes = [8, 32], strides = [1, 1]} : vector<8x128xf32> to vector<8x32xf32>
    %192 = arith.negf %191 : vector<8x32xf32>
    %193 = math.exp %192 : vector<8x32xf32>
    %cst_66 = arith.constant 1.000000e+00 : f32
    %194 = vector.broadcast %cst_66 : f32 to vector<8x32xf32>
    %195 = arith.addf %194, %193 : vector<8x32xf32>
    %196 = arith.divf %194, %195 : vector<8x32xf32>
    %197 = vector.extract_strided_slice %190 {offsets = [0, 32], sizes = [8, 32], strides = [1, 1]} : vector<8x128xf32> to vector<8x32xf32>
    %198 = arith.negf %197 : vector<8x32xf32>
    %199 = math.exp %198 : vector<8x32xf32>
    %cst_67 = arith.constant 1.000000e+00 : f32
    %200 = vector.broadcast %cst_67 : f32 to vector<8x32xf32>
    %201 = arith.addf %200, %199 : vector<8x32xf32>
    %202 = arith.divf %200, %201 : vector<8x32xf32>
    %203 = vector.extract_strided_slice %190 {offsets = [0, 64], sizes = [8, 32], strides = [1, 1]} : vector<8x128xf32> to vector<8x32xf32>
    %204 = math.tanh %203 : vector<8x32xf32>
    %205 = vector.extract_strided_slice %190 {offsets = [0, 96], sizes = [8, 32], strides = [1, 1]} : vector<8x128xf32> to vector<8x32xf32>
    %206 = arith.negf %205 : vector<8x32xf32>
    %207 = math.exp %206 : vector<8x32xf32>
    %cst_68 = arith.constant 1.000000e+00 : f32
    %208 = vector.broadcast %cst_68 : f32 to vector<8x32xf32>
    %209 = arith.addf %208, %207 : vector<8x32xf32>
    %210 = arith.divf %208, %209 : vector<8x32xf32>
    %211 = arith.mulf %202, %145 : vector<8x32xf32>
    %212 = arith.mulf %196, %204 : vector<8x32xf32>
    %213 = arith.addf %211, %212 : vector<8x32xf32>
    %214 = math.tanh %213 : vector<8x32xf32>
    %215 = arith.mulf %210, %214 : vector<8x32xf32>
    %c1_69 = arith.constant 1 : index
    %c0_70 = arith.constant 0 : index
    %c0_71 = arith.constant 0 : index
    %216 = vector.load %arg6[%c1_69, %c0_70, %c0_71] : memref<4x8x32xf32, #tpu.memory_space<vmem>>, vector<1x8x32xf32>
    %217 = vector.shape_cast %216 : vector<1x8x32xf32> to vector<8x32xf32>
    %218 = vector.shape_cast %215 : vector<8x32xf32> to vector<1x8x32xf32>
    tpu.vector_store %arg6[%c1_69, %c0_70, %c0_71], %218 {strides = array<i32>} : memref<4x8x32xf32, #tpu.memory_space<vmem>>, vector<1x8x32xf32>,
    %c3_72 = arith.constant 3 : index
    %c0_73 = arith.constant 0 : index
    %c0_74 = arith.constant 0 : index
    %219 = vector.load %arg1[%c3_72, %c0_73, %c0_74] : memref<4x8x128xbf16, #tpu.memory_space<vmem>>, vector<1x8x128xbf16>
    %220 = vector.shape_cast %219 : vector<1x8x128xbf16> to vector<8x128xbf16>
    %221 = arith.extf %220 : vector<8x128xbf16> to vector<8x128xf32>
    %222 = arith.truncf %181 : vector<8x32xf32> to vector<8x32xbf16>
    %cst_75 = arith.constant dense<0.000000e+00> : vector<8x128xf32>
    %223 = tpu.matmul %222, %4, %cst_75 {dimension_numbers = #tpu.dot_dimension_numbers<[1], [0], [0], [1], [0, 0, 1, 1], [], []>} : vector<8x32xbf16>, vector<32x128xbf16>, vector<8x128xf32> -> vector<8x128xf32>
    %224 = arith.addf %221, %223 : vector<8x128xf32>
    %225 = vector.extract_strided_slice %224 {offsets = [0, 0], sizes = [8, 32], strides = [1, 1]} : vector<8x128xf32> to vector<8x32xf32>
    %226 = arith.negf %225 : vector<8x32xf32>
    %227 = math.exp %226 : vector<8x32xf32>
    %cst_76 = arith.constant 1.000000e+00 : f32
    %228 = vector.broadcast %cst_76 : f32 to vector<8x32xf32>
    %229 = arith.addf %228, %227 : vector<8x32xf32>
    %230 = arith.divf %228, %229 : vector<8x32xf32>
    %231 = vector.extract_strided_slice %224 {offsets = [0, 32], sizes = [8, 32], strides = [1, 1]} : vector<8x128xf32> to vector<8x32xf32>
    %232 = arith.negf %231 : vector<8x32xf32>
    %233 = math.exp %232 : vector<8x32xf32>
    %cst_77 = arith.constant 1.000000e+00 : f32
    %234 = vector.broadcast %cst_77 : f32 to vector<8x32xf32>
    %235 = arith.addf %234, %233 : vector<8x32xf32>
    %236 = arith.divf %234, %235 : vector<8x32xf32>
    %237 = vector.extract_strided_slice %224 {offsets = [0, 64], sizes = [8, 32], strides = [1, 1]} : vector<8x128xf32> to vector<8x32xf32>
    %238 = math.tanh %237 : vector<8x32xf32>
    %239 = vector.extract_strided_slice %224 {offsets = [0, 96], sizes = [8, 32], strides = [1, 1]} : vector<8x128xf32> to vector<8x32xf32>
    %240 = arith.negf %239 : vector<8x32xf32>
    %241 = math.exp %240 : vector<8x32xf32>
    %cst_78 = arith.constant 1.000000e+00 : f32
    %242 = vector.broadcast %cst_78 : f32 to vector<8x32xf32>
    %243 = arith.addf %242, %241 : vector<8x32xf32>
    %244 = arith.divf %242, %243 : vector<8x32xf32>
    %245 = arith.mulf %236, %179 : vector<8x32xf32>
    %246 = arith.mulf %230, %238 : vector<8x32xf32>
    %247 = arith.addf %245, %246 : vector<8x32xf32>
    %248 = math.tanh %247 : vector<8x32xf32>
    %249 = arith.mulf %244, %248 : vector<8x32xf32>
    %c3_79 = arith.constant 3 : index
    %c0_80 = arith.constant 0 : index
    %c0_81 = arith.constant 0 : index
    %250 = vector.load %arg5[%c3_79, %c0_80, %c0_81] : memref<4x8x32xf32, #tpu.memory_space<vmem>>, vector<1x8x32xf32>
    %251 = vector.shape_cast %250 : vector<1x8x32xf32> to vector<8x32xf32>
    %252 = vector.shape_cast %249 : vector<8x32xf32> to vector<1x8x32xf32>
    tpu.vector_store %arg5[%c3_79, %c0_80, %c0_81], %252 {strides = array<i32>} : memref<4x8x32xf32, #tpu.memory_space<vmem>>, vector<1x8x32xf32>,
    %c0_82 = arith.constant 0 : index
    %c0_83 = arith.constant 0 : index
    %c0_84 = arith.constant 0 : index
    %253 = vector.load %arg2[%c0_82, %c0_83, %c0_84] : memref<4x8x128xbf16, #tpu.memory_space<vmem>>, vector<1x8x128xbf16>
    %254 = vector.shape_cast %253 : vector<1x8x128xbf16> to vector<8x128xbf16>
    %255 = arith.extf %254 : vector<8x128xbf16> to vector<8x128xf32>
    %256 = arith.truncf %215 : vector<8x32xf32> to vector<8x32xbf16>
    %cst_85 = arith.constant dense<0.000000e+00> : vector<8x128xf32>
    %257 = tpu.matmul %256, %6, %cst_85 {dimension_numbers = #tpu.dot_dimension_numbers<[1], [0], [0], [1], [0, 0, 1, 1], [], []>} : vector<8x32xbf16>, vector<32x128xbf16>, vector<8x128xf32> -> vector<8x128xf32>
    %258 = arith.addf %255, %257 : vector<8x128xf32>
    %259 = vector.extract_strided_slice %258 {offsets = [0, 0], sizes = [8, 32], strides = [1, 1]} : vector<8x128xf32> to vector<8x32xf32>
    %260 = arith.negf %259 : vector<8x32xf32>
    %261 = math.exp %260 : vector<8x32xf32>
    %cst_86 = arith.constant 1.000000e+00 : f32
    %262 = vector.broadcast %cst_86 : f32 to vector<8x32xf32>
    %263 = arith.addf %262, %261 : vector<8x32xf32>
    %264 = arith.divf %262, %263 : vector<8x32xf32>
    %265 = vector.extract_strided_slice %258 {offsets = [0, 32], sizes = [8, 32], strides = [1, 1]} : vector<8x128xf32> to vector<8x32xf32>
    %266 = arith.negf %265 : vector<8x32xf32>
    %267 = math.exp %266 : vector<8x32xf32>
    %cst_87 = arith.constant 1.000000e+00 : f32
    %268 = vector.broadcast %cst_87 : f32 to vector<8x32xf32>
    %269 = arith.addf %268, %267 : vector<8x32xf32>
    %270 = arith.divf %268, %269 : vector<8x32xf32>
    %271 = vector.extract_strided_slice %258 {offsets = [0, 64], sizes = [8, 32], strides = [1, 1]} : vector<8x128xf32> to vector<8x32xf32>
    %272 = math.tanh %271 : vector<8x32xf32>
    %273 = vector.extract_strided_slice %258 {offsets = [0, 96], sizes = [8, 32], strides = [1, 1]} : vector<8x128xf32> to vector<8x32xf32>
    %274 = arith.negf %273 : vector<8x32xf32>
    %275 = math.exp %274 : vector<8x32xf32>
    %cst_88 = arith.constant 1.000000e+00 : f32
    %276 = vector.broadcast %cst_88 : f32 to vector<8x32xf32>
    %277 = arith.addf %276, %275 : vector<8x32xf32>
    %278 = arith.divf %276, %277 : vector<8x32xf32>
    %279 = arith.mulf %270, %213 : vector<8x32xf32>
    %280 = arith.mulf %264, %272 : vector<8x32xf32>
    %281 = arith.addf %279, %280 : vector<8x32xf32>
    %282 = math.tanh %281 : vector<8x32xf32>
    %283 = arith.mulf %278, %282 : vector<8x32xf32>
    %c0_89 = arith.constant 0 : index
    %c0_90 = arith.constant 0 : index
    %c0_91 = arith.constant 0 : index
    %284 = vector.load %arg6[%c0_89, %c0_90, %c0_91] : memref<4x8x32xf32, #tpu.memory_space<vmem>>, vector<1x8x32xf32>
    %285 = vector.shape_cast %284 : vector<1x8x32xf32> to vector<8x32xf32>
    %286 = vector.shape_cast %283 : vector<8x32xf32> to vector<1x8x32xf32>
    tpu.vector_store %arg6[%c0_89, %c0_90, %c0_91], %286 {strides = array<i32>} : memref<4x8x32xf32, #tpu.memory_space<vmem>>, vector<1x8x32xf32>,
    %c0_92 = arith.constant 0 : index
    %c0_93 = arith.constant 0 : index
    %c0_94 = arith.constant 0 : index
    %287 = vector.load %arg7[%c0_92, %c0_93, %c0_94] : memref<2x8x32xf32, #tpu.memory_space<vmem>>, vector<1x8x32xf32>
    %288 = vector.shape_cast %287 : vector<1x8x32xf32> to vector<8x32xf32>
    %289 = vector.shape_cast %249 : vector<8x32xf32> to vector<1x8x32xf32>
    tpu.vector_store %arg7[%c0_92, %c0_93, %c0_94], %289 {strides = array<i32>} : memref<2x8x32xf32, #tpu.memory_space<vmem>>, vector<1x8x32xf32>,
    %c0_95 = arith.constant 0 : index
    %c0_96 = arith.constant 0 : index
    %c0_97 = arith.constant 0 : index
    %290 = vector.load %arg8[%c0_95, %c0_96, %c0_97] : memref<2x8x32xf32, #tpu.memory_space<vmem>>, vector<1x8x32xf32>
    %291 = vector.shape_cast %290 : vector<1x8x32xf32> to vector<8x32xf32>
    %292 = vector.shape_cast %247 : vector<8x32xf32> to vector<1x8x32xf32>
    tpu.vector_store %arg8[%c0_95, %c0_96, %c0_97], %292 {strides = array<i32>} : memref<2x8x32xf32, #tpu.memory_space<vmem>>, vector<1x8x32xf32>,
    %c1_98 = arith.constant 1 : index
    %c0_99 = arith.constant 0 : index
    %c0_100 = arith.constant 0 : index
    %293 = vector.load %arg7[%c1_98, %c0_99, %c0_100] : memref<2x8x32xf32, #tpu.memory_space<vmem>>, vector<1x8x32xf32>
    %294 = vector.shape_cast %293 : vector<1x8x32xf32> to vector<8x32xf32>
    %295 = vector.shape_cast %283 : vector<8x32xf32> to vector<1x8x32xf32>
    tpu.vector_store %arg7[%c1_98, %c0_99, %c0_100], %295 {strides = array<i32>} : memref<2x8x32xf32, #tpu.memory_space<vmem>>, vector<1x8x32xf32>,
    %c1_101 = arith.constant 1 : index
    %c0_102 = arith.constant 0 : index
    %c0_103 = arith.constant 0 : index
    %296 = vector.load %arg8[%c1_101, %c0_102, %c0_103] : memref<2x8x32xf32, #tpu.memory_space<vmem>>, vector<1x8x32xf32>
    %297 = vector.shape_cast %296 : vector<1x8x32xf32> to vector<8x32xf32>
    %298 = vector.shape_cast %281 : vector<8x32xf32> to vector<1x8x32xf32>
    tpu.vector_store %arg8[%c1_101, %c0_102, %c0_103], %298 {strides = array<i32>} : memref<2x8x32xf32, #tpu.memory_space<vmem>>, vector<1x8x32xf32>,
    return
  }
  func.func @transform_0(%arg0: i32) -> (i32, i32, i32) {
    %c0_i32 = arith.constant 0 : i32
    %c0_i32_0 = arith.constant 0 : i32
    %c0_i32_1 = arith.constant 0 : i32
    return %arg0, %c0_i32, %c0_i32_0 : i32, i32, i32
  }
  func.func @transform_1(%arg0: i32) -> (i32, i32, i32) {
    %c0_i32 = arith.constant 0 : i32
    %0 = arith.subi %c0_i32, %arg0 : i32
    %c0_i32_0 = arith.constant 0 : i32
    %c0_i32_1 = arith.constant 0 : i32
    %c0_i32_2 = arith.constant 0 : i32
    return %0, %c0_i32_0, %c0_i32_1 : i32, i32, i32
  }
  func.func @transform_2(%arg0: i32) -> (i32, i32) {
    %c0_i32 = arith.constant 0 : i32
    %c0_i32_0 = arith.constant 0 : i32
    %c0_i32_1 = arith.constant 0 : i32
    return %c0_i32, %c0_i32_0 : i32, i32
  }
  func.func @transform_3(%arg0: i32) -> (i32, i32) {
    %c0_i32 = arith.constant 0 : i32
    %c0_i32_0 = arith.constant 0 : i32
    %c0_i32_1 = arith.constant 0 : i32
    return %c0_i32, %c0_i32_0 : i32, i32
  }
  func.func @transform_4(%arg0: i32) -> (i32, i32, i32) {
    %c0_i32 = arith.constant 0 : i32
    %c0_i32_0 = arith.constant 0 : i32
    %c0_i32_1 = arith.constant 0 : i32
    return %arg0, %c0_i32, %c0_i32_0 : i32, i32, i32
  }
  func.func @transform_5(%arg0: i32) -> (i32, i32, i32) {
    %c0_i32 = arith.constant 0 : i32
    %0 = arith.subi %c0_i32, %arg0 : i32
    %c0_i32_0 = arith.constant 0 : i32
    %c0_i32_1 = arith.constant 0 : i32
    %c0_i32_2 = arith.constant 0 : i32
    return %0, %c0_i32_0, %c0_i32_1 : i32, i32, i32
  }
}

module attributes {stable_mosaic.version = 11 : i64} {
  func.func @dual_matmul_bias_kernel(%arg0: i32, %arg1: memref<16x128xf32, #tpu.memory_space<vmem>>, %arg2: memref<128x256xf32, #tpu.memory_space<vmem>>, %arg3: memref<1x256xf32, #tpu.memory_space<vmem>>, %arg4: memref<16x128xbf16, #tpu.memory_space<vmem>>, %arg5: memref<16x128xbf16, #tpu.memory_space<vmem>>) attributes {dimension_semantics = [#tpu.dimension_semantics<parallel>], iteration_bounds = array<i64: 1>, scalar_prefetch = 0 : i64, scratch_operands = 0 : i64, tpu.core_type = #tpu.core_type<tc>, window_params = [{transform_indices = @transform_0, window_bounds = array<i64: 16, 128>}, {pipeline_mode = #tpu.pipeline_mode<synchronous>, transform_indices = @transform_1, window_bounds = array<i64: 128, 256>}, {pipeline_mode = #tpu.pipeline_mode<synchronous>, transform_indices = @transform_2, window_bounds = array<i64: 1, 256>}, {transform_indices = @transform_3, window_bounds = array<i64: 16, 128>}, {transform_indices = @transform_4, window_bounds = array<i64: 16, 128>}]} {
    %c0 = arith.constant 0 : index
    %c0_0 = arith.constant 0 : index
    %0 = vector.load %arg1[%c0, %c0_0] : memref<16x128xf32, #tpu.memory_space<vmem>>, vector<16x128xf32>
    %1 = arith.truncf %0 : vector<16x128xf32> to vector<16x128xbf16>
    %c0_1 = arith.constant 0 : index
    %c0_2 = arith.constant 0 : index
    %2 = vector.load %arg2[%c0_1, %c0_2] : memref<128x256xf32, #tpu.memory_space<vmem>>, vector<128x256xf32>
    %3 = arith.truncf %2 : vector<128x256xf32> to vector<128x256xbf16>
    %cst = arith.constant dense<0.000000e+00> : vector<16x256xf32>
    %4 = tpu.matmul %1, %3, %cst {dimension_numbers = #tpu.dot_dimension_numbers<[1], [0], [0], [1], [0, 0, 1, 1], [], []>} : vector<16x128xbf16>, vector<128x256xbf16>, vector<16x256xf32> -> vector<16x256xf32>
    %c0_3 = arith.constant 0 : index
    %c0_4 = arith.constant 0 : index
    %5 = vector.load %arg3[%c0_3, %c0_4] : memref<1x256xf32, #tpu.memory_space<vmem>>, vector<1x256xf32>
    %6 = vector.broadcast %5 : vector<1x256xf32> to vector<16x256xf32>
    %7 = arith.addf %4, %6 : vector<16x256xf32>
    %8 = vector.extract_strided_slice %7 {offsets = [0, 0], sizes = [16, 128], strides = [1, 1]} : vector<16x256xf32> to vector<16x128xf32>
    %9 = arith.truncf %8 : vector<16x128xf32> to vector<16x128xbf16>
    %c0_5 = arith.constant 0 : index
    %c0_6 = arith.constant 0 : index
    %10 = vector.load %arg4[%c0_5, %c0_6] : memref<16x128xbf16, #tpu.memory_space<vmem>>, vector<16x128xbf16>
    tpu.vector_store %arg4[%c0_5, %c0_6], %9 {strides = array<i32>} : memref<16x128xbf16, #tpu.memory_space<vmem>>, vector<16x128xbf16>,
    %11 = vector.extract_strided_slice %7 {offsets = [0, 128], sizes = [16, 128], strides = [1, 1]} : vector<16x256xf32> to vector<16x128xf32>
    %12 = arith.truncf %11 : vector<16x128xf32> to vector<16x128xbf16>
    %c0_7 = arith.constant 0 : index
    %c0_8 = arith.constant 0 : index
    %13 = vector.load %arg5[%c0_7, %c0_8] : memref<16x128xbf16, #tpu.memory_space<vmem>>, vector<16x128xbf16>
    tpu.vector_store %arg5[%c0_7, %c0_8], %12 {strides = array<i32>} : memref<16x128xbf16, #tpu.memory_space<vmem>>, vector<16x128xbf16>,
    return
  }
  func.func @transform_0(%arg0: i32) -> (i32, i32) {
    %c0_i32 = arith.constant 0 : i32
    %c0_i32_0 = arith.constant 0 : i32
    return %arg0, %c0_i32 : i32, i32
  }
  func.func @transform_1(%arg0: i32) -> (i32, i32) {
    %c0_i32 = arith.constant 0 : i32
    %c0_i32_0 = arith.constant 0 : i32
    %c0_i32_1 = arith.constant 0 : i32
    return %c0_i32, %c0_i32_0 : i32, i32
  }
  func.func @transform_2(%arg0: i32) -> (i32, i32) {
    %c0_i32 = arith.constant 0 : i32
    %c0_i32_0 = arith.constant 0 : i32
    %c0_i32_1 = arith.constant 0 : i32
    return %c0_i32, %c0_i32_0 : i32, i32
  }
  func.func @transform_3(%arg0: i32) -> (i32, i32) {
    %c0_i32 = arith.constant 0 : i32
    %c0_i32_0 = arith.constant 0 : i32
    return %arg0, %c0_i32 : i32, i32
  }
  func.func @transform_4(%arg0: i32) -> (i32, i32) {
    %c0_i32 = arith.constant 0 : i32
    %c0_i32_0 = arith.constant 0 : i32
    return %arg0, %c0_i32 : i32, i32
  }
}

module attributes {stable_mosaic.version = 11 : i64} {
  func.func @bilstm_chunk_kernel(%arg0: i32, %arg1: memref<2x8x128xbf16, #tpu.memory_space<vmem>>, %arg2: memref<2x8x128xbf16, #tpu.memory_space<vmem>>, %arg3: memref<32x128xf32, #tpu.memory_space<vmem>>, %arg4: memref<32x128xf32, #tpu.memory_space<vmem>>, %arg5: memref<2x8x32xf32, #tpu.memory_space<vmem>>, %arg6: memref<2x8x32xf32, #tpu.memory_space<vmem>>, %arg7: memref<2x8x32xf32, #tpu.memory_space<vmem>>, %arg8: memref<2x8x32xf32, #tpu.memory_space<vmem>>) attributes {dimension_semantics = [#tpu.dimension_semantics<arbitrary>], iteration_bounds = array<i64: 1>, scalar_prefetch = 0 : i64, scratch_operands = 2 : i64, tpu.core_type = #tpu.core_type<tc>, window_params = [{transform_indices = @transform_0, window_bounds = array<i64: 2, 8, 128>}, {transform_indices = @transform_1, window_bounds = array<i64: 2, 8, 128>}, {pipeline_mode = #tpu.pipeline_mode<synchronous>, transform_indices = @transform_2, window_bounds = array<i64: 32, 128>}, {pipeline_mode = #tpu.pipeline_mode<synchronous>, transform_indices = @transform_3, window_bounds = array<i64: 32, 128>}, {transform_indices = @transform_4, window_bounds = array<i64: 2, 8, 32>}, {transform_indices = @transform_5, window_bounds = array<i64: 2, 8, 32>}]} {
    %c0_i32 = arith.constant 0 : i32
    %0 = arith.cmpi eq, %arg0, %c0_i32 : i32
    %1 = arith.extui %0 : i1 to i32
    %c0_i32_0 = arith.constant 0 : i32
    %2 = arith.cmpi ne, %1, %c0_i32_0 : i32
    scf.if %2 {
      %cst_66 = arith.constant 0.000000e+00 : f32
      %163 = vector.broadcast %cst_66 : f32 to vector<2x8x32xf32>
      %c0_67 = arith.constant 0 : index
      %c0_68 = arith.constant 0 : index
      %c0_69 = arith.constant 0 : index
      %164 = vector.load %arg7[%c0_67, %c0_68, %c0_69] : memref<2x8x32xf32, #tpu.memory_space<vmem>>, vector<2x8x32xf32>
      tpu.vector_store %arg7[%c0_67, %c0_68, %c0_69], %163 {strides = array<i32>} : memref<2x8x32xf32, #tpu.memory_space<vmem>>, vector<2x8x32xf32>,
      %cst_70 = arith.constant 0.000000e+00 : f32
      %165 = vector.broadcast %cst_70 : f32 to vector<2x8x32xf32>
      %c0_71 = arith.constant 0 : index
      %c0_72 = arith.constant 0 : index
      %c0_73 = arith.constant 0 : index
      %166 = vector.load %arg8[%c0_71, %c0_72, %c0_73] : memref<2x8x32xf32, #tpu.memory_space<vmem>>, vector<2x8x32xf32>
      tpu.vector_store %arg8[%c0_71, %c0_72, %c0_73], %165 {strides = array<i32>} : memref<2x8x32xf32, #tpu.memory_space<vmem>>, vector<2x8x32xf32>,
    } else {
    }
    %c0 = arith.constant 0 : index
    %c0_1 = arith.constant 0 : index
    %3 = vector.load %arg3[%c0, %c0_1] : memref<32x128xf32, #tpu.memory_space<vmem>>, vector<32x128xf32>
    %4 = arith.truncf %3 : vector<32x128xf32> to vector<32x128xbf16>
    %c0_2 = arith.constant 0 : index
    %c0_3 = arith.constant 0 : index
    %5 = vector.load %arg4[%c0_2, %c0_3] : memref<32x128xf32, #tpu.memory_space<vmem>>, vector<32x128xf32>
    %6 = arith.truncf %5 : vector<32x128xf32> to vector<32x128xbf16>
    %c0_4 = arith.constant 0 : index
    %c0_5 = arith.constant 0 : index
    %c0_6 = arith.constant 0 : index
    %7 = vector.load %arg7[%c0_4, %c0_5, %c0_6] : memref<2x8x32xf32, #tpu.memory_space<vmem>>, vector<1x8x32xf32>
    %8 = vector.shape_cast %7 : vector<1x8x32xf32> to vector<8x32xf32>
    %c0_7 = arith.constant 0 : index
    %c0_8 = arith.constant 0 : index
    %c0_9 = arith.constant 0 : index
    %9 = vector.load %arg8[%c0_7, %c0_8, %c0_9] : memref<2x8x32xf32, #tpu.memory_space<vmem>>, vector<1x8x32xf32>
    %10 = vector.shape_cast %9 : vector<1x8x32xf32> to vector<8x32xf32>
    %c1 = arith.constant 1 : index
    %c0_10 = arith.constant 0 : index
    %c0_11 = arith.constant 0 : index
    %11 = vector.load %arg7[%c1, %c0_10, %c0_11] : memref<2x8x32xf32, #tpu.memory_space<vmem>>, vector<1x8x32xf32>
    %12 = vector.shape_cast %11 : vector<1x8x32xf32> to vector<8x32xf32>
    %c1_12 = arith.constant 1 : index
    %c0_13 = arith.constant 0 : index
    %c0_14 = arith.constant 0 : index
    %13 = vector.load %arg8[%c1_12, %c0_13, %c0_14] : memref<2x8x32xf32, #tpu.memory_space<vmem>>, vector<1x8x32xf32>
    %14 = vector.shape_cast %13 : vector<1x8x32xf32> to vector<8x32xf32>
    %c0_15 = arith.constant 0 : index
    %c0_16 = arith.constant 0 : index
    %c0_17 = arith.constant 0 : index
    %15 = vector.load %arg1[%c0_15, %c0_16, %c0_17] : memref<2x8x128xbf16, #tpu.memory_space<vmem>>, vector<1x8x128xbf16>
    %16 = vector.shape_cast %15 : vector<1x8x128xbf16> to vector<8x128xbf16>
    %17 = arith.extf %16 : vector<8x128xbf16> to vector<8x128xf32>
    %18 = arith.truncf %8 : vector<8x32xf32> to vector<8x32xbf16>
    %cst = arith.constant dense<0.000000e+00> : vector<8x128xf32>
    %19 = tpu.matmul %18, %4, %cst {dimension_numbers = #tpu.dot_dimension_numbers<[1], [0], [0], [1], [0, 0, 1, 1], [], []>} : vector<8x32xbf16>, vector<32x128xbf16>, vector<8x128xf32> -> vector<8x128xf32>
    %20 = arith.addf %17, %19 : vector<8x128xf32>
    %21 = vector.extract_strided_slice %20 {offsets = [0, 0], sizes = [8, 32], strides = [1, 1]} : vector<8x128xf32> to vector<8x32xf32>
    %22 = arith.negf %21 : vector<8x32xf32>
    %23 = math.exp %22 : vector<8x32xf32>
    %cst_18 = arith.constant 1.000000e+00 : f32
    %24 = vector.broadcast %cst_18 : f32 to vector<8x32xf32>
    %25 = arith.addf %24, %23 : vector<8x32xf32>
    %26 = arith.divf %24, %25 : vector<8x32xf32>
    %27 = vector.extract_strided_slice %20 {offsets = [0, 32], sizes = [8, 32], strides = [1, 1]} : vector<8x128xf32> to vector<8x32xf32>
    %28 = arith.negf %27 : vector<8x32xf32>
    %29 = math.exp %28 : vector<8x32xf32>
    %cst_19 = arith.constant 1.000000e+00 : f32
    %30 = vector.broadcast %cst_19 : f32 to vector<8x32xf32>
    %31 = arith.addf %30, %29 : vector<8x32xf32>
    %32 = arith.divf %30, %31 : vector<8x32xf32>
    %33 = vector.extract_strided_slice %20 {offsets = [0, 64], sizes = [8, 32], strides = [1, 1]} : vector<8x128xf32> to vector<8x32xf32>
    %34 = math.tanh %33 : vector<8x32xf32>
    %35 = vector.extract_strided_slice %20 {offsets = [0, 96], sizes = [8, 32], strides = [1, 1]} : vector<8x128xf32> to vector<8x32xf32>
    %36 = arith.negf %35 : vector<8x32xf32>
    %37 = math.exp %36 : vector<8x32xf32>
    %cst_20 = arith.constant 1.000000e+00 : f32
    %38 = vector.broadcast %cst_20 : f32 to vector<8x32xf32>
    %39 = arith.addf %38, %37 : vector<8x32xf32>
    %40 = arith.divf %38, %39 : vector<8x32xf32>
    %41 = arith.mulf %32, %10 : vector<8x32xf32>
    %42 = arith.mulf %26, %34 : vector<8x32xf32>
    %43 = arith.addf %41, %42 : vector<8x32xf32>
    %44 = math.tanh %43 : vector<8x32xf32>
    %45 = arith.mulf %40, %44 : vector<8x32xf32>
    %c0_21 = arith.constant 0 : index
    %c0_22 = arith.constant 0 : index
    %c0_23 = arith.constant 0 : index
    %46 = vector.load %arg5[%c0_21, %c0_22, %c0_23] : memref<2x8x32xf32, #tpu.memory_space<vmem>>, vector<1x8x32xf32>
    %47 = vector.shape_cast %46 : vector<1x8x32xf32> to vector<8x32xf32>
    %48 = vector.shape_cast %45 : vector<8x32xf32> to vector<1x8x32xf32>
    tpu.vector_store %arg5[%c0_21, %c0_22, %c0_23], %48 {strides = array<i32>} : memref<2x8x32xf32, #tpu.memory_space<vmem>>, vector<1x8x32xf32>,
    %c1_24 = arith.constant 1 : index
    %c0_25 = arith.constant 0 : index
    %c0_26 = arith.constant 0 : index
    %49 = vector.load %arg2[%c1_24, %c0_25, %c0_26] : memref<2x8x128xbf16, #tpu.memory_space<vmem>>, vector<1x8x128xbf16>
    %50 = vector.shape_cast %49 : vector<1x8x128xbf16> to vector<8x128xbf16>
    %51 = arith.extf %50 : vector<8x128xbf16> to vector<8x128xf32>
    %52 = arith.truncf %12 : vector<8x32xf32> to vector<8x32xbf16>
    %cst_27 = arith.constant dense<0.000000e+00> : vector<8x128xf32>
    %53 = tpu.matmul %52, %6, %cst_27 {dimension_numbers = #tpu.dot_dimension_numbers<[1], [0], [0], [1], [0, 0, 1, 1], [], []>} : vector<8x32xbf16>, vector<32x128xbf16>, vector<8x128xf32> -> vector<8x128xf32>
    %54 = arith.addf %51, %53 : vector<8x128xf32>
    %55 = vector.extract_strided_slice %54 {offsets = [0, 0], sizes = [8, 32], strides = [1, 1]} : vector<8x128xf32> to vector<8x32xf32>
    %56 = arith.negf %55 : vector<8x32xf32>
    %57 = math.exp %56 : vector<8x32xf32>
    %cst_28 = arith.constant 1.000000e+00 : f32
    %58 = vector.broadcast %cst_28 : f32 to vector<8x32xf32>
    %59 = arith.addf %58, %57 : vector<8x32xf32>
    %60 = arith.divf %58, %59 : vector<8x32xf32>
    %61 = vector.extract_strided_slice %54 {offsets = [0, 32], sizes = [8, 32], strides = [1, 1]} : vector<8x128xf32> to vector<8x32xf32>
    %62 = arith.negf %61 : vector<8x32xf32>
    %63 = math.exp %62 : vector<8x32xf32>
    %cst_29 = arith.constant 1.000000e+00 : f32
    %64 = vector.broadcast %cst_29 : f32 to vector<8x32xf32>
    %65 = arith.addf %64, %63 : vector<8x32xf32>
    %66 = arith.divf %64, %65 : vector<8x32xf32>
    %67 = vector.extract_strided_slice %54 {offsets = [0, 64], sizes = [8, 32], strides = [1, 1]} : vector<8x128xf32> to vector<8x32xf32>
    %68 = math.tanh %67 : vector<8x32xf32>
    %69 = vector.extract_strided_slice %54 {offsets = [0, 96], sizes = [8, 32], strides = [1, 1]} : vector<8x128xf32> to vector<8x32xf32>
    %70 = arith.negf %69 : vector<8x32xf32>
    %71 = math.exp %70 : vector<8x32xf32>
    %cst_30 = arith.constant 1.000000e+00 : f32
    %72 = vector.broadcast %cst_30 : f32 to vector<8x32xf32>
    %73 = arith.addf %72, %71 : vector<8x32xf32>
    %74 = arith.divf %72, %73 : vector<8x32xf32>
    %75 = arith.mulf %66, %14 : vector<8x32xf32>
    %76 = arith.mulf %60, %68 : vector<8x32xf32>
    %77 = arith.addf %75, %76 : vector<8x32xf32>
    %78 = math.tanh %77 : vector<8x32xf32>
    %79 = arith.mulf %74, %78 : vector<8x32xf32>
    %c1_31 = arith.constant 1 : index
    %c0_32 = arith.constant 0 : index
    %c0_33 = arith.constant 0 : index
    %80 = vector.load %arg6[%c1_31, %c0_32, %c0_33] : memref<2x8x32xf32, #tpu.memory_space<vmem>>, vector<1x8x32xf32>
    %81 = vector.shape_cast %80 : vector<1x8x32xf32> to vector<8x32xf32>
    %82 = vector.shape_cast %79 : vector<8x32xf32> to vector<1x8x32xf32>
    tpu.vector_store %arg6[%c1_31, %c0_32, %c0_33], %82 {strides = array<i32>} : memref<2x8x32xf32, #tpu.memory_space<vmem>>, vector<1x8x32xf32>,
    %c1_34 = arith.constant 1 : index
    %c0_35 = arith.constant 0 : index
    %c0_36 = arith.constant 0 : index
    %83 = vector.load %arg1[%c1_34, %c0_35, %c0_36] : memref<2x8x128xbf16, #tpu.memory_space<vmem>>, vector<1x8x128xbf16>
    %84 = vector.shape_cast %83 : vector<1x8x128xbf16> to vector<8x128xbf16>
    %85 = arith.extf %84 : vector<8x128xbf16> to vector<8x128xf32>
    %86 = arith.truncf %45 : vector<8x32xf32> to vector<8x32xbf16>
    %cst_37 = arith.constant dense<0.000000e+00> : vector<8x128xf32>
    %87 = tpu.matmul %86, %4, %cst_37 {dimension_numbers = #tpu.dot_dimension_numbers<[1], [0], [0], [1], [0, 0, 1, 1], [], []>} : vector<8x32xbf16>, vector<32x128xbf16>, vector<8x128xf32> -> vector<8x128xf32>
    %88 = arith.addf %85, %87 : vector<8x128xf32>
    %89 = vector.extract_strided_slice %88 {offsets = [0, 0], sizes = [8, 32], strides = [1, 1]} : vector<8x128xf32> to vector<8x32xf32>
    %90 = arith.negf %89 : vector<8x32xf32>
    %91 = math.exp %90 : vector<8x32xf32>
    %cst_38 = arith.constant 1.000000e+00 : f32
    %92 = vector.broadcast %cst_38 : f32 to vector<8x32xf32>
    %93 = arith.addf %92, %91 : vector<8x32xf32>
    %94 = arith.divf %92, %93 : vector<8x32xf32>
    %95 = vector.extract_strided_slice %88 {offsets = [0, 32], sizes = [8, 32], strides = [1, 1]} : vector<8x128xf32> to vector<8x32xf32>
    %96 = arith.negf %95 : vector<8x32xf32>
    %97 = math.exp %96 : vector<8x32xf32>
    %cst_39 = arith.constant 1.000000e+00 : f32
    %98 = vector.broadcast %cst_39 : f32 to vector<8x32xf32>
    %99 = arith.addf %98, %97 : vector<8x32xf32>
    %100 = arith.divf %98, %99 : vector<8x32xf32>
    %101 = vector.extract_strided_slice %88 {offsets = [0, 64], sizes = [8, 32], strides = [1, 1]} : vector<8x128xf32> to vector<8x32xf32>
    %102 = math.tanh %101 : vector<8x32xf32>
    %103 = vector.extract_strided_slice %88 {offsets = [0, 96], sizes = [8, 32], strides = [1, 1]} : vector<8x128xf32> to vector<8x32xf32>
    %104 = arith.negf %103 : vector<8x32xf32>
    %105 = math.exp %104 : vector<8x32xf32>
    %cst_40 = arith.constant 1.000000e+00 : f32
    %106 = vector.broadcast %cst_40 : f32 to vector<8x32xf32>
    %107 = arith.addf %106, %105 : vector<8x32xf32>
    %108 = arith.divf %106, %107 : vector<8x32xf32>
    %109 = arith.mulf %100, %43 : vector<8x32xf32>
    %110 = arith.mulf %94, %102 : vector<8x32xf32>
    %111 = arith.addf %109, %110 : vector<8x32xf32>
    %112 = math.tanh %111 : vector<8x32xf32>
    %113 = arith.mulf %108, %112 : vector<8x32xf32>
    %c1_41 = arith.constant 1 : index
    %c0_42 = arith.constant 0 : index
    %c0_43 = arith.constant 0 : index
    %114 = vector.load %arg5[%c1_41, %c0_42, %c0_43] : memref<2x8x32xf32, #tpu.memory_space<vmem>>, vector<1x8x32xf32>
    %115 = vector.shape_cast %114 : vector<1x8x32xf32> to vector<8x32xf32>
    %116 = vector.shape_cast %113 : vector<8x32xf32> to vector<1x8x32xf32>
    tpu.vector_store %arg5[%c1_41, %c0_42, %c0_43], %116 {strides = array<i32>} : memref<2x8x32xf32, #tpu.memory_space<vmem>>, vector<1x8x32xf32>,
    %c0_44 = arith.constant 0 : index
    %c0_45 = arith.constant 0 : index
    %c0_46 = arith.constant 0 : index
    %117 = vector.load %arg2[%c0_44, %c0_45, %c0_46] : memref<2x8x128xbf16, #tpu.memory_space<vmem>>, vector<1x8x128xbf16>
    %118 = vector.shape_cast %117 : vector<1x8x128xbf16> to vector<8x128xbf16>
    %119 = arith.extf %118 : vector<8x128xbf16> to vector<8x128xf32>
    %120 = arith.truncf %79 : vector<8x32xf32> to vector<8x32xbf16>
    %cst_47 = arith.constant dense<0.000000e+00> : vector<8x128xf32>
    %121 = tpu.matmul %120, %6, %cst_47 {dimension_numbers = #tpu.dot_dimension_numbers<[1], [0], [0], [1], [0, 0, 1, 1], [], []>} : vector<8x32xbf16>, vector<32x128xbf16>, vector<8x128xf32> -> vector<8x128xf32>
    %122 = arith.addf %119, %121 : vector<8x128xf32>
    %123 = vector.extract_strided_slice %122 {offsets = [0, 0], sizes = [8, 32], strides = [1, 1]} : vector<8x128xf32> to vector<8x32xf32>
    %124 = arith.negf %123 : vector<8x32xf32>
    %125 = math.exp %124 : vector<8x32xf32>
    %cst_48 = arith.constant 1.000000e+00 : f32
    %126 = vector.broadcast %cst_48 : f32 to vector<8x32xf32>
    %127 = arith.addf %126, %125 : vector<8x32xf32>
    %128 = arith.divf %126, %127 : vector<8x32xf32>
    %129 = vector.extract_strided_slice %122 {offsets = [0, 32], sizes = [8, 32], strides = [1, 1]} : vector<8x128xf32> to vector<8x32xf32>
    %130 = arith.negf %129 : vector<8x32xf32>
    %131 = math.exp %130 : vector<8x32xf32>
    %cst_49 = arith.constant 1.000000e+00 : f32
    %132 = vector.broadcast %cst_49 : f32 to vector<8x32xf32>
    %133 = arith.addf %132, %131 : vector<8x32xf32>
    %134 = arith.divf %132, %133 : vector<8x32xf32>
    %135 = vector.extract_strided_slice %122 {offsets = [0, 64], sizes = [8, 32], strides = [1, 1]} : vector<8x128xf32> to vector<8x32xf32>
    %136 = math.tanh %135 : vector<8x32xf32>
    %137 = vector.extract_strided_slice %122 {offsets = [0, 96], sizes = [8, 32], strides = [1, 1]} : vector<8x128xf32> to vector<8x32xf32>
    %138 = arith.negf %137 : vector<8x32xf32>
    %139 = math.exp %138 : vector<8x32xf32>
    %cst_50 = arith.constant 1.000000e+00 : f32
    %140 = vector.broadcast %cst_50 : f32 to vector<8x32xf32>
    %141 = arith.addf %140, %139 : vector<8x32xf32>
    %142 = arith.divf %140, %141 : vector<8x32xf32>
    %143 = arith.mulf %134, %77 : vector<8x32xf32>
    %144 = arith.mulf %128, %136 : vector<8x32xf32>
    %145 = arith.addf %143, %144 : vector<8x32xf32>
    %146 = math.tanh %145 : vector<8x32xf32>
    %147 = arith.mulf %142, %146 : vector<8x32xf32>
    %c0_51 = arith.constant 0 : index
    %c0_52 = arith.constant 0 : index
    %c0_53 = arith.constant 0 : index
    %148 = vector.load %arg6[%c0_51, %c0_52, %c0_53] : memref<2x8x32xf32, #tpu.memory_space<vmem>>, vector<1x8x32xf32>
    %149 = vector.shape_cast %148 : vector<1x8x32xf32> to vector<8x32xf32>
    %150 = vector.shape_cast %147 : vector<8x32xf32> to vector<1x8x32xf32>
    tpu.vector_store %arg6[%c0_51, %c0_52, %c0_53], %150 {strides = array<i32>} : memref<2x8x32xf32, #tpu.memory_space<vmem>>, vector<1x8x32xf32>,
    %c0_54 = arith.constant 0 : index
    %c0_55 = arith.constant 0 : index
    %c0_56 = arith.constant 0 : index
    %151 = vector.load %arg7[%c0_54, %c0_55, %c0_56] : memref<2x8x32xf32, #tpu.memory_space<vmem>>, vector<1x8x32xf32>
    %152 = vector.shape_cast %151 : vector<1x8x32xf32> to vector<8x32xf32>
    %153 = vector.shape_cast %113 : vector<8x32xf32> to vector<1x8x32xf32>
    tpu.vector_store %arg7[%c0_54, %c0_55, %c0_56], %153 {strides = array<i32>} : memref<2x8x32xf32, #tpu.memory_space<vmem>>, vector<1x8x32xf32>,
    %c0_57 = arith.constant 0 : index
    %c0_58 = arith.constant 0 : index
    %c0_59 = arith.constant 0 : index
    %154 = vector.load %arg8[%c0_57, %c0_58, %c0_59] : memref<2x8x32xf32, #tpu.memory_space<vmem>>, vector<1x8x32xf32>
    %155 = vector.shape_cast %154 : vector<1x8x32xf32> to vector<8x32xf32>
    %156 = vector.shape_cast %111 : vector<8x32xf32> to vector<1x8x32xf32>
    tpu.vector_store %arg8[%c0_57, %c0_58, %c0_59], %156 {strides = array<i32>} : memref<2x8x32xf32, #tpu.memory_space<vmem>>, vector<1x8x32xf32>,
    %c1_60 = arith.constant 1 : index
    %c0_61 = arith.constant 0 : index
    %c0_62 = arith.constant 0 : index
    %157 = vector.load %arg7[%c1_60, %c0_61, %c0_62] : memref<2x8x32xf32, #tpu.memory_space<vmem>>, vector<1x8x32xf32>
    %158 = vector.shape_cast %157 : vector<1x8x32xf32> to vector<8x32xf32>
    %159 = vector.shape_cast %147 : vector<8x32xf32> to vector<1x8x32xf32>
    tpu.vector_store %arg7[%c1_60, %c0_61, %c0_62], %159 {strides = array<i32>} : memref<2x8x32xf32, #tpu.memory_space<vmem>>, vector<1x8x32xf32>,
    %c1_63 = arith.constant 1 : index
    %c0_64 = arith.constant 0 : index
    %c0_65 = arith.constant 0 : index
    %160 = vector.load %arg8[%c1_63, %c0_64, %c0_65] : memref<2x8x32xf32, #tpu.memory_space<vmem>>, vector<1x8x32xf32>
    %161 = vector.shape_cast %160 : vector<1x8x32xf32> to vector<8x32xf32>
    %162 = vector.shape_cast %145 : vector<8x32xf32> to vector<1x8x32xf32>
    tpu.vector_store %arg8[%c1_63, %c0_64, %c0_65], %162 {strides = array<i32>} : memref<2x8x32xf32, #tpu.memory_space<vmem>>, vector<1x8x32xf32>,
    return
  }
  func.func @transform_0(%arg0: i32) -> (i32, i32, i32) {
    %c0_i32 = arith.constant 0 : i32
    %c0_i32_0 = arith.constant 0 : i32
    %c0_i32_1 = arith.constant 0 : i32
    return %arg0, %c0_i32, %c0_i32_0 : i32, i32, i32
  }
  func.func @transform_1(%arg0: i32) -> (i32, i32, i32) {
    %c0_i32 = arith.constant 0 : i32
    %0 = arith.subi %c0_i32, %arg0 : i32
    %c0_i32_0 = arith.constant 0 : i32
    %c0_i32_1 = arith.constant 0 : i32
    %c0_i32_2 = arith.constant 0 : i32
    return %0, %c0_i32_0, %c0_i32_1 : i32, i32, i32
  }
  func.func @transform_2(%arg0: i32) -> (i32, i32) {
    %c0_i32 = arith.constant 0 : i32
    %c0_i32_0 = arith.constant 0 : i32
    %c0_i32_1 = arith.constant 0 : i32
    return %c0_i32, %c0_i32_0 : i32, i32
  }
  func.func @transform_3(%arg0: i32) -> (i32, i32) {
    %c0_i32 = arith.constant 0 : i32
    %c0_i32_0 = arith.constant 0 : i32
    %c0_i32_1 = arith.constant 0 : i32
    return %c0_i32, %c0_i32_0 : i32, i32
  }
  func.func @transform_4(%arg0: i32) -> (i32, i32, i32) {
    %c0_i32 = arith.constant 0 : i32
    %c0_i32_0 = arith.constant 0 : i32
    %c0_i32_1 = arith.constant 0 : i32
    return %arg0, %c0_i32, %c0_i32_0 : i32, i32, i32
  }
  func.func @transform_5(%arg0: i32) -> (i32, i32, i32) {
    %c0_i32 = arith.constant 0 : i32
    %0 = arith.subi %c0_i32, %arg0 : i32
    %c0_i32_0 = arith.constant 0 : i32
    %c0_i32_1 = arith.constant 0 : i32
    %c0_i32_2 = arith.constant 0 : i32
    return %0, %c0_i32_0, %c0_i32_1 : i32, i32, i32
  }
}

module attributes {stable_mosaic.version = 11 : i64} {
  func.func @dual_matmul_bias_kernel(%arg0: i32, %arg1: memref<16x64xf32, #tpu.memory_space<vmem>>, %arg2: memref<64x128xf32, #tpu.memory_space<vmem>>, %arg3: memref<1x128xf32, #tpu.memory_space<vmem>>, %arg4: memref<16x64xf32, #tpu.memory_space<vmem>>, %arg5: memref<16x64xf32, #tpu.memory_space<vmem>>) attributes {dimension_semantics = [#tpu.dimension_semantics<parallel>], iteration_bounds = array<i64: 1>, scalar_prefetch = 0 : i64, scratch_operands = 0 : i64, tpu.core_type = #tpu.core_type<tc>, window_params = [{transform_indices = @transform_0, window_bounds = array<i64: 16, 64>}, {pipeline_mode = #tpu.pipeline_mode<synchronous>, transform_indices = @transform_1, window_bounds = array<i64: 64, 128>}, {pipeline_mode = #tpu.pipeline_mode<synchronous>, transform_indices = @transform_2, window_bounds = array<i64: 1, 128>}, {transform_indices = @transform_3, window_bounds = array<i64: 16, 64>}, {transform_indices = @transform_4, window_bounds = array<i64: 16, 64>}]} {
    %c0 = arith.constant 0 : index
    %c0_0 = arith.constant 0 : index
    %0 = vector.load %arg1[%c0, %c0_0] : memref<16x64xf32, #tpu.memory_space<vmem>>, vector<16x64xf32>
    %1 = arith.truncf %0 : vector<16x64xf32> to vector<16x64xbf16>
    %c0_1 = arith.constant 0 : index
    %c0_2 = arith.constant 0 : index
    %2 = vector.load %arg2[%c0_1, %c0_2] : memref<64x128xf32, #tpu.memory_space<vmem>>, vector<64x128xf32>
    %3 = arith.truncf %2 : vector<64x128xf32> to vector<64x128xbf16>
    %cst = arith.constant dense<0.000000e+00> : vector<16x128xf32>
    %4 = tpu.matmul %1, %3, %cst {dimension_numbers = #tpu.dot_dimension_numbers<[1], [0], [0], [1], [0, 0, 1, 1], [], []>} : vector<16x64xbf16>, vector<64x128xbf16>, vector<16x128xf32> -> vector<16x128xf32>
    %c0_3 = arith.constant 0 : index
    %c0_4 = arith.constant 0 : index
    %5 = vector.load %arg3[%c0_3, %c0_4] : memref<1x128xf32, #tpu.memory_space<vmem>>, vector<1x128xf32>
    %6 = vector.broadcast %5 : vector<1x128xf32> to vector<16x128xf32>
    %7 = arith.addf %4, %6 : vector<16x128xf32>
    %cst_5 = arith.constant 0.000000e+00 : f32
    %8 = vector.broadcast %cst_5 : f32 to vector<16x128xf32>
    %9 = arith.cmpf ogt, %7, %8 : vector<16x128xf32>
    %cst_6 = arith.constant 0.000000e+00 : f32
    %10 = vector.broadcast %cst_6 : f32 to vector<16x128xf32>
    %11 = arith.minimumf %7, %10 : vector<16x128xf32>
    %12 = math.exp %11 : vector<16x128xf32>
    %cst_7 = arith.constant 1.000000e+00 : f32
    %13 = vector.broadcast %cst_7 : f32 to vector<16x128xf32>
    %14 = arith.subf %12, %13 : vector<16x128xf32>
    %cst_8 = arith.constant 1.67326319 : f32
    %15 = vector.broadcast %cst_8 : f32 to vector<16x128xf32>
    %16 = arith.mulf %15, %14 : vector<16x128xf32>
    %17 = arith.select %9, %7, %16 : vector<16x128xi1>, vector<16x128xf32>
    %cst_9 = arith.constant 1.05070102 : f32
    %18 = vector.broadcast %cst_9 : f32 to vector<16x128xf32>
    %19 = arith.mulf %18, %17 : vector<16x128xf32>
    %20 = vector.extract_strided_slice %19 {offsets = [0, 0], sizes = [16, 64], strides = [1, 1]} : vector<16x128xf32> to vector<16x64xf32>
    %c0_10 = arith.constant 0 : index
    %c0_11 = arith.constant 0 : index
    %21 = vector.load %arg4[%c0_10, %c0_11] : memref<16x64xf32, #tpu.memory_space<vmem>>, vector<16x64xf32>
    tpu.vector_store %arg4[%c0_10, %c0_11], %20 {strides = array<i32>} : memref<16x64xf32, #tpu.memory_space<vmem>>, vector<16x64xf32>,
    %22 = vector.extract_strided_slice %19 {offsets = [0, 64], sizes = [16, 64], strides = [1, 1]} : vector<16x128xf32> to vector<16x64xf32>
    %c0_12 = arith.constant 0 : index
    %c0_13 = arith.constant 0 : index
    %23 = vector.load %arg5[%c0_12, %c0_13] : memref<16x64xf32, #tpu.memory_space<vmem>>, vector<16x64xf32>
    tpu.vector_store %arg5[%c0_12, %c0_13], %22 {strides = array<i32>} : memref<16x64xf32, #tpu.memory_space<vmem>>, vector<16x64xf32>,
    return
  }
  func.func @transform_0(%arg0: i32) -> (i32, i32) {
    %c0_i32 = arith.constant 0 : i32
    %c0_i32_0 = arith.constant 0 : i32
    return %arg0, %c0_i32 : i32, i32
  }
  func.func @transform_1(%arg0: i32) -> (i32, i32) {
    %c0_i32 = arith.constant 0 : i32
    %c0_i32_0 = arith.constant 0 : i32
    %c0_i32_1 = arith.constant 0 : i32
    return %c0_i32, %c0_i32_0 : i32, i32
  }
  func.func @transform_2(%arg0: i32) -> (i32, i32) {
    %c0_i32 = arith.constant 0 : i32
    %c0_i32_0 = arith.constant 0 : i32
    %c0_i32_1 = arith.constant 0 : i32
    return %c0_i32, %c0_i32_0 : i32, i32
  }
  func.func @transform_3(%arg0: i32) -> (i32, i32) {
    %c0_i32 = arith.constant 0 : i32
    %c0_i32_0 = arith.constant 0 : i32
    return %arg0, %c0_i32 : i32, i32
  }
  func.func @transform_4(%arg0: i32) -> (i32, i32) {
    %c0_i32 = arith.constant 0 : i32
    %c0_i32_0 = arith.constant 0 : i32
    return %arg0, %c0_i32 : i32, i32
  }
}

</mosaic_0001>

<bundles_post_ra>
// kernel: encoder_forward.9
= control target key start
LH: loop header
LB: loop body
LE: loop exit
PB: predicated region body
PF: predicated region fallthrough
CT: control target
= control target key end

     0   :  { %vm88_vm0 = vcmask 1043456   ;;  %vm63_vm1 = vcmask 326656   ;;  %s587_s1 = inlined_call_operand.vmem [shape: f32[40,256], index: 1, kind: input, shape index: {}]   ;;  %s588_s0 = inlined_call_operand.vmem [shape: f32[128,40], index: 0, kind: input, shape index: {}]   ;;  %s589_s2 = inlined_call_operand.vmem [shape: f32[1,256], index: 2, kind: input, shape index: {}]   ;;  %s590_s3 = inlined_call_operand.vmem [shape: bf16[128,128], index: 3, kind: output, shape index: {0}]   ;;  %s591_s4 = inlined_call_operand.vmem [shape: bf16[128,128], index: 4, kind: output, shape index: {1}]  }
   0x1   :  { %v49_v0 = vld [vmem:[%s587_s1 + $0x40] sm:$0xff]  ;;  %v50_v1 = vld [vmem:[%s587_s1 + $0x48] sm:$0xff]  ;;  %v47_v5 = vld [vmem:[%s587_s1 + $0x30] sm:$0xff] }
   0x2   :  { %v55_v2 = vpack.c.bf16 %v49_v0, %v49_v0  ;;  %v56_v3 = vpack.c.bf16 %v50_v1, %v50_v1  ;;  %v45_v4 = vld [vmem:[%s587_s1 + $0x20] sm:$0xff]  ;;  %v46_v6 = vld [vmem:[%s587_s1 + $0x28] sm:$0xff]  ;;  %v48_v7 = vld [vmem:[%s587_s1 + $0x38] sm:$0xff] }
   0x3   :  { %v53_v10 = vpack.c.bf16 %v47_v5, %v45_v4  ;;  %v54_v11 = vpack.c.bf16 %v48_v7, %v46_v6  ;;  %v41_v12 = vld [vmem:[%s587_s1] sm:$0xff]  ;;  %v43_v13 = vld [vmem:[%s587_s1 + $0x10] sm:$0xff]  ;;  %v42_v14 = vld [vmem:[%s587_s1 + $0x8] sm:$0xff] }
   0x4   :  { %v90_v8 = vsel %vm88_vm0, %v55_v2, 0  ;;  %v93_v9 = vsel %vm88_vm0, %v56_v3, 0  ;;  %v44_v15 = vld [vmem:[%s587_s1 + $0x18] sm:$0xff]  ;;  %v17_v16 = vld [vmem:[%s588_s0] sm:$0xff]  ;;  %v51_v17 = vpack.c.bf16 %v43_v13, %v41_v12  ;;  %v18_v18 = vld [vmem:[%s588_s0 + $0x8] sm:$0xff] }
   0x5   :  { %100 = vmatpush.bf16.msra.mxu0 %v90_v8  ;;  %375 = vmatpush.bf16.msra.mxu2 %v90_v8  ;;  %v25_v19 = vld [vmem:[%s588_s0 + $0x40] sm:$0xff]  ;;  %v26_v20 = vld [vmem:[%s588_s0 + $0x48] sm:$0xff]  ;;  %v52_v21 = vpack.c.bf16 %v44_v15, %v42_v14  ;;  %v33_v22 = vpack.c.bf16 %v18_v18, %v17_v16  ;;  %v19_v24 = vld [vmem:[%s588_s0 + $0x10] sm:$0xff] }
   0x6   :  { %149 = vmatpush.bf16.msra.mxu1 %v93_v9  ;;  %378 = vmatpush.bf16.msra.mxu3 %v93_v9  ;;  %v37_v23 = vpack.c.bf16 %v26_v20, %v25_v19  ;;  %v20_v25 = vld [vmem:[%s588_s0 + $0x18] sm:$0xff]  ;;  %v27_v26 = vld [vmem:[%s588_s0 + $0x50] sm:$0xff]  ;;  %v21_v30 = vld [vmem:[%s588_s0 + $0x20] sm:$0xff] }
   0x7   :  { %v28_v27 = vld [vmem:[%s588_s0 + $0x58] sm:$0xff]  ;;  %v34_v28 = vpack.c.bf16 %v20_v25, %v19_v24  ;;  %v22_v31 = vld [vmem:[%s588_s0 + $0x28] sm:$0xff]  ;;  %v29_v32 = vld [vmem:[%s588_s0 + $0x60] sm:$0xff] }
   0x8   :  { %v38_v29 = vpack.c.bf16 %v28_v27, %v27_v26  ;;  %v30_v33 = vld [vmem:[%s588_s0 + $0x68] sm:$0xff]  ;;  %v35_v34 = vpack.c.bf16 %v22_v31, %v21_v30  ;;  %v23_v36 = vld [vmem:[%s588_s0 + $0x30] sm:$0xff]  ;;  %v24_v37 = vld [vmem:[%s588_s0 + $0x38] sm:$0xff] }
   0x9   :  { %101 = vmatpush.bf16.msra.mxu0 %v53_v10  ;;  %376 = vmatpush.bf16.msra.mxu2 %v53_v10  ;;  %v39_v35 = vpack.c.bf16 %v30_v33, %v29_v32  ;;  %v31_v38 = vld [vmem:[%s588_s0 + $0x70] sm:$0xff]  ;;  %v32_v39 = vld [vmem:[%s588_s0 + $0x78] sm:$0xff]  ;;  %v36_v40 = vpack.c.bf16 %v24_v37, %v23_v36  ;;  %v57_v44 = vld [vmem:[%s589_s2] sm:$0x3] }
   0xa   :  { %150 = vmatpush.bf16.msra.mxu1 %v54_v11  ;;  %379 = vmatpush.bf16.msra.mxu3 %v54_v11  ;;  %v40_v41 = vpack.c.bf16 %v32_v39, %v31_v38  ;;  %v503_v45 = vperm.slane %v57_v44, 0  ;;  %v505_v46 = vperm.slane %v57_v44, 1 }
   0xd   :  { %102 = vmatpush.bf16.msra.mxu0 %v51_v17  ;;  %377 = vmatpush.bf16.msra.mxu2 %v51_v17 }
   0xe   :  { %151 = vmatpush.bf16.msra.mxu1 %v52_v21  ;;  %380 = vmatpush.bf16.msra.mxu3 %v52_v21 }
  0x10   :  { %265 = vmatmul.msk.bf16.vlgmr.msra.gmra.mxu0 %vm63_vm1, %v33_v22  ;;  %269 = vmatmul.msk.bf16.vlgmr.msra.gmra.mxu2 %vm63_vm1, %v37_v23 }
  0x11   :  { %273 = vmatmul.msk.bf16.vlgmr.msra.gmra.mxu1 %vm63_vm1, %v33_v22  ;;  %277 = vmatmul.msk.bf16.vlgmr.msra.gmra.mxu3 %vm63_vm1, %v37_v23 }
  0x20   :  { %266 = vmatmul.msk.bf16.gmra.mxu0 %vm63_vm1, %v34_v28  ;;  %270 = vmatmul.msk.bf16.gmra.mxu2 %vm63_vm1, %v38_v29 }
  0x21   :  { %274 = vmatmul.msk.bf16.gmra.mxu1 %vm63_vm1, %v34_v28  ;;  %278 = vmatmul.msk.bf16.gmra.mxu3 %vm63_vm1, %v38_v29 }
  0x30   :  { %267 = vmatmul.msk.bf16.gmra.mxu0 %vm63_vm1, %v35_v34  ;;  %271 = vmatmul.msk.bf16.gmra.mxu2 %vm63_vm1, %v39_v35 }
  0x31   :  { %275 = vmatmul.msk.bf16.gmra.mxu1 %vm63_vm1, %v35_v34  ;;  %279 = vmatmul.msk.bf16.gmra.mxu3 %vm63_vm1, %v39_v35 }
  0x40   :  { %268 = vmatmul.msk.bf16.gmra.mxu0 %vm63_vm1, %v36_v40  ;;  %272 = vmatmul.msk.bf16.gmra.mxu2 %vm63_vm1, %v40_v41 }
  0x41   :  { %276 = vmatmul.msk.bf16.gmra.mxu1 %vm63_vm1, %v36_v40  ;;  %280 = vmatmul.msk.bf16.gmra.mxu3 %vm63_vm1, %v40_v41 }
  0x8d   :  { %v104_v42 = vpop.f32.mrf.mxu0 }
  0x8e   :  { %v153_v43 = vpop.f32.mrf.mxu1  ;;  %v105_v50 = vadd.f32 %v104_v42, %v503_v45 }
  0x8f   :  { %v154_v53 = vadd.f32 %v153_v43, %v505_v46 }
  0x93   :  { %v124_v47 = vpop.f32.mrf.mxu2 }
  0x94   :  { %v173_v48 = vpop.f32.mrf.mxu3  ;;  %v125_v58 = vadd.f32 %v124_v47, %v503_v45 }
  0x95   :  { %v106_v49 = vpop.f32.mrf.mxu0  ;;  %v174_v61 = vadd.f32 %v173_v48, %v505_v46 }
  0x96   :  { %v107_v51 = vadd.f32 %v106_v49, %v503_v45  ;;  %v155_v52 = vpop.f32.mrf.mxu1 }
  0x97   :  { %v156_v54 = vadd.f32 %v155_v52, %v505_v46 }
  0x98   :  { %v284_v55 = vpack.c.bf16 %v107_v51, %v105_v50 }
  0x99   :  { %v324_v56 = vpack.c.bf16 %v156_v54, %v154_v53 }
  0x9a   :  { %285 = vst [vmem:[%s590_s3] sm:$0xff] %v284_v55  }
  0x9b   :  { %325 = vst [vmem:[%s591_s4] sm:$0xff] %v324_v56   ;;  %v126_v57 = vpop.f32.mrf.mxu2 }
  0x9c   :  { %v127_v59 = vadd.f32 %v126_v57, %v503_v45  ;;  %v175_v60 = vpop.f32.mrf.mxu3 }
  0x9d   :  { %v176_v62 = vadd.f32 %v175_v60, %v505_v46  ;;  %v109_v63 = vpop.f32.mrf.mxu0 }
  0x9e   :  { %v304_v0 = vpack.c.bf16 %v127_v59, %v125_v58  ;;  %v158_v1 = vpop.f32.mrf.mxu1  ;;  %v110_v6 = vadd.f32 %v109_v63, %v503_v45 }
  0x9f   :  { %v344_v2 = vpack.c.bf16 %v176_v62, %v174_v61  ;;  %v159_v9 = vadd.f32 %v158_v1, %v505_v46 }
  0xa0   :  { %364 = vst [vmem:[%s590_s3 + $0x20] sm:$0xff] %v304_v0  }
  0xa1   :  { %371 = vst [vmem:[%s591_s4 + $0x20] sm:$0xff] %v344_v2  }
  0xa3   :  { %v129_v3 = vpop.f32.mrf.mxu2 }
  0xa4   :  { %v178_v4 = vpop.f32.mrf.mxu3  ;;  %v130_v14 = vadd.f32 %v129_v3, %v503_v45 }
  0xa5   :  { %v111_v5 = vpop.f32.mrf.mxu0  ;;  %v179_v17 = vadd.f32 %v178_v4, %v505_v46 }
  0xa6   :  { %v112_v7 = vadd.f32 %v111_v5, %v503_v45  ;;  %v160_v8 = vpop.f32.mrf.mxu1 }
  0xa7   :  { %v161_v10 = vadd.f32 %v160_v8, %v505_v46 }
  0xa8   :  { %v289_v11 = vpack.c.bf16 %v112_v7, %v110_v6 }
  0xa9   :  { %v329_v12 = vpack.c.bf16 %v161_v10, %v159_v9 }
  0xaa   :  { %361 = vst [vmem:[%s590_s3 + $0x8] sm:$0xff] %v289_v11  }
  0xab   :  { %368 = vst [vmem:[%s591_s4 + $0x8] sm:$0xff] %v329_v12   ;;  %v131_v13 = vpop.f32.mrf.mxu2 }
  0xac   :  { %v132_v15 = vadd.f32 %v131_v13, %v503_v45  ;;  %v180_v16 = vpop.f32.mrf.mxu3 }
  0xad   :  { %v181_v18 = vadd.f32 %v180_v16, %v505_v46  ;;  %v114_v19 = vpop.f32.mrf.mxu0 }
  0xae   :  { %v309_v20 = vpack.c.bf16 %v132_v15, %v130_v14  ;;  %v163_v21 = vpop.f32.mrf.mxu1  ;;  %v115_v26 = vadd.f32 %v114_v19, %v503_v45 }
  0xaf   :  { %v349_v22 = vpack.c.bf16 %v181_v18, %v179_v17  ;;  %v164_v29 = vadd.f32 %v163_v21, %v505_v46 }
  0xb0   :  { %365 = vst [vmem:[%s590_s3 + $0x28] sm:$0xff] %v309_v20  }
  0xb1   :  { %372 = vst [vmem:[%s591_s4 + $0x28] sm:$0xff] %v349_v22  }
  0xb3   :  { %v134_v23 = vpop.f32.mrf.mxu2 }
  0xb4   :  { %v183_v24 = vpop.f32.mrf.mxu3  ;;  %v135_v34 = vadd.f32 %v134_v23, %v503_v45 }
  0xb5   :  { %v116_v25 = vpop.f32.mrf.mxu0  ;;  %v184_v37 = vadd.f32 %v183_v24, %v505_v46 }
  0xb6   :  { %v117_v27 = vadd.f32 %v116_v25, %v503_v45  ;;  %v165_v28 = vpop.f32.mrf.mxu1 }
  0xb7   :  { %v166_v30 = vadd.f32 %v165_v28, %v505_v46 }
  0xb8   :  { %v294_v31 = vpack.c.bf16 %v117_v27, %v115_v26 }
  0xb9   :  { %v334_v32 = vpack.c.bf16 %v166_v30, %v164_v29 }
  0xba   :  { %362 = vst [vmem:[%s590_s3 + $0x10] sm:$0xff] %v294_v31  }
  0xbb   :  { %369 = vst [vmem:[%s591_s4 + $0x10] sm:$0xff] %v334_v32   ;;  %v136_v33 = vpop.f32.mrf.mxu2 }
  0xbc   :  { %v137_v35 = vadd.f32 %v136_v33, %v503_v45  ;;  %v185_v36 = vpop.f32.mrf.mxu3 }
  0xbd   :  { %v186_v38 = vadd.f32 %v185_v36, %v505_v46  ;;  %v119_v39 = vpop.f32.mrf.mxu0 }
  0xbe   :  { %v314_v40 = vpack.c.bf16 %v137_v35, %v135_v34  ;;  %v168_v41 = vpop.f32.mrf.mxu1  ;;  %v120_v48 = vadd.f32 %v119_v39, %v503_v45 }
  0xbf   :  { %v354_v42 = vpack.c.bf16 %v186_v38, %v184_v37  ;;  %v169_v51 = vadd.f32 %v168_v41, %v505_v46 }
  0xc0   :  { %366 = vst [vmem:[%s590_s3 + $0x30] sm:$0xff] %v314_v40  }
  0xc1   :  { %373 = vst [vmem:[%s591_s4 + $0x30] sm:$0xff] %v354_v42  }
  0xc3   :  { %v139_v43 = vpop.f32.mrf.mxu2 }
  0xc4   :  { %v188_v44 = vpop.f32.mrf.mxu3  ;;  %v140_v56 = vadd.f32 %v139_v43, %v503_v45 }
  0xc5   :  { %v121_v47 = vpop.f32.mrf.mxu0  ;;  %v189_v59 = vadd.f32 %v188_v44, %v505_v46 }
  0xc6   :  { %v122_v49 = vadd.f32 %v121_v47, %v503_v45  ;;  %v170_v50 = vpop.f32.mrf.mxu1 }
  0xc7   :  { %v171_v52 = vadd.f32 %v170_v50, %v505_v46 }
  0xc8   :  { %v299_v53 = vpack.c.bf16 %v122_v49, %v120_v48 }
  0xc9   :  { %v339_v54 = vpack.c.bf16 %v171_v52, %v169_v51 }
  0xca   :  { %363 = vst [vmem:[%s590_s3 + $0x18] sm:$0xff] %v299_v53  }
  0xcb   :  { %370 = vst [vmem:[%s591_s4 + $0x18] sm:$0xff] %v339_v54   ;;  %v141_v55 = vpop.f32.mrf.mxu2 }
  0xcc   :  { %v142_v57 = vadd.f32 %v141_v55, %v503_v45  ;;  %v190_v58 = vpop.f32.mrf.mxu3 }
  0xcd   :  { %v191_v60 = vadd.f32 %v190_v58, %v505_v46 }
  0xce   :  { %v319_v61 = vpack.c.bf16 %v142_v57, %v140_v56 }
  0xcf   :  { %v359_v62 = vpack.c.bf16 %v191_v60, %v189_v59 }
  0xd0   :  { %367 = vst [vmem:[%s590_s3 + $0x38] sm:$0xff] %v319_v61  }
  0xd1   :  { %374 = vst [vmem:[%s591_s4 + $0x38] sm:$0xff] %v359_v62  }

// kernel: encoder_forward.11
= control target key start
LH: loop header
LB: loop body
LE: loop exit
PB: predicated region body
PF: predicated region fallthrough
CT: control target
= control target key end

     0   :  { %s414_s1 = inlined_call_operand.vmem [shape: f32[128,256], index: 1, kind: input, shape index: {}]   ;;  %s415_s0 = inlined_call_operand.vmem [shape: f32[64,128], index: 0, kind: input, shape index: {}]   ;;  %s416_s2 = inlined_call_operand.vmem [shape: f32[1,256], index: 2, kind: input, shape index: {}]   ;;  %s417_s3 = inlined_call_operand.vmem [shape: bf16[64,128], index: 3, kind: output, shape index: {0}]   ;;  %s418_s4 = inlined_call_operand.vmem [shape: bf16[64,128], index: 4, kind: output, shape index: {1}]  }
   0x1   :  { %v56_v0 = vld [vmem:[%s414_s1 + $0xe0] sm:$0xff]  ;;  %v58_v1 = vld [vmem:[%s414_s1 + $0xf0] sm:$0xff]  ;;  %v57_v2 = vld [vmem:[%s414_s1 + $0xe8] sm:$0xff] }
   0x2   :  { %v74_v3 = vpack.c.bf16 %v58_v1, %v56_v0  ;;  %v59_v4 = vld [vmem:[%s414_s1 + $0xf8] sm:$0xff]  ;;  %v52_v5 = vld [vmem:[%s414_s1 + $0xc0] sm:$0xff]  ;;  %v54_v6 = vld [vmem:[%s414_s1 + $0xd0] sm:$0xff] }
   0x3   :  { %v75_v7 = vpack.c.bf16 %v59_v4, %v57_v2  ;;  %v53_v8 = vld [vmem:[%s414_s1 + $0xc8] sm:$0xff]  ;;  %v55_v9 = vld [vmem:[%s414_s1 + $0xd8] sm:$0xff]  ;;  %v72_v10 = vpack.c.bf16 %v54_v6, %v52_v5  ;;  %v48_v12 = vld [vmem:[%s414_s1 + $0xa0] sm:$0xff] }
   0x4   :  { %82 = vmatpush.bf16.msra.mxu0 %v74_v3  ;;  %226 = vmatpush.bf16.msra.mxu2 %v74_v3  ;;  %v73_v11 = vpack.c.bf16 %v55_v9, %v53_v8  ;;  %v50_v13 = vld [vmem:[%s414_s1 + $0xb0] sm:$0xff]  ;;  %v49_v14 = vld [vmem:[%s414_s1 + $0xa8] sm:$0xff]  ;;  %v51_v15 = vld [vmem:[%s414_s1 + $0xb8] sm:$0xff] }
   0x5   :  { %111 = vmatpush.bf16.msra.mxu1 %v75_v7  ;;  %234 = vmatpush.bf16.msra.mxu3 %v75_v7  ;;  %v70_v16 = vpack.c.bf16 %v50_v13, %v48_v12  ;;  %v71_v17 = vpack.c.bf16 %v51_v15, %v49_v14  ;;  %v44_v18 = vld [vmem:[%s414_s1 + $0x80] sm:$0xff]  ;;  %v46_v19 = vld [vmem:[%s414_s1 + $0x90] sm:$0xff]  ;;  %v45_v20 = vld [vmem:[%s414_s1 + $0x88] sm:$0xff] }
   0x6   :  { %v47_v21 = vld [vmem:[%s414_s1 + $0x98] sm:$0xff]  ;;  %v68_v22 = vpack.c.bf16 %v46_v19, %v44_v18  ;;  %v40_v24 = vld [vmem:[%s414_s1 + $0x60] sm:$0xff]  ;;  %v42_v25 = vld [vmem:[%s414_s1 + $0x70] sm:$0xff] }
   0x7   :  { %v69_v23 = vpack.c.bf16 %v47_v21, %v45_v20  ;;  %v41_v26 = vld [vmem:[%s414_s1 + $0x68] sm:$0xff]  ;;  %v43_v27 = vld [vmem:[%s414_s1 + $0x78] sm:$0xff]  ;;  %v66_v28 = vpack.c.bf16 %v42_v25, %v40_v24  ;;  %v36_v30 = vld [vmem:[%s414_s1 + $0x40] sm:$0xff] }
   0x8   :  { %83 = vmatpush.bf16.msra.mxu0 %v72_v10  ;;  %227 = vmatpush.bf16.msra.mxu2 %v72_v10  ;;  %v67_v29 = vpack.c.bf16 %v43_v27, %v41_v26  ;;  %v38_v31 = vld [vmem:[%s414_s1 + $0x50] sm:$0xff]  ;;  %v37_v32 = vld [vmem:[%s414_s1 + $0x48] sm:$0xff]  ;;  %v39_v33 = vld [vmem:[%s414_s1 + $0x58] sm:$0xff] }
   0x9   :  { %112 = vmatpush.bf16.msra.mxu1 %v73_v11  ;;  %235 = vmatpush.bf16.msra.mxu3 %v73_v11  ;;  %v64_v34 = vpack.c.bf16 %v38_v31, %v36_v30  ;;  %v65_v35 = vpack.c.bf16 %v39_v33, %v37_v32  ;;  %v32_v36 = vld [vmem:[%s414_s1 + $0x20] sm:$0xff]  ;;  %v34_v37 = vld [vmem:[%s414_s1 + $0x30] sm:$0xff]  ;;  %v33_v38 = vld [vmem:[%s414_s1 + $0x28] sm:$0xff] }
   0xa   :  { %v35_v39 = vld [vmem:[%s414_s1 + $0x38] sm:$0xff]  ;;  %v62_v40 = vpack.c.bf16 %v34_v37, %v32_v36  ;;  %v28_v42 = vld [vmem:[%s414_s1] sm:$0xff]  ;;  %v30_v43 = vld [vmem:[%s414_s1 + $0x10] sm:$0xff] }
   0xb   :  { %v63_v41 = vpack.c.bf16 %v35_v39, %v33_v38  ;;  %v29_v44 = vld [vmem:[%s414_s1 + $0x8] sm:$0xff]  ;;  %v31_v45 = vld [vmem:[%s414_s1 + $0x18] sm:$0xff]  ;;  %v16_v46 = vld [vmem:[%s415_s0] sm:$0xff]  ;;  %v60_v47 = vpack.c.bf16 %v30_v43, %v28_v42 }
   0xc   :  { %84 = vmatpush.bf16.msra.mxu0 %v70_v16  ;;  %228 = vmatpush.bf16.msra.mxu2 %v70_v16  ;;  %v17_v48 = vld [vmem:[%s415_s0 + $0x8] sm:$0xff]  ;;  %v20_v49 = vld [vmem:[%s415_s0 + $0x20] sm:$0xff]  ;;  %v61_v51 = vpack.c.bf16 %v31_v45, %v29_v44  ;;  %v18_v54 = vld [vmem:[%s415_s0 + $0x10] sm:$0xff] }
   0xd   :  { %113 = vmatpush.bf16.msra.mxu1 %v71_v17  ;;  %236 = vmatpush.bf16.msra.mxu3 %v71_v17  ;;  %v21_v50 = vld [vmem:[%s415_s0 + $0x28] sm:$0xff]  ;;  %v24_v52 = vpack.c.bf16 %v17_v48, %v16_v46  ;;  %v19_v55 = vld [vmem:[%s415_s0 + $0x18] sm:$0xff]  ;;  %v22_v56 = vld [vmem:[%s415_s0 + $0x30] sm:$0xff] }
   0xe   :  { %v26_v53 = vpack.c.bf16 %v21_v50, %v20_v49  ;;  %v23_v57 = vld [vmem:[%s415_s0 + $0x38] sm:$0xff]  ;;  %v25_v58 = vpack.c.bf16 %v19_v55, %v18_v54  ;;  %v76_v62 = vld [vmem:[%s416_s2] sm:$0x3] }
   0xf   :  { %v27_v59 = vpack.c.bf16 %v23_v57, %v22_v56  ;;  %v78_v63 = vperm.slane %v76_v62, 0  ;;  %v79_v0 = vperm.slane %v76_v62, 1 }
  0x10   :  { %85 = vmatpush.bf16.msra.mxu0 %v68_v22  ;;  %229 = vmatpush.bf16.msra.mxu2 %v68_v22 }
  0x11   :  { %114 = vmatpush.bf16.msra.mxu1 %v69_v23  ;;  %237 = vmatpush.bf16.msra.mxu3 %v69_v23 }
  0x14   :  { %86 = vmatpush.bf16.msra.mxu0 %v66_v28  ;;  %230 = vmatpush.bf16.msra.mxu2 %v66_v28 }
  0x15   :  { %115 = vmatpush.bf16.msra.mxu1 %v67_v29  ;;  %238 = vmatpush.bf16.msra.mxu3 %v67_v29 }
  0x18   :  { %87 = vmatpush.bf16.msra.mxu0 %v64_v34  ;;  %231 = vmatpush.bf16.msra.mxu2 %v64_v34 }
  0x19   :  { %116 = vmatpush.bf16.msra.mxu1 %v65_v35  ;;  %239 = vmatpush.bf16.msra.mxu3 %v65_v35 }
  0x1c   :  { %88 = vmatpush.bf16.msra.mxu0 %v62_v40  ;;  %232 = vmatpush.bf16.msra.mxu2 %v62_v40 }
  0x1d   :  { %117 = vmatpush.bf16.msra.mxu1 %v63_v41  ;;  %240 = vmatpush.bf16.msra.mxu3 %v63_v41 }
  0x20   :  { %89 = vmatpush.bf16.msra.mxu0 %v60_v47  ;;  %233 = vmatpush.bf16.msra.mxu2 %v60_v47 }
  0x21   :  { %118 = vmatpush.bf16.msra.mxu1 %v61_v51  ;;  %241 = vmatpush.bf16.msra.mxu3 %v61_v51 }
  0x23   :  { %90 = vmatmul.bf16.vlgmr.msra.gmra.mxu0 %v24_v52  ;;  %100 = vmatmul.bf16.vlgmr.msra.gmra.mxu2 %v26_v53 }
  0x24   :  { %119 = vmatmul.bf16.vlgmr.msra.gmra.mxu1 %v24_v52  ;;  %129 = vmatmul.bf16.vlgmr.msra.gmra.mxu3 %v26_v53 }
  0x33   :  { %95 = vmatmul.bf16.gmra.mxu0 %v25_v58  ;;  %105 = vmatmul.bf16.gmra.mxu2 %v27_v59 }
  0x34   :  { %124 = vmatmul.bf16.gmra.mxu1 %v25_v58  ;;  %134 = vmatmul.bf16.gmra.mxu3 %v27_v59 }
  0xa0   :  { %v91_v60 = vpop.f32.mrf.mxu0 }
  0xa1   :  { %v120_v61 = vpop.f32.mrf.mxu1  ;;  %v92_v4 = vadd.f32 %v91_v60, %v78_v63 }
  0xa2   :  { %v121_v7 = vadd.f32 %v120_v61, %v79_v0 }
  0xa6   :  { %v101_v1 = vpop.f32.mrf.mxu2 }
  0xa7   :  { %v130_v2 = vpop.f32.mrf.mxu3  ;;  %v102_v12 = vadd.f32 %v101_v1, %v78_v63 }
  0xa8   :  { %v93_v3 = vpop.f32.mrf.mxu0  ;;  %v131_v15 = vadd.f32 %v130_v2, %v79_v0 }
  0xa9   :  { %v94_v5 = vadd.f32 %v93_v3, %v78_v63  ;;  %v122_v6 = vpop.f32.mrf.mxu1 }
  0xaa   :  { %v123_v8 = vadd.f32 %v122_v6, %v79_v0 }
  0xab   :  { %v183_v9 = vpack.c.bf16 %v94_v5, %v92_v4 }
  0xac   :  { %v203_v10 = vpack.c.bf16 %v123_v8, %v121_v7 }
  0xad   :  { %184 = vst [vmem:[%s417_s3] sm:$0xff] %v183_v9  }
  0xae   :  { %204 = vst [vmem:[%s418_s4] sm:$0xff] %v203_v10   ;;  %v103_v11 = vpop.f32.mrf.mxu2 }
  0xaf   :  { %v104_v13 = vadd.f32 %v103_v11, %v78_v63  ;;  %v132_v14 = vpop.f32.mrf.mxu3 }
  0xb0   :  { %v133_v16 = vadd.f32 %v132_v14, %v79_v0  ;;  %v96_v17 = vpop.f32.mrf.mxu0 }
  0xb1   :  { %v193_v18 = vpack.c.bf16 %v104_v13, %v102_v12  ;;  %v125_v19 = vpop.f32.mrf.mxu1  ;;  %v97_v24 = vadd.f32 %v96_v17, %v78_v63 }
  0xb2   :  { %v213_v20 = vpack.c.bf16 %v133_v16, %v131_v15  ;;  %v126_v27 = vadd.f32 %v125_v19, %v79_v0 }
  0xb3   :  { %221 = vst [vmem:[%s417_s3 + $0x10] sm:$0xff] %v193_v18  }
  0xb4   :  { %224 = vst [vmem:[%s418_s4 + $0x10] sm:$0xff] %v213_v20  }
  0xb6   :  { %v106_v21 = vpop.f32.mrf.mxu2 }
  0xb7   :  { %v135_v22 = vpop.f32.mrf.mxu3  ;;  %v107_v32 = vadd.f32 %v106_v21, %v78_v63 }
  0xb8   :  { %v98_v23 = vpop.f32.mrf.mxu0  ;;  %v136_v35 = vadd.f32 %v135_v22, %v79_v0 }
  0xb9   :  { %v99_v25 = vadd.f32 %v98_v23, %v78_v63  ;;  %v127_v26 = vpop.f32.mrf.mxu1 }
  0xba   :  { %v128_v28 = vadd.f32 %v127_v26, %v79_v0 }
  0xbb   :  { %v188_v29 = vpack.c.bf16 %v99_v25, %v97_v24 }
  0xbc   :  { %v208_v30 = vpack.c.bf16 %v128_v28, %v126_v27 }
  0xbd   :  { %220 = vst [vmem:[%s417_s3 + $0x8] sm:$0xff] %v188_v29  }
  0xbe   :  { %223 = vst [vmem:[%s418_s4 + $0x8] sm:$0xff] %v208_v30   ;;  %v108_v31 = vpop.f32.mrf.mxu2 }
  0xbf   :  { %v109_v33 = vadd.f32 %v108_v31, %v78_v63  ;;  %v137_v34 = vpop.f32.mrf.mxu3 }
  0xc0   :  { %v138_v36 = vadd.f32 %v137_v34, %v79_v0 }
  0xc1   :  { %v198_v37 = vpack.c.bf16 %v109_v33, %v107_v32 }
  0xc2   :  { %v218_v38 = vpack.c.bf16 %v138_v36, %v136_v35 }
  0xc3   :  { %222 = vst [vmem:[%s417_s3 + $0x18] sm:$0xff] %v198_v37  }
  0xc4   :  { %225 = vst [vmem:[%s418_s4 + $0x18] sm:$0xff] %v218_v38  }

// kernel: encoder_forward.13
= control target key start
LH: loop header
LB: loop body
LE: loop exit
PB: predicated region body
PF: predicated region fallthrough
CT: control target
= control target key end

     0   :  { %s324_s1 = inlined_call_operand.vmem [shape: f32[128,256], index: 1, kind: input, shape index: {}]   ;;  %s325_s0 = inlined_call_operand.vmem [shape: f32[32,128], index: 0, kind: input, shape index: {}]   ;;  %s326_s2 = inlined_call_operand.vmem [shape: f32[1,256], index: 2, kind: input, shape index: {}]   ;;  %s327_s3 = inlined_call_operand.vmem [shape: bf16[32,128], index: 3, kind: output, shape index: {0}]   ;;  %s328_s4 = inlined_call_operand.vmem [shape: bf16[32,128], index: 4, kind: output, shape index: {1}]  }
   0x1   :  { %v50_v0 = vld [vmem:[%s324_s1 + $0xe0] sm:$0xff]  ;;  %v52_v1 = vld [vmem:[%s324_s1 + $0xf0] sm:$0xff]  ;;  %v51_v2 = vld [vmem:[%s324_s1 + $0xe8] sm:$0xff] }
   0x2   :  { %v68_v3 = vpack.c.bf16 %v52_v1, %v50_v0  ;;  %v53_v4 = vld [vmem:[%s324_s1 + $0xf8] sm:$0xff]  ;;  %v46_v5 = vld [vmem:[%s324_s1 + $0xc0] sm:$0xff]  ;;  %v48_v6 = vld [vmem:[%s324_s1 + $0xd0] sm:$0xff] }
   0x3   :  { %v69_v7 = vpack.c.bf16 %v53_v4, %v51_v2  ;;  %v47_v8 = vld [vmem:[%s324_s1 + $0xc8] sm:$0xff]  ;;  %v49_v9 = vld [vmem:[%s324_s1 + $0xd8] sm:$0xff]  ;;  %v66_v10 = vpack.c.bf16 %v48_v6, %v46_v5  ;;  %v42_v12 = vld [vmem:[%s324_s1 + $0xa0] sm:$0xff] }
   0x4   :  { %76 = vmatpush.bf16.msra.mxu0 %v68_v3  ;;  %160 = vmatpush.bf16.msra.mxu2 %v68_v3  ;;  %v67_v11 = vpack.c.bf16 %v49_v9, %v47_v8  ;;  %v44_v13 = vld [vmem:[%s324_s1 + $0xb0] sm:$0xff]  ;;  %v43_v14 = vld [vmem:[%s324_s1 + $0xa8] sm:$0xff]  ;;  %v45_v15 = vld [vmem:[%s324_s1 + $0xb8] sm:$0xff] }
   0x5   :  { %95 = vmatpush.bf16.msra.mxu1 %v69_v7  ;;  %168 = vmatpush.bf16.msra.mxu3 %v69_v7  ;;  %v64_v16 = vpack.c.bf16 %v44_v13, %v42_v12  ;;  %v65_v17 = vpack.c.bf16 %v45_v15, %v43_v14  ;;  %v38_v18 = vld [vmem:[%s324_s1 + $0x80] sm:$0xff]  ;;  %v40_v19 = vld [vmem:[%s324_s1 + $0x90] sm:$0xff]  ;;  %v39_v20 = vld [vmem:[%s324_s1 + $0x88] sm:$0xff] }
   0x6   :  { %v41_v21 = vld [vmem:[%s324_s1 + $0x98] sm:$0xff]  ;;  %v62_v22 = vpack.c.bf16 %v40_v19, %v38_v18  ;;  %v34_v24 = vld [vmem:[%s324_s1 + $0x60] sm:$0xff]  ;;  %v36_v25 = vld [vmem:[%s324_s1 + $0x70] sm:$0xff] }
   0x7   :  { %v63_v23 = vpack.c.bf16 %v41_v21, %v39_v20  ;;  %v35_v26 = vld [vmem:[%s324_s1 + $0x68] sm:$0xff]  ;;  %v37_v27 = vld [vmem:[%s324_s1 + $0x78] sm:$0xff]  ;;  %v60_v28 = vpack.c.bf16 %v36_v25, %v34_v24  ;;  %v30_v30 = vld [vmem:[%s324_s1 + $0x40] sm:$0xff] }
   0x8   :  { %77 = vmatpush.bf16.msra.mxu0 %v66_v10  ;;  %161 = vmatpush.bf16.msra.mxu2 %v66_v10  ;;  %v61_v29 = vpack.c.bf16 %v37_v27, %v35_v26  ;;  %v32_v31 = vld [vmem:[%s324_s1 + $0x50] sm:$0xff]  ;;  %v31_v32 = vld [vmem:[%s324_s1 + $0x48] sm:$0xff]  ;;  %v33_v33 = vld [vmem:[%s324_s1 + $0x58] sm:$0xff] }
   0x9   :  { %96 = vmatpush.bf16.msra.mxu1 %v67_v11  ;;  %169 = vmatpush.bf16.msra.mxu3 %v67_v11  ;;  %v58_v34 = vpack.c.bf16 %v32_v31, %v30_v30  ;;  %v59_v35 = vpack.c.bf16 %v33_v33, %v31_v32  ;;  %v26_v36 = vld [vmem:[%s324_s1 + $0x20] sm:$0xff]  ;;  %v28_v37 = vld [vmem:[%s324_s1 + $0x30] sm:$0xff]  ;;  %v27_v38 = vld [vmem:[%s324_s1 + $0x28] sm:$0xff] }
   0xa   :  { %v29_v39 = vld [vmem:[%s324_s1 + $0x38] sm:$0xff]  ;;  %v56_v40 = vpack.c.bf16 %v28_v37, %v26_v36  ;;  %v22_v42 = vld [vmem:[%s324_s1] sm:$0xff]  ;;  %v24_v43 = vld [vmem:[%s324_s1 + $0x10] sm:$0xff] }
   0xb   :  { %v57_v41 = vpack.c.bf16 %v29_v39, %v27_v38  ;;  %v23_v44 = vld [vmem:[%s324_s1 + $0x8] sm:$0xff]  ;;  %v25_v45 = vld [vmem:[%s324_s1 + $0x18] sm:$0xff]  ;;  %v16_v46 = vld [vmem:[%s325_s0] sm:$0xff]  ;;  %v54_v47 = vpack.c.bf16 %v24_v43, %v22_v42 }
   0xc   :  { %78 = vmatpush.bf16.msra.mxu0 %v64_v16  ;;  %162 = vmatpush.bf16.msra.mxu2 %v64_v16  ;;  %v17_v48 = vld [vmem:[%s325_s0 + $0x8] sm:$0xff]  ;;  %v18_v49 = vld [vmem:[%s325_s0 + $0x10] sm:$0xff]  ;;  %v19_v50 = vld [vmem:[%s325_s0 + $0x18] sm:$0xff]  ;;  %v55_v51 = vpack.c.bf16 %v25_v45, %v23_v44 }
   0xd   :  { %97 = vmatpush.bf16.msra.mxu1 %v65_v17  ;;  %170 = vmatpush.bf16.msra.mxu3 %v65_v17  ;;  %v20_v52 = vpack.c.bf16 %v17_v48, %v16_v46  ;;  %v21_v53 = vpack.c.bf16 %v19_v50, %v18_v49  ;;  %v70_v56 = vld [vmem:[%s326_s2] sm:$0x3] }
   0xe   :  { %v72_v57 = vperm.slane %v70_v56, 0  ;;  %v73_v58 = vperm.slane %v70_v56, 1 }
  0x10   :  { %79 = vmatpush.bf16.msra.mxu0 %v62_v22  ;;  %163 = vmatpush.bf16.msra.mxu2 %v62_v22 }
  0x11   :  { %98 = vmatpush.bf16.msra.mxu1 %v63_v23  ;;  %171 = vmatpush.bf16.msra.mxu3 %v63_v23 }
  0x14   :  { %80 = vmatpush.bf16.msra.mxu0 %v60_v28  ;;  %164 = vmatpush.bf16.msra.mxu2 %v60_v28 }
  0x15   :  { %99 = vmatpush.bf16.msra.mxu1 %v61_v29  ;;  %172 = vmatpush.bf16.msra.mxu3 %v61_v29 }
  0x18   :  { %81 = vmatpush.bf16.msra.mxu0 %v58_v34  ;;  %165 = vmatpush.bf16.msra.mxu2 %v58_v34 }
  0x19   :  { %100 = vmatpush.bf16.msra.mxu1 %v59_v35  ;;  %173 = vmatpush.bf16.msra.mxu3 %v59_v35 }
  0x1c   :  { %82 = vmatpush.bf16.msra.mxu0 %v56_v40  ;;  %166 = vmatpush.bf16.msra.mxu2 %v56_v40 }
  0x1d   :  { %101 = vmatpush.bf16.msra.mxu1 %v57_v41  ;;  %174 = vmatpush.bf16.msra.mxu3 %v57_v41 }
  0x20   :  { %83 = vmatpush.bf16.msra.mxu0 %v54_v47  ;;  %167 = vmatpush.bf16.msra.mxu2 %v54_v47 }
  0x21   :  { %102 = vmatpush.bf16.msra.mxu1 %v55_v51  ;;  %175 = vmatpush.bf16.msra.mxu3 %v55_v51 }
  0x23   :  { %84 = vmatmul.bf16.vlgmr.msra.gmra.mxu0 %v20_v52  ;;  %89 = vmatmul.bf16.vlgmr.msra.gmra.mxu2 %v21_v53 }
  0x24   :  { %103 = vmatmul.bf16.vlgmr.msra.gmra.mxu1 %v20_v52  ;;  %108 = vmatmul.bf16.vlgmr.msra.gmra.mxu3 %v21_v53 }
  0xa0   :  { %v85_v54 = vpop.f32.mrf.mxu0 }
  0xa1   :  { %v104_v55 = vpop.f32.mrf.mxu1  ;;  %v86_v62 = vadd.f32 %v85_v54, %v72_v57 }
  0xa2   :  { %v105_v1 = vadd.f32 %v104_v55, %v73_v58 }
  0xa6   :  { %v90_v59 = vpop.f32.mrf.mxu2 }
  0xa7   :  { %v109_v60 = vpop.f32.mrf.mxu3  ;;  %v91_v6 = vadd.f32 %v90_v59, %v72_v57 }
  0xa8   :  { %v87_v61 = vpop.f32.mrf.mxu0  ;;  %v110_v9 = vadd.f32 %v109_v60, %v73_v58 }
  0xa9   :  { %v88_v63 = vadd.f32 %v87_v61, %v72_v57  ;;  %v106_v0 = vpop.f32.mrf.mxu1 }
  0xaa   :  { %v107_v2 = vadd.f32 %v106_v0, %v73_v58 }
  0xab   :  { %v141_v3 = vpack.c.bf16 %v88_v63, %v86_v62 }
  0xac   :  { %v151_v4 = vpack.c.bf16 %v107_v2, %v105_v1 }
  0xad   :  { %142 = vst [vmem:[%s327_s3] sm:$0xff] %v141_v3  }
  0xae   :  { %152 = vst [vmem:[%s328_s4] sm:$0xff] %v151_v4   ;;  %v92_v5 = vpop.f32.mrf.mxu2 }
  0xaf   :  { %v93_v7 = vadd.f32 %v92_v5, %v72_v57  ;;  %v111_v8 = vpop.f32.mrf.mxu3 }
  0xb0   :  { %v112_v10 = vadd.f32 %v111_v8, %v73_v58 }
  0xb1   :  { %v146_v11 = vpack.c.bf16 %v93_v7, %v91_v6 }
  0xb2   :  { %v156_v12 = vpack.c.bf16 %v112_v10, %v110_v9 }
  0xb3   :  { %158 = vst [vmem:[%s327_s3 + $0x8] sm:$0xff] %v146_v11  }
  0xb4   :  { %159 = vst [vmem:[%s328_s4 + $0x8] sm:$0xff] %v156_v12  }

// kernel: encoder_forward.12
= control target key start
LH: loop header
LB: loop body
LE: loop exit
PB: predicated region body
PF: predicated region fallthrough
CT: control target
= control target key end

     0   :  { %vm60_vm0 = vcmask 261120   ;;  %v1394_v3 = vmov 0.0   ;;  %s1396_s12 = smov 64   ;;  %s1397_s9 = smov 96   ;;  %s1841_s2 = inlined_call_operand.vmem [shape: f32[32,128], index: 2, kind: input, shape index: {}]   ;;  %s1842_s3 = inlined_call_operand.vmem [shape: f32[32,128], index: 3, kind: input, shape index: {}]   ;;  %s1843_s0 = inlined_call_operand.vmem [shape: bf16[8,8,128], index: 0, kind: input, shape index: {}]   ;;  %s1844_s1 = inlined_call_operand.vmem [shape: bf16[8,8,128], index: 1, kind: input, shape index: {}]   ;;  %s1845_s4 = inlined_call_operand.vmem [shape: f32[8,8,32], index: 4, kind: output, shape index: {0}]   ;;  %s1846_s5 = inlined_call_operand.vmem [shape: f32[8,8,32], index: 5, kind: output, shape index: {1}]  }
   0x1   :  { %v67_v0 = vld [vmem:[%s1841_s2 + $0x10] sm:$0xff]  ;;  %v68_v1 = vld [vmem:[%s1841_s2 + $0x18] sm:$0xff]  ;;  %61 = vst.msk [vmem:[#allocation2] sm:$0xff] %vm60_vm0, %v1394_v3  ;;  %v65_v6 = vld [vmem:[%s1841_s2] sm:$0xff] }
   0x2   :  { %v73_v2 = vld [vmem:[%s1842_s3 + $0x10] sm:$0xff]  ;;  %v1438_v4 = vpack.c.bf16 %v68_v1, %v67_v0  ;;  %v74_v5 = vld [vmem:[%s1842_s3 + $0x18] sm:$0xff]  ;;  %v66_v7 = vld [vmem:[%s1841_s2 + $0x8] sm:$0xff]  ;;  %62 = vst.msk [vmem:[#allocation2 + $0x8] sm:$0xff] %vm60_vm0, %v1394_v3  ;;  %s1395_s2 = smov 32  }
   0x3   :  { %v1450_v8 = vpack.c.bf16 %v74_v5, %v73_v2  ;;  %v71_v9 = vld [vmem:[%s1842_s3] sm:$0xff]  ;;  %v72_v10 = vld [vmem:[%s1842_s3 + $0x8] sm:$0xff]  ;;  %63 = vst.msk [vmem:[#allocation3] sm:$0xff] %vm60_vm0, %v1394_v3  ;;  %v1460_v11 = vpack.c.bf16 %v66_v7, %v65_v6  ;;  %v1494_v22 = vld [vmem:[%s1844_s1 + $0x18] sm:$0xff]  }
   0x4   :  { %96 = vmatpush.bf16.msra.mxu0 %v1438_v4  ;;  %64 = vst.msk [vmem:[#allocation3 + $0x8] sm:$0xff] %vm60_vm0, %v1394_v3  ;;  %234 = vmatpush.bf16.msra.mxu2 %v1438_v4  ;;  %v1465_v12 = vpack.c.bf16 %v72_v10, %v71_v9  ;;  %v83_v19 = vld [vmem:[%s1843_s0] sm:$0xf]  ;;  %v152_v25 = vunpack.c.h.bf16 %v1494_v22 }
   0x5   :  { %163 = vmatpush.bf16.msra.mxu1 %v1450_v8  ;;  %301 = vmatpush.bf16.msra.mxu3 %v1450_v8  ;;  %v84_v20 = vunpack.c.l.bf16 %v83_v19  ;;  %v1528_v19 = vld [vmem:[%s1843_s0 + $0x4] sm:$0xff]  }
   0x8   :  { %97 = vmatpush.bf16.msra.mxu0 %v1460_v11  ;;  %v77_v13 = vld [vmem:[#allocation2] sm:$0xff]  ;;  %235 = vmatpush.bf16.msra.mxu2 %v1460_v11 }
   0x9   :  { %164 = vmatpush.bf16.msra.mxu1 %v1465_v12  ;;  %v85_v14 = vpack.c.bf16 %v77_v13, %v77_v13  ;;  %v80_v15 = vld [vmem:[#allocation2 + $0x8] sm:$0xff]  ;;  %302 = vmatpush.bf16.msra.mxu3 %v1465_v12 }
   0xa   :  { %v153_v16 = vpack.c.bf16 %v80_v15, %v80_v15  ;;  %v78_v17 = vld [vmem:[#allocation3] sm:$0xff] }
   0xb   :  { %1202 = vmatmul.msk.bf16.vlgmr.msra.gmra.mxu0 %vm60_vm0, %v85_v14  ;;  %125 = vrot.lane.b32.xlu1 %v78_v17, %s1395_s2  ;;  %v82_v18 = vld [vmem:[#allocation3 + $0x8] sm:$0xff] }
   0xc   :  { %368 = vmatpush.bf16.msrb.mxu0 %v1438_v4  ;;  %1205 = vmatmul.msk.bf16.vlgmr.msra.gmra.mxu1 %vm60_vm0, %v153_v16 }
   0xd   :  { %435 = vmatpush.bf16.msrb.mxu1 %v1450_v8  ;;  %569 = vmatpush.bf16.msrb.mxu3 %v1450_v8 }
   0xe   :  { %502 = vmatpush.bf16.msrb.mxu2 %v1438_v4 }
  0x10   :  { %369 = vmatpush.bf16.msrb.mxu0 %v1460_v11 }
  0x11   :  { %436 = vmatpush.bf16.msrb.mxu1 %v1465_v12  ;;  %570 = vmatpush.bf16.msrb.mxu3 %v1465_v12 }
  0x12   :  { %503 = vmatpush.bf16.msrb.mxu2 %v1460_v11 }
  0x13   :  { %192 = vrot.lane.b32.xlu1 %v82_v18, %s1395_s2 }
  0x14   :  { %636 = vmatpush.bf16.msra.mxu0 %v1438_v4 }
  0x15   :  { %703 = vmatpush.bf16.msra.mxu1 %v1450_v8 }
  0x18   :  { %637 = vmatpush.bf16.msra.mxu0 %v1460_v11 }
  0x19   :  { %704 = vmatpush.bf16.msra.mxu1 %v1465_v12 }
  0x7d   :  { %v126_v61 = vpop.permute.xlu1 %125 }
  0x85   :  { %v193_v1 = vpop.permute.xlu1 %192 }
  0x88   :  { %v99_v21 = vpop.f32.mrf.mxu0 }
  0x89   :  { %v103_v23 = vadd.f32 %v99_v21, %v84_v20  ;;  %v166_v24 = vpop.f32.mrf.mxu1  ;;  %v220_v20 = vunpack.c.l.bf16 %v1528_v19 }
  0x8a   :  { %v170_v26 = vadd.f32 %v166_v24, %v152_v25 }
  0x8b   :  { %1266 = vtanh.f32 %v103_v23  ;;  %v1203_v31 = vmul.f32 -1.442695, %v103_v23 }
  0x8c   :  { %1268 = vtanh.f32 %v170_v26  ;;  %v1206_v32 = vmul.f32 -1.442695, %v170_v26  ;;  %v287_v26 = vunpack.c.l.bf16 %v1494_v22 }
  0x8d   :  { %1270 = vpow2.f32 %v1203_v31 }
  0x8e   :  { %1272 = vpow2.f32 %v1206_v32 }
  0x90   :  { %v101_v27 = vpop.f32.mrf.mxu0 }
  0x91   :  { %v1267_v28 = vpop.eup %1266  ;;  %v168_v29 = vpop.f32.mrf.mxu1 }
  0x92   :  { %130 = vrot.lane.b32.xlu0 %v1267_v28, %s1396_s12  ;;  %v1269_v30 = vpop.eup %1268 }
  0x93   :  { %v1271_v33 = vpop.eup %1270 }
  0x94   :  { %v107_v34 = vadd.f32 1.0, %v1271_v33  ;;  %v1273_v35 = vpop.eup %1272 }
  0x95   :  { %v174_v36 = vadd.f32 1.0, %v1273_v35 }
  0x96   :  { %1274 = vrcp.f32 %v107_v34  ;;  %v119_v45 = vand.u32 2147483648, %v107_v34  ;;  %vm113_vm2 = vweird.f32 %v107_v34  ;;  %v117_v46 = vand.u32 2147483647, %v107_v34 }
  0x97   :  { %1276 = vrcp.f32 %v174_v36  ;;  %vm180_vm5 = vweird.f32 %v174_v36  ;;  %v186_v54 = vand.u32 2147483648, %v174_v36  ;;  %v184_v55 = vand.u32 2147483647, %v174_v36 }
  0x98   :  { %v120_v49 = vor.u32 1.1754944e-38, %v119_v45  ;;  %vm118_vm4 = vcmp.eq.f32.partialorder %v117_v46, 8.507059e+37 }
  0x99   :  { %v187_v57 = vor.u32 1.1754944e-38, %v186_v54  ;;  %vm185_vm8 = vcmp.eq.f32.partialorder %v184_v55, 8.507059e+37 }
  0x9a   :  { %197 = vrot.lane.b32.xlu0 %v1269_v30, %s1396_s12 }
  0x9c   :  { %v1275_v37 = vpop.eup %1274 }
  0x9d   :  { %v109_v38 = vmul.f32 %v1275_v37, %v107_v34  ;;  %v1277_v40 = vpop.eup %1276  ;;  %vm114_vm1 = vweird.f32 %v1275_v37 }
  0x9e   :  { %v176_v42 = vmul.f32 %v1277_v40, %v174_v36  ;;  %vm115_vm3 = vmor %vm113_vm2, %vm114_vm1  ;;  %vm181_vm6 = vweird.f32 %v1277_v40 }
  0x9f   :  { %v110_v39 = vsub.f32 1.0, %v109_v38  ;;  %vm182_vm7 = vmor %vm180_vm5, %vm181_vm6 }
  0xa0   :  { %v177_v44 = vsub.f32 1.0, %v176_v42 }
  0xa1   :  { %v111_v41 = vmul.f32 %v1275_v37, %v110_v39 }
  0xa2   :  { %v178_v48 = vmul.f32 %v1277_v40, %v177_v44 }
  0xa3   :  { %v112_v43 = vadd.f32 %v1275_v37, %v111_v41 }
  0xa4   :  { %v179_v52 = vadd.f32 %v1277_v40, %v178_v48 }
  0xa5   :  { %v116_v47 = vsel %vm115_vm3, %v1275_v37, %v112_v43 }
  0xa6   :  { %v121_v50 = vsel %vm118_vm4, %v120_v49, %v116_v47  ;;  %v183_v56 = vsel %vm182_vm7, %v1277_v40, %v179_v52 }
  0xa7   :  { %v188_v58 = vsel %vm185_vm8, %v187_v57, %v183_v56  ;;  %v128_v62 = vmul.f32 %v126_v61, %v121_v50 }
  0xa8   :  { %v195_v2 = vmul.f32 %v193_v1, %v188_v58 }
 0x104   :  { %v131_v51 = vpop.permute.xlu0 %130 }
 0x105   :  { %v133_v53 = vmul.f32 %v131_v51, %v121_v50 }
 0x107   :  { %135 = vrot.lane.b32.xlu2 %v133_v53, %s1395_s2 }
 0x10c   :  { %v198_v59 = vpop.permute.xlu0 %197 }
 0x10d   :  { %v200_v60 = vmul.f32 %v198_v59, %v188_v58 }
 0x10f   :  { %202 = vrot.lane.b32.xlu2 %v200_v60, %s1395_s2 }
 0x161   :  { %v136_v63 = vpop.permute.xlu2 %135 }
 0x162   :  { %v1501_v0 = vadd.f32 %v136_v63, %v128_v62 }
 0x164   :  { %1278 = vtanh.f32 %v1501_v0 }
 0x169   :  { %v203_v3 = vpop.permute.xlu2 %202 }
 0x16a   :  { %v1279_v5 = vpop.eup %1278  ;;  %v1504_v6 = vadd.f32 %v203_v3, %v195_v2 }
 0x16b   :  { %141 = vrot.lane.b32.xlu0 %v1279_v5, %s1396_s12 }
 0x16c   :  { %1280 = vtanh.f32 %v1504_v6 }
 0x172   :  { %v1281_v7 = vpop.eup %1280 }
 0x173   :  { %208 = vrot.lane.b32.xlu1 %v1281_v7, %s1396_s12 }
 0x1dd   :  { %v142_v9 = vpop.permute.xlu0 %141 }
 0x1de   :  { %v1509_v10 = vmul.f32 %v142_v9, %v121_v50 }
 0x1e0   :  { %v221_v13 = vpack.c.bf16 %v1509_v10, %v1509_v10 }
 0x1e2   :  { %223 = vrot.lane.b32.xlu2 %v221_v13, %s1395_s2 }
 0x1e5   :  { %v209_v14 = vpop.permute.xlu1 %208 }
 0x1e6   :  { %v1514_v15 = vmul.f32 %v209_v14, %v188_v58 }
 0x1e8   :  { %v288_v16 = vpack.c.bf16 %v1514_v15, %v1514_v15 }
 0x1ea   :  { %290 = vrot.lane.b32.xlu0 %v288_v16, %s1395_s2 }
 0x23c   :  { %v224_v17 = vpop.permute.xlu2 %223 }
 0x23d   :  { %1209 = vmatmul.msk.bf16.vlgmr.msra.gmra.mxu2 %vm60_vm0, %v224_v17 }
 0x23e   :  { %770 = vmatpush.bf16.msra.mxu2 %v1438_v4 }
 0x242   :  { %771 = vmatpush.bf16.msra.mxu2 %v1460_v11 }
 0x25c   :  { %v291_v18 = vpop.permute.xlu0 %290 }
 0x25d   :  { %1213 = vmatmul.msk.bf16.vlgmr.msra.gmra.mxu3 %vm60_vm0, %v291_v18  ;;  %v354_v18 = vunpack.c.h.bf16 %v1528_v19 }
 0x25e   :  { %837 = vmatpush.bf16.msra.mxu3 %v1450_v8 }
 0x262   :  { %838 = vmatpush.bf16.msra.mxu3 %v1465_v12 }
 0x2c0   :  { %v237_v21 = vpop.f32.mrf.mxu2 }
 0x2c1   :  { %v241_v23 = vadd.f32 %v237_v21, %v220_v20 }
 0x2c3   :  { %1282 = vtanh.f32 %v241_v23  ;;  %v1210_v31 = vmul.f32 -1.442695, %v241_v23  ;;  %v1566_v23 = vld [vmem:[%s1844_s1 + $0x10] sm:$0xff]  }
 0x2c8   :  { %v239_v24 = vpop.f32.mrf.mxu2 }
 0x2c9   :  { %v1283_v25 = vpop.eup %1282  ;;  %v421_v24 = vunpack.c.h.bf16 %v1566_v23 }
 0x2ca   :  { %264 = vrot.lane.b32.xlu1 %v1283_v25, %s1396_s12 }
 0x2e0   :  { %v304_v27 = vpop.f32.mrf.mxu3 }
 0x2e1   :  { %v308_v28 = vadd.f32 %v304_v27, %v287_v26 }
 0x2e3   :  { %1284 = vtanh.f32 %v308_v28  ;;  %v1214_v32 = vmul.f32 -1.442695, %v308_v28 }
 0x2e4   :  { %1286 = vpow2.f32 %v1210_v31 }
 0x2e5   :  { %1288 = vpow2.f32 %v1214_v32 }
 0x2e8   :  { %v306_v29 = vpop.f32.mrf.mxu3 }
 0x2e9   :  { %v1285_v30 = vpop.eup %1284 }
 0x2ea   :  { %331 = vrot.lane.b32.xlu2 %v1285_v30, %s1396_s12  ;;  %v1287_v33 = vpop.eup %1286 }
 0x2eb   :  { %v245_v34 = vadd.f32 1.0, %v1287_v33  ;;  %v1289_v35 = vpop.eup %1288 }
 0x2ec   :  { %v312_v36 = vadd.f32 1.0, %v1289_v35 }
 0x2ed   :  { %1290 = vrcp.f32 %v245_v34  ;;  %v257_v44 = vand.u32 2147483648, %v245_v34  ;;  %vm251_vm10 = vweird.f32 %v245_v34  ;;  %v255_v45 = vand.u32 2147483647, %v245_v34 }
 0x2ee   :  { %1292 = vrcp.f32 %v312_v36  ;;  %v324_v53 = vand.u32 2147483648, %v312_v36  ;;  %vm318_vm14 = vweird.f32 %v312_v36  ;;  %v322_v54 = vand.u32 2147483647, %v312_v36 }
 0x2ef   :  { %v258_v48 = vor.u32 1.1754944e-38, %v257_v44  ;;  %vm256_vm12 = vcmp.eq.f32.partialorder %v255_v45, 8.507059e+37 }
 0x2f0   :  { %v325_v56 = vor.u32 1.1754944e-38, %v324_v53  ;;  %vm323_vm1 = vcmp.eq.f32.partialorder %v322_v54, 8.507059e+37 }
 0x2f3   :  { %v1291_v37 = vpop.eup %1290 }
 0x2f4   :  { %v247_v38 = vmul.f32 %v1291_v37, %v245_v34  ;;  %v1293_v39 = vpop.eup %1292  ;;  %vm252_vm9 = vweird.f32 %v1291_v37 }
 0x2f5   :  { %v314_v41 = vmul.f32 %v1293_v39, %v312_v36  ;;  %vm253_vm11 = vmor %vm251_vm10, %vm252_vm9  ;;  %vm319_vm13 = vweird.f32 %v1293_v39 }
 0x2f6   :  { %v248_v22 = vsub.f32 1.0, %v247_v38  ;;  %vm320_vm15 = vmor %vm318_vm14, %vm319_vm13 }
 0x2f7   :  { %v315_v43 = vsub.f32 1.0, %v314_v41 }
 0x2f8   :  { %v249_v40 = vmul.f32 %v1291_v37, %v248_v22 }
 0x2f9   :  { %v316_v47 = vmul.f32 %v1293_v39, %v315_v43 }
 0x2fa   :  { %v250_v42 = vadd.f32 %v1291_v37, %v249_v40 }
 0x2fb   :  { %v317_v52 = vadd.f32 %v1293_v39, %v316_v47 }
 0x2fc   :  { %v254_v46 = vsel %vm253_vm11, %v1291_v37, %v250_v42 }
 0x2fd   :  { %v259_v50 = vsel %vm256_vm12, %v258_v48, %v254_v46  ;;  %v321_v55 = vsel %vm320_vm15, %v1293_v39, %v317_v52 }
 0x2fe   :  { %v326_v58 = vsel %vm323_vm1, %v325_v56, %v321_v55  ;;  %v262_v60 = vmul.f32 %v259_v50, %v1501_v0 }
 0x2ff   :  { %v329_v63 = vmul.f32 %v326_v58, %v1504_v6 }
 0x33c   :  { %v265_v49 = vpop.permute.xlu1 %264 }
 0x33d   :  { %v267_v51 = vmul.f32 %v265_v49, %v259_v50 }
 0x33f   :  { %269 = vrot.lane.b32.xlu0 %v267_v51, %s1395_s2 }
 0x344   :  { %v332_v57 = vpop.permute.xlu2 %331 }
 0x345   :  { %v334_v59 = vmul.f32 %v332_v57, %v326_v58 }
 0x347   :  { %336 = vrot.lane.b32.xlu1 %v334_v59, %s1395_s2 }
 0x3b1   :  { %v270_v61 = vpop.permute.xlu0 %269 }
 0x3b2   :  { %v1537_v62 = vadd.f32 %v270_v61, %v262_v60 }
 0x3b4   :  { %1294 = vtanh.f32 %v1537_v62 }
 0x3b9   :  { %v337_v1 = vpop.permute.xlu1 %336 }
 0x3ba   :  { %v1295_v2 = vpop.eup %1294  ;;  %v1541_v3 = vadd.f32 %v337_v1, %v329_v63 }
 0x3bb   :  { %275 = vrot.lane.b32.xlu2 %v1295_v2, %s1396_s12 }
 0x3bc   :  { %1296 = vtanh.f32 %v1541_v3 }
 0x3c2   :  { %v1297_v5 = vpop.eup %1296 }
 0x3c3   :  { %342 = vrot.lane.b32.xlu0 %v1297_v5, %s1396_s12 }
 0x415   :  { %v276_v7 = vpop.permute.xlu2 %275 }
 0x416   :  { %v1546_v0 = vmul.f32 %v276_v7, %v259_v50 }
 0x418   :  { %v355_v9 = vpack.c.bf16 %v1546_v0, %v1546_v0 }
 0x41a   :  { %357 = vrot.lane.b32.xlu1 %v355_v9, %s1395_s2 }
 0x435   :  { %v343_v6 = vpop.permute.xlu0 %342 }
 0x436   :  { %v1551_v13 = vmul.f32 %v343_v6, %v326_v58 }
 0x438   :  { %v422_v14 = vpack.c.bf16 %v1551_v13, %v1551_v13 }
 0x43a   :  { %424 = vrot.lane.b32.xlu2 %v422_v14, %s1395_s2 }
 0x48c   :  { %v358_v16 = vpop.permute.xlu1 %357 }
 0x48d   :  { %1217 = vmatmul.msk.bf16.vlgmr.msrb.gmra.mxu0 %vm60_vm0, %v358_v16 }
 0x48e   :  { %904 = vmatpush.bf16.msrb.mxu0 %v1438_v4 }
 0x492   :  { %905 = vmatpush.bf16.msrb.mxu0 %v1460_v11 }
 0x494   :  { %v425_v17 = vpop.permute.xlu2 %424 }
 0x495   :  { %1221 = vmatmul.msk.bf16.vlgmr.msrb.gmra.mxu1 %vm60_vm0, %v425_v17 }
 0x496   :  { %971 = vmatpush.bf16.msrb.mxu1 %v1450_v8 }
 0x49a   :  { %972 = vmatpush.bf16.msrb.mxu1 %v1465_v12 }
 0x50a   :  { %v371_v20 = vpop.f32.mrf.mxu0 }
 0x50b   :  { %v375_v21 = vadd.f32 %v371_v20, %v354_v18  ;;  %v1602_v20 = vld [vmem:[%s1843_s0 + $0xc] sm:$0xff]  }
 0x50d   :  { %1298 = vtanh.f32 %v375_v21  ;;  %v1218_v19 = vmul.f32 -1.442695, %v375_v21  ;;  %v488_v21 = vunpack.c.l.bf16 %v1602_v20 }
 0x512   :  { %v373_v25 = vpop.f32.mrf.mxu0  ;;  %v438_v26 = vpop.f32.mrf.mxu1 }
 0x513   :  { %v1299_v27 = vpop.eup %1298  ;;  %v442_v28 = vadd.f32 %v438_v26, %v421_v24 }
 0x514   :  { %398 = vrot.lane.b32.xlu0 %v1299_v27, %s1396_s12 }
 0x515   :  { %1300 = vtanh.f32 %v442_v28  ;;  %v1222_v31 = vmul.f32 -1.442695, %v442_v28 }
 0x516   :  { %1302 = vpow2.f32 %v1218_v19 }
 0x517   :  { %1304 = vpow2.f32 %v1222_v31 }
 0x51a   :  { %v440_v29 = vpop.f32.mrf.mxu1 }
 0x51b   :  { %v1301_v30 = vpop.eup %1300 }
 0x51c   :  { %465 = vrot.lane.b32.xlu1 %v1301_v30, %s1396_s12  ;;  %v1303_v32 = vpop.eup %1302 }
 0x51d   :  { %v379_v33 = vadd.f32 1.0, %v1303_v32  ;;  %v1305_v34 = vpop.eup %1304 }
 0x51e   :  { %v446_v35 = vadd.f32 1.0, %v1305_v34 }
 0x51f   :  { %1306 = vrcp.f32 %v379_v33  ;;  %v391_v43 = vand.u32 2147483648, %v379_v33  ;;  %vm385_vm3 = vweird.f32 %v379_v33  ;;  %v389_v44 = vand.u32 2147483647, %v379_v33 }
 0x520   :  { %1308 = vrcp.f32 %v446_v35  ;;  %v458_v52 = vand.u32 2147483648, %v446_v35  ;;  %vm452_vm7 = vweird.f32 %v446_v35  ;;  %v456_v53 = vand.u32 2147483647, %v446_v35 }
 0x521   :  { %v392_v47 = vor.u32 1.1754944e-38, %v391_v43  ;;  %vm390_vm5 = vcmp.eq.f32.partialorder %v389_v44, 8.507059e+37 }
 0x522   :  { %v459_v55 = vor.u32 1.1754944e-38, %v458_v52  ;;  %vm457_vm9 = vcmp.eq.f32.partialorder %v456_v53, 8.507059e+37 }
 0x525   :  { %v1307_v36 = vpop.eup %1306 }
 0x526   :  { %v381_v37 = vmul.f32 %v1307_v36, %v379_v33  ;;  %v1309_v22 = vpop.eup %1308  ;;  %vm386_vm2 = vweird.f32 %v1307_v36 }
 0x527   :  { %v448_v40 = vmul.f32 %v1309_v22, %v446_v35  ;;  %vm387_vm4 = vmor %vm385_vm3, %vm386_vm2  ;;  %vm453_vm6 = vweird.f32 %v1309_v22 }
 0x528   :  { %v382_v38 = vsub.f32 1.0, %v381_v37  ;;  %vm454_vm8 = vmor %vm452_vm7, %vm453_vm6 }
 0x529   :  { %v449_v42 = vsub.f32 1.0, %v448_v40 }
 0x52a   :  { %v383_v39 = vmul.f32 %v1307_v36, %v382_v38 }
 0x52b   :  { %v450_v46 = vmul.f32 %v1309_v22, %v449_v42 }
 0x52c   :  { %v384_v41 = vadd.f32 %v1307_v36, %v383_v39 }
 0x52d   :  { %v451_v51 = vadd.f32 %v1309_v22, %v450_v46 }
 0x52e   :  { %v388_v45 = vsel %vm387_vm4, %v1307_v36, %v384_v41 }
 0x52f   :  { %v393_v48 = vsel %vm390_vm5, %v392_v47, %v388_v45  ;;  %v455_v54 = vsel %vm454_vm8, %v1309_v22, %v451_v51 }
 0x530   :  { %v460_v57 = vsel %vm457_vm9, %v459_v55, %v455_v54  ;;  %v396_v59 = vmul.f32 %v393_v48, %v1537_v62 }
 0x531   :  { %v463_v1 = vmul.f32 %v460_v57, %v1541_v3 }
 0x586   :  { %v399_v49 = vpop.permute.xlu0 %398 }
 0x587   :  { %v401_v50 = vmul.f32 %v399_v49, %v393_v48 }
 0x589   :  { %403 = vrot.lane.b32.xlu2 %v401_v50, %s1395_s2 }
 0x58e   :  { %v466_v56 = vpop.permute.xlu1 %465 }
 0x58f   :  { %v468_v58 = vmul.f32 %v466_v56, %v460_v57 }
 0x591   :  { %470 = vrot.lane.b32.xlu0 %v468_v58, %s1395_s2 }
 0x5e3   :  { %v404_v60 = vpop.permute.xlu2 %403 }
 0x5e4   :  { %v1574_v61 = vadd.f32 %v404_v60, %v396_v59 }
 0x5e6   :  { %1310 = vtanh.f32 %v1574_v61 }
 0x5ec   :  { %v1311_v63 = vpop.eup %1310 }
 0x5ed   :  { %409 = vrot.lane.b32.xlu1 %v1311_v63, %s1396_s12 }
 0x603   :  { %v471_v2 = vpop.permute.xlu0 %470 }
 0x604   :  { %v1579_v5 = vadd.f32 %v471_v2, %v463_v1 }
 0x606   :  { %1312 = vtanh.f32 %v1579_v5 }
 0x60c   :  { %v1313_v7 = vpop.eup %1312 }
 0x60d   :  { %476 = vrot.lane.b32.xlu2 %v1313_v7, %s1396_s12 }
 0x65f   :  { %v410_v9 = vpop.permute.xlu1 %409 }
 0x660   :  { %v1583_v62 = vmul.f32 %v410_v9, %v393_v48 }
 0x662   :  { %v489_v6 = vpack.c.bf16 %v1583_v62, %v1583_v62 }
 0x664   :  { %491 = vrot.lane.b32.xlu0 %v489_v6, %s1395_s2 }
 0x667   :  { %v477_v14 = vpop.permute.xlu2 %476 }
 0x668   :  { %v1588_v16 = vmul.f32 %v477_v14, %v460_v57 }
 0x66a   :  { %v556_v3 = vpack.c.bf16 %v1588_v16, %v1588_v16 }
 0x66c   :  { %558 = vrot.lane.b32.xlu1 %v556_v3, %s1395_s2 }
 0x6d6   :  { %v492_v17 = vpop.permute.xlu0 %491 }
 0x6d7   :  { %1225 = vmatmul.msk.bf16.vlgmr.msrb.gmra.mxu2 %vm60_vm0, %v492_v17 }
 0x6d8   :  { %1038 = vmatpush.bf16.msrb.mxu2 %v1438_v4  ;;  %v555_v4 = vunpack.c.l.bf16 %v1566_v23 }
 0x6dc   :  { %1039 = vmatpush.bf16.msrb.mxu2 %v1460_v11 }
 0x6de   :  { %v559_v18 = vpop.permute.xlu1 %558 }
 0x6df   :  { %1229 = vmatmul.msk.bf16.vlgmr.msrb.gmra.mxu3 %vm60_vm0, %v559_v18  ;;  %v622_v18 = vunpack.c.h.bf16 %v1602_v20 }
 0x6e0   :  { %1104 = vmatpush.bf16.msrb.mxu3 %v1450_v8 }
 0x6e4   :  { %1105 = vmatpush.bf16.msrb.mxu3 %v1465_v12 }
 0x75a   :  { %v505_v24 = vpop.f32.mrf.mxu2 }
 0x75b   :  { %v509_v25 = vadd.f32 %v505_v24, %v488_v21 }
 0x75d   :  { %1314 = vtanh.f32 %v509_v25  ;;  %v1226_v29 = vmul.f32 -1.442695, %v509_v25 }
 0x762   :  { %v507_v11 = vpop.f32.mrf.mxu2  ;;  %v572_v26 = vpop.f32.mrf.mxu3 }
 0x763   :  { %v1315_v27 = vpop.eup %1314  ;;  %v576_v28 = vadd.f32 %v572_v26, %v555_v4  ;;  %v1637_v11 = vld [vmem:[%s1844_s1 + $0x8] sm:$0xff]  }
 0x764   :  { %532 = vrot.lane.b32.xlu2 %v1315_v27, %s1396_s12  ;;  %v689_v26 = vunpack.c.h.bf16 %v1637_v11 }
 0x765   :  { %1316 = vtanh.f32 %v576_v28  ;;  %v1230_v23 = vmul.f32 -1.442695, %v576_v28 }
 0x766   :  { %1318 = vpow2.f32 %v1226_v29 }
 0x76a   :  { %v574_v8 = vpop.f32.mrf.mxu3 }
 0x76b   :  { %v1317_v12 = vpop.eup %1316 }
 0x76c   :  { %599 = vrot.lane.b32.xlu0 %v1317_v12, %s1396_s12  ;;  %v1319_v30 = vpop.eup %1318 }
 0x76d   :  { %v513_v19 = vadd.f32 1.0, %v1319_v30 }
 0x76f   :  { %1320 = vrcp.f32 %v513_v19  ;;  %v525_v36 = vand.u32 2147483648, %v513_v19  ;;  %vm519_vm11 = vweird.f32 %v513_v19  ;;  %v523_v37 = vand.u32 2147483647, %v513_v19 }
 0x770   :  { %1322 = vpow2.f32 %v1230_v23 }
 0x771   :  { %v526_v39 = vor.u32 1.1754944e-38, %v525_v36  ;;  %vm524_vm13 = vcmp.eq.f32.partialorder %v523_v37, 8.507059e+37 }
 0x775   :  { %v1321_v31 = vpop.eup %1320 }
 0x776   :  { %v515_v32 = vmul.f32 %v1321_v31, %v513_v19  ;;  %vm520_vm10 = vweird.f32 %v1321_v31  ;;  %v1323_v38 = vpop.eup %1322 }
 0x777   :  { %vm521_vm12 = vmor %vm519_vm11, %vm520_vm10  ;;  %v580_v40 = vadd.f32 1.0, %v1323_v38 }
 0x778   :  { %v516_v33 = vsub.f32 1.0, %v515_v32 }
 0x779   :  { %1324 = vrcp.f32 %v580_v40  ;;  %v592_v49 = vand.u32 2147483648, %v580_v40  ;;  %vm586_vm15 = vweird.f32 %v580_v40  ;;  %v590_v50 = vand.u32 2147483647, %v580_v40 }
 0x77a   :  { %v517_v34 = vmul.f32 %v1321_v31, %v516_v33 }
 0x77b   :  { %v593_v52 = vor.u32 1.1754944e-38, %v592_v49  ;;  %vm591_vm2 = vcmp.eq.f32.partialorder %v590_v50, 8.507059e+37 }
 0x77c   :  { %v518_v35 = vadd.f32 %v1321_v31, %v517_v34 }
 0x77e   :  { %v522_v22 = vsel %vm521_vm12, %v1321_v31, %v518_v35 }
 0x77f   :  { %v527_v42 = vsel %vm524_vm13, %v526_v39, %v522_v22  ;;  %v1325_v44 = vpop.eup %1324 }
 0x780   :  { %v582_v45 = vmul.f32 %v1325_v44, %v580_v40  ;;  %vm587_vm14 = vweird.f32 %v1325_v44  ;;  %v530_v56 = vmul.f32 %v527_v42, %v1574_v61 }
 0x781   :  { %vm588_vm1 = vmor %vm586_vm15, %vm587_vm14 }
 0x782   :  { %v583_v46 = vsub.f32 1.0, %v582_v45 }
 0x784   :  { %v584_v47 = vmul.f32 %v1325_v44, %v583_v46 }
 0x786   :  { %v585_v48 = vadd.f32 %v1325_v44, %v584_v47 }
 0x788   :  { %v589_v51 = vsel %vm588_vm1, %v1325_v44, %v585_v48 }
 0x789   :  { %v594_v53 = vsel %vm591_vm2, %v593_v52, %v589_v51 }
 0x78a   :  { %v597_v59 = vmul.f32 %v594_v53, %v1579_v5 }
 0x7be   :  { %v533_v41 = vpop.permute.xlu2 %532 }
 0x7bf   :  { %v535_v43 = vmul.f32 %v533_v41, %v527_v42 }
 0x7c1   :  { %537 = vrot.lane.b32.xlu1 %v535_v43, %s1395_s2 }
 0x7de   :  { %v600_v54 = vpop.permute.xlu0 %599 }
 0x7df   :  { %v602_v55 = vmul.f32 %v600_v54, %v594_v53 }
 0x7e1   :  { %604 = vrot.lane.b32.xlu2 %v602_v55, %s1395_s2 }
 0x833   :  { %v538_v57 = vpop.permute.xlu1 %537 }
 0x834   :  { %v1611_v58 = vadd.f32 %v538_v57, %v530_v56 }
 0x836   :  { %1326 = vtanh.f32 %v1611_v58 }
 0x83b   :  { %v605_v60 = vpop.permute.xlu2 %604 }
 0x83c   :  { %v1327_v63 = vpop.eup %1326  ;;  %v1615_v1 = vadd.f32 %v605_v60, %v597_v59 }
 0x83d   :  { %543 = vrot.lane.b32.xlu0 %v1327_v63, %s1396_s12 }
 0x83e   :  { %1328 = vtanh.f32 %v1615_v1 }
 0x844   :  { %v1329_v2 = vpop.eup %1328 }
 0x845   :  { %610 = vrot.lane.b32.xlu1 %v1329_v2, %s1396_s12 }
 0x8af   :  { %v544_v7 = vpop.permute.xlu0 %543 }
 0x8b0   :  { %v1620_v61 = vmul.f32 %v544_v7, %v527_v42 }
 0x8b2   :  { %v623_v9 = vpack.c.bf16 %v1620_v61, %v1620_v61 }
 0x8b4   :  { %625 = vrot.lane.b32.xlu2 %v623_v9, %s1395_s2 }
 0x8b7   :  { %v611_v5 = vpop.permute.xlu1 %610 }
 0x8b8   :  { %v1625_v6 = vmul.f32 %v611_v5, %v594_v53 }
 0x8ba   :  { %v690_v14 = vpack.c.bf16 %v1625_v6, %v1625_v6 }
 0x8bc   :  { %692 = vrot.lane.b32.xlu0 %v690_v14, %s1395_s2 }
 0x90e   :  { %v626_v3 = vpop.permute.xlu2 %625 }
 0x90f   :  { %1233 = vmatmul.msk.bf16.vlgmr.msra.gmra.mxu0 %vm60_vm0, %v626_v3 }
 0x92e   :  { %v693_v17 = vpop.permute.xlu0 %692 }
 0x92f   :  { %1237 = vmatmul.msk.bf16.vlgmr.msra.gmra.mxu1 %vm60_vm0, %v693_v17 }
 0x98c   :  { %v639_v21 = vpop.f32.mrf.mxu0 }
 0x98d   :  { %v643_v24 = vadd.f32 %v639_v21, %v622_v18  ;;  %v1668_v21 = vld [vmem:[%s1843_s0 + $0x14] sm:$0xff]  }
 0x98f   :  { %1330 = vtanh.f32 %v643_v24  ;;  %v1234_v20 = vmul.f32 -1.442695, %v643_v24  ;;  %v756_v24 = vunpack.c.l.bf16 %v1668_v21 }
 0x994   :  { %v641_v25 = vpop.f32.mrf.mxu0 }
 0x995   :  { %v1331_v4 = vpop.eup %1330 }
 0x996   :  { %666 = vrot.lane.b32.xlu1 %v1331_v4, %s1396_s12 }
 0x9ac   :  { %v706_v27 = vpop.f32.mrf.mxu1 }
 0x9ad   :  { %v710_v28 = vadd.f32 %v706_v27, %v689_v26  ;;  %v823_v26 = vunpack.c.l.bf16 %v1637_v11 }
 0x9af   :  { %1332 = vtanh.f32 %v710_v28  ;;  %v1238_v29 = vmul.f32 -1.442695, %v710_v28 }
 0x9b0   :  { %1334 = vpow2.f32 %v1234_v20 }
 0x9b1   :  { %1336 = vpow2.f32 %v1238_v29 }
 0x9b4   :  { %v708_v8 = vpop.f32.mrf.mxu1 }
 0x9b5   :  { %v1333_v12 = vpop.eup %1332 }
 0x9b6   :  { %733 = vrot.lane.b32.xlu2 %v1333_v12, %s1396_s12  ;;  %v1335_v30 = vpop.eup %1334 }
 0x9b7   :  { %v647_v19 = vadd.f32 1.0, %v1335_v30  ;;  %v1337_v31 = vpop.eup %1336 }
 0x9b8   :  { %v714_v32 = vadd.f32 1.0, %v1337_v31 }
 0x9b9   :  { %1338 = vrcp.f32 %v647_v19  ;;  %v659_v39 = vand.u32 2147483648, %v647_v19  ;;  %vm653_vm4 = vweird.f32 %v647_v19  ;;  %v657_v40 = vand.u32 2147483647, %v647_v19 }
 0x9ba   :  { %1340 = vrcp.f32 %v714_v32  ;;  %v726_v48 = vand.u32 2147483648, %v714_v32  ;;  %vm720_vm8 = vweird.f32 %v714_v32  ;;  %v724_v49 = vand.u32 2147483647, %v714_v32 }
 0x9bb   :  { %v660_v43 = vor.u32 1.1754944e-38, %v659_v39  ;;  %vm658_vm6 = vcmp.eq.f32.partialorder %v657_v40, 8.507059e+37 }
 0x9bc   :  { %v727_v51 = vor.u32 1.1754944e-38, %v726_v48  ;;  %vm725_vm10 = vcmp.eq.f32.partialorder %v724_v49, 8.507059e+37 }
 0x9bf   :  { %v1339_v33 = vpop.eup %1338 }
 0x9c0   :  { %v649_v23 = vmul.f32 %v1339_v33, %v647_v19  ;;  %v1341_v35 = vpop.eup %1340  ;;  %vm654_vm3 = vweird.f32 %v1339_v33 }
 0x9c1   :  { %v716_v37 = vmul.f32 %v1341_v35, %v714_v32  ;;  %vm655_vm5 = vmor %vm653_vm4, %vm654_vm3  ;;  %vm721_vm7 = vweird.f32 %v1341_v35 }
 0x9c2   :  { %v650_v34 = vsub.f32 1.0, %v649_v23  ;;  %vm722_vm9 = vmor %vm720_vm8, %vm721_vm7 }
 0x9c3   :  { %v717_v22 = vsub.f32 1.0, %v716_v37 }
 0x9c4   :  { %v651_v36 = vmul.f32 %v1339_v33, %v650_v34 }
 0x9c5   :  { %v718_v42 = vmul.f32 %v1341_v35, %v717_v22 }
 0x9c6   :  { %v652_v38 = vadd.f32 %v1339_v33, %v651_v36 }
 0x9c7   :  { %v719_v47 = vadd.f32 %v1341_v35, %v718_v42 }
 0x9c8   :  { %v656_v41 = vsel %vm655_vm5, %v1339_v33, %v652_v38 }
 0x9c9   :  { %v661_v45 = vsel %vm658_vm6, %v660_v43, %v656_v41  ;;  %v723_v50 = vsel %vm722_vm9, %v1341_v35, %v719_v47 }
 0x9ca   :  { %v728_v53 = vsel %vm725_vm10, %v727_v51, %v723_v50  ;;  %v664_v55 = vmul.f32 %v661_v45, %v1611_v58 }
 0x9cb   :  { %v731_v59 = vmul.f32 %v728_v53, %v1615_v1 }
 0xa08   :  { %v667_v44 = vpop.permute.xlu1 %666 }
 0xa09   :  { %v669_v46 = vmul.f32 %v667_v44, %v661_v45 }
 0xa0b   :  { %671 = vrot.lane.b32.xlu0 %v669_v46, %s1395_s2 }
 0xa10   :  { %v734_v52 = vpop.permute.xlu2 %733 }
 0xa11   :  { %v736_v54 = vmul.f32 %v734_v52, %v728_v53 }
 0xa13   :  { %738 = vrot.lane.b32.xlu1 %v736_v54, %s1395_s2 }
 0xa7d   :  { %v672_v56 = vpop.permute.xlu0 %671 }
 0xa7e   :  { %v1644_v57 = vadd.f32 %v672_v56, %v664_v55 }
 0xa80   :  { %1342 = vtanh.f32 %v1644_v57 }
 0xa85   :  { %v739_v60 = vpop.permute.xlu1 %738 }
 0xa86   :  { %v1343_v63 = vpop.eup %1342  ;;  %v1648_v2 = vadd.f32 %v739_v60, %v731_v59 }
 0xa87   :  { %677 = vrot.lane.b32.xlu2 %v1343_v63, %s1396_s12 }
 0xa88   :  { %1344 = vtanh.f32 %v1648_v2 }
 0xa8e   :  { %v1345_v7 = vpop.eup %1344 }
 0xa8f   :  { %744 = vrot.lane.b32.xlu0 %v1345_v7, %s1396_s12 }
 0xae1   :  { %v678_v9 = vpop.permute.xlu2 %677 }
 0xae2   :  { %v1653_v58 = vmul.f32 %v678_v9, %v661_v45 }
 0xae4   :  { %v757_v5 = vpack.c.bf16 %v1653_v58, %v1653_v58 }
 0xae6   :  { %759 = vrot.lane.b32.xlu1 %v757_v5, %s1395_s2 }
 0xb01   :  { %v745_v1 = vpop.permute.xlu0 %744 }
 0xb02   :  { %v1658_v14 = vmul.f32 %v745_v1, %v728_v53 }
 0xb04   :  { %v824_v3 = vpack.c.bf16 %v1658_v14, %v1658_v14 }
 0xb06   :  { %826 = vrot.lane.b32.xlu2 %v824_v3, %s1395_s2 }
 0xb58   :  { %v760_v17 = vpop.permute.xlu1 %759 }
 0xb59   :  { %1241 = vmatmul.msk.bf16.vlgmr.msra.gmra.mxu2 %vm60_vm0, %v760_v17 }
 0xb60   :  { %v827_v18 = vpop.permute.xlu2 %826 }
 0xb61   :  { %1245 = vmatmul.msk.bf16.vlgmr.msra.gmra.mxu3 %vm60_vm0, %v827_v18 }
 0xbdc   :  { %v773_v25 = vpop.f32.mrf.mxu2 }
 0xbdd   :  { %v777_v4 = vadd.f32 %v773_v25, %v756_v24 }
 0xbdf   :  { %1346 = vtanh.f32 %v777_v4  ;;  %v1242_v30 = vmul.f32 -1.442695, %v777_v4 }
 0xbe4   :  { %v775_v27 = vpop.f32.mrf.mxu2  ;;  %v840_v28 = vpop.f32.mrf.mxu3 }
 0xbe5   :  { %v1347_v8 = vpop.eup %1346  ;;  %v844_v12 = vadd.f32 %v840_v28, %v823_v26  ;;  %v890_v26 = vunpack.c.h.bf16 %v1668_v21 }
 0xbe6   :  { %800 = vrot.lane.b32.xlu0 %v1347_v8, %s1396_s12  ;;  %v1702_v8 = vld [vmem:[%s1844_s1] sm:$0xff]  }
 0xbe7   :  { %1348 = vtanh.f32 %v844_v12  ;;  %v1246_v19 = vmul.f32 -1.442695, %v844_v12  ;;  %v957_v12 = vunpack.c.h.bf16 %v1702_v8 }
 0xbe8   :  { %1350 = vpow2.f32 %v1242_v30 }
 0xbe9   :  { %1352 = vpow2.f32 %v1246_v19 }
 0xbec   :  { %v842_v20 = vpop.f32.mrf.mxu3 }
 0xbed   :  { %v1349_v29 = vpop.eup %1348 }
 0xbee   :  { %867 = vrot.lane.b32.xlu1 %v1349_v29, %s1396_s12  ;;  %v1351_v31 = vpop.eup %1350 }
 0xbef   :  { %v781_v32 = vadd.f32 1.0, %v1351_v31  ;;  %v1353_v33 = vpop.eup %1352 }
 0xbf0   :  { %v848_v11 = vadd.f32 1.0, %v1353_v33 }
 0xbf1   :  { %1354 = vrcp.f32 %v781_v32  ;;  %v793_v40 = vand.u32 2147483648, %v781_v32  ;;  %vm787_vm12 = vweird.f32 %v781_v32  ;;  %v791_v41 = vand.u32 2147483647, %v781_v32 }
 0xbf2   :  { %1356 = vrcp.f32 %v848_v11  ;;  %v860_v49 = vand.u32 2147483648, %v848_v11  ;;  %vm854_vm1 = vweird.f32 %v848_v11  ;;  %v858_v50 = vand.u32 2147483647, %v848_v11 }
 0xbf3   :  { %v794_v44 = vor.u32 1.1754944e-38, %v793_v40  ;;  %vm792_vm14 = vcmp.eq.f32.partialorder %v791_v41, 8.507059e+37 }
 0xbf4   :  { %v861_v52 = vor.u32 1.1754944e-38, %v860_v49  ;;  %vm859_vm3 = vcmp.eq.f32.partialorder %v858_v50, 8.507059e+37 }
 0xbf7   :  { %v1355_v23 = vpop.eup %1354 }
 0xbf8   :  { %v783_v34 = vmul.f32 %v1355_v23, %v781_v32  ;;  %v1357_v36 = vpop.eup %1356  ;;  %vm788_vm11 = vweird.f32 %v1355_v23 }
 0xbf9   :  { %v850_v38 = vmul.f32 %v1357_v36, %v848_v11  ;;  %vm789_vm13 = vmor %vm787_vm12, %vm788_vm11  ;;  %vm855_vm15 = vweird.f32 %v1357_v36 }
 0xbfa   :  { %v784_v35 = vsub.f32 1.0, %v783_v34  ;;  %vm856_vm2 = vmor %vm854_vm1, %vm855_vm15 }
 0xbfb   :  { %v851_v39 = vsub.f32 1.0, %v850_v38 }
 0xbfc   :  { %v785_v37 = vmul.f32 %v1355_v23, %v784_v35 }
 0xbfd   :  { %v852_v43 = vmul.f32 %v1357_v36, %v851_v39 }
 0xbfe   :  { %v786_v22 = vadd.f32 %v1355_v23, %v785_v37 }
 0xbff   :  { %v853_v48 = vadd.f32 %v1357_v36, %v852_v43 }
 0xc00   :  { %v790_v42 = vsel %vm789_vm13, %v1355_v23, %v786_v22 }
 0xc01   :  { %v795_v45 = vsel %vm792_vm14, %v794_v44, %v790_v42  ;;  %v857_v51 = vsel %vm856_vm2, %v1357_v36, %v853_v48 }
 0xc02   :  { %v862_v54 = vsel %vm859_vm3, %v861_v52, %v857_v51  ;;  %v798_v56 = vmul.f32 %v795_v45, %v1644_v57 }
 0xc03   :  { %v865_v7 = vmul.f32 %v862_v54, %v1648_v2 }
 0xc58   :  { %v801_v46 = vpop.permute.xlu0 %800 }
 0xc59   :  { %v803_v47 = vmul.f32 %v801_v46, %v795_v45 }
 0xc5b   :  { %805 = vrot.lane.b32.xlu2 %v803_v47, %s1395_s2 }
 0xc60   :  { %v868_v53 = vpop.permute.xlu1 %867 }
 0xc61   :  { %v870_v55 = vmul.f32 %v868_v53, %v862_v54 }
 0xc63   :  { %872 = vrot.lane.b32.xlu0 %v870_v55, %s1395_s2 }
 0xcb5   :  { %v806_v59 = vpop.permute.xlu2 %805 }
 0xcb6   :  { %v1677_v60 = vadd.f32 %v806_v59, %v798_v56 }
 0xcb8   :  { %1358 = vtanh.f32 %v1677_v60 }
 0xcbe   :  { %v1359_v63 = vpop.eup %1358 }
 0xcbf   :  { %811 = vrot.lane.b32.xlu1 %v1359_v63, %s1396_s12 }
 0xcd5   :  { %v873_v9 = vpop.permute.xlu0 %872 }
 0xcd6   :  { %v1682_v5 = vadd.f32 %v873_v9, %v865_v7 }
 0xcd8   :  { %1360 = vtanh.f32 %v1682_v5 }
 0xcde   :  { %v1361_v1 = vpop.eup %1360 }
 0xcdf   :  { %878 = vrot.lane.b32.xlu2 %v1361_v1, %s1396_s12 }
 0xd31   :  { %v812_v3 = vpop.permute.xlu1 %811 }
 0xd32   :  { %v1686_v57 = vmul.f32 %v812_v3, %v795_v45 }
 0xd34   :  { %v891_v17 = vpack.c.bf16 %v1686_v57, %v1686_v57 }
 0xd36   :  { %893 = vrot.lane.b32.xlu0 %v891_v17, %s1395_s2 }
 0xd39   :  { %v879_v18 = vpop.permute.xlu2 %878 }
 0xd3a   :  { %v1691_v24 = vmul.f32 %v879_v18, %v862_v54 }
 0xd3c   :  { %v958_v2 = vpack.c.bf16 %v1691_v24, %v1691_v24 }
 0xd3e   :  { %960 = vrot.lane.b32.xlu1 %v958_v2, %s1395_s2 }
 0xda8   :  { %v894_v25 = vpop.permute.xlu0 %893 }
 0xda9   :  { %1249 = vmatmul.msk.bf16.vlgmr.msrb.gmra.mxu0 %vm60_vm0, %v894_v25 }
 0xdb0   :  { %v961_v4 = vpop.permute.xlu1 %960 }
 0xdb1   :  { %1253 = vmatmul.msk.bf16.vlgmr.msrb.gmra.mxu1 %vm60_vm0, %v961_v4 }
 0xe26   :  { %v907_v27 = vpop.f32.mrf.mxu0 }
 0xe27   :  { %v911_v28 = vadd.f32 %v907_v27, %v890_v26 }
 0xe29   :  { %1362 = vtanh.f32 %v911_v28  ;;  %v1250_v21 = vmul.f32 -1.442695, %v911_v28 }
 0xe2e   :  { %v909_v20 = vpop.f32.mrf.mxu0  ;;  %v974_v29 = vpop.f32.mrf.mxu1 }
 0xe2f   :  { %v1363_v30 = vpop.eup %1362  ;;  %v978_v19 = vadd.f32 %v974_v29, %v957_v12  ;;  %v1256_v29 = vld [vmem:[%s1843_s0 + $0x1c] sm:$0xf] }
 0xe30   :  { %934 = vrot.lane.b32.xlu2 %v1363_v30, %s1396_s12  ;;  %v1024_v30 = vunpack.c.l.bf16 %v1256_v29 }
 0xe31   :  { %1364 = vtanh.f32 %v978_v19  ;;  %v1254_v36 = vmul.f32 -1.442695, %v978_v19 }
 0xe32   :  { %1366 = vpow2.f32 %v1250_v21 }
 0xe36   :  { %v976_v31 = vpop.f32.mrf.mxu1 }
 0xe37   :  { %v1365_v32 = vpop.eup %1364 }
 0xe38   :  { %1001 = vrot.lane.b32.xlu0 %v1365_v32, %s1396_s12  ;;  %v1367_v33 = vpop.eup %1366 }
 0xe39   :  { %v915_v11 = vadd.f32 1.0, %v1367_v33  ;;  %v1090_v33 = vunpack.c.l.bf16 %v1702_v8 }
 0xe3b   :  { %1368 = vrcp.f32 %v915_v11  ;;  %v927_v22 = vand.u32 2147483648, %v915_v11  ;;  %vm921_vm5 = vweird.f32 %v915_v11  ;;  %v925_v39 = vand.u32 2147483647, %v915_v11 }
 0xe3c   :  { %1370 = vpow2.f32 %v1254_v36 }
 0xe3d   :  { %v928_v42 = vor.u32 1.1754944e-38, %v927_v22  ;;  %vm926_vm7 = vcmp.eq.f32.partialorder %v925_v39, 8.507059e+37 }
 0xe41   :  { %v1369_v23 = vpop.eup %1368 }
 0xe42   :  { %v917_v34 = vmul.f32 %v1369_v23, %v915_v11  ;;  %vm922_vm4 = vweird.f32 %v1369_v23  ;;  %v1371_v40 = vpop.eup %1370 }
 0xe43   :  { %vm923_vm6 = vmor %vm921_vm5, %vm922_vm4  ;;  %v982_v43 = vadd.f32 1.0, %v1371_v40 }
 0xe44   :  { %v918_v35 = vsub.f32 1.0, %v917_v34 }
 0xe45   :  { %1372 = vrcp.f32 %v982_v43  ;;  %v994_v52 = vand.u32 2147483648, %v982_v43  ;;  %vm988_vm9 = vweird.f32 %v982_v43  ;;  %v992_v53 = vand.u32 2147483647, %v982_v43 }
 0xe46   :  { %v919_v37 = vmul.f32 %v1369_v23, %v918_v35 }
 0xe47   :  { %v995_v55 = vor.u32 1.1754944e-38, %v994_v52  ;;  %vm993_vm11 = vcmp.eq.f32.partialorder %v992_v53, 8.507059e+37 }
 0xe48   :  { %v920_v38 = vadd.f32 %v1369_v23, %v919_v37 }
 0xe4a   :  { %v924_v41 = vsel %vm923_vm6, %v1369_v23, %v920_v38 }
 0xe4b   :  { %v929_v45 = vsel %vm926_vm7, %v928_v42, %v924_v41  ;;  %v1373_v47 = vpop.eup %1372 }
 0xe4c   :  { %v984_v48 = vmul.f32 %v1373_v47, %v982_v43  ;;  %vm989_vm8 = vweird.f32 %v1373_v47  ;;  %v932_v7 = vmul.f32 %v929_v45, %v1677_v60 }
 0xe4d   :  { %vm990_vm10 = vmor %vm988_vm9, %vm989_vm8 }
 0xe4e   :  { %v985_v49 = vsub.f32 1.0, %v984_v48 }
 0xe50   :  { %v986_v50 = vmul.f32 %v1373_v47, %v985_v49 }
 0xe52   :  { %v987_v51 = vadd.f32 %v1373_v47, %v986_v50 }
 0xe54   :  { %v991_v54 = vsel %vm990_vm10, %v1373_v47, %v987_v51 }
 0xe55   :  { %v996_v56 = vsel %vm993_vm11, %v995_v55, %v991_v54 }
 0xe56   :  { %v999_v3 = vmul.f32 %v996_v56, %v1682_v5 }
 0xe8a   :  { %v935_v44 = vpop.permute.xlu2 %934 }
 0xe8b   :  { %v937_v46 = vmul.f32 %v935_v44, %v929_v45 }
 0xe8d   :  { %939 = vrot.lane.b32.xlu1 %v937_v46, %s1395_s2 }
 0xeaa   :  { %v1002_v59 = vpop.permute.xlu0 %1001 }
 0xeab   :  { %v1004_v63 = vmul.f32 %v1002_v59, %v996_v56 }
 0xead   :  { %1006 = vrot.lane.b32.xlu2 %v1004_v63, %s1395_s2 }
 0xeff   :  { %v940_v9 = vpop.permute.xlu1 %939 }
 0xf00   :  { %v1710_v1 = vadd.f32 %v940_v9, %v932_v7 }
 0xf02   :  { %1374 = vtanh.f32 %v1710_v1 }
 0xf07   :  { %v1007_v17 = vpop.permute.xlu2 %1006 }
 0xf08   :  { %v1375_v18 = vpop.eup %1374  ;;  %v1714_v2 = vadd.f32 %v1007_v17, %v999_v3 }
 0xf09   :  { %945 = vrot.lane.b32.xlu0 %v1375_v18, %s1396_s12 }
 0xf0a   :  { %1376 = vtanh.f32 %v1714_v2 }
 0xf10   :  { %v1377_v25 = vpop.eup %1376 }
 0xf11   :  { %1012 = vrot.lane.b32.xlu1 %v1377_v25, %s1396_s12 }
 0xf7b   :  { %v946_v4 = vpop.permute.xlu0 %945 }
 0xf7c   :  { %v1719_v60 = vmul.f32 %v946_v4, %v929_v45 }
 0xf7e   :  { %v1025_v26 = vpack.c.bf16 %v1719_v60, %v1719_v60 }
 0xf80   :  { %1027 = vrot.lane.b32.xlu2 %v1025_v26, %s1395_s2 }
 0xf83   :  { %v1013_v5 = vpop.permute.xlu1 %1012 }
 0xf84   :  { %v1724_v27 = vmul.f32 %v1013_v5, %v996_v56 }
 0xf86   :  { %v1091_v28 = vpack.c.bf16 %v1724_v27, %v1724_v27 }
 0xf88   :  { %1093 = vrot.lane.b32.xlu0 %v1091_v28, %s1395_s2 }
 0xfda   :  { %v1028_v12 = vpop.permute.xlu2 %1027 }
 0xfdb   :  { %1257 = vmatmul.msk.bf16.vlgmr.msrb.gmra.mxu2 %vm60_vm0, %v1028_v12 }
 0xffa   :  { %v1094_v20 = vpop.permute.xlu0 %1093 }
 0xffb   :  { %1260 = vmatmul.msk.bf16.vlgmr.msrb.gmra.mxu3 %vm60_vm0, %v1094_v20 }
0x105e   :  { %v1041_v19 = vpop.f32.mrf.mxu2 }
0x105f   :  { %v1045_v31 = vadd.f32 %v1041_v19, %v1024_v30 }
0x1061   :  { %1378 = vtanh.f32 %v1045_v31  ;;  %v1258_v36 = vmul.f32 -1.442695, %v1045_v31 }
0x1066   :  { %v1043_v32 = vpop.f32.mrf.mxu2 }
0x1067   :  { %v1379_v21 = vpop.eup %1378 }
0x1068   :  { %1068 = vrot.lane.b32.xlu1 %v1379_v21, %s1396_s12 }
0x107e   :  { %v1107_v11 = vpop.f32.mrf.mxu3 }
0x107f   :  { %v1111_v23 = vadd.f32 %v1107_v11, %v1090_v33 }
0x1081   :  { %1380 = vtanh.f32 %v1111_v23  ;;  %v1261_v37 = vmul.f32 -1.442695, %v1111_v23 }
0x1082   :  { %1382 = vpow2.f32 %v1258_v36 }
0x1083   :  { %1384 = vpow2.f32 %v1261_v37 }
0x1086   :  { %v1109_v34 = vpop.f32.mrf.mxu3 }
0x1087   :  { %v1381_v35 = vpop.eup %1380 }
0x1088   :  { %1134 = vrot.lane.b32.xlu2 %v1381_v35, %s1396_s12  ;;  %v1383_v38 = vpop.eup %1382 }
0x1089   :  { %v1049_v22 = vadd.f32 1.0, %v1383_v38  ;;  %v1385_v39 = vpop.eup %1384 }
0x108a   :  { %v1115_v40 = vadd.f32 1.0, %v1385_v39 }
0x108b   :  { %1386 = vrcp.f32 %v1049_v22  ;;  %v1061_v48 = vand.u32 2147483648, %v1049_v22  ;;  %vm1055_vm13 = vweird.f32 %v1049_v22  ;;  %v1059_v49 = vand.u32 2147483647, %v1049_v22 }
0x108c   :  { %1388 = vrcp.f32 %v1115_v40  ;;  %v1127_v59 = vand.u32 2147483648, %v1115_v40  ;;  %vm1121_vm2 = vweird.f32 %v1115_v40  ;;  %v1125_v63 = vand.u32 2147483647, %v1115_v40 }
0x108d   :  { %v1062_v52 = vor.u32 1.1754944e-38, %v1061_v48  ;;  %vm1060_vm15 = vcmp.eq.f32.partialorder %v1059_v49, 8.507059e+37 }
0x108e   :  { %v1128_v9 = vor.u32 1.1754944e-38, %v1127_v59  ;;  %vm1126_vm4 = vcmp.eq.f32.partialorder %v1125_v63, 8.507059e+37 }
0x1091   :  { %v1387_v41 = vpop.eup %1386 }
0x1092   :  { %v1051_v42 = vmul.f32 %v1387_v41, %v1049_v22  ;;  %v1389_v43 = vpop.eup %1388  ;;  %vm1056_vm12 = vweird.f32 %v1387_v41 }
0x1093   :  { %v1117_v45 = vmul.f32 %v1389_v43, %v1115_v40  ;;  %vm1057_vm14 = vmor %vm1055_vm13, %vm1056_vm12  ;;  %vm1122_vm1 = vweird.f32 %v1389_v43 }
0x1094   :  { %v1052_v8 = vsub.f32 1.0, %v1051_v42  ;;  %vm1123_vm3 = vmor %vm1121_vm2, %vm1122_vm1 }
0x1095   :  { %v1118_v47 = vsub.f32 1.0, %v1117_v45 }
0x1096   :  { %v1053_v44 = vmul.f32 %v1387_v41, %v1052_v8 }
0x1097   :  { %v1119_v51 = vmul.f32 %v1389_v43, %v1118_v47 }
0x1098   :  { %v1054_v46 = vadd.f32 %v1387_v41, %v1053_v44 }
0x1099   :  { %v1120_v56 = vadd.f32 %v1389_v43, %v1119_v51 }
0x109a   :  { %v1058_v50 = vsel %vm1057_vm14, %v1387_v41, %v1054_v46 }
0x109b   :  { %v1063_v54 = vsel %vm1060_vm15, %v1062_v52, %v1058_v50  ;;  %v1124_v7 = vsel %vm1123_vm3, %v1389_v43, %v1120_v56 }
0x109c   :  { %v1129_v17 = vsel %vm1126_vm4, %v1128_v9, %v1124_v7  ;;  %v1066_v25 = vmul.f32 %v1063_v54, %v1710_v1 }
0x109d   :  { %v1132_v5 = vmul.f32 %v1129_v17, %v1714_v2 }
0x10da   :  { %v1069_v53 = vpop.permute.xlu1 %1068 }
0x10db   :  { %v1071_v55 = vmul.f32 %v1069_v53, %v1063_v54 }
0x10dd   :  { %1073 = vrot.lane.b32.xlu0 %v1071_v55, %s1395_s2 }
0x10e2   :  { %v1135_v3 = vpop.permute.xlu2 %1134 }
0x10e3   :  { %v1137_v18 = vmul.f32 %v1135_v3, %v1129_v17 }
0x10e5   :  { %1139 = vrot.lane.b32.xlu1 %v1137_v18, %s1395_s2 }
0x10ed   :  { %146 = vrot.lane.b32.xlu1 %v1509_v10, %s1395_s2 }
0x10f5   :  { %347 = vrot.lane.b32.xlu1 %v1551_v13, %s1395_s2 }
0x10fd   :  { %548 = vrot.lane.b32.xlu1 %v1620_v61, %s1395_s2 }
0x1105   :  { %749 = vrot.lane.b32.xlu1 %v1658_v14, %s1395_s2 }
0x110d   :  { %950 = vrot.lane.b32.xlu1 %v1719_v60, %s1395_s2 }
0x114f   :  { %v1074_v4 = vpop.permute.xlu0 %1073 }
0x1150   :  { %v1076_v26 = vadd.f32 %v1074_v4, %v1066_v25 }
0x1152   :  { %1390 = vtanh.f32 %v1076_v26 }
0x1157   :  { %v1140_v10 = vpop.permute.xlu1 %1139 }
0x1158   :  { %v1391_v28 = vpop.eup %1390  ;;  %v1142_v12 = vadd.f32 %v1140_v10, %v1132_v5 }
0x1159   :  { %1079 = vrot.lane.b32.xlu2 %v1391_v28, %s1396_s12 }
0x115a   :  { %1392 = vtanh.f32 %v1142_v12 }
0x115f   :  { %v147_v13 = vpop.permute.xlu1 %146 }
0x1160   :  { %v1393_v61 = vpop.eup %1392  ;;  %149 = vst.msk [vmem:[%s1845_s4] sm:$0xff] %vm60_vm0, %v147_v13 }
0x1161   :  { %1145 = vrot.lane.b32.xlu0 %v1393_v61, %s1396_s12  ;;  %213 = vrot.lane.b32.xlu2 %v1514_v15, %s1395_s2 }
0x1167   :  { %v348_v14 = vpop.permute.xlu1 %347 }
0x1168   :  { %1215 = vst.msk [vmem:[%s1846_s5 + $0x30] sm:$0xff] %vm60_vm0, %v348_v14 }
0x1169   :  { %280 = vrot.lane.b32.xlu0 %v1546_v0, %s1395_s2  ;;  %414 = vrot.lane.b32.xlu2 %v1583_v62, %s1395_s2 }
0x116f   :  { %v549_v1 = vpop.permute.xlu1 %548 }
0x1170   :  { %1227 = vst.msk [vmem:[%s1845_s4 + $0x18] sm:$0xff] %vm60_vm0, %v549_v1 }
0x1171   :  { %481 = vrot.lane.b32.xlu0 %v1588_v16, %s1395_s2  ;;  %615 = vrot.lane.b32.xlu2 %v1625_v6, %s1395_s2 }
0x1177   :  { %v750_v15 = vpop.permute.xlu1 %749 }
0x1178   :  { %1239 = vst.msk [vmem:[%s1846_s5 + $0x18] sm:$0xff] %vm60_vm0, %v750_v15 }
0x1179   :  { %682 = vrot.lane.b32.xlu0 %v1653_v58, %s1395_s2  ;;  %816 = vrot.lane.b32.xlu2 %v1686_v57, %s1395_s2 }
0x117f   :  { %v951_v0 = vpop.permute.xlu1 %950 }
0x1180   :  { %1251 = vst.msk [vmem:[%s1845_s4 + $0x30] sm:$0xff] %vm60_vm0, %v951_v0 }
0x1181   :  { %883 = vrot.lane.b32.xlu0 %v1691_v24, %s1395_s2  ;;  %1017 = vrot.lane.b32.xlu2 %v1724_v27, %s1395_s2 }
0x1189   :  { %1156 = vrot.lane.b32.xlu2 %v1076_v26, %s1397_s9 }
0x11b3   :  { %v1080_v62 = vpop.permute.xlu2 %1079 }
0x11b4   :  { %v1082_v16 = vmul.f32 %v1080_v62, %v1063_v54 }
0x11b6   :  { %1084 = vrot.lane.b32.xlu0 %v1082_v16, %s1395_s2 }
0x11bb   :  { %v214_v6 = vpop.permute.xlu2 %213 }
0x11bc   :  { %1207 = vst.msk [vmem:[%s1846_s5 + $0x38] sm:$0xff] %vm60_vm0, %v214_v6 }
0x11be   :  { %1162 = vrot.lane.b32.xlu0 %v1142_v12, %s1397_s9 }
0x11c3   :  { %v415_v58 = vpop.permute.xlu2 %414 }
0x11c4   :  { %1219 = vst.msk [vmem:[%s1845_s4 + $0x10] sm:$0xff] %vm60_vm0, %v415_v58 }
0x11cb   :  { %v616_v57 = vpop.permute.xlu2 %615 }
0x11cc   :  { %1231 = vst.msk [vmem:[%s1846_s5 + $0x20] sm:$0xff] %vm60_vm0, %v616_v57 }
0x11d3   :  { %v817_v24 = vpop.permute.xlu2 %816  ;;  %v1146_v2 = vpop.permute.xlu0 %1145 }
0x11d4   :  { %1243 = vst.msk [vmem:[%s1845_s4 + $0x28] sm:$0xff] %vm60_vm0, %v817_v24  ;;  %v1148_v60 = vmul.f32 %v1146_v2, %v1129_v17 }
0x11d6   :  { %1150 = vrot.lane.b32.xlu1 %v1148_v60, %s1395_s2 }
0x11db   :  { %v1018_v27 = vpop.permute.xlu2 %1017  ;;  %v281_v20 = vpop.permute.xlu0 %280 }
0x11dc   :  { %1255 = vst.msk [vmem:[%s1846_s5 + $0x8] sm:$0xff] %vm60_vm0, %v1018_v27 }
0x11dd   :  { %1211 = vst.msk [vmem:[%s1845_s4 + $0x8] sm:$0xff] %vm60_vm0, %v281_v20 }
0x11e3   :  { %v1157_v29 = vpop.permute.xlu2 %1156  ;;  %v482_v30 = vpop.permute.xlu0 %481 }
0x11e4   :  { %1159 = vst.msk [vmem:[#allocation3] sm:$0xff] %vm60_vm0, %v1157_v29 }
0x11e5   :  { %1223 = vst.msk [vmem:[%s1846_s5 + $0x28] sm:$0xff] %vm60_vm0, %v482_v30 }
0x11eb   :  { %v683_v19 = vpop.permute.xlu0 %682 }
0x11ec   :  { %1235 = vst.msk [vmem:[%s1845_s4 + $0x20] sm:$0xff] %vm60_vm0, %v683_v19 }
0x11f3   :  { %v884_v31 = vpop.permute.xlu0 %883 }
0x11f4   :  { %1247 = vst.msk [vmem:[%s1846_s5 + $0x10] sm:$0xff] %vm60_vm0, %v884_v31 }
0x1228   :  { %v1085_v32 = vpop.permute.xlu0 %1084 }
0x1229   :  { %1259 = vst.msk [vmem:[%s1845_s4 + $0x38] sm:$0xff] %vm60_vm0, %v1085_v32 }
0x122a   :  { %1154 = vst.msk [vmem:[#allocation2] sm:$0xff] %vm60_vm0, %v1085_v32 }
0x1230   :  { %v1163_v21 = vpop.permute.xlu0 %1162 }
0x1231   :  { %1165 = vst.msk [vmem:[#allocation3 + $0x8] sm:$0xff] %vm60_vm0, %v1163_v21 }
0x1248   :  { %v1151_v33 = vpop.permute.xlu1 %1150 }
0x1249   :  { %1153 = vst.msk [vmem:[%s1846_s5] sm:$0xff] %vm60_vm0, %v1151_v33 }
0x124a   :  { %1160 = vst.msk [vmem:[#allocation2 + $0x8] sm:$0xff] %vm60_vm0, %v1151_v33 }

// kernel: encoder_forward.14
= control target key start
LH: loop header
LB: loop body
LE: loop exit
PB: predicated region body
PF: predicated region fallthrough
CT: control target
= control target key end

     0   :  { %vm60_vm0 = vcmask 261120   ;;  %v762_v3 = vmov 0.0   ;;  %s764_s12 = smov 64   ;;  %s765_s21 = smov 96   ;;  %s989_s2 = inlined_call_operand.vmem [shape: f32[32,128], index: 2, kind: input, shape index: {}]   ;;  %s990_s3 = inlined_call_operand.vmem [shape: f32[32,128], index: 3, kind: input, shape index: {}]   ;;  %s991_s0 = inlined_call_operand.vmem [shape: bf16[4,8,128], index: 0, kind: input, shape index: {}]   ;;  %s992_s1 = inlined_call_operand.vmem [shape: bf16[4,8,128], index: 1, kind: input, shape index: {}]   ;;  %s993_s4 = inlined_call_operand.vmem [shape: f32[4,8,32], index: 4, kind: output, shape index: {0}]   ;;  %s994_s5 = inlined_call_operand.vmem [shape: f32[4,8,32], index: 5, kind: output, shape index: {1}]  }
   0x1   :  { %v67_v0 = vld [vmem:[%s989_s2 + $0x10] sm:$0xff]  ;;  %v68_v1 = vld [vmem:[%s989_s2 + $0x18] sm:$0xff]  ;;  %61 = vst.msk [vmem:[#allocation2] sm:$0xff] %vm60_vm0, %v762_v3  ;;  %v65_v6 = vld [vmem:[%s989_s2] sm:$0xff] }
   0x2   :  { %v73_v2 = vld [vmem:[%s990_s3 + $0x10] sm:$0xff]  ;;  %v70_v4 = vpack.c.bf16 %v68_v1, %v67_v0  ;;  %v74_v5 = vld [vmem:[%s990_s3 + $0x18] sm:$0xff]  ;;  %v66_v7 = vld [vmem:[%s989_s2 + $0x8] sm:$0xff]  ;;  %62 = vst.msk [vmem:[#allocation2 + $0x8] sm:$0xff] %vm60_vm0, %v762_v3  ;;  %s763_s2 = smov 32  }
   0x3   :  { %v76_v8 = vpack.c.bf16 %v74_v5, %v73_v2  ;;  %v71_v9 = vld [vmem:[%s990_s3] sm:$0xff]  ;;  %v72_v10 = vld [vmem:[%s990_s3 + $0x8] sm:$0xff]  ;;  %63 = vst.msk [vmem:[#allocation3] sm:$0xff] %vm60_vm0, %v762_v3  ;;  %v69_v11 = vpack.c.bf16 %v66_v7, %v65_v6 }
   0x4   :  { %96 = vmatpush.bf16.msra.mxu0 %v70_v4  ;;  %64 = vst.msk [vmem:[#allocation3 + $0x8] sm:$0xff] %vm60_vm0, %v762_v3  ;;  %234 = vmatpush.bf16.msra.mxu2 %v70_v4  ;;  %v75_v12 = vpack.c.bf16 %v72_v10, %v71_v9  ;;  %v83_v19 = vld [vmem:[%s991_s0] sm:$0xf]  ;;  %v834_v22 = vld [vmem:[%s992_s1 + $0x8] sm:$0xff]  }
   0x5   :  { %163 = vmatpush.bf16.msra.mxu1 %v76_v8  ;;  %301 = vmatpush.bf16.msra.mxu3 %v76_v8  ;;  %v84_v20 = vunpack.c.l.bf16 %v83_v19  ;;  %v152_v25 = vunpack.c.h.bf16 %v834_v22 }
   0x8   :  { %97 = vmatpush.bf16.msra.mxu0 %v69_v11  ;;  %v77_v13 = vld [vmem:[#allocation2] sm:$0xff]  ;;  %235 = vmatpush.bf16.msra.mxu2 %v69_v11 }
   0x9   :  { %164 = vmatpush.bf16.msra.mxu1 %v75_v12  ;;  %v85_v14 = vpack.c.bf16 %v77_v13, %v77_v13  ;;  %v80_v15 = vld [vmem:[#allocation2 + $0x8] sm:$0xff]  ;;  %302 = vmatpush.bf16.msra.mxu3 %v75_v12 }
   0xa   :  { %v153_v16 = vpack.c.bf16 %v80_v15, %v80_v15  ;;  %v78_v17 = vld [vmem:[#allocation3] sm:$0xff]  ;;  %v864_v15 = vld [vmem:[%s991_s0 + $0x4] sm:$0xff]  }
   0xb   :  { %666 = vmatmul.msk.bf16.vlgmr.msra.gmra.mxu0 %vm60_vm0, %v85_v14  ;;  %125 = vrot.lane.b32.xlu1 %v78_v17, %s763_s2  ;;  %v82_v18 = vld [vmem:[#allocation3 + $0x8] sm:$0xff] }
   0xc   :  { %368 = vmatpush.bf16.msrb.mxu0 %v70_v4  ;;  %669 = vmatmul.msk.bf16.vlgmr.msra.gmra.mxu1 %vm60_vm0, %v153_v16  ;;  %v220_v16 = vunpack.c.l.bf16 %v864_v15 }
   0xd   :  { %435 = vmatpush.bf16.msrb.mxu1 %v76_v8  ;;  %568 = vmatpush.bf16.msrb.mxu3 %v76_v8 }
   0xe   :  { %502 = vmatpush.bf16.msrb.mxu2 %v70_v4 }
  0x10   :  { %369 = vmatpush.bf16.msrb.mxu0 %v69_v11 }
  0x11   :  { %436 = vmatpush.bf16.msrb.mxu1 %v75_v12  ;;  %569 = vmatpush.bf16.msrb.mxu3 %v75_v12 }
  0x12   :  { %503 = vmatpush.bf16.msrb.mxu2 %v69_v11 }
  0x13   :  { %192 = vrot.lane.b32.xlu1 %v82_v18, %s763_s2 }
  0x7d   :  { %v126_v61 = vpop.permute.xlu1 %125 }
  0x85   :  { %v193_v1 = vpop.permute.xlu1 %192 }
  0x88   :  { %v99_v21 = vpop.f32.mrf.mxu0 }
  0x89   :  { %v103_v23 = vadd.f32 %v99_v21, %v84_v20  ;;  %v166_v24 = vpop.f32.mrf.mxu1  ;;  %v287_v21 = vunpack.c.l.bf16 %v834_v22 }
  0x8a   :  { %v170_v26 = vadd.f32 %v166_v24, %v152_v25 }
  0x8b   :  { %698 = vtanh.f32 %v103_v23  ;;  %v667_v31 = vmul.f32 -1.442695, %v103_v23 }
  0x8c   :  { %700 = vtanh.f32 %v170_v26  ;;  %v670_v32 = vmul.f32 -1.442695, %v170_v26 }
  0x8d   :  { %702 = vpow2.f32 %v667_v31 }
  0x8e   :  { %704 = vpow2.f32 %v670_v32 }
  0x90   :  { %v101_v27 = vpop.f32.mrf.mxu0 }
  0x91   :  { %v699_v28 = vpop.eup %698  ;;  %v168_v29 = vpop.f32.mrf.mxu1 }
  0x92   :  { %130 = vrot.lane.b32.xlu0 %v699_v28, %s764_s12  ;;  %v701_v30 = vpop.eup %700 }
  0x93   :  { %v703_v33 = vpop.eup %702 }
  0x94   :  { %v107_v34 = vadd.f32 1.0, %v703_v33  ;;  %v705_v35 = vpop.eup %704 }
  0x95   :  { %v174_v36 = vadd.f32 1.0, %v705_v35 }
  0x96   :  { %706 = vrcp.f32 %v107_v34  ;;  %v119_v45 = vand.u32 2147483648, %v107_v34  ;;  %vm113_vm2 = vweird.f32 %v107_v34  ;;  %v117_v46 = vand.u32 2147483647, %v107_v34 }
  0x97   :  { %708 = vrcp.f32 %v174_v36  ;;  %vm180_vm5 = vweird.f32 %v174_v36  ;;  %v186_v54 = vand.u32 2147483648, %v174_v36  ;;  %v184_v55 = vand.u32 2147483647, %v174_v36 }
  0x98   :  { %v120_v49 = vor.u32 1.1754944e-38, %v119_v45  ;;  %vm118_vm4 = vcmp.eq.f32.partialorder %v117_v46, 8.507059e+37 }
  0x99   :  { %v187_v57 = vor.u32 1.1754944e-38, %v186_v54  ;;  %vm185_vm8 = vcmp.eq.f32.partialorder %v184_v55, 8.507059e+37 }
  0x9a   :  { %197 = vrot.lane.b32.xlu0 %v701_v30, %s764_s12 }
  0x9c   :  { %v707_v37 = vpop.eup %706 }
  0x9d   :  { %v109_v38 = vmul.f32 %v707_v37, %v107_v34  ;;  %v709_v40 = vpop.eup %708  ;;  %vm114_vm1 = vweird.f32 %v707_v37 }
  0x9e   :  { %v176_v42 = vmul.f32 %v709_v40, %v174_v36  ;;  %vm115_vm3 = vmor %vm113_vm2, %vm114_vm1  ;;  %vm181_vm6 = vweird.f32 %v709_v40 }
  0x9f   :  { %v110_v39 = vsub.f32 1.0, %v109_v38  ;;  %vm182_vm7 = vmor %vm180_vm5, %vm181_vm6 }
  0xa0   :  { %v177_v44 = vsub.f32 1.0, %v176_v42 }
  0xa1   :  { %v111_v41 = vmul.f32 %v707_v37, %v110_v39 }
  0xa2   :  { %v178_v48 = vmul.f32 %v709_v40, %v177_v44 }
  0xa3   :  { %v112_v43 = vadd.f32 %v707_v37, %v111_v41 }
  0xa4   :  { %v179_v52 = vadd.f32 %v709_v40, %v178_v48 }
  0xa5   :  { %v116_v47 = vsel %vm115_vm3, %v707_v37, %v112_v43 }
  0xa6   :  { %v121_v50 = vsel %vm118_vm4, %v120_v49, %v116_v47  ;;  %v183_v56 = vsel %vm182_vm7, %v709_v40, %v179_v52 }
  0xa7   :  { %v188_v58 = vsel %vm185_vm8, %v187_v57, %v183_v56  ;;  %v128_v62 = vmul.f32 %v126_v61, %v121_v50 }
  0xa8   :  { %v195_v2 = vmul.f32 %v193_v1, %v188_v58 }
 0x104   :  { %v131_v51 = vpop.permute.xlu0 %130 }
 0x105   :  { %v133_v53 = vmul.f32 %v131_v51, %v121_v50 }
 0x107   :  { %135 = vrot.lane.b32.xlu2 %v133_v53, %s763_s2 }
 0x10c   :  { %v198_v59 = vpop.permute.xlu0 %197 }
 0x10d   :  { %v200_v60 = vmul.f32 %v198_v59, %v188_v58 }
 0x10f   :  { %202 = vrot.lane.b32.xlu2 %v200_v60, %s763_s2 }
 0x161   :  { %v136_v63 = vpop.permute.xlu2 %135 }
 0x162   :  { %v841_v0 = vadd.f32 %v136_v63, %v128_v62 }
 0x164   :  { %710 = vtanh.f32 %v841_v0 }
 0x169   :  { %v203_v3 = vpop.permute.xlu2 %202 }
 0x16a   :  { %v711_v4 = vpop.eup %710  ;;  %v844_v5 = vadd.f32 %v203_v3, %v195_v2 }
 0x16b   :  { %141 = vrot.lane.b32.xlu0 %v711_v4, %s764_s12 }
 0x16c   :  { %712 = vtanh.f32 %v844_v5 }
 0x172   :  { %v713_v6 = vpop.eup %712 }
 0x173   :  { %208 = vrot.lane.b32.xlu1 %v713_v6, %s764_s12 }
 0x1dd   :  { %v142_v7 = vpop.permute.xlu0 %141 }
 0x1de   :  { %v849_v8 = vmul.f32 %v142_v7, %v121_v50 }
 0x1e0   :  { %v221_v9 = vpack.c.bf16 %v849_v8, %v849_v8 }
 0x1e2   :  { %223 = vrot.lane.b32.xlu2 %v221_v9, %s763_s2  ;;  %v354_v9 = vunpack.c.h.bf16 %v864_v15 }
 0x1e5   :  { %v209_v10 = vpop.permute.xlu1 %208 }
 0x1e6   :  { %v854_v11 = vmul.f32 %v209_v10, %v188_v58 }
 0x1e8   :  { %v288_v12 = vpack.c.bf16 %v854_v11, %v854_v11 }
 0x1ea   :  { %290 = vrot.lane.b32.xlu0 %v288_v12, %s763_s2 }
 0x23c   :  { %v224_v13 = vpop.permute.xlu2 %223 }
 0x23d   :  { %673 = vmatmul.msk.bf16.vlgmr.msra.gmra.mxu2 %vm60_vm0, %v224_v13  ;;  %v898_v13 = vld [vmem:[%s992_s1] sm:$0xff]  }
 0x25c   :  { %v291_v14 = vpop.permute.xlu0 %290 }
 0x25d   :  { %677 = vmatmul.msk.bf16.vlgmr.msra.gmra.mxu3 %vm60_vm0, %v291_v14  ;;  %v421_v14 = vunpack.c.h.bf16 %v898_v13 }
 0x2c0   :  { %v237_v17 = vpop.f32.mrf.mxu2 }
 0x2c1   :  { %v241_v18 = vadd.f32 %v237_v17, %v220_v16 }
 0x2c3   :  { %714 = vtanh.f32 %v241_v18  ;;  %v674_v27 = vmul.f32 -1.442695, %v241_v18 }
 0x2c8   :  { %v239_v19 = vpop.f32.mrf.mxu2 }
 0x2c9   :  { %v715_v20 = vpop.eup %714 }
 0x2ca   :  { %264 = vrot.lane.b32.xlu1 %v715_v20, %s764_s12 }
 0x2e0   :  { %v304_v23 = vpop.f32.mrf.mxu3 }
 0x2e1   :  { %v308_v24 = vadd.f32 %v304_v23, %v287_v21 }
 0x2e3   :  { %716 = vtanh.f32 %v308_v24  ;;  %v678_v28 = vmul.f32 -1.442695, %v308_v24 }
 0x2e4   :  { %718 = vpow2.f32 %v674_v27 }
 0x2e5   :  { %720 = vpow2.f32 %v678_v28 }
 0x2e8   :  { %v306_v25 = vpop.f32.mrf.mxu3 }
 0x2e9   :  { %v717_v26 = vpop.eup %716 }
 0x2ea   :  { %331 = vrot.lane.b32.xlu2 %v717_v26, %s764_s12  ;;  %v719_v29 = vpop.eup %718 }
 0x2eb   :  { %v245_v30 = vadd.f32 1.0, %v719_v29  ;;  %v721_v31 = vpop.eup %720 }
 0x2ec   :  { %v312_v32 = vadd.f32 1.0, %v721_v31 }
 0x2ed   :  { %722 = vrcp.f32 %v245_v30  ;;  %v257_v40 = vand.u32 2147483648, %v245_v30  ;;  %vm251_vm10 = vweird.f32 %v245_v30  ;;  %v255_v41 = vand.u32 2147483647, %v245_v30 }
 0x2ee   :  { %724 = vrcp.f32 %v312_v32  ;;  %v324_v49 = vand.u32 2147483648, %v312_v32  ;;  %vm318_vm14 = vweird.f32 %v312_v32  ;;  %v322_v50 = vand.u32 2147483647, %v312_v32 }
 0x2ef   :  { %v258_v44 = vor.u32 1.1754944e-38, %v257_v40  ;;  %vm256_vm12 = vcmp.eq.f32.partialorder %v255_v41, 8.507059e+37 }
 0x2f0   :  { %v325_v52 = vor.u32 1.1754944e-38, %v324_v49  ;;  %vm323_vm1 = vcmp.eq.f32.partialorder %v322_v50, 8.507059e+37 }
 0x2f3   :  { %v723_v33 = vpop.eup %722 }
 0x2f4   :  { %v247_v34 = vmul.f32 %v723_v33, %v245_v30  ;;  %v725_v35 = vpop.eup %724  ;;  %vm252_vm9 = vweird.f32 %v723_v33 }
 0x2f5   :  { %v314_v37 = vmul.f32 %v725_v35, %v312_v32  ;;  %vm253_vm11 = vmor %vm251_vm10, %vm252_vm9  ;;  %vm319_vm13 = vweird.f32 %v725_v35 }
 0x2f6   :  { %v248_v22 = vsub.f32 1.0, %v247_v34  ;;  %vm320_vm15 = vmor %vm318_vm14, %vm319_vm13 }
 0x2f7   :  { %v315_v39 = vsub.f32 1.0, %v314_v37 }
 0x2f8   :  { %v249_v36 = vmul.f32 %v723_v33, %v248_v22 }
 0x2f9   :  { %v316_v43 = vmul.f32 %v725_v35, %v315_v39 }
 0x2fa   :  { %v250_v38 = vadd.f32 %v723_v33, %v249_v36 }
 0x2fb   :  { %v317_v48 = vadd.f32 %v725_v35, %v316_v43 }
 0x2fc   :  { %v254_v42 = vsel %vm253_vm11, %v723_v33, %v250_v38 }
 0x2fd   :  { %v259_v46 = vsel %vm256_vm12, %v258_v44, %v254_v42  ;;  %v321_v51 = vsel %vm320_vm15, %v725_v35, %v317_v48 }
 0x2fe   :  { %v326_v54 = vsel %vm323_vm1, %v325_v52, %v321_v51  ;;  %v262_v56 = vmul.f32 %v259_v46, %v841_v0 }
 0x2ff   :  { %v329_v59 = vmul.f32 %v326_v54, %v844_v5 }
 0x33c   :  { %v265_v45 = vpop.permute.xlu1 %264 }
 0x33d   :  { %v267_v47 = vmul.f32 %v265_v45, %v259_v46 }
 0x33f   :  { %269 = vrot.lane.b32.xlu0 %v267_v47, %s763_s2 }
 0x344   :  { %v332_v53 = vpop.permute.xlu2 %331 }
 0x345   :  { %v334_v55 = vmul.f32 %v332_v53, %v326_v54 }
 0x347   :  { %336 = vrot.lane.b32.xlu1 %v334_v55, %s763_s2 }
 0x3b1   :  { %v270_v57 = vpop.permute.xlu0 %269 }
 0x3b2   :  { %v873_v58 = vadd.f32 %v270_v57, %v262_v56 }
 0x3b4   :  { %726 = vtanh.f32 %v873_v58 }
 0x3b9   :  { %v337_v60 = vpop.permute.xlu1 %336 }
 0x3ba   :  { %v727_v61 = vpop.eup %726  ;;  %v877_v62 = vadd.f32 %v337_v60, %v329_v59 }
 0x3bb   :  { %275 = vrot.lane.b32.xlu2 %v727_v61, %s764_s12 }
 0x3bc   :  { %728 = vtanh.f32 %v877_v62 }
 0x3c2   :  { %v729_v63 = vpop.eup %728 }
 0x3c3   :  { %342 = vrot.lane.b32.xlu0 %v729_v63, %s764_s12 }
 0x415   :  { %v276_v1 = vpop.permute.xlu2 %275 }
 0x416   :  { %v882_v0 = vmul.f32 %v276_v1, %v259_v46 }
 0x418   :  { %v355_v2 = vpack.c.bf16 %v882_v0, %v882_v0 }
 0x41a   :  { %357 = vrot.lane.b32.xlu1 %v355_v2, %s763_s2 }
 0x435   :  { %v343_v3 = vpop.permute.xlu0 %342 }
 0x436   :  { %v887_v4 = vmul.f32 %v343_v3, %v326_v54 }
 0x438   :  { %v422_v5 = vpack.c.bf16 %v887_v4, %v887_v4 }
 0x43a   :  { %424 = vrot.lane.b32.xlu2 %v422_v5, %s763_s2  ;;  %v688_v5 = vld [vmem:[%s991_s0 + $0xc] sm:$0xf] }
 0x48c   :  { %v358_v6 = vpop.permute.xlu1 %357 }
 0x48d   :  { %681 = vmatmul.msk.bf16.vlgmr.msrb.gmra.mxu0 %vm60_vm0, %v358_v6  ;;  %v488_v6 = vunpack.c.l.bf16 %v688_v5 }
 0x494   :  { %v425_v7 = vpop.permute.xlu2 %424 }
 0x495   :  { %685 = vmatmul.msk.bf16.vlgmr.msrb.gmra.mxu1 %vm60_vm0, %v425_v7 }
 0x50a   :  { %v371_v10 = vpop.f32.mrf.mxu0 }
 0x50b   :  { %v375_v12 = vadd.f32 %v371_v10, %v354_v9  ;;  %v554_v10 = vunpack.c.l.bf16 %v898_v13 }
 0x50d   :  { %730 = vtanh.f32 %v375_v12  ;;  %v682_v15 = vmul.f32 -1.442695, %v375_v12 }
 0x512   :  { %v373_v16 = vpop.f32.mrf.mxu0  ;;  %v438_v17 = vpop.f32.mrf.mxu1 }
 0x513   :  { %v731_v18 = vpop.eup %730  ;;  %v442_v19 = vadd.f32 %v438_v17, %v421_v14 }
 0x514   :  { %398 = vrot.lane.b32.xlu0 %v731_v18, %s764_s12 }
 0x515   :  { %732 = vtanh.f32 %v442_v19  ;;  %v686_v23 = vmul.f32 -1.442695, %v442_v19 }
 0x516   :  { %734 = vpow2.f32 %v682_v15 }
 0x517   :  { %736 = vpow2.f32 %v686_v23 }
 0x51a   :  { %v440_v20 = vpop.f32.mrf.mxu1 }
 0x51b   :  { %v733_v21 = vpop.eup %732 }
 0x51c   :  { %465 = vrot.lane.b32.xlu1 %v733_v21, %s764_s12  ;;  %v735_v24 = vpop.eup %734 }
 0x51d   :  { %v379_v25 = vadd.f32 1.0, %v735_v24  ;;  %v737_v26 = vpop.eup %736 }
 0x51e   :  { %v446_v27 = vadd.f32 1.0, %v737_v26 }
 0x51f   :  { %738 = vrcp.f32 %v379_v25  ;;  %v391_v35 = vand.u32 2147483648, %v379_v25  ;;  %vm385_vm3 = vweird.f32 %v379_v25  ;;  %v389_v36 = vand.u32 2147483647, %v379_v25 }
 0x520   :  { %740 = vrcp.f32 %v446_v27  ;;  %v458_v44 = vand.u32 2147483648, %v446_v27  ;;  %vm452_vm7 = vweird.f32 %v446_v27  ;;  %v456_v45 = vand.u32 2147483647, %v446_v27 }
 0x521   :  { %v392_v39 = vor.u32 1.1754944e-38, %v391_v35  ;;  %vm390_vm5 = vcmp.eq.f32.partialorder %v389_v36, 8.507059e+37 }
 0x522   :  { %v459_v47 = vor.u32 1.1754944e-38, %v458_v44  ;;  %vm457_vm9 = vcmp.eq.f32.partialorder %v456_v45, 8.507059e+37 }
 0x525   :  { %v739_v28 = vpop.eup %738 }
 0x526   :  { %v381_v29 = vmul.f32 %v739_v28, %v379_v25  ;;  %v741_v31 = vpop.eup %740  ;;  %vm386_vm2 = vweird.f32 %v739_v28 }
 0x527   :  { %v448_v33 = vmul.f32 %v741_v31, %v446_v27  ;;  %vm387_vm4 = vmor %vm385_vm3, %vm386_vm2  ;;  %vm453_vm6 = vweird.f32 %v741_v31 }
 0x528   :  { %v382_v30 = vsub.f32 1.0, %v381_v29  ;;  %vm454_vm8 = vmor %vm452_vm7, %vm453_vm6 }
 0x529   :  { %v449_v22 = vsub.f32 1.0, %v448_v33 }
 0x52a   :  { %v383_v32 = vmul.f32 %v739_v28, %v382_v30 }
 0x52b   :  { %v450_v38 = vmul.f32 %v741_v31, %v449_v22 }
 0x52c   :  { %v384_v34 = vadd.f32 %v739_v28, %v383_v32 }
 0x52d   :  { %v451_v43 = vadd.f32 %v741_v31, %v450_v38 }
 0x52e   :  { %v388_v37 = vsel %vm387_vm4, %v739_v28, %v384_v34 }
 0x52f   :  { %v393_v40 = vsel %vm390_vm5, %v392_v39, %v388_v37  ;;  %v455_v46 = vsel %vm454_vm8, %v741_v31, %v451_v43 }
 0x530   :  { %v460_v49 = vsel %vm457_vm9, %v459_v47, %v455_v46  ;;  %v396_v51 = vmul.f32 %v393_v40, %v873_v58 }
 0x531   :  { %v463_v55 = vmul.f32 %v460_v49, %v877_v62 }
 0x586   :  { %v399_v41 = vpop.permute.xlu0 %398 }
 0x587   :  { %v401_v42 = vmul.f32 %v399_v41, %v393_v40 }
 0x589   :  { %403 = vrot.lane.b32.xlu2 %v401_v42, %s763_s2 }
 0x58e   :  { %v466_v48 = vpop.permute.xlu1 %465 }
 0x58f   :  { %v468_v50 = vmul.f32 %v466_v48, %v460_v49 }
 0x591   :  { %470 = vrot.lane.b32.xlu0 %v468_v50, %s763_s2 }
 0x5e3   :  { %v404_v52 = vpop.permute.xlu2 %403 }
 0x5e4   :  { %v906_v53 = vadd.f32 %v404_v52, %v396_v51 }
 0x5e6   :  { %742 = vtanh.f32 %v906_v53 }
 0x5ec   :  { %v743_v54 = vpop.eup %742 }
 0x5ed   :  { %409 = vrot.lane.b32.xlu1 %v743_v54, %s764_s12 }
 0x603   :  { %v471_v56 = vpop.permute.xlu0 %470 }
 0x604   :  { %v911_v57 = vadd.f32 %v471_v56, %v463_v55 }
 0x606   :  { %744 = vtanh.f32 %v911_v57 }
 0x60c   :  { %v745_v59 = vpop.eup %744 }
 0x60d   :  { %476 = vrot.lane.b32.xlu2 %v745_v59, %s764_s12 }
 0x65f   :  { %v410_v60 = vpop.permute.xlu1 %409 }
 0x660   :  { %v915_v58 = vmul.f32 %v410_v60, %v393_v40 }
 0x662   :  { %v489_v61 = vpack.c.bf16 %v915_v58, %v915_v58 }
 0x664   :  { %491 = vrot.lane.b32.xlu0 %v489_v61, %s763_s2 }
 0x667   :  { %v477_v63 = vpop.permute.xlu2 %476 }
 0x668   :  { %v920_v1 = vmul.f32 %v477_v63, %v460_v49 }
 0x66a   :  { %v555_v62 = vpack.c.bf16 %v920_v1, %v920_v1 }
 0x66c   :  { %557 = vrot.lane.b32.xlu1 %v555_v62, %s763_s2 }
 0x6d6   :  { %v492_v2 = vpop.permute.xlu0 %491 }
 0x6d7   :  { %689 = vmatmul.msk.bf16.vlgmr.msrb.gmra.mxu2 %vm60_vm0, %v492_v2 }
 0x6de   :  { %v558_v3 = vpop.permute.xlu1 %557 }
 0x6df   :  { %692 = vmatmul.msk.bf16.vlgmr.msrb.gmra.mxu3 %vm60_vm0, %v558_v3 }
 0x75a   :  { %v505_v7 = vpop.f32.mrf.mxu2 }
 0x75b   :  { %v509_v9 = vadd.f32 %v505_v7, %v488_v6 }
 0x75d   :  { %746 = vtanh.f32 %v509_v9  ;;  %v690_v20 = vmul.f32 -1.442695, %v509_v9 }
 0x762   :  { %v507_v12 = vpop.f32.mrf.mxu2  ;;  %v571_v14 = vpop.f32.mrf.mxu3 }
 0x763   :  { %v747_v16 = vpop.eup %746  ;;  %v575_v17 = vadd.f32 %v571_v14, %v554_v10 }
 0x764   :  { %532 = vrot.lane.b32.xlu2 %v747_v16, %s764_s12 }
 0x765   :  { %748 = vtanh.f32 %v575_v17  ;;  %v693_v13 = vmul.f32 -1.442695, %v575_v17 }
 0x766   :  { %750 = vpow2.f32 %v690_v20 }
 0x76a   :  { %v573_v18 = vpop.f32.mrf.mxu3 }
 0x76b   :  { %v749_v19 = vpop.eup %748 }
 0x76c   :  { %598 = vrot.lane.b32.xlu0 %v749_v19, %s764_s12  ;;  %v751_v21 = vpop.eup %750 }
 0x76d   :  { %v513_v15 = vadd.f32 1.0, %v751_v21 }
 0x76f   :  { %752 = vrcp.f32 %v513_v15  ;;  %v525_v28 = vand.u32 2147483648, %v513_v15  ;;  %vm519_vm11 = vweird.f32 %v513_v15  ;;  %v523_v29 = vand.u32 2147483647, %v513_v15 }
 0x770   :  { %754 = vpow2.f32 %v693_v13 }
 0x771   :  { %v526_v32 = vor.u32 1.1754944e-38, %v525_v28  ;;  %vm524_vm13 = vcmp.eq.f32.partialorder %v523_v29, 8.507059e+37 }
 0x775   :  { %v753_v23 = vpop.eup %752 }
 0x776   :  { %v515_v24 = vmul.f32 %v753_v23, %v513_v15  ;;  %vm520_vm10 = vweird.f32 %v753_v23  ;;  %v755_v30 = vpop.eup %754 }
 0x777   :  { %vm521_vm12 = vmor %vm519_vm11, %vm520_vm10  ;;  %v579_v33 = vadd.f32 1.0, %v755_v30 }
 0x778   :  { %v516_v25 = vsub.f32 1.0, %v515_v24 }
 0x779   :  { %756 = vrcp.f32 %v579_v33  ;;  %v591_v41 = vand.u32 2147483648, %v579_v33  ;;  %vm585_vm15 = vweird.f32 %v579_v33  ;;  %v589_v42 = vand.u32 2147483647, %v579_v33 }
 0x77a   :  { %v517_v26 = vmul.f32 %v753_v23, %v516_v25 }
 0x77b   :  { %v592_v44 = vor.u32 1.1754944e-38, %v591_v41  ;;  %vm590_vm2 = vcmp.eq.f32.partialorder %v589_v42, 8.507059e+37 }
 0x77c   :  { %v518_v27 = vadd.f32 %v753_v23, %v517_v26 }
 0x77e   :  { %v522_v31 = vsel %vm521_vm12, %v753_v23, %v518_v27 }
 0x77f   :  { %v527_v22 = vsel %vm524_vm13, %v526_v32, %v522_v31  ;;  %v757_v36 = vpop.eup %756 }
 0x780   :  { %v581_v37 = vmul.f32 %v757_v36, %v579_v33  ;;  %vm586_vm14 = vweird.f32 %v757_v36  ;;  %v530_v48 = vmul.f32 %v527_v22, %v906_v53 }
 0x781   :  { %vm587_vm1 = vmor %vm585_vm15, %vm586_vm14 }
 0x782   :  { %v582_v38 = vsub.f32 1.0, %v581_v37 }
 0x784   :  { %v583_v39 = vmul.f32 %v757_v36, %v582_v38 }
 0x786   :  { %v584_v40 = vadd.f32 %v757_v36, %v583_v39 }
 0x788   :  { %v588_v43 = vsel %vm587_vm1, %v757_v36, %v584_v40 }
 0x789   :  { %v593_v45 = vsel %vm590_vm2, %v592_v44, %v588_v43 }
 0x78a   :  { %v596_v51 = vmul.f32 %v593_v45, %v911_v57 }
 0x7be   :  { %v533_v34 = vpop.permute.xlu2 %532 }
 0x7bf   :  { %v535_v35 = vmul.f32 %v533_v34, %v527_v22 }
 0x7c1   :  { %537 = vrot.lane.b32.xlu1 %v535_v35, %s763_s2 }
 0x7de   :  { %v599_v46 = vpop.permute.xlu0 %598 }
 0x7df   :  { %v601_v47 = vmul.f32 %v599_v46, %v593_v45 }
 0x7e1   :  { %603 = vrot.lane.b32.xlu2 %v601_v47, %s763_s2 }
 0x7e9   :  { %146 = vrot.lane.b32.xlu2 %v849_v8, %s763_s2 }
 0x7f1   :  { %347 = vrot.lane.b32.xlu2 %v887_v4, %s763_s2 }
 0x833   :  { %v538_v49 = vpop.permute.xlu1 %537 }
 0x834   :  { %v540_v50 = vadd.f32 %v538_v49, %v530_v48 }
 0x836   :  { %758 = vtanh.f32 %v540_v50 }
 0x83b   :  { %v604_v52 = vpop.permute.xlu2 %603 }
 0x83c   :  { %v759_v54 = vpop.eup %758  ;;  %v606_v55 = vadd.f32 %v604_v52, %v596_v51 }
 0x83d   :  { %543 = vrot.lane.b32.xlu0 %v759_v54, %s764_s12 }
 0x83e   :  { %760 = vtanh.f32 %v606_v55 }
 0x843   :  { %v147_v56 = vpop.permute.xlu2 %146 }
 0x844   :  { %v761_v59 = vpop.eup %760  ;;  %149 = vst.msk [vmem:[%s993_s4] sm:$0xff] %vm60_vm0, %v147_v56 }
 0x845   :  { %213 = vrot.lane.b32.xlu0 %v854_v11, %s763_s2  ;;  %609 = vrot.lane.b32.xlu1 %v761_v59, %s764_s12 }
 0x84b   :  { %v348_v8 = vpop.permute.xlu2 %347 }
 0x84c   :  { %679 = vst.msk [vmem:[%s994_s5 + $0x10] sm:$0xff] %vm60_vm0, %v348_v8 }
 0x84d   :  { %414 = vrot.lane.b32.xlu0 %v915_v58, %s763_s2  ;;  %280 = vrot.lane.b32.xlu1 %v882_v0, %s763_s2 }
 0x855   :  { %481 = vrot.lane.b32.xlu1 %v920_v1, %s763_s2 }
 0x85d   :  { %620 = vrot.lane.b32.xlu1 %v540_v50, %s765_s21 }
 0x8af   :  { %v544_v11 = vpop.permute.xlu0 %543 }
 0x8b0   :  { %v546_v4 = vmul.f32 %v544_v11, %v527_v22 }
 0x8b2   :  { %548 = vrot.lane.b32.xlu2 %v546_v4, %s763_s2 }
 0x8b7   :  { %v610_v53 = vpop.permute.xlu1 %609  ;;  %v214_v57 = vpop.permute.xlu0 %213 }
 0x8b8   :  { %v612_v60 = vmul.f32 %v610_v53, %v593_v45  ;;  %671 = vst.msk [vmem:[%s994_s5 + $0x18] sm:$0xff] %vm60_vm0, %v214_v57 }
 0x8ba   :  { %614 = vrot.lane.b32.xlu0 %v612_v60, %s763_s2  ;;  %626 = vrot.lane.b32.xlu2 %v606_v55, %s765_s21 }
 0x8bf   :  { %v281_v0 = vpop.permute.xlu1 %280  ;;  %v415_v58 = vpop.permute.xlu0 %414 }
 0x8c0   :  { %675 = vst.msk [vmem:[%s993_s4 + $0x8] sm:$0xff] %vm60_vm0, %v281_v0 }
 0x8c1   :  { %683 = vst.msk [vmem:[%s993_s4 + $0x10] sm:$0xff] %vm60_vm0, %v415_v58 }
 0x8c7   :  { %v482_v61 = vpop.permute.xlu1 %481 }
 0x8c8   :  { %687 = vst.msk [vmem:[%s994_s5 + $0x8] sm:$0xff] %vm60_vm0, %v482_v61 }
 0x8cf   :  { %v621_v63 = vpop.permute.xlu1 %620 }
 0x8d0   :  { %623 = vst.msk [vmem:[#allocation3] sm:$0xff] %vm60_vm0, %v621_v63 }
 0x90c   :  { %v549_v1 = vpop.permute.xlu2 %548 }
 0x90d   :  { %691 = vst.msk [vmem:[%s993_s4 + $0x18] sm:$0xff] %vm60_vm0, %v549_v1 }
 0x90e   :  { %618 = vst.msk [vmem:[#allocation2] sm:$0xff] %vm60_vm0, %v549_v1 }
 0x914   :  { %v627_v62 = vpop.permute.xlu2 %626 }
 0x915   :  { %629 = vst.msk [vmem:[#allocation3 + $0x8] sm:$0xff] %vm60_vm0, %v627_v62 }
 0x92c   :  { %v615_v2 = vpop.permute.xlu0 %614 }
 0x92d   :  { %617 = vst.msk [vmem:[%s994_s5] sm:$0xff] %vm60_vm0, %v615_v2 }
 0x92e   :  { %624 = vst.msk [vmem:[#allocation2 + $0x8] sm:$0xff] %vm60_vm0, %v615_v2 }

// kernel: encoder_forward.10
= control target key start
LH: loop header
LB: loop body
LE: loop exit
PB: predicated region body
PF: predicated region fallthrough
CT: control target
= control target key end

     0   :  { %vm60_vm0 = vcmask 261120   ;;  %v2658_v3 = vmov 0.0   ;;  %s2660_s12 = smov 64   ;;  %s2661_s30 = smov 96   ;;  %s3502_s2 = inlined_call_operand.vmem [shape: f32[32,128], index: 2, kind: input, shape index: {}]   ;;  %s3503_s3 = inlined_call_operand.vmem [shape: f32[32,128], index: 3, kind: input, shape index: {}]   ;;  %s3504_s0 = inlined_call_operand.vmem [shape: bf16[16,8,128], index: 0, kind: input, shape index: {}]   ;;  %s3505_s1 = inlined_call_operand.vmem [shape: bf16[16,8,128], index: 1, kind: input, shape index: {}]   ;;  %s3506_s4 = inlined_call_operand.vmem [shape: f32[16,8,32], index: 4, kind: output, shape index: {0}]   ;;  %s3507_s5 = inlined_call_operand.vmem [shape: f32[16,8,32], index: 5, kind: output, shape index: {1}]  }
   0x1   :  { %v67_v0 = vld [vmem:[%s3502_s2 + $0x10] sm:$0xff]  ;;  %v68_v1 = vld [vmem:[%s3502_s2 + $0x18] sm:$0xff]  ;;  %61 = vst.msk [vmem:[#allocation2] sm:$0xff] %vm60_vm0, %v2658_v3  ;;  %v65_v6 = vld [vmem:[%s3502_s2] sm:$0xff] }
   0x2   :  { %v73_v2 = vld [vmem:[%s3503_s3 + $0x10] sm:$0xff]  ;;  %v2702_v4 = vpack.c.bf16 %v68_v1, %v67_v0  ;;  %v74_v5 = vld [vmem:[%s3503_s3 + $0x18] sm:$0xff]  ;;  %v66_v7 = vld [vmem:[%s3502_s2 + $0x8] sm:$0xff]  ;;  %62 = vst.msk [vmem:[#allocation2 + $0x8] sm:$0xff] %vm60_vm0, %v2658_v3  ;;  %s2659_s2 = smov 32  }
   0x3   :  { %v2714_v8 = vpack.c.bf16 %v74_v5, %v73_v2  ;;  %v71_v9 = vld [vmem:[%s3503_s3] sm:$0xff]  ;;  %v72_v10 = vld [vmem:[%s3503_s3 + $0x8] sm:$0xff]  ;;  %63 = vst.msk [vmem:[#allocation3] sm:$0xff] %vm60_vm0, %v2658_v3  ;;  %v2724_v11 = vpack.c.bf16 %v66_v7, %v65_v6  ;;  %v2758_v22 = vld [vmem:[%s3505_s1 + $0x38] sm:$0xff]  }
   0x4   :  { %96 = vmatpush.bf16.msra.mxu0 %v2702_v4  ;;  %64 = vst.msk [vmem:[#allocation3 + $0x8] sm:$0xff] %vm60_vm0, %v2658_v3  ;;  %234 = vmatpush.bf16.msra.mxu2 %v2702_v4  ;;  %v2729_v12 = vpack.c.bf16 %v72_v10, %v71_v9  ;;  %v83_v19 = vld [vmem:[%s3504_s0] sm:$0xf]  ;;  %v152_v25 = vunpack.c.h.bf16 %v2758_v22 }
   0x5   :  { %163 = vmatpush.bf16.msra.mxu1 %v2714_v8  ;;  %301 = vmatpush.bf16.msra.mxu3 %v2714_v8  ;;  %v84_v20 = vunpack.c.l.bf16 %v83_v19  ;;  %v2792_v19 = vld [vmem:[%s3504_s0 + $0x4] sm:$0xff]  }
   0x8   :  { %97 = vmatpush.bf16.msra.mxu0 %v2724_v11  ;;  %v77_v13 = vld [vmem:[#allocation2] sm:$0xff]  ;;  %235 = vmatpush.bf16.msra.mxu2 %v2724_v11 }
   0x9   :  { %164 = vmatpush.bf16.msra.mxu1 %v2729_v12  ;;  %v85_v14 = vpack.c.bf16 %v77_v13, %v77_v13  ;;  %v80_v15 = vld [vmem:[#allocation2 + $0x8] sm:$0xff]  ;;  %302 = vmatpush.bf16.msra.mxu3 %v2729_v12 }
   0xa   :  { %v153_v16 = vpack.c.bf16 %v80_v15, %v80_v15  ;;  %v78_v17 = vld [vmem:[#allocation3] sm:$0xff] }
   0xb   :  { %2274 = vmatmul.msk.bf16.vlgmr.msra.gmra.mxu0 %vm60_vm0, %v85_v14  ;;  %125 = vrot.lane.b32.xlu1 %v78_v17, %s2659_s2  ;;  %v82_v18 = vld [vmem:[#allocation3 + $0x8] sm:$0xff] }
   0xc   :  { %368 = vmatpush.bf16.msrb.mxu0 %v2702_v4  ;;  %2277 = vmatmul.msk.bf16.vlgmr.msra.gmra.mxu1 %vm60_vm0, %v153_v16 }
   0xd   :  { %435 = vmatpush.bf16.msrb.mxu1 %v2714_v8  ;;  %502 = vmatpush.bf16.msrb.mxu2 %v2702_v4 }
   0xe   :  { %569 = vmatpush.bf16.msrb.mxu3 %v2714_v8 }
  0x10   :  { %369 = vmatpush.bf16.msrb.mxu0 %v2724_v11 }
  0x11   :  { %436 = vmatpush.bf16.msrb.mxu1 %v2729_v12  ;;  %503 = vmatpush.bf16.msrb.mxu2 %v2724_v11 }
  0x12   :  { %570 = vmatpush.bf16.msrb.mxu3 %v2729_v12 }
  0x13   :  { %192 = vrot.lane.b32.xlu1 %v82_v18, %s2659_s2 }
  0x14   :  { %636 = vmatpush.bf16.msra.mxu0 %v2702_v4 }
  0x15   :  { %703 = vmatpush.bf16.msra.mxu1 %v2714_v8 }
  0x18   :  { %637 = vmatpush.bf16.msra.mxu0 %v2724_v11 }
  0x19   :  { %704 = vmatpush.bf16.msra.mxu1 %v2729_v12 }
  0x7d   :  { %v126_v61 = vpop.permute.xlu1 %125 }
  0x85   :  { %v193_v1 = vpop.permute.xlu1 %192 }
  0x88   :  { %v99_v21 = vpop.f32.mrf.mxu0 }
  0x89   :  { %v103_v23 = vadd.f32 %v99_v21, %v84_v20  ;;  %v166_v24 = vpop.f32.mrf.mxu1  ;;  %v220_v20 = vunpack.c.l.bf16 %v2792_v19 }
  0x8a   :  { %v170_v26 = vadd.f32 %v166_v24, %v152_v25 }
  0x8b   :  { %2402 = vtanh.f32 %v103_v23  ;;  %v2275_v31 = vmul.f32 -1.442695, %v103_v23 }
  0x8c   :  { %2404 = vtanh.f32 %v170_v26  ;;  %v2278_v32 = vmul.f32 -1.442695, %v170_v26  ;;  %v287_v26 = vunpack.c.l.bf16 %v2758_v22 }
  0x8d   :  { %2406 = vpow2.f32 %v2275_v31 }
  0x8e   :  { %2408 = vpow2.f32 %v2278_v32 }
  0x90   :  { %v101_v27 = vpop.f32.mrf.mxu0 }
  0x91   :  { %v2403_v28 = vpop.eup %2402  ;;  %v168_v29 = vpop.f32.mrf.mxu1 }
  0x92   :  { %130 = vrot.lane.b32.xlu0 %v2403_v28, %s2660_s12  ;;  %v2405_v30 = vpop.eup %2404 }
  0x93   :  { %v2407_v33 = vpop.eup %2406 }
  0x94   :  { %v107_v34 = vadd.f32 1.0, %v2407_v33  ;;  %v2409_v35 = vpop.eup %2408 }
  0x95   :  { %v174_v36 = vadd.f32 1.0, %v2409_v35 }
  0x96   :  { %2410 = vrcp.f32 %v107_v34  ;;  %v119_v45 = vand.u32 2147483648, %v107_v34  ;;  %vm113_vm2 = vweird.f32 %v107_v34  ;;  %v117_v46 = vand.u32 2147483647, %v107_v34 }
  0x97   :  { %2412 = vrcp.f32 %v174_v36  ;;  %vm180_vm5 = vweird.f32 %v174_v36  ;;  %v186_v54 = vand.u32 2147483648, %v174_v36  ;;  %v184_v55 = vand.u32 2147483647, %v174_v36 }
  0x98   :  { %v120_v49 = vor.u32 1.1754944e-38, %v119_v45  ;;  %vm118_vm4 = vcmp.eq.f32.partialorder %v117_v46, 8.507059e+37 }
  0x99   :  { %v187_v57 = vor.u32 1.1754944e-38, %v186_v54  ;;  %vm185_vm8 = vcmp.eq.f32.partialorder %v184_v55, 8.507059e+37 }
  0x9a   :  { %197 = vrot.lane.b32.xlu0 %v2405_v30, %s2660_s12 }
  0x9c   :  { %v2411_v37 = vpop.eup %2410 }
  0x9d   :  { %v109_v38 = vmul.f32 %v2411_v37, %v107_v34  ;;  %v2413_v40 = vpop.eup %2412  ;;  %vm114_vm1 = vweird.f32 %v2411_v37 }
  0x9e   :  { %v176_v42 = vmul.f32 %v2413_v40, %v174_v36  ;;  %vm115_vm3 = vmor %vm113_vm2, %vm114_vm1  ;;  %vm181_vm6 = vweird.f32 %v2413_v40 }
  0x9f   :  { %v110_v39 = vsub.f32 1.0, %v109_v38  ;;  %vm182_vm7 = vmor %vm180_vm5, %vm181_vm6 }
  0xa0   :  { %v177_v44 = vsub.f32 1.0, %v176_v42 }
  0xa1   :  { %v111_v41 = vmul.f32 %v2411_v37, %v110_v39 }
  0xa2   :  { %v178_v48 = vmul.f32 %v2413_v40, %v177_v44 }
  0xa3   :  { %v112_v43 = vadd.f32 %v2411_v37, %v111_v41 }
  0xa4   :  { %v179_v52 = vadd.f32 %v2413_v40, %v178_v48 }
  0xa5   :  { %v116_v47 = vsel %vm115_vm3, %v2411_v37, %v112_v43 }
  0xa6   :  { %v121_v50 = vsel %vm118_vm4, %v120_v49, %v116_v47  ;;  %v183_v56 = vsel %vm182_vm7, %v2413_v40, %v179_v52 }
  0xa7   :  { %v188_v58 = vsel %vm185_vm8, %v187_v57, %v183_v56  ;;  %v128_v62 = vmul.f32 %v126_v61, %v121_v50 }
  0xa8   :  { %v195_v2 = vmul.f32 %v193_v1, %v188_v58 }
 0x104   :  { %v131_v51 = vpop.permute.xlu0 %130 }
 0x105   :  { %v133_v53 = vmul.f32 %v131_v51, %v121_v50 }
 0x107   :  { %135 = vrot.lane.b32.xlu2 %v133_v53, %s2659_s2 }
 0x10c   :  { %v198_v59 = vpop.permute.xlu0 %197 }
 0x10d   :  { %v200_v60 = vmul.f32 %v198_v59, %v188_v58 }
 0x10f   :  { %202 = vrot.lane.b32.xlu2 %v200_v60, %s2659_s2 }
 0x161   :  { %v136_v63 = vpop.permute.xlu2 %135 }
 0x162   :  { %v2765_v0 = vadd.f32 %v136_v63, %v128_v62 }
 0x164   :  { %2414 = vtanh.f32 %v2765_v0 }
 0x169   :  { %v203_v3 = vpop.permute.xlu2 %202 }
 0x16a   :  { %v2415_v5 = vpop.eup %2414  ;;  %v2768_v6 = vadd.f32 %v203_v3, %v195_v2 }
 0x16b   :  { %141 = vrot.lane.b32.xlu0 %v2415_v5, %s2660_s12 }
 0x16c   :  { %2416 = vtanh.f32 %v2768_v6 }
 0x172   :  { %v2417_v7 = vpop.eup %2416 }
 0x173   :  { %208 = vrot.lane.b32.xlu1 %v2417_v7, %s2660_s12 }
 0x1dd   :  { %v142_v9 = vpop.permute.xlu0 %141 }
 0x1de   :  { %v2773_v10 = vmul.f32 %v142_v9, %v121_v50 }
 0x1e0   :  { %v221_v13 = vpack.c.bf16 %v2773_v10, %v2773_v10 }
 0x1e2   :  { %223 = vrot.lane.b32.xlu2 %v221_v13, %s2659_s2 }
 0x1e5   :  { %v209_v14 = vpop.permute.xlu1 %208 }
 0x1e6   :  { %v2778_v15 = vmul.f32 %v209_v14, %v188_v58 }
 0x1e8   :  { %v288_v16 = vpack.c.bf16 %v2778_v15, %v2778_v15 }
 0x1ea   :  { %290 = vrot.lane.b32.xlu0 %v288_v16, %s2659_s2 }
 0x23c   :  { %v224_v17 = vpop.permute.xlu2 %223 }
 0x23d   :  { %2281 = vmatmul.msk.bf16.vlgmr.msra.gmra.mxu2 %vm60_vm0, %v224_v17 }
 0x23e   :  { %770 = vmatpush.bf16.msra.mxu2 %v2702_v4 }
 0x242   :  { %771 = vmatpush.bf16.msra.mxu2 %v2724_v11 }
 0x25c   :  { %v291_v18 = vpop.permute.xlu0 %290 }
 0x25d   :  { %2285 = vmatmul.msk.bf16.vlgmr.msra.gmra.mxu3 %vm60_vm0, %v291_v18  ;;  %v354_v18 = vunpack.c.h.bf16 %v2792_v19 }
 0x25e   :  { %837 = vmatpush.bf16.msra.mxu3 %v2714_v8 }
 0x262   :  { %838 = vmatpush.bf16.msra.mxu3 %v2729_v12 }
 0x2c0   :  { %v237_v21 = vpop.f32.mrf.mxu2 }
 0x2c1   :  { %v241_v23 = vadd.f32 %v237_v21, %v220_v20 }
 0x2c3   :  { %2418 = vtanh.f32 %v241_v23  ;;  %v2282_v31 = vmul.f32 -1.442695, %v241_v23  ;;  %v2830_v23 = vld [vmem:[%s3505_s1 + $0x30] sm:$0xff]  }
 0x2c8   :  { %v239_v24 = vpop.f32.mrf.mxu2 }
 0x2c9   :  { %v2419_v25 = vpop.eup %2418  ;;  %v421_v24 = vunpack.c.h.bf16 %v2830_v23 }
 0x2ca   :  { %264 = vrot.lane.b32.xlu1 %v2419_v25, %s2660_s12 }
 0x2e0   :  { %v304_v27 = vpop.f32.mrf.mxu3 }
 0x2e1   :  { %v308_v28 = vadd.f32 %v304_v27, %v287_v26 }
 0x2e3   :  { %2420 = vtanh.f32 %v308_v28  ;;  %v2286_v32 = vmul.f32 -1.442695, %v308_v28 }
 0x2e4   :  { %2422 = vpow2.f32 %v2282_v31 }
 0x2e5   :  { %2424 = vpow2.f32 %v2286_v32 }
 0x2e8   :  { %v306_v29 = vpop.f32.mrf.mxu3 }
 0x2e9   :  { %v2421_v30 = vpop.eup %2420 }
 0x2ea   :  { %331 = vrot.lane.b32.xlu2 %v2421_v30, %s2660_s12  ;;  %v2423_v33 = vpop.eup %2422 }
 0x2eb   :  { %v245_v34 = vadd.f32 1.0, %v2423_v33  ;;  %v2425_v35 = vpop.eup %2424 }
 0x2ec   :  { %v312_v36 = vadd.f32 1.0, %v2425_v35 }
 0x2ed   :  { %2426 = vrcp.f32 %v245_v34  ;;  %v257_v44 = vand.u32 2147483648, %v245_v34  ;;  %vm251_vm10 = vweird.f32 %v245_v34  ;;  %v255_v45 = vand.u32 2147483647, %v245_v34 }
 0x2ee   :  { %2428 = vrcp.f32 %v312_v36  ;;  %v324_v53 = vand.u32 2147483648, %v312_v36  ;;  %vm318_vm14 = vweird.f32 %v312_v36  ;;  %v322_v54 = vand.u32 2147483647, %v312_v36 }
 0x2ef   :  { %v258_v48 = vor.u32 1.1754944e-38, %v257_v44  ;;  %vm256_vm12 = vcmp.eq.f32.partialorder %v255_v45, 8.507059e+37 }
 0x2f0   :  { %v325_v56 = vor.u32 1.1754944e-38, %v324_v53  ;;  %vm323_vm1 = vcmp.eq.f32.partialorder %v322_v54, 8.507059e+37 }
 0x2f3   :  { %v2427_v37 = vpop.eup %2426 }
 0x2f4   :  { %v247_v38 = vmul.f32 %v2427_v37, %v245_v34  ;;  %v2429_v39 = vpop.eup %2428  ;;  %vm252_vm9 = vweird.f32 %v2427_v37 }
 0x2f5   :  { %v314_v41 = vmul.f32 %v2429_v39, %v312_v36  ;;  %vm253_vm11 = vmor %vm251_vm10, %vm252_vm9  ;;  %vm319_vm13 = vweird.f32 %v2429_v39 }
 0x2f6   :  { %v248_v22 = vsub.f32 1.0, %v247_v38  ;;  %vm320_vm15 = vmor %vm318_vm14, %vm319_vm13 }
 0x2f7   :  { %v315_v43 = vsub.f32 1.0, %v314_v41 }
 0x2f8   :  { %v249_v40 = vmul.f32 %v2427_v37, %v248_v22 }
 0x2f9   :  { %v316_v47 = vmul.f32 %v2429_v39, %v315_v43 }
 0x2fa   :  { %v250_v42 = vadd.f32 %v2427_v37, %v249_v40 }
 0x2fb   :  { %v317_v52 = vadd.f32 %v2429_v39, %v316_v47 }
 0x2fc   :  { %v254_v46 = vsel %vm253_vm11, %v2427_v37, %v250_v42 }
 0x2fd   :  { %v259_v50 = vsel %vm256_vm12, %v258_v48, %v254_v46  ;;  %v321_v55 = vsel %vm320_vm15, %v2429_v39, %v317_v52 }
 0x2fe   :  { %v326_v58 = vsel %vm323_vm1, %v325_v56, %v321_v55  ;;  %v262_v60 = vmul.f32 %v259_v50, %v2765_v0 }
 0x2ff   :  { %v329_v63 = vmul.f32 %v326_v58, %v2768_v6 }
 0x33c   :  { %v265_v49 = vpop.permute.xlu1 %264 }
 0x33d   :  { %v267_v51 = vmul.f32 %v265_v49, %v259_v50 }
 0x33f   :  { %269 = vrot.lane.b32.xlu0 %v267_v51, %s2659_s2 }
 0x344   :  { %v332_v57 = vpop.permute.xlu2 %331 }
 0x345   :  { %v334_v59 = vmul.f32 %v332_v57, %v326_v58 }
 0x347   :  { %336 = vrot.lane.b32.xlu1 %v334_v59, %s2659_s2 }
 0x3b1   :  { %v270_v61 = vpop.permute.xlu0 %269 }
 0x3b2   :  { %v2801_v62 = vadd.f32 %v270_v61, %v262_v60 }
 0x3b4   :  { %2430 = vtanh.f32 %v2801_v62 }
 0x3b9   :  { %v337_v1 = vpop.permute.xlu1 %336 }
 0x3ba   :  { %v2431_v2 = vpop.eup %2430  ;;  %v2805_v3 = vadd.f32 %v337_v1, %v329_v63 }
 0x3bb   :  { %275 = vrot.lane.b32.xlu2 %v2431_v2, %s2660_s12 }
 0x3bc   :  { %2432 = vtanh.f32 %v2805_v3 }
 0x3c2   :  { %v2433_v5 = vpop.eup %2432 }
 0x3c3   :  { %342 = vrot.lane.b32.xlu0 %v2433_v5, %s2660_s12 }
 0x415   :  { %v276_v7 = vpop.permute.xlu2 %275 }
 0x416   :  { %v2810_v0 = vmul.f32 %v276_v7, %v259_v50 }
 0x418   :  { %v355_v9 = vpack.c.bf16 %v2810_v0, %v2810_v0 }
 0x41a   :  { %357 = vrot.lane.b32.xlu1 %v355_v9, %s2659_s2 }
 0x435   :  { %v343_v6 = vpop.permute.xlu0 %342 }
 0x436   :  { %v2815_v13 = vmul.f32 %v343_v6, %v326_v58 }
 0x438   :  { %v422_v14 = vpack.c.bf16 %v2815_v13, %v2815_v13 }
 0x43a   :  { %424 = vrot.lane.b32.xlu2 %v422_v14, %s2659_s2 }
 0x48c   :  { %v358_v16 = vpop.permute.xlu1 %357 }
 0x48d   :  { %2289 = vmatmul.msk.bf16.vlgmr.msrb.gmra.mxu0 %vm60_vm0, %v358_v16 }
 0x48e   :  { %904 = vmatpush.bf16.msrb.mxu0 %v2702_v4 }
 0x492   :  { %905 = vmatpush.bf16.msrb.mxu0 %v2724_v11 }
 0x494   :  { %v425_v17 = vpop.permute.xlu2 %424 }
 0x495   :  { %2293 = vmatmul.msk.bf16.vlgmr.msrb.gmra.mxu1 %vm60_vm0, %v425_v17 }
 0x496   :  { %971 = vmatpush.bf16.msrb.mxu1 %v2714_v8 }
 0x49a   :  { %972 = vmatpush.bf16.msrb.mxu1 %v2729_v12 }
 0x50a   :  { %v371_v20 = vpop.f32.mrf.mxu0 }
 0x50b   :  { %v375_v21 = vadd.f32 %v371_v20, %v354_v18  ;;  %v2866_v20 = vld [vmem:[%s3504_s0 + $0xc] sm:$0xff]  }
 0x50d   :  { %2434 = vtanh.f32 %v375_v21  ;;  %v2290_v19 = vmul.f32 -1.442695, %v375_v21  ;;  %v488_v21 = vunpack.c.l.bf16 %v2866_v20 }
 0x512   :  { %v373_v25 = vpop.f32.mrf.mxu0  ;;  %v438_v26 = vpop.f32.mrf.mxu1 }
 0x513   :  { %v2435_v27 = vpop.eup %2434  ;;  %v442_v28 = vadd.f32 %v438_v26, %v421_v24  ;;  %v555_v26 = vunpack.c.l.bf16 %v2830_v23 }
 0x514   :  { %398 = vrot.lane.b32.xlu0 %v2435_v27, %s2660_s12 }
 0x515   :  { %2436 = vtanh.f32 %v442_v28  ;;  %v2294_v31 = vmul.f32 -1.442695, %v442_v28 }
 0x516   :  { %2438 = vpow2.f32 %v2290_v19 }
 0x517   :  { %2440 = vpow2.f32 %v2294_v31 }
 0x51a   :  { %v440_v29 = vpop.f32.mrf.mxu1 }
 0x51b   :  { %v2437_v30 = vpop.eup %2436 }
 0x51c   :  { %465 = vrot.lane.b32.xlu1 %v2437_v30, %s2660_s12  ;;  %v2439_v32 = vpop.eup %2438 }
 0x51d   :  { %v379_v33 = vadd.f32 1.0, %v2439_v32  ;;  %v2441_v34 = vpop.eup %2440 }
 0x51e   :  { %v446_v35 = vadd.f32 1.0, %v2441_v34 }
 0x51f   :  { %2442 = vrcp.f32 %v379_v33  ;;  %v391_v43 = vand.u32 2147483648, %v379_v33  ;;  %vm385_vm3 = vweird.f32 %v379_v33  ;;  %v389_v44 = vand.u32 2147483647, %v379_v33 }
 0x520   :  { %2444 = vrcp.f32 %v446_v35  ;;  %v458_v52 = vand.u32 2147483648, %v446_v35  ;;  %vm452_vm7 = vweird.f32 %v446_v35  ;;  %v456_v53 = vand.u32 2147483647, %v446_v35 }
 0x521   :  { %v392_v47 = vor.u32 1.1754944e-38, %v391_v43  ;;  %vm390_vm5 = vcmp.eq.f32.partialorder %v389_v44, 8.507059e+37 }
 0x522   :  { %v459_v55 = vor.u32 1.1754944e-38, %v458_v52  ;;  %vm457_vm9 = vcmp.eq.f32.partialorder %v456_v53, 8.507059e+37 }
 0x525   :  { %v2443_v36 = vpop.eup %2442 }
 0x526   :  { %v381_v37 = vmul.f32 %v2443_v36, %v379_v33  ;;  %v2445_v22 = vpop.eup %2444  ;;  %vm386_vm2 = vweird.f32 %v2443_v36 }
 0x527   :  { %v448_v40 = vmul.f32 %v2445_v22, %v446_v35  ;;  %vm387_vm4 = vmor %vm385_vm3, %vm386_vm2  ;;  %vm453_vm6 = vweird.f32 %v2445_v22 }
 0x528   :  { %v382_v38 = vsub.f32 1.0, %v381_v37  ;;  %vm454_vm8 = vmor %vm452_vm7, %vm453_vm6 }
 0x529   :  { %v449_v42 = vsub.f32 1.0, %v448_v40 }
 0x52a   :  { %v383_v39 = vmul.f32 %v2443_v36, %v382_v38 }
 0x52b   :  { %v450_v46 = vmul.f32 %v2445_v22, %v449_v42 }
 0x52c   :  { %v384_v41 = vadd.f32 %v2443_v36, %v383_v39 }
 0x52d   :  { %v451_v51 = vadd.f32 %v2445_v22, %v450_v46 }
 0x52e   :  { %v388_v45 = vsel %vm387_vm4, %v2443_v36, %v384_v41 }
 0x52f   :  { %v393_v48 = vsel %vm390_vm5, %v392_v47, %v388_v45  ;;  %v455_v54 = vsel %vm454_vm8, %v2445_v22, %v451_v51 }
 0x530   :  { %v460_v57 = vsel %vm457_vm9, %v459_v55, %v455_v54  ;;  %v396_v59 = vmul.f32 %v393_v48, %v2801_v62 }
 0x531   :  { %v463_v1 = vmul.f32 %v460_v57, %v2805_v3 }
 0x586   :  { %v399_v49 = vpop.permute.xlu0 %398 }
 0x587   :  { %v401_v50 = vmul.f32 %v399_v49, %v393_v48 }
 0x589   :  { %403 = vrot.lane.b32.xlu2 %v401_v50, %s2659_s2 }
 0x58e   :  { %v466_v56 = vpop.permute.xlu1 %465 }
 0x58f   :  { %v468_v58 = vmul.f32 %v466_v56, %v460_v57 }
 0x591   :  { %470 = vrot.lane.b32.xlu0 %v468_v58, %s2659_s2 }
 0x5e3   :  { %v404_v60 = vpop.permute.xlu2 %403 }
 0x5e4   :  { %v2838_v61 = vadd.f32 %v404_v60, %v396_v59 }
 0x5e6   :  { %2446 = vtanh.f32 %v2838_v61 }
 0x5ec   :  { %v2447_v63 = vpop.eup %2446 }
 0x5ed   :  { %409 = vrot.lane.b32.xlu1 %v2447_v63, %s2660_s12 }
 0x603   :  { %v471_v2 = vpop.permute.xlu0 %470 }
 0x604   :  { %v2843_v5 = vadd.f32 %v471_v2, %v463_v1 }
 0x606   :  { %2448 = vtanh.f32 %v2843_v5 }
 0x60c   :  { %v2449_v7 = vpop.eup %2448 }
 0x60d   :  { %476 = vrot.lane.b32.xlu2 %v2449_v7, %s2660_s12 }
 0x65f   :  { %v410_v9 = vpop.permute.xlu1 %409 }
 0x660   :  { %v2847_v62 = vmul.f32 %v410_v9, %v393_v48 }
 0x662   :  { %v489_v6 = vpack.c.bf16 %v2847_v62, %v2847_v62 }
 0x664   :  { %491 = vrot.lane.b32.xlu0 %v489_v6, %s2659_s2 }
 0x667   :  { %v477_v14 = vpop.permute.xlu2 %476 }
 0x668   :  { %v2852_v16 = vmul.f32 %v477_v14, %v460_v57 }
 0x66a   :  { %v556_v3 = vpack.c.bf16 %v2852_v16, %v2852_v16 }
 0x66c   :  { %558 = vrot.lane.b32.xlu1 %v556_v3, %s2659_s2 }
 0x6d6   :  { %v492_v17 = vpop.permute.xlu0 %491 }
 0x6d7   :  { %2297 = vmatmul.msk.bf16.vlgmr.msrb.gmra.mxu2 %vm60_vm0, %v492_v17 }
 0x6d8   :  { %1038 = vmatpush.bf16.msrb.mxu2 %v2702_v4 }
 0x6dc   :  { %1039 = vmatpush.bf16.msrb.mxu2 %v2724_v11 }
 0x6de   :  { %v559_v18 = vpop.permute.xlu1 %558 }
 0x6df   :  { %2301 = vmatmul.msk.bf16.vlgmr.msrb.gmra.mxu3 %vm60_vm0, %v559_v18 }
 0x6e0   :  { %1105 = vmatpush.bf16.msrb.mxu3 %v2714_v8 }
 0x6e4   :  { %1106 = vmatpush.bf16.msrb.mxu3 %v2729_v12 }
 0x75a   :  { %v505_v24 = vpop.f32.mrf.mxu2 }
 0x75b   :  { %v509_v25 = vadd.f32 %v505_v24, %v488_v21 }
 0x75d   :  { %2450 = vtanh.f32 %v509_v25  ;;  %v2298_v32 = vmul.f32 -1.442695, %v509_v25 }
 0x762   :  { %v507_v27 = vpop.f32.mrf.mxu2  ;;  %v572_v28 = vpop.f32.mrf.mxu3 }
 0x763   :  { %v2451_v29 = vpop.eup %2450  ;;  %v576_v30 = vadd.f32 %v572_v28, %v555_v26  ;;  %v622_v26 = vunpack.c.h.bf16 %v2866_v20 }
 0x764   :  { %532 = vrot.lane.b32.xlu2 %v2451_v29, %s2660_s12 }
 0x765   :  { %2452 = vtanh.f32 %v576_v30  ;;  %v2302_v23 = vmul.f32 -1.442695, %v576_v30 }
 0x766   :  { %2454 = vpow2.f32 %v2298_v32 }
 0x76a   :  { %v574_v19 = vpop.f32.mrf.mxu3 }
 0x76b   :  { %v2453_v31 = vpop.eup %2452  ;;  %v2905_v19 = vld [vmem:[%s3505_s1 + $0x28] sm:$0xff]  }
 0x76c   :  { %599 = vrot.lane.b32.xlu0 %v2453_v31, %s2660_s12  ;;  %v2455_v33 = vpop.eup %2454  ;;  %v689_v31 = vunpack.c.h.bf16 %v2905_v19 }
 0x76d   :  { %v513_v34 = vadd.f32 1.0, %v2455_v33 }
 0x76f   :  { %2456 = vrcp.f32 %v513_v34  ;;  %v525_v39 = vand.u32 2147483648, %v513_v34  ;;  %vm519_vm11 = vweird.f32 %v513_v34  ;;  %v523_v40 = vand.u32 2147483647, %v513_v34 }
 0x770   :  { %2458 = vpow2.f32 %v2302_v23 }
 0x771   :  { %v526_v43 = vor.u32 1.1754944e-38, %v525_v39  ;;  %vm524_vm13 = vcmp.eq.f32.partialorder %v523_v40, 8.507059e+37 }
 0x775   :  { %v2457_v35 = vpop.eup %2456 }
 0x776   :  { %v515_v36 = vmul.f32 %v2457_v35, %v513_v34  ;;  %vm520_vm10 = vweird.f32 %v2457_v35  ;;  %v2459_v41 = vpop.eup %2458 }
 0x777   :  { %vm521_vm12 = vmor %vm519_vm11, %vm520_vm10  ;;  %v580_v44 = vadd.f32 1.0, %v2459_v41 }
 0x778   :  { %v516_v37 = vsub.f32 1.0, %v515_v36 }
 0x779   :  { %2460 = vrcp.f32 %v580_v44  ;;  %v592_v53 = vand.u32 2147483648, %v580_v44  ;;  %vm586_vm15 = vweird.f32 %v580_v44  ;;  %v590_v54 = vand.u32 2147483647, %v580_v44 }
 0x77a   :  { %v517_v38 = vmul.f32 %v2457_v35, %v516_v37 }
 0x77b   :  { %v593_v56 = vor.u32 1.1754944e-38, %v592_v53  ;;  %vm591_vm2 = vcmp.eq.f32.partialorder %v590_v54, 8.507059e+37 }
 0x77c   :  { %v518_v22 = vadd.f32 %v2457_v35, %v517_v38 }
 0x77e   :  { %v522_v42 = vsel %vm521_vm12, %v2457_v35, %v518_v22 }
 0x77f   :  { %v527_v46 = vsel %vm524_vm13, %v526_v43, %v522_v42  ;;  %v2461_v48 = vpop.eup %2460 }
 0x780   :  { %v582_v49 = vmul.f32 %v2461_v48, %v580_v44  ;;  %vm587_vm14 = vweird.f32 %v2461_v48  ;;  %v530_v60 = vmul.f32 %v527_v46, %v2838_v61 }
 0x781   :  { %vm588_vm1 = vmor %vm586_vm15, %vm587_vm14 }
 0x782   :  { %v583_v50 = vsub.f32 1.0, %v582_v49 }
 0x784   :  { %v584_v51 = vmul.f32 %v2461_v48, %v583_v50 }
 0x786   :  { %v585_v52 = vadd.f32 %v2461_v48, %v584_v51 }
 0x788   :  { %v589_v55 = vsel %vm588_vm1, %v2461_v48, %v585_v52 }
 0x789   :  { %v594_v57 = vsel %vm591_vm2, %v593_v56, %v589_v55 }
 0x78a   :  { %v597_v2 = vmul.f32 %v594_v57, %v2843_v5 }
 0x7be   :  { %v533_v45 = vpop.permute.xlu2 %532 }
 0x7bf   :  { %v535_v47 = vmul.f32 %v533_v45, %v527_v46 }
 0x7c1   :  { %537 = vrot.lane.b32.xlu1 %v535_v47, %s2659_s2 }
 0x7de   :  { %v600_v58 = vpop.permute.xlu0 %599 }
 0x7df   :  { %v602_v59 = vmul.f32 %v600_v58, %v594_v57 }
 0x7e1   :  { %604 = vrot.lane.b32.xlu2 %v602_v59, %s2659_s2 }
 0x833   :  { %v538_v63 = vpop.permute.xlu1 %537 }
 0x834   :  { %v2875_v1 = vadd.f32 %v538_v63, %v530_v60 }
 0x836   :  { %2462 = vtanh.f32 %v2875_v1 }
 0x83b   :  { %v605_v7 = vpop.permute.xlu2 %604 }
 0x83c   :  { %v2463_v9 = vpop.eup %2462  ;;  %v2879_v6 = vadd.f32 %v605_v7, %v597_v2 }
 0x83d   :  { %543 = vrot.lane.b32.xlu0 %v2463_v9, %s2660_s12 }
 0x83e   :  { %2464 = vtanh.f32 %v2879_v6 }
 0x844   :  { %v2465_v14 = vpop.eup %2464 }
 0x845   :  { %610 = vrot.lane.b32.xlu1 %v2465_v14, %s2660_s12 }
 0x8af   :  { %v544_v3 = vpop.permute.xlu0 %543 }
 0x8b0   :  { %v2884_v61 = vmul.f32 %v544_v3, %v527_v46 }
 0x8b2   :  { %v623_v17 = vpack.c.bf16 %v2884_v61, %v2884_v61 }
 0x8b4   :  { %625 = vrot.lane.b32.xlu2 %v623_v17, %s2659_s2 }
 0x8b7   :  { %v611_v5 = vpop.permute.xlu1 %610 }
 0x8b8   :  { %v2889_v18 = vmul.f32 %v611_v5, %v594_v57 }
 0x8ba   :  { %v690_v21 = vpack.c.bf16 %v2889_v18, %v2889_v18 }
 0x8bc   :  { %692 = vrot.lane.b32.xlu0 %v690_v21, %s2659_s2 }
 0x90e   :  { %v626_v24 = vpop.permute.xlu2 %625 }
 0x90f   :  { %2305 = vmatmul.msk.bf16.vlgmr.msra.gmra.mxu0 %vm60_vm0, %v626_v24 }
 0x910   :  { %1172 = vmatpush.bf16.msra.mxu0 %v2702_v4 }
 0x914   :  { %1173 = vmatpush.bf16.msra.mxu0 %v2724_v11 }
 0x92e   :  { %v693_v25 = vpop.permute.xlu0 %692 }
 0x92f   :  { %2309 = vmatmul.msk.bf16.vlgmr.msra.gmra.mxu1 %vm60_vm0, %v693_v25 }
 0x930   :  { %1239 = vmatpush.bf16.msra.mxu1 %v2714_v8 }
 0x934   :  { %1240 = vmatpush.bf16.msra.mxu1 %v2729_v12 }
 0x98c   :  { %v639_v27 = vpop.f32.mrf.mxu0 }
 0x98d   :  { %v643_v28 = vadd.f32 %v639_v27, %v622_v26 }
 0x98f   :  { %2466 = vtanh.f32 %v643_v28  ;;  %v2306_v20 = vmul.f32 -1.442695, %v643_v28 }
 0x994   :  { %v641_v29 = vpop.f32.mrf.mxu0 }
 0x995   :  { %v2467_v30 = vpop.eup %2466 }
 0x996   :  { %666 = vrot.lane.b32.xlu1 %v2467_v30, %s2660_s12 }
 0x9ac   :  { %v706_v32 = vpop.f32.mrf.mxu1 }
 0x9ad   :  { %v710_v33 = vadd.f32 %v706_v32, %v689_v31  ;;  %v2940_v31 = vld [vmem:[%s3504_s0 + $0x14] sm:$0xff]  }
 0x9ae   :  { %v756_v32 = vunpack.c.l.bf16 %v2940_v31 }
 0x9af   :  { %2468 = vtanh.f32 %v710_v33  ;;  %v2310_v36 = vmul.f32 -1.442695, %v710_v33 }
 0x9b0   :  { %2470 = vpow2.f32 %v2306_v20 }
 0x9b1   :  { %2472 = vpow2.f32 %v2310_v36 }
 0x9b4   :  { %v708_v34 = vpop.f32.mrf.mxu1 }
 0x9b5   :  { %v2469_v35 = vpop.eup %2468 }
 0x9b6   :  { %733 = vrot.lane.b32.xlu2 %v2469_v35, %s2660_s12  ;;  %v2471_v37 = vpop.eup %2470  ;;  %v823_v35 = vunpack.c.l.bf16 %v2905_v19 }
 0x9b7   :  { %v647_v23 = vadd.f32 1.0, %v2471_v37  ;;  %v2473_v38 = vpop.eup %2472 }
 0x9b8   :  { %v714_v22 = vadd.f32 1.0, %v2473_v38 }
 0x9b9   :  { %2474 = vrcp.f32 %v647_v23  ;;  %v659_v47 = vand.u32 2147483648, %v647_v23  ;;  %vm653_vm4 = vweird.f32 %v647_v23  ;;  %v657_v48 = vand.u32 2147483647, %v647_v23 }
 0x9ba   :  { %2476 = vrcp.f32 %v714_v22  ;;  %v726_v56 = vand.u32 2147483648, %v714_v22  ;;  %vm720_vm8 = vweird.f32 %v714_v22  ;;  %v724_v57 = vand.u32 2147483647, %v714_v22 }
 0x9bb   :  { %v660_v51 = vor.u32 1.1754944e-38, %v659_v47  ;;  %vm658_vm6 = vcmp.eq.f32.partialorder %v657_v48, 8.507059e+37 }
 0x9bc   :  { %v727_v59 = vor.u32 1.1754944e-38, %v726_v56  ;;  %vm725_vm10 = vcmp.eq.f32.partialorder %v724_v57, 8.507059e+37 }
 0x9bf   :  { %v2475_v39 = vpop.eup %2474 }
 0x9c0   :  { %v649_v40 = vmul.f32 %v2475_v39, %v647_v23  ;;  %v2477_v42 = vpop.eup %2476  ;;  %vm654_vm3 = vweird.f32 %v2475_v39 }
 0x9c1   :  { %v716_v44 = vmul.f32 %v2477_v42, %v714_v22  ;;  %vm655_vm5 = vmor %vm653_vm4, %vm654_vm3  ;;  %vm721_vm7 = vweird.f32 %v2477_v42 }
 0x9c2   :  { %v650_v41 = vsub.f32 1.0, %v649_v40  ;;  %vm722_vm9 = vmor %vm720_vm8, %vm721_vm7 }
 0x9c3   :  { %v717_v46 = vsub.f32 1.0, %v716_v44 }
 0x9c4   :  { %v651_v43 = vmul.f32 %v2475_v39, %v650_v41 }
 0x9c5   :  { %v718_v50 = vmul.f32 %v2477_v42, %v717_v46 }
 0x9c6   :  { %v652_v45 = vadd.f32 %v2475_v39, %v651_v43 }
 0x9c7   :  { %v719_v55 = vadd.f32 %v2477_v42, %v718_v50 }
 0x9c8   :  { %v656_v49 = vsel %vm655_vm5, %v2475_v39, %v652_v45 }
 0x9c9   :  { %v661_v53 = vsel %vm658_vm6, %v660_v51, %v656_v49  ;;  %v723_v58 = vsel %vm722_vm9, %v2477_v42, %v719_v55 }
 0x9ca   :  { %v728_v63 = vsel %vm725_vm10, %v727_v59, %v723_v58  ;;  %v664_v7 = vmul.f32 %v661_v53, %v2875_v1 }
 0x9cb   :  { %v731_v3 = vmul.f32 %v728_v63, %v2879_v6 }
 0xa08   :  { %v667_v52 = vpop.permute.xlu1 %666 }
 0xa09   :  { %v669_v54 = vmul.f32 %v667_v52, %v661_v53 }
 0xa0b   :  { %671 = vrot.lane.b32.xlu0 %v669_v54, %s2659_s2 }
 0xa10   :  { %v734_v60 = vpop.permute.xlu2 %733 }
 0xa11   :  { %v736_v2 = vmul.f32 %v734_v60, %v728_v63 }
 0xa13   :  { %738 = vrot.lane.b32.xlu1 %v736_v2, %s2659_s2 }
 0xa7d   :  { %v672_v9 = vpop.permute.xlu0 %671 }
 0xa7e   :  { %v2912_v14 = vadd.f32 %v672_v9, %v664_v7 }
 0xa80   :  { %2478 = vtanh.f32 %v2912_v14 }
 0xa85   :  { %v739_v17 = vpop.permute.xlu1 %738 }
 0xa86   :  { %v2479_v5 = vpop.eup %2478  ;;  %v2916_v21 = vadd.f32 %v739_v17, %v731_v3 }
 0xa87   :  { %677 = vrot.lane.b32.xlu2 %v2479_v5, %s2660_s12 }
 0xa88   :  { %2480 = vtanh.f32 %v2916_v21 }
 0xa8e   :  { %v2481_v24 = vpop.eup %2480 }
 0xa8f   :  { %744 = vrot.lane.b32.xlu0 %v2481_v24, %s2660_s12 }
 0xae1   :  { %v678_v25 = vpop.permute.xlu2 %677 }
 0xae2   :  { %v2921_v1 = vmul.f32 %v678_v25, %v661_v53 }
 0xae4   :  { %v757_v26 = vpack.c.bf16 %v2921_v1, %v2921_v1 }
 0xae6   :  { %759 = vrot.lane.b32.xlu1 %v757_v26, %s2659_s2 }
 0xb01   :  { %v745_v6 = vpop.permute.xlu0 %744 }
 0xb02   :  { %v2926_v27 = vmul.f32 %v745_v6, %v728_v63 }
 0xb04   :  { %v824_v28 = vpack.c.bf16 %v2926_v27, %v2926_v27 }
 0xb06   :  { %826 = vrot.lane.b32.xlu2 %v824_v28, %s2659_s2 }
 0xb58   :  { %v760_v29 = vpop.permute.xlu1 %759 }
 0xb59   :  { %2313 = vmatmul.msk.bf16.vlgmr.msra.gmra.mxu2 %vm60_vm0, %v760_v29 }
 0xb5a   :  { %1306 = vmatpush.bf16.msra.mxu2 %v2702_v4 }
 0xb5e   :  { %1307 = vmatpush.bf16.msra.mxu2 %v2724_v11 }
 0xb60   :  { %v827_v30 = vpop.permute.xlu2 %826 }
 0xb61   :  { %2317 = vmatmul.msk.bf16.vlgmr.msra.gmra.mxu3 %vm60_vm0, %v827_v30 }
 0xb62   :  { %1373 = vmatpush.bf16.msra.mxu3 %v2714_v8 }
 0xb66   :  { %1374 = vmatpush.bf16.msra.mxu3 %v2729_v12 }
 0xbdc   :  { %v773_v33 = vpop.f32.mrf.mxu2 }
 0xbdd   :  { %v777_v34 = vadd.f32 %v773_v33, %v756_v32 }
 0xbdf   :  { %2482 = vtanh.f32 %v777_v34  ;;  %v2314_v39 = vmul.f32 -1.442695, %v777_v34 }
 0xbe4   :  { %v775_v20 = vpop.f32.mrf.mxu2  ;;  %v840_v36 = vpop.f32.mrf.mxu3 }
 0xbe5   :  { %v2483_v37 = vpop.eup %2482  ;;  %v844_v23 = vadd.f32 %v840_v36, %v823_v35 }
 0xbe6   :  { %800 = vrot.lane.b32.xlu0 %v2483_v37, %s2660_s12 }
 0xbe7   :  { %2484 = vtanh.f32 %v844_v23  ;;  %v2318_v40 = vmul.f32 -1.442695, %v844_v23  ;;  %v890_v23 = vunpack.c.h.bf16 %v2940_v31 }
 0xbe8   :  { %2486 = vpow2.f32 %v2314_v39  ;;  %v2978_v39 = vld [vmem:[%s3505_s1 + $0x20] sm:$0xff]  }
 0xbe9   :  { %2488 = vpow2.f32 %v2318_v40  ;;  %v957_v40 = vunpack.c.h.bf16 %v2978_v39 }
 0xbec   :  { %v842_v38 = vpop.f32.mrf.mxu3 }
 0xbed   :  { %v2485_v22 = vpop.eup %2484 }
 0xbee   :  { %867 = vrot.lane.b32.xlu1 %v2485_v22, %s2660_s12  ;;  %v2487_v41 = vpop.eup %2486 }
 0xbef   :  { %v781_v42 = vadd.f32 1.0, %v2487_v41  ;;  %v2489_v43 = vpop.eup %2488 }
 0xbf0   :  { %v848_v19 = vadd.f32 1.0, %v2489_v43 }
 0xbf1   :  { %2490 = vrcp.f32 %v781_v42  ;;  %v793_v52 = vand.u32 2147483648, %v781_v42  ;;  %vm787_vm12 = vweird.f32 %v781_v42  ;;  %v791_v53 = vand.u32 2147483647, %v781_v42 }
 0xbf2   :  { %2492 = vrcp.f32 %v848_v19  ;;  %v860_v63 = vand.u32 2147483648, %v848_v19  ;;  %vm854_vm1 = vweird.f32 %v848_v19  ;;  %v858_v2 = vand.u32 2147483647, %v848_v19 }
 0xbf3   :  { %v794_v56 = vor.u32 1.1754944e-38, %v793_v52  ;;  %vm792_vm14 = vcmp.eq.f32.partialorder %v791_v53, 8.507059e+37 }
 0xbf4   :  { %v861_v9 = vor.u32 1.1754944e-38, %v860_v63  ;;  %vm859_vm3 = vcmp.eq.f32.partialorder %v858_v2, 8.507059e+37 }
 0xbf7   :  { %v2491_v44 = vpop.eup %2490 }
 0xbf8   :  { %v783_v45 = vmul.f32 %v2491_v44, %v781_v42  ;;  %v2493_v47 = vpop.eup %2492  ;;  %vm788_vm11 = vweird.f32 %v2491_v44 }
 0xbf9   :  { %v850_v49 = vmul.f32 %v2493_v47, %v848_v19  ;;  %vm789_vm13 = vmor %vm787_vm12, %vm788_vm11  ;;  %vm855_vm15 = vweird.f32 %v2493_v47 }
 0xbfa   :  { %v784_v46 = vsub.f32 1.0, %v783_v45  ;;  %vm856_vm2 = vmor %vm854_vm1, %vm855_vm15 }
 0xbfb   :  { %v851_v51 = vsub.f32 1.0, %v850_v49 }
 0xbfc   :  { %v785_v48 = vmul.f32 %v2491_v44, %v784_v46 }
 0xbfd   :  { %v852_v55 = vmul.f32 %v2493_v47, %v851_v51 }
 0xbfe   :  { %v786_v50 = vadd.f32 %v2491_v44, %v785_v48 }
 0xbff   :  { %v853_v60 = vadd.f32 %v2493_v47, %v852_v55 }
 0xc00   :  { %v790_v54 = vsel %vm789_vm13, %v2491_v44, %v786_v50 }
 0xc01   :  { %v795_v57 = vsel %vm792_vm14, %v794_v56, %v790_v54  ;;  %v857_v7 = vsel %vm856_vm2, %v2493_v47, %v853_v60 }
 0xc02   :  { %v862_v17 = vsel %vm859_vm3, %v861_v9, %v857_v7  ;;  %v798_v24 = vmul.f32 %v795_v57, %v2912_v14 }
 0xc03   :  { %v865_v28 = vmul.f32 %v862_v17, %v2916_v21 }
 0xc58   :  { %v801_v58 = vpop.permute.xlu0 %800 }
 0xc59   :  { %v803_v59 = vmul.f32 %v801_v58, %v795_v57 }
 0xc5b   :  { %805 = vrot.lane.b32.xlu2 %v803_v59, %s2659_s2 }
 0xc60   :  { %v868_v3 = vpop.permute.xlu1 %867 }
 0xc61   :  { %v870_v5 = vmul.f32 %v868_v3, %v862_v17 }
 0xc63   :  { %872 = vrot.lane.b32.xlu0 %v870_v5, %s2659_s2 }
 0xcb5   :  { %v806_v25 = vpop.permute.xlu2 %805 }
 0xcb6   :  { %v2949_v26 = vadd.f32 %v806_v25, %v798_v24 }
 0xcb8   :  { %2494 = vtanh.f32 %v2949_v26 }
 0xcbe   :  { %v2495_v6 = vpop.eup %2494 }
 0xcbf   :  { %811 = vrot.lane.b32.xlu1 %v2495_v6, %s2660_s12 }
 0xcd5   :  { %v873_v29 = vpop.permute.xlu0 %872 }
 0xcd6   :  { %v2954_v30 = vadd.f32 %v873_v29, %v865_v28 }
 0xcd8   :  { %2496 = vtanh.f32 %v2954_v30 }
 0xcde   :  { %v2497_v32 = vpop.eup %2496 }
 0xcdf   :  { %878 = vrot.lane.b32.xlu2 %v2497_v32, %s2660_s12 }
 0xd31   :  { %v812_v33 = vpop.permute.xlu1 %811 }
 0xd32   :  { %v2958_v14 = vmul.f32 %v812_v33, %v795_v57 }
 0xd34   :  { %v891_v34 = vpack.c.bf16 %v2958_v14, %v2958_v14 }
 0xd36   :  { %893 = vrot.lane.b32.xlu0 %v891_v34, %s2659_s2 }
 0xd39   :  { %v879_v35 = vpop.permute.xlu2 %878 }
 0xd3a   :  { %v2963_v20 = vmul.f32 %v879_v35, %v862_v17 }
 0xd3c   :  { %v958_v21 = vpack.c.bf16 %v2963_v20, %v2963_v20 }
 0xd3e   :  { %960 = vrot.lane.b32.xlu1 %v958_v21, %s2659_s2 }
 0xda8   :  { %v894_v36 = vpop.permute.xlu0 %893 }
 0xda9   :  { %2321 = vmatmul.msk.bf16.vlgmr.msrb.gmra.mxu0 %vm60_vm0, %v894_v36 }
 0xdaa   :  { %1440 = vmatpush.bf16.msrb.mxu0 %v2702_v4 }
 0xdae   :  { %1441 = vmatpush.bf16.msrb.mxu0 %v2724_v11 }
 0xdb0   :  { %v961_v37 = vpop.permute.xlu1 %960 }
 0xdb1   :  { %2325 = vmatmul.msk.bf16.vlgmr.msrb.gmra.mxu1 %vm60_vm0, %v961_v37 }
 0xdb2   :  { %1507 = vmatpush.bf16.msrb.mxu1 %v2714_v8 }
 0xdb6   :  { %1508 = vmatpush.bf16.msrb.mxu1 %v2729_v12 }
 0xe26   :  { %v907_v38 = vpop.f32.mrf.mxu0 }
 0xe27   :  { %v911_v22 = vadd.f32 %v907_v38, %v890_v23 }
 0xe29   :  { %2498 = vtanh.f32 %v911_v22  ;;  %v2322_v31 = vmul.f32 -1.442695, %v911_v22 }
 0xe2e   :  { %v909_v41 = vpop.f32.mrf.mxu0  ;;  %v974_v42 = vpop.f32.mrf.mxu1 }
 0xe2f   :  { %v2499_v43 = vpop.eup %2498  ;;  %v978_v19 = vadd.f32 %v974_v42, %v957_v40 }
 0xe30   :  { %934 = vrot.lane.b32.xlu2 %v2499_v43, %s2660_s12 }
 0xe31   :  { %2500 = vtanh.f32 %v978_v19  ;;  %v2326_v51 = vmul.f32 -1.442695, %v978_v19 }
 0xe32   :  { %2502 = vpow2.f32 %v2322_v31 }
 0xe36   :  { %v976_v44 = vpop.f32.mrf.mxu1 }
 0xe37   :  { %v2501_v45 = vpop.eup %2500 }
 0xe38   :  { %1001 = vrot.lane.b32.xlu0 %v2501_v45, %s2660_s12  ;;  %v2503_v46 = vpop.eup %2502  ;;  %v3014_v45 = vld [vmem:[%s3504_s0 + $0x1c] sm:$0xff]  }
 0xe39   :  { %v915_v47 = vadd.f32 1.0, %v2503_v46  ;;  %v1024_v31 = vunpack.c.l.bf16 %v3014_v45 }
 0xe3b   :  { %2504 = vrcp.f32 %v915_v47  ;;  %v927_v54 = vand.u32 2147483648, %v915_v47  ;;  %vm921_vm5 = vweird.f32 %v915_v47  ;;  %v925_v55 = vand.u32 2147483647, %v915_v47 }
 0xe3c   :  { %2506 = vpow2.f32 %v2326_v51 }
 0xe3d   :  { %v928_v58 = vor.u32 1.1754944e-38, %v927_v54  ;;  %vm926_vm7 = vcmp.eq.f32.partialorder %v925_v55, 8.507059e+37 }
 0xe41   :  { %v2505_v48 = vpop.eup %2504 }
 0xe42   :  { %v917_v49 = vmul.f32 %v2505_v48, %v915_v47  ;;  %vm922_vm4 = vweird.f32 %v2505_v48  ;;  %v2507_v56 = vpop.eup %2506 }
 0xe43   :  { %vm923_vm6 = vmor %vm921_vm5, %vm922_vm4  ;;  %v982_v59 = vadd.f32 1.0, %v2507_v56 }
 0xe44   :  { %v918_v50 = vsub.f32 1.0, %v917_v49 }
 0xe45   :  { %2508 = vrcp.f32 %v982_v59  ;;  %v994_v24 = vand.u32 2147483648, %v982_v59  ;;  %vm988_vm9 = vweird.f32 %v982_v59  ;;  %v992_v25 = vand.u32 2147483647, %v982_v59 }
 0xe46   :  { %v919_v52 = vmul.f32 %v2505_v48, %v918_v50  ;;  %v1091_v50 = vunpack.c.l.bf16 %v2978_v39 }
 0xe47   :  { %v995_v28 = vor.u32 1.1754944e-38, %v994_v24  ;;  %vm993_vm11 = vcmp.eq.f32.partialorder %v992_v25, 8.507059e+37 }
 0xe48   :  { %v920_v53 = vadd.f32 %v2505_v48, %v919_v52 }
 0xe4a   :  { %v924_v57 = vsel %vm923_vm6, %v2505_v48, %v920_v53 }
 0xe4b   :  { %v929_v63 = vsel %vm926_vm7, %v928_v58, %v924_v57  ;;  %v2509_v7 = vpop.eup %2508 }
 0xe4c   :  { %v984_v9 = vmul.f32 %v2509_v7, %v982_v59  ;;  %vm989_vm8 = vweird.f32 %v2509_v7  ;;  %v932_v34 = vmul.f32 %v929_v63, %v2949_v26 }
 0xe4d   :  { %vm990_vm10 = vmor %vm988_vm9, %vm989_vm8 }
 0xe4e   :  { %v985_v3 = vsub.f32 1.0, %v984_v9 }
 0xe50   :  { %v986_v17 = vmul.f32 %v2509_v7, %v985_v3 }
 0xe52   :  { %v987_v5 = vadd.f32 %v2509_v7, %v986_v17 }
 0xe54   :  { %v991_v6 = vsel %vm990_vm10, %v2509_v7, %v987_v5 }
 0xe55   :  { %v996_v29 = vsel %vm993_vm11, %v995_v28, %v991_v6 }
 0xe56   :  { %v999_v36 = vmul.f32 %v996_v29, %v2954_v30 }
 0xe8a   :  { %v935_v60 = vpop.permute.xlu2 %934 }
 0xe8b   :  { %v937_v2 = vmul.f32 %v935_v60, %v929_v63 }
 0xe8d   :  { %939 = vrot.lane.b32.xlu1 %v937_v2, %s2659_s2 }
 0xeaa   :  { %v1002_v32 = vpop.permute.xlu0 %1001 }
 0xeab   :  { %v1004_v33 = vmul.f32 %v1002_v32, %v996_v29 }
 0xead   :  { %1006 = vrot.lane.b32.xlu2 %v1004_v33, %s2659_s2 }
 0xeff   :  { %v940_v35 = vpop.permute.xlu1 %939 }
 0xf00   :  { %v2986_v21 = vadd.f32 %v940_v35, %v932_v34 }
 0xf02   :  { %2510 = vtanh.f32 %v2986_v21 }
 0xf07   :  { %v1007_v37 = vpop.permute.xlu2 %1006 }
 0xf08   :  { %v2511_v23 = vpop.eup %2510  ;;  %v2990_v38 = vadd.f32 %v1007_v37, %v999_v36 }
 0xf09   :  { %945 = vrot.lane.b32.xlu0 %v2511_v23, %s2660_s12 }
 0xf0a   :  { %2512 = vtanh.f32 %v2990_v38 }
 0xf10   :  { %v2513_v22 = vpop.eup %2512 }
 0xf11   :  { %1012 = vrot.lane.b32.xlu1 %v2513_v22, %s2660_s12 }
 0xf7b   :  { %v946_v40 = vpop.permute.xlu0 %945 }
 0xf7c   :  { %v2995_v26 = vmul.f32 %v946_v40, %v929_v63 }
 0xf7e   :  { %v1025_v41 = vpack.c.bf16 %v2995_v26, %v2995_v26 }
 0xf80   :  { %1027 = vrot.lane.b32.xlu2 %v1025_v41, %s2659_s2 }
 0xf83   :  { %v1013_v30 = vpop.permute.xlu1 %1012 }
 0xf84   :  { %v3000_v42 = vmul.f32 %v1013_v30, %v996_v29 }
 0xf86   :  { %v1092_v43 = vpack.c.bf16 %v3000_v42, %v3000_v42 }
 0xf88   :  { %1094 = vrot.lane.b32.xlu0 %v1092_v43, %s2659_s2 }
 0xfda   :  { %v1028_v19 = vpop.permute.xlu2 %1027 }
 0xfdb   :  { %2329 = vmatmul.msk.bf16.vlgmr.msrb.gmra.mxu2 %vm60_vm0, %v1028_v19 }
 0xfdc   :  { %1574 = vmatpush.bf16.msrb.mxu2 %v2702_v4 }
 0xfe0   :  { %1575 = vmatpush.bf16.msrb.mxu2 %v2724_v11 }
 0xffa   :  { %v1095_v44 = vpop.permute.xlu0 %1094 }
 0xffb   :  { %2333 = vmatmul.msk.bf16.vlgmr.msrb.gmra.mxu3 %vm60_vm0, %v1095_v44 }
 0xffc   :  { %1641 = vmatpush.bf16.msrb.mxu3 %v2714_v8 }
0x1000   :  { %1642 = vmatpush.bf16.msrb.mxu3 %v2729_v12 }
0x105e   :  { %v1041_v46 = vpop.f32.mrf.mxu2 }
0x105f   :  { %v1045_v47 = vadd.f32 %v1041_v46, %v1024_v31 }
0x1061   :  { %2514 = vtanh.f32 %v1045_v47  ;;  %v2330_v55 = vmul.f32 -1.442695, %v1045_v47 }
0x1066   :  { %v1043_v48 = vpop.f32.mrf.mxu2 }
0x1067   :  { %v2515_v49 = vpop.eup %2514 }
0x1068   :  { %1068 = vrot.lane.b32.xlu1 %v2515_v49, %s2660_s12 }
0x107e   :  { %v1108_v51 = vpop.f32.mrf.mxu3 }
0x107f   :  { %v1112_v52 = vadd.f32 %v1108_v51, %v1091_v50 }
0x1081   :  { %2516 = vtanh.f32 %v1112_v52  ;;  %v2334_v56 = vmul.f32 -1.442695, %v1112_v52 }
0x1082   :  { %2518 = vpow2.f32 %v2330_v55 }
0x1083   :  { %2520 = vpow2.f32 %v2334_v56  ;;  %v1158_v56 = vunpack.c.h.bf16 %v3014_v45 }
0x1086   :  { %v1110_v53 = vpop.f32.mrf.mxu3 }
0x1087   :  { %v2517_v54 = vpop.eup %2516 }
0x1088   :  { %1135 = vrot.lane.b32.xlu2 %v2517_v54, %s2660_s12  ;;  %v2519_v57 = vpop.eup %2518 }
0x1089   :  { %v1049_v58 = vadd.f32 1.0, %v2519_v57  ;;  %v2521_v59 = vpop.eup %2520 }
0x108a   :  { %v1116_v60 = vadd.f32 1.0, %v2521_v59  ;;  %v3052_v59 = vld [vmem:[%s3505_s1 + $0x18] sm:$0xff]  }
0x108b   :  { %2522 = vrcp.f32 %v1049_v58  ;;  %v1061_v24 = vand.u32 2147483648, %v1049_v58  ;;  %vm1055_vm13 = vweird.f32 %v1049_v58  ;;  %v1059_v25 = vand.u32 2147483647, %v1049_v58 }
0x108c   :  { %2524 = vrcp.f32 %v1116_v60  ;;  %v1128_v36 = vand.u32 2147483648, %v1116_v60  ;;  %vm1122_vm2 = vweird.f32 %v1116_v60  ;;  %v1126_v37 = vand.u32 2147483647, %v1116_v60 }
0x108d   :  { %v1062_v29 = vor.u32 1.1754944e-38, %v1061_v24  ;;  %vm1060_vm15 = vcmp.eq.f32.partialorder %v1059_v25, 8.507059e+37 }
0x108e   :  { %v1129_v22 = vor.u32 1.1754944e-38, %v1128_v36  ;;  %vm1127_vm4 = vcmp.eq.f32.partialorder %v1126_v37, 8.507059e+37 }
0x1091   :  { %v2523_v63 = vpop.eup %2522 }
0x1092   :  { %v1051_v2 = vmul.f32 %v2523_v63, %v1049_v58  ;;  %v2525_v7 = vpop.eup %2524  ;;  %vm1056_vm12 = vweird.f32 %v2523_v63 }
0x1093   :  { %v1118_v3 = vmul.f32 %v2525_v7, %v1116_v60  ;;  %vm1057_vm14 = vmor %vm1055_vm13, %vm1056_vm12  ;;  %vm1123_vm1 = vweird.f32 %v2525_v7  ;;  %v1225_v60 = vunpack.c.h.bf16 %v3052_v59 }
0x1094   :  { %v1052_v39 = vsub.f32 1.0, %v1051_v2  ;;  %vm1124_vm3 = vmor %vm1122_vm2, %vm1123_vm1 }
0x1095   :  { %v1119_v5 = vsub.f32 1.0, %v1118_v3 }
0x1096   :  { %v1053_v9 = vmul.f32 %v2523_v63, %v1052_v39 }
0x1097   :  { %v1120_v28 = vmul.f32 %v2525_v7, %v1119_v5 }
0x1098   :  { %v1054_v17 = vadd.f32 %v2523_v63, %v1053_v9 }
0x1099   :  { %v1121_v35 = vadd.f32 %v2525_v7, %v1120_v28 }
0x109a   :  { %v1058_v6 = vsel %vm1057_vm14, %v2523_v63, %v1054_v17 }
0x109b   :  { %v1063_v33 = vsel %vm1060_vm15, %v1062_v29, %v1058_v6  ;;  %v1125_v23 = vsel %vm1124_vm3, %v2525_v7, %v1121_v35 }
0x109c   :  { %v1130_v41 = vsel %vm1127_vm4, %v1129_v22, %v1125_v23  ;;  %v1066_v43 = vmul.f32 %v1063_v33, %v2986_v21 }
0x109d   :  { %v1133_v31 = vmul.f32 %v1130_v41, %v2990_v38 }
0x10da   :  { %v1069_v32 = vpop.permute.xlu1 %1068 }
0x10db   :  { %v1071_v34 = vmul.f32 %v1069_v32, %v1063_v33 }
0x10dd   :  { %1073 = vrot.lane.b32.xlu0 %v1071_v34, %s2659_s2 }
0x10e2   :  { %v1136_v40 = vpop.permute.xlu2 %1135 }
0x10e3   :  { %v1138_v30 = vmul.f32 %v1136_v40, %v1130_v41 }
0x10e5   :  { %1140 = vrot.lane.b32.xlu1 %v1138_v30, %s2659_s2 }
0x114f   :  { %v1074_v19 = vpop.permute.xlu0 %1073 }
0x1150   :  { %v3023_v44 = vadd.f32 %v1074_v19, %v1066_v43 }
0x1152   :  { %2526 = vtanh.f32 %v3023_v44 }
0x1157   :  { %v1141_v46 = vpop.permute.xlu1 %1140 }
0x1158   :  { %v2527_v47 = vpop.eup %2526  ;;  %v3027_v48 = vadd.f32 %v1141_v46, %v1133_v31 }
0x1159   :  { %1079 = vrot.lane.b32.xlu2 %v2527_v47, %s2660_s12 }
0x115a   :  { %2528 = vtanh.f32 %v3027_v48 }
0x1160   :  { %v2529_v49 = vpop.eup %2528 }
0x1161   :  { %1146 = vrot.lane.b32.xlu0 %v2529_v49, %s2660_s12 }
0x11b3   :  { %v1080_v50 = vpop.permute.xlu2 %1079 }
0x11b4   :  { %v3032_v21 = vmul.f32 %v1080_v50, %v1063_v33 }
0x11b6   :  { %v1159_v51 = vpack.c.bf16 %v3032_v21, %v3032_v21 }
0x11b8   :  { %1161 = vrot.lane.b32.xlu1 %v1159_v51, %s2659_s2 }
0x11d3   :  { %v1147_v38 = vpop.permute.xlu0 %1146 }
0x11d4   :  { %v3037_v52 = vmul.f32 %v1147_v38, %v1130_v41 }
0x11d6   :  { %v1226_v53 = vpack.c.bf16 %v3037_v52, %v3037_v52 }
0x11d8   :  { %1228 = vrot.lane.b32.xlu2 %v1226_v53, %s2659_s2 }
0x122a   :  { %v1162_v54 = vpop.permute.xlu1 %1161 }
0x122b   :  { %2337 = vmatmul.msk.bf16.vlgmr.msra.gmra.mxu0 %vm60_vm0, %v1162_v54 }
0x122c   :  { %1708 = vmatpush.bf16.msra.mxu0 %v2702_v4 }
0x1230   :  { %1709 = vmatpush.bf16.msra.mxu0 %v2724_v11 }
0x1232   :  { %v1229_v55 = vpop.permute.xlu2 %1228 }
0x1233   :  { %2341 = vmatmul.msk.bf16.vlgmr.msra.gmra.mxu1 %vm60_vm0, %v1229_v55 }
0x1234   :  { %1775 = vmatpush.bf16.msra.mxu1 %v2714_v8 }
0x1238   :  { %1776 = vmatpush.bf16.msra.mxu1 %v2729_v12 }
0x12a8   :  { %v1175_v57 = vpop.f32.mrf.mxu0 }
0x12a9   :  { %v1179_v58 = vadd.f32 %v1175_v57, %v1158_v56 }
0x12ab   :  { %2530 = vtanh.f32 %v1179_v58  ;;  %v2338_v45 = vmul.f32 -1.442695, %v1179_v58 }
0x12b0   :  { %v1177_v63 = vpop.f32.mrf.mxu0  ;;  %v1242_v2 = vpop.f32.mrf.mxu1 }
0x12b1   :  { %v2531_v39 = vpop.eup %2530  ;;  %v1246_v7 = vadd.f32 %v1242_v2, %v1225_v60 }
0x12b2   :  { %1202 = vrot.lane.b32.xlu0 %v2531_v39, %s2660_s12 }
0x12b3   :  { %2532 = vtanh.f32 %v1246_v7  ;;  %v2342_v17 = vmul.f32 -1.442695, %v1246_v7 }
0x12b4   :  { %2534 = vpow2.f32 %v2338_v45 }
0x12b5   :  { %2536 = vpow2.f32 %v2342_v17 }
0x12b8   :  { %v1244_v9 = vpop.f32.mrf.mxu1 }
0x12b9   :  { %v2533_v3 = vpop.eup %2532 }
0x12ba   :  { %1269 = vrot.lane.b32.xlu1 %v2533_v3, %s2660_s12  ;;  %v2535_v5 = vpop.eup %2534 }
0x12bb   :  { %v1183_v24 = vadd.f32 1.0, %v2535_v5  ;;  %v2537_v25 = vpop.eup %2536 }
0x12bc   :  { %v1250_v6 = vadd.f32 1.0, %v2537_v25 }
0x12bd   :  { %2538 = vrcp.f32 %v1183_v24  ;;  %v1195_v23 = vand.u32 2147483648, %v1183_v24  ;;  %vm1189_vm6 = vweird.f32 %v1183_v24  ;;  %v1193_v22 = vand.u32 2147483647, %v1183_v24 }
0x12be   :  { %2540 = vrcp.f32 %v1250_v6  ;;  %v1262_v47 = vand.u32 2147483648, %v1250_v6  ;;  %vm1256_vm10 = vweird.f32 %v1250_v6  ;;  %v1260_v49 = vand.u32 2147483647, %v1250_v6 }
0x12bf   :  { %v1196_v30 = vor.u32 1.1754944e-38, %v1195_v23  ;;  %vm1194_vm8 = vcmp.eq.f32.partialorder %v1193_v22, 8.507059e+37 }
0x12c0   :  { %v1263_v51 = vor.u32 1.1754944e-38, %v1262_v47  ;;  %vm1261_vm12 = vcmp.eq.f32.partialorder %v1260_v49, 8.507059e+37 }
0x12c3   :  { %v2539_v28 = vpop.eup %2538 }
0x12c4   :  { %v1185_v29 = vmul.f32 %v2539_v28, %v1183_v24  ;;  %v2541_v33 = vpop.eup %2540  ;;  %vm1190_vm5 = vweird.f32 %v2539_v28  ;;  %v3088_v24 = vld [vmem:[%s3504_s0 + $0x24] sm:$0xff]  }
0x12c5   :  { %v1252_v35 = vmul.f32 %v2541_v33, %v1250_v6  ;;  %vm1191_vm7 = vmor %vm1189_vm6, %vm1190_vm5  ;;  %vm1257_vm9 = vweird.f32 %v2541_v33  ;;  %v1292_v25 = vunpack.c.l.bf16 %v3088_v24 }
0x12c6   :  { %v1186_v32 = vsub.f32 1.0, %v1185_v29  ;;  %vm1258_vm11 = vmor %vm1256_vm10, %vm1257_vm9  ;;  %v1359_v29 = vunpack.c.l.bf16 %v3052_v59 }
0x12c7   :  { %v1253_v37 = vsub.f32 1.0, %v1252_v35 }
0x12c8   :  { %v1187_v34 = vmul.f32 %v2539_v28, %v1186_v32 }
0x12c9   :  { %v1254_v41 = vmul.f32 %v2541_v33, %v1253_v37 }
0x12ca   :  { %v1188_v36 = vadd.f32 %v2539_v28, %v1187_v34 }
0x12cb   :  { %v1255_v46 = vadd.f32 %v2541_v33, %v1254_v41 }
0x12cc   :  { %v1192_v40 = vsel %vm1191_vm7, %v2539_v28, %v1188_v36 }
0x12cd   :  { %v1197_v43 = vsel %vm1194_vm8, %v1196_v30, %v1192_v40  ;;  %v1259_v50 = vsel %vm1258_vm11, %v2541_v33, %v1255_v46 }
0x12ce   :  { %v1264_v53 = vsel %vm1261_vm12, %v1263_v51, %v1259_v50  ;;  %v1200_v55 = vmul.f32 %v1197_v43, %v3023_v44 }
0x12cf   :  { %v1267_v60 = vmul.f32 %v1264_v53, %v3027_v48 }
0x1324   :  { %v1203_v19 = vpop.permute.xlu0 %1202 }
0x1325   :  { %v1205_v31 = vmul.f32 %v1203_v19, %v1197_v43 }
0x1327   :  { %1207 = vrot.lane.b32.xlu2 %v1205_v31, %s2659_s2 }
0x132c   :  { %v1270_v38 = vpop.permute.xlu1 %1269 }
0x132d   :  { %v1272_v54 = vmul.f32 %v1270_v38, %v1264_v53 }
0x132f   :  { %1274 = vrot.lane.b32.xlu0 %v1272_v54, %s2659_s2 }
0x1381   :  { %v1208_v56 = vpop.permute.xlu2 %1207 }
0x1382   :  { %v3060_v57 = vadd.f32 %v1208_v56, %v1200_v55 }
0x1384   :  { %2542 = vtanh.f32 %v3060_v57 }
0x138a   :  { %v2543_v58 = vpop.eup %2542 }
0x138b   :  { %1213 = vrot.lane.b32.xlu1 %v2543_v58, %s2660_s12 }
0x13a1   :  { %v1275_v63 = vpop.permute.xlu0 %1274 }
0x13a2   :  { %v3065_v2 = vadd.f32 %v1275_v63, %v1267_v60 }
0x13a4   :  { %2544 = vtanh.f32 %v3065_v2 }
0x13aa   :  { %v2545_v39 = vpop.eup %2544 }
0x13ab   :  { %1280 = vrot.lane.b32.xlu2 %v2545_v39, %s2660_s12 }
0x13fd   :  { %v1214_v7 = vpop.permute.xlu1 %1213 }
0x13fe   :  { %v3069_v44 = vmul.f32 %v1214_v7, %v1197_v43 }
0x1400   :  { %v1293_v9 = vpack.c.bf16 %v3069_v44, %v3069_v44 }
0x1402   :  { %1295 = vrot.lane.b32.xlu0 %v1293_v9, %s2659_s2 }
0x1405   :  { %v1281_v3 = vpop.permute.xlu2 %1280 }
0x1406   :  { %v3074_v45 = vmul.f32 %v1281_v3, %v1264_v53 }
0x1408   :  { %v1360_v48 = vpack.c.bf16 %v3074_v45, %v3074_v45 }
0x140a   :  { %1362 = vrot.lane.b32.xlu1 %v1360_v48, %s2659_s2 }
0x1474   :  { %v1296_v17 = vpop.permute.xlu0 %1295 }
0x1475   :  { %2345 = vmatmul.msk.bf16.vlgmr.msra.gmra.mxu2 %vm60_vm0, %v1296_v17 }
0x1476   :  { %1842 = vmatpush.bf16.msra.mxu2 %v2702_v4 }
0x147a   :  { %1843 = vmatpush.bf16.msra.mxu2 %v2724_v11 }
0x147c   :  { %v1363_v5 = vpop.permute.xlu1 %1362 }
0x147d   :  { %2349 = vmatmul.msk.bf16.vlgmr.msra.gmra.mxu3 %vm60_vm0, %v1363_v5 }
0x147e   :  { %1909 = vmatpush.bf16.msra.mxu3 %v2714_v8 }
0x1482   :  { %1910 = vmatpush.bf16.msra.mxu3 %v2729_v12 }
0x14f8   :  { %v1309_v6 = vpop.f32.mrf.mxu2 }
0x14f9   :  { %v1313_v28 = vadd.f32 %v1309_v6, %v1292_v25 }
0x14fb   :  { %2546 = vtanh.f32 %v1313_v28  ;;  %v2346_v23 = vmul.f32 -1.442695, %v1313_v28 }
0x1500   :  { %v1311_v32 = vpop.f32.mrf.mxu2  ;;  %v1376_v33 = vpop.f32.mrf.mxu3 }
0x1501   :  { %v2547_v34 = vpop.eup %2546  ;;  %v1380_v35 = vadd.f32 %v1376_v33, %v1359_v29 }
0x1502   :  { %1336 = vrot.lane.b32.xlu2 %v2547_v34, %s2660_s12 }
0x1503   :  { %2548 = vtanh.f32 %v1380_v35  ;;  %v2350_v59 = vmul.f32 -1.442695, %v1380_v35 }
0x1504   :  { %2550 = vpow2.f32 %v2346_v23 }
0x1508   :  { %v1378_v36 = vpop.f32.mrf.mxu3 }
0x1509   :  { %v2549_v37 = vpop.eup %2548 }
0x150a   :  { %1403 = vrot.lane.b32.xlu0 %v2549_v37, %s2660_s12  ;;  %v2551_v22 = vpop.eup %2550 }
0x150b   :  { %v1317_v40 = vadd.f32 1.0, %v2551_v22 }
0x150d   :  { %2552 = vrcp.f32 %v1317_v40  ;;  %v1329_v46 = vand.u32 2147483648, %v1317_v40  ;;  %vm1323_vm14 = vweird.f32 %v1317_v40  ;;  %v1327_v47 = vand.u32 2147483647, %v1317_v40 }
0x150e   :  { %2554 = vpow2.f32 %v2350_v59 }
0x150f   :  { %v1330_v51 = vor.u32 1.1754944e-38, %v1329_v46  ;;  %vm1328_vm1 = vcmp.eq.f32.partialorder %v1327_v47, 8.507059e+37  ;;  %v3127_v47 = vld [vmem:[%s3505_s1 + $0x10] sm:$0xff]  }
0x1513   :  { %v2553_v41 = vpop.eup %2552 }
0x1514   :  { %v1319_v30 = vmul.f32 %v2553_v41, %v1317_v40  ;;  %vm1324_vm13 = vweird.f32 %v2553_v41  ;;  %v2555_v49 = vpop.eup %2554 }
0x1515   :  { %vm1325_vm15 = vmor %vm1323_vm14, %vm1324_vm13  ;;  %v1384_v38 = vadd.f32 1.0, %v2555_v49  ;;  %v1493_v49 = vunpack.c.h.bf16 %v3127_v47 }
0x1516   :  { %v1320_v43 = vsub.f32 1.0, %v1319_v30 }
0x1517   :  { %2556 = vrcp.f32 %v1384_v38  ;;  %v1396_v7 = vand.u32 2147483648, %v1384_v38  ;;  %vm1390_vm3 = vweird.f32 %v1384_v38  ;;  %v1394_v9 = vand.u32 2147483647, %v1384_v38 }
0x1518   :  { %v1321_v19 = vmul.f32 %v2553_v41, %v1320_v43  ;;  %v1426_v43 = vunpack.c.h.bf16 %v3088_v24 }
0x1519   :  { %v1397_v48 = vor.u32 1.1754944e-38, %v1396_v7  ;;  %vm1395_vm5 = vcmp.eq.f32.partialorder %v1394_v9, 8.507059e+37 }
0x151a   :  { %v1322_v31 = vadd.f32 %v2553_v41, %v1321_v19 }
0x151c   :  { %v1326_v50 = vsel %vm1325_vm15, %v2553_v41, %v1322_v31 }
0x151d   :  { %v1331_v54 = vsel %vm1328_vm1, %v1330_v51, %v1326_v50  ;;  %v2557_v56 = vpop.eup %2556 }
0x151e   :  { %v1386_v58 = vmul.f32 %v2557_v56, %v1384_v38  ;;  %vm1391_vm2 = vweird.f32 %v2557_v56  ;;  %v1334_v6 = vmul.f32 %v1331_v54, %v3060_v57 }
0x151f   :  { %vm1392_vm4 = vmor %vm1390_vm3, %vm1391_vm2 }
0x1520   :  { %v1387_v60 = vsub.f32 1.0, %v1386_v58 }
0x1522   :  { %v1388_v63 = vmul.f32 %v2557_v56, %v1387_v60 }
0x1524   :  { %v1389_v39 = vadd.f32 %v2557_v56, %v1388_v63 }
0x1526   :  { %v1393_v3 = vsel %vm1392_vm4, %v2557_v56, %v1389_v39 }
0x1527   :  { %v1398_v17 = vsel %vm1395_vm5, %v1397_v48, %v1393_v3 }
0x1528   :  { %v1401_v32 = vmul.f32 %v1398_v17, %v3065_v2 }
0x155c   :  { %v1337_v53 = vpop.permute.xlu2 %1336 }
0x155d   :  { %v1339_v55 = vmul.f32 %v1337_v53, %v1331_v54 }
0x155f   :  { %1341 = vrot.lane.b32.xlu1 %v1339_v55, %s2659_s2 }
0x157c   :  { %v1404_v5 = vpop.permute.xlu0 %1403 }
0x157d   :  { %v1406_v25 = vmul.f32 %v1404_v5, %v1398_v17 }
0x157f   :  { %1408 = vrot.lane.b32.xlu2 %v1406_v25, %s2659_s2 }
0x15d1   :  { %v1342_v28 = vpop.permute.xlu1 %1341 }
0x15d2   :  { %v3097_v29 = vadd.f32 %v1342_v28, %v1334_v6 }
0x15d4   :  { %2558 = vtanh.f32 %v3097_v29 }
0x15d9   :  { %v1409_v33 = vpop.permute.xlu2 %1408 }
0x15da   :  { %v2559_v34 = vpop.eup %2558  ;;  %v3101_v35 = vadd.f32 %v1409_v33, %v1401_v32 }
0x15db   :  { %1347 = vrot.lane.b32.xlu0 %v2559_v34, %s2660_s12 }
0x15dc   :  { %2560 = vtanh.f32 %v3101_v35 }
0x15e2   :  { %v2561_v36 = vpop.eup %2560 }
0x15e3   :  { %1414 = vrot.lane.b32.xlu1 %v2561_v36, %s2660_s12 }
0x164d   :  { %v1348_v37 = vpop.permute.xlu0 %1347 }
0x164e   :  { %v3106_v57 = vmul.f32 %v1348_v37, %v1331_v54 }
0x1650   :  { %v1427_v23 = vpack.c.bf16 %v3106_v57, %v3106_v57 }
0x1652   :  { %1429 = vrot.lane.b32.xlu2 %v1427_v23, %s2659_s2 }
0x1655   :  { %v1415_v2 = vpop.permute.xlu1 %1414 }
0x1656   :  { %v3111_v22 = vmul.f32 %v1415_v2, %v1398_v17 }
0x1658   :  { %v1494_v40 = vpack.c.bf16 %v3111_v22, %v3111_v22 }
0x165a   :  { %1496 = vrot.lane.b32.xlu0 %v1494_v40, %s2659_s2 }
0x16ac   :  { %v1430_v41 = vpop.permute.xlu2 %1429 }
0x16ad   :  { %2353 = vmatmul.msk.bf16.vlgmr.msrb.gmra.mxu0 %vm60_vm0, %v1430_v41 }
0x16ae   :  { %1976 = vmatpush.bf16.msrb.mxu0 %v2702_v4 }
0x16b2   :  { %1977 = vmatpush.bf16.msrb.mxu0 %v2724_v11 }
0x16cc   :  { %v1497_v30 = vpop.permute.xlu0 %1496 }
0x16cd   :  { %2357 = vmatmul.msk.bf16.vlgmr.msrb.gmra.mxu1 %vm60_vm0, %v1497_v30 }
0x16ce   :  { %2043 = vmatpush.bf16.msrb.mxu1 %v2714_v8 }
0x16d2   :  { %2044 = vmatpush.bf16.msrb.mxu1 %v2729_v12 }
0x172a   :  { %v1443_v59 = vpop.f32.mrf.mxu0 }
0x172b   :  { %v1447_v19 = vadd.f32 %v1443_v59, %v1426_v43 }
0x172d   :  { %2562 = vtanh.f32 %v1447_v19  ;;  %v2354_v24 = vmul.f32 -1.442695, %v1447_v19 }
0x1732   :  { %v1445_v31 = vpop.f32.mrf.mxu0 }
0x1733   :  { %v2563_v46 = vpop.eup %2562 }
0x1734   :  { %1470 = vrot.lane.b32.xlu1 %v2563_v46, %s2660_s12 }
0x174a   :  { %v1510_v50 = vpop.f32.mrf.mxu1 }
0x174b   :  { %v1514_v51 = vadd.f32 %v1510_v50, %v1493_v49 }
0x174d   :  { %2564 = vtanh.f32 %v1514_v51  ;;  %v2358_v54 = vmul.f32 -1.442695, %v1514_v51 }
0x174e   :  { %2566 = vpow2.f32 %v2354_v24 }
0x174f   :  { %2568 = vpow2.f32 %v2358_v54 }
0x1752   :  { %v1512_v38 = vpop.f32.mrf.mxu1 }
0x1753   :  { %v2565_v53 = vpop.eup %2564 }
0x1754   :  { %1537 = vrot.lane.b32.xlu2 %v2565_v53, %s2660_s12  ;;  %v2567_v55 = vpop.eup %2566 }
0x1755   :  { %v1451_v56 = vadd.f32 1.0, %v2567_v55  ;;  %v2569_v58 = vpop.eup %2568 }
0x1756   :  { %v1518_v60 = vadd.f32 1.0, %v2569_v58 }
0x1757   :  { %2570 = vrcp.f32 %v1451_v56  ;;  %v1463_v25 = vand.u32 2147483648, %v1451_v56  ;;  %vm1457_vm7 = vweird.f32 %v1451_v56  ;;  %v1461_v6 = vand.u32 2147483647, %v1451_v56 }
0x1758   :  { %2572 = vrcp.f32 %v1518_v60  ;;  %v1530_v2 = vand.u32 2147483648, %v1518_v60  ;;  %vm1524_vm11 = vweird.f32 %v1518_v60  ;;  %v1528_v40 = vand.u32 2147483647, %v1518_v60 }
0x1759   :  { %v1464_v33 = vor.u32 1.1754944e-38, %v1463_v25  ;;  %vm1462_vm9 = vcmp.eq.f32.partialorder %v1461_v6, 8.507059e+37 }
0x175a   :  { %v1531_v30 = vor.u32 1.1754944e-38, %v1530_v2  ;;  %vm1529_vm13 = vcmp.eq.f32.partialorder %v1528_v40, 8.507059e+37 }
0x175d   :  { %v2571_v63 = vpop.eup %2570 }
0x175e   :  { %v1453_v39 = vmul.f32 %v2571_v63, %v1451_v56  ;;  %v2573_v9 = vpop.eup %2572  ;;  %vm1458_vm6 = vweird.f32 %v2571_v63 }
0x175f   :  { %v1520_v48 = vmul.f32 %v2573_v9, %v1518_v60  ;;  %vm1459_vm8 = vmor %vm1457_vm7, %vm1458_vm6  ;;  %vm1525_vm10 = vweird.f32 %v2573_v9 }
0x1760   :  { %v1454_v7 = vsub.f32 1.0, %v1453_v39  ;;  %vm1526_vm12 = vmor %vm1524_vm11, %vm1525_vm10  ;;  %v3162_v39 = vld [vmem:[%s3504_s0 + $0x2c] sm:$0xff]  }
0x1761   :  { %v1521_v5 = vsub.f32 1.0, %v1520_v48 }
0x1762   :  { %v1455_v3 = vmul.f32 %v2571_v63, %v1454_v7  ;;  %v1560_v7 = vunpack.c.l.bf16 %v3162_v39 }
0x1763   :  { %v1522_v32 = vmul.f32 %v2573_v9, %v1521_v5 }
0x1764   :  { %v1456_v17 = vadd.f32 %v2571_v63, %v1455_v3 }
0x1765   :  { %v1523_v23 = vadd.f32 %v2573_v9, %v1522_v32 }
0x1766   :  { %v1460_v28 = vsel %vm1459_vm8, %v2571_v63, %v1456_v17 }
0x1767   :  { %v1465_v36 = vsel %vm1462_vm9, %v1464_v33, %v1460_v28  ;;  %v1527_v41 = vsel %vm1526_vm12, %v2573_v9, %v1523_v23 }
0x1768   :  { %v1532_v59 = vsel %vm1529_vm13, %v1531_v30, %v1527_v41  ;;  %v1468_v31 = vmul.f32 %v1465_v36, %v3097_v29 }
0x1769   :  { %v1535_v50 = vmul.f32 %v1532_v59, %v3101_v35 }
0x17a6   :  { %v1471_v34 = vpop.permute.xlu1 %1470 }
0x17a7   :  { %v1473_v37 = vmul.f32 %v1471_v34, %v1465_v36 }
0x17a9   :  { %1475 = vrot.lane.b32.xlu0 %v1473_v37, %s2659_s2 }
0x17ae   :  { %v1538_v43 = vpop.permute.xlu2 %1537 }
0x17af   :  { %v1540_v19 = vmul.f32 %v1538_v43, %v1532_v59 }
0x17b1   :  { %1542 = vrot.lane.b32.xlu1 %v1540_v19, %s2659_s2 }
0x181b   :  { %v1476_v46 = vpop.permute.xlu0 %1475 }
0x181c   :  { %v3134_v49 = vadd.f32 %v1476_v46, %v1468_v31 }
0x181e   :  { %2574 = vtanh.f32 %v3134_v49 }
0x1823   :  { %v1543_v51 = vpop.permute.xlu1 %1542 }
0x1824   :  { %v2575_v38 = vpop.eup %2574  ;;  %v3138_v53 = vadd.f32 %v1543_v51, %v1535_v50 }
0x1825   :  { %1481 = vrot.lane.b32.xlu2 %v2575_v38, %s2660_s12 }
0x1826   :  { %2576 = vtanh.f32 %v3138_v53 }
0x182c   :  { %v2577_v24 = vpop.eup %2576 }
0x182d   :  { %1548 = vrot.lane.b32.xlu0 %v2577_v24, %s2660_s12 }
0x187f   :  { %v1482_v54 = vpop.permute.xlu2 %1481 }
0x1880   :  { %v3143_v29 = vmul.f32 %v1482_v54, %v1465_v36 }
0x1882   :  { %v1561_v55 = vpack.c.bf16 %v3143_v29, %v3143_v29 }
0x1884   :  { %1563 = vrot.lane.b32.xlu1 %v1561_v55, %s2659_s2 }
0x189f   :  { %v1549_v35 = vpop.permute.xlu0 %1548 }
0x18a0   :  { %v3148_v56 = vmul.f32 %v1549_v35, %v1532_v59 }
0x18a2   :  { %v1628_v58 = vpack.c.bf16 %v3148_v56, %v3148_v56 }
0x18a4   :  { %1630 = vrot.lane.b32.xlu2 %v1628_v58, %s2659_s2 }
0x18f6   :  { %v1564_v60 = vpop.permute.xlu1 %1563 }
0x18f7   :  { %2361 = vmatmul.msk.bf16.vlgmr.msrb.gmra.mxu2 %vm60_vm0, %v1564_v60 }
0x18f8   :  { %2110 = vmatpush.bf16.msrb.mxu2 %v2702_v4  ;;  %v1627_v4 = vunpack.c.l.bf16 %v3127_v47 }
0x18fc   :  { %2111 = vmatpush.bf16.msrb.mxu2 %v2724_v11 }
0x18fe   :  { %v1631_v63 = vpop.permute.xlu2 %1630 }
0x18ff   :  { %2365 = vmatmul.msk.bf16.vlgmr.msrb.gmra.mxu3 %vm60_vm0, %v1631_v63 }
0x1900   :  { %2176 = vmatpush.bf16.msrb.mxu3 %v2714_v8 }
0x1904   :  { %2177 = vmatpush.bf16.msrb.mxu3 %v2729_v12 }
0x197a   :  { %v1577_v9 = vpop.f32.mrf.mxu2 }
0x197b   :  { %v1581_v3 = vadd.f32 %v1577_v9, %v1560_v7 }
0x197d   :  { %2578 = vtanh.f32 %v1581_v3  ;;  %v2362_v25 = vmul.f32 -1.442695, %v1581_v3 }
0x1982   :  { %v1579_v11 = vpop.f32.mrf.mxu2  ;;  %v1644_v48 = vpop.f32.mrf.mxu3 }
0x1983   :  { %v2579_v17 = vpop.eup %2578  ;;  %v1648_v5 = vadd.f32 %v1644_v48, %v1627_v4 }
0x1984   :  { %1604 = vrot.lane.b32.xlu0 %v2579_v17, %s2660_s12 }
0x1985   :  { %2580 = vtanh.f32 %v1648_v5  ;;  %v2366_v6 = vmul.f32 -1.442695, %v1648_v5 }
0x1986   :  { %2582 = vpow2.f32 %v2362_v25 }
0x1987   :  { %2584 = vpow2.f32 %v2366_v6 }
0x198a   :  { %v1646_v8 = vpop.f32.mrf.mxu3 }
0x198b   :  { %v2581_v12 = vpop.eup %2580 }
0x198c   :  { %1671 = vrot.lane.b32.xlu1 %v2581_v12, %s2660_s12  ;;  %v2583_v28 = vpop.eup %2582 }
0x198d   :  { %v1585_v32 = vadd.f32 1.0, %v2583_v28  ;;  %v2585_v33 = vpop.eup %2584 }
0x198e   :  { %v1652_v47 = vadd.f32 1.0, %v2585_v33 }
0x198f   :  { %2586 = vrcp.f32 %v1585_v32  ;;  %v1597_v43 = vand.u32 2147483648, %v1585_v32  ;;  %vm1591_vm15 = vweird.f32 %v1585_v32  ;;  %v1595_v59 = vand.u32 2147483647, %v1585_v32 }
0x1990   :  { %2588 = vrcp.f32 %v1652_v47  ;;  %v1664_v54 = vand.u32 2147483648, %v1652_v47  ;;  %vm1658_vm4 = vweird.f32 %v1652_v47  ;;  %v1662_v55 = vand.u32 2147483647, %v1652_v47 }
0x1991   :  { %v1598_v46 = vor.u32 1.1754944e-38, %v1597_v43  ;;  %vm1596_vm2 = vcmp.eq.f32.partialorder %v1595_v59, 8.507059e+37 }
0x1992   :  { %v1665_v58 = vor.u32 1.1754944e-38, %v1664_v54  ;;  %vm1663_vm6 = vcmp.eq.f32.partialorder %v1662_v55, 8.507059e+37 }
0x1995   :  { %v2587_v34 = vpop.eup %2586 }
0x1996   :  { %v1587_v36 = vmul.f32 %v2587_v34, %v1585_v32  ;;  %v2589_v23 = vpop.eup %2588  ;;  %vm1592_vm14 = vweird.f32 %v2587_v34 }
0x1997   :  { %v1654_v40 = vmul.f32 %v2589_v23, %v1652_v47  ;;  %vm1593_vm1 = vmor %vm1591_vm15, %vm1592_vm14  ;;  %vm1659_vm3 = vweird.f32 %v2589_v23  ;;  %v1694_v47 = vunpack.c.h.bf16 %v3162_v39 }
0x1998   :  { %v1588_v37 = vsub.f32 1.0, %v1587_v36  ;;  %vm1660_vm5 = vmor %vm1658_vm4, %vm1659_vm3 }
0x1999   :  { %v1655_v30 = vsub.f32 1.0, %v1654_v40 }
0x199a   :  { %v1589_v2 = vmul.f32 %v2587_v34, %v1588_v37  ;;  %v3196_v37 = vld [vmem:[%s3505_s1 + $0x8] sm:$0xff]  }
0x199b   :  { %v1656_v31 = vmul.f32 %v2589_v23, %v1655_v30 }
0x199c   :  { %v1590_v41 = vadd.f32 %v2587_v34, %v1589_v2 }
0x199d   :  { %v1657_v24 = vadd.f32 %v2589_v23, %v1656_v31 }
0x199e   :  { %v1594_v19 = vsel %vm1593_vm1, %v2587_v34, %v1590_v41 }
0x199f   :  { %v1599_v50 = vsel %vm1596_vm2, %v1598_v46, %v1594_v19  ;;  %v1661_v35 = vsel %vm1660_vm5, %v2589_v23, %v1657_v24  ;;  %v1761_v23 = vunpack.c.h.bf16 %v3196_v37 }
0x19a0   :  { %v1666_v63 = vsel %vm1663_vm6, %v1665_v58, %v1661_v35  ;;  %v1602_v9 = vmul.f32 %v1599_v50, %v3134_v49 }
0x19a1   :  { %v1669_v48 = vmul.f32 %v1666_v63, %v3138_v53 }
0x19f6   :  { %v1605_v51 = vpop.permute.xlu0 %1604 }
0x19f7   :  { %v1607_v38 = vmul.f32 %v1605_v51, %v1599_v50 }
0x19f9   :  { %1609 = vrot.lane.b32.xlu2 %v1607_v38, %s2659_s2 }
0x19fe   :  { %v1672_v60 = vpop.permute.xlu1 %1671 }
0x19ff   :  { %v1674_v7 = vmul.f32 %v1672_v60, %v1666_v63 }
0x1a01   :  { %1676 = vrot.lane.b32.xlu0 %v1674_v7, %s2659_s2 }
0x1a53   :  { %v1610_v3 = vpop.permute.xlu2 %1609 }
0x1a54   :  { %v3171_v4 = vadd.f32 %v1610_v3, %v1602_v9 }
0x1a56   :  { %2590 = vtanh.f32 %v3171_v4 }
0x1a5c   :  { %v2591_v11 = vpop.eup %2590 }
0x1a5d   :  { %1615 = vrot.lane.b32.xlu1 %v2591_v11, %s2660_s12 }
0x1a73   :  { %v1677_v17 = vpop.permute.xlu0 %1676 }
0x1a74   :  { %v3176_v5 = vadd.f32 %v1677_v17, %v1669_v48 }
0x1a76   :  { %2592 = vtanh.f32 %v3176_v5 }
0x1a7c   :  { %v2593_v8 = vpop.eup %2592 }
0x1a7d   :  { %1682 = vrot.lane.b32.xlu2 %v2593_v8, %s2660_s12 }
0x1acf   :  { %v1616_v12 = vpop.permute.xlu1 %1615 }
0x1ad0   :  { %v3180_v49 = vmul.f32 %v1616_v12, %v1599_v50 }
0x1ad2   :  { %v1695_v25 = vpack.c.bf16 %v3180_v49, %v3180_v49 }
0x1ad4   :  { %1697 = vrot.lane.b32.xlu0 %v1695_v25, %s2659_s2 }
0x1ad7   :  { %v1683_v6 = vpop.permute.xlu2 %1682 }
0x1ad8   :  { %v3185_v28 = vmul.f32 %v1683_v6, %v1666_v63 }
0x1ada   :  { %v1762_v53 = vpack.c.bf16 %v3185_v28, %v3185_v28 }
0x1adc   :  { %1764 = vrot.lane.b32.xlu1 %v1762_v53, %s2659_s2 }
0x1b46   :  { %v1698_v32 = vpop.permute.xlu0 %1697 }
0x1b47   :  { %2369 = vmatmul.msk.bf16.vlgmr.msra.gmra.mxu0 %vm60_vm0, %v1698_v32 }
0x1b4e   :  { %v1765_v33 = vpop.permute.xlu1 %1764 }
0x1b4f   :  { %2373 = vmatmul.msk.bf16.vlgmr.msra.gmra.mxu1 %vm60_vm0, %v1765_v33 }
0x1bc4   :  { %v1711_v34 = vpop.f32.mrf.mxu0 }
0x1bc5   :  { %v1715_v36 = vadd.f32 %v1711_v34, %v1694_v47 }
0x1bc7   :  { %2594 = vtanh.f32 %v1715_v36  ;;  %v2370_v39 = vmul.f32 -1.442695, %v1715_v36 }
0x1bcc   :  { %v1713_v2 = vpop.f32.mrf.mxu0  ;;  %v1778_v40 = vpop.f32.mrf.mxu1 }
0x1bcd   :  { %v2595_v41 = vpop.eup %2594  ;;  %v1782_v30 = vadd.f32 %v1778_v40, %v1761_v23 }
0x1bce   :  { %1738 = vrot.lane.b32.xlu2 %v2595_v41, %s2660_s12 }
0x1bcf   :  { %2596 = vtanh.f32 %v1782_v30  ;;  %v2374_v38 = vmul.f32 -1.442695, %v1782_v30 }
0x1bd0   :  { %2598 = vpow2.f32 %v2370_v39 }
0x1bd4   :  { %v1780_v43 = vpop.f32.mrf.mxu1 }
0x1bd5   :  { %v2597_v59 = vpop.eup %2596 }
0x1bd6   :  { %1805 = vrot.lane.b32.xlu0 %v2597_v59, %s2660_s12  ;;  %v2599_v19 = vpop.eup %2598 }
0x1bd7   :  { %v1719_v31 = vadd.f32 1.0, %v2599_v19 }
0x1bd9   :  { %2600 = vrcp.f32 %v1719_v31  ;;  %v1731_v55 = vand.u32 2147483648, %v1719_v31  ;;  %vm1725_vm8 = vweird.f32 %v1719_v31  ;;  %v1729_v35 = vand.u32 2147483647, %v1719_v31 }
0x1bda   :  { %2602 = vpow2.f32 %v2374_v38 }
0x1bdb   :  { %v1732_v63 = vor.u32 1.1754944e-38, %v1731_v55  ;;  %vm1730_vm10 = vcmp.eq.f32.partialorder %v1729_v35, 8.507059e+37 }
0x1bdf   :  { %v2601_v46 = vpop.eup %2600 }
0x1be0   :  { %v1721_v50 = vmul.f32 %v2601_v46, %v1719_v31  ;;  %vm1726_vm7 = vweird.f32 %v2601_v46  ;;  %v2603_v58 = vpop.eup %2602 }
0x1be1   :  { %vm1727_vm9 = vmor %vm1725_vm8, %vm1726_vm7  ;;  %v1786_v7 = vadd.f32 1.0, %v2603_v58 }
0x1be2   :  { %v1722_v51 = vsub.f32 1.0, %v1721_v50 }
0x1be3   :  { %2604 = vrcp.f32 %v1786_v7  ;;  %v1798_v6 = vand.u32 2147483648, %v1786_v7  ;;  %vm1792_vm12 = vweird.f32 %v1786_v7  ;;  %v1796_v53 = vand.u32 2147483647, %v1786_v7 }
0x1be4   :  { %v1723_v24 = vmul.f32 %v2601_v46, %v1722_v51 }
0x1be5   :  { %v1799_v33 = vor.u32 1.1754944e-38, %v1798_v6  ;;  %vm1797_vm14 = vcmp.eq.f32.partialorder %v1796_v53, 8.507059e+37 }
0x1be6   :  { %v1724_v54 = vadd.f32 %v2601_v46, %v1723_v24  ;;  %v3228_v24 = vld [vmem:[%s3504_s0 + $0x34] sm:$0xff]  }
0x1be8   :  { %v1728_v60 = vsel %vm1727_vm9, %v2601_v46, %v1724_v54  ;;  %v1828_v54 = vunpack.c.l.bf16 %v3228_v24 }
0x1be9   :  { %v1733_v3 = vsel %vm1730_vm10, %v1732_v63, %v1728_v60  ;;  %v2605_v48 = vpop.eup %2604  ;;  %v1895_v63 = vunpack.c.l.bf16 %v3196_v37 }
0x1bea   :  { %v1788_v17 = vmul.f32 %v2605_v48, %v1786_v7  ;;  %vm1793_vm11 = vweird.f32 %v2605_v48  ;;  %v1736_v23 = vmul.f32 %v1733_v3, %v3171_v4 }
0x1beb   :  { %vm1794_vm13 = vmor %vm1792_vm12, %vm1793_vm11 }
0x1bec   :  { %v1789_v8 = vsub.f32 1.0, %v1788_v17 }
0x1bee   :  { %v1790_v12 = vmul.f32 %v2605_v48, %v1789_v8 }
0x1bf0   :  { %v1791_v25 = vadd.f32 %v2605_v48, %v1790_v12 }
0x1bf2   :  { %v1795_v32 = vsel %vm1794_vm13, %v2605_v48, %v1791_v25 }
0x1bf3   :  { %v1800_v47 = vsel %vm1797_vm14, %v1799_v33, %v1795_v32 }
0x1bf4   :  { %v1803_v41 = vmul.f32 %v1800_v47, %v3176_v5 }
0x1c28   :  { %v1739_v9 = vpop.permute.xlu2 %1738 }
0x1c29   :  { %v1741_v11 = vmul.f32 %v1739_v9, %v1733_v3 }
0x1c2b   :  { %1743 = vrot.lane.b32.xlu1 %v1741_v11, %s2659_s2 }
0x1c48   :  { %v1806_v34 = vpop.permute.xlu0 %1805 }
0x1c49   :  { %v1808_v36 = vmul.f32 %v1806_v34, %v1800_v47 }
0x1c4b   :  { %1810 = vrot.lane.b32.xlu2 %v1808_v36, %s2659_s2 }
0x1c9d   :  { %v1744_v2 = vpop.permute.xlu1 %1743 }
0x1c9e   :  { %v3204_v40 = vadd.f32 %v1744_v2, %v1736_v23 }
0x1ca0   :  { %2606 = vtanh.f32 %v3204_v40 }
0x1ca5   :  { %v1811_v30 = vpop.permute.xlu2 %1810 }
0x1ca6   :  { %v2607_v43 = vpop.eup %2606  ;;  %v3208_v59 = vadd.f32 %v1811_v30, %v1803_v41 }
0x1ca7   :  { %1749 = vrot.lane.b32.xlu0 %v2607_v43, %s2660_s12 }
0x1ca8   :  { %2608 = vtanh.f32 %v3208_v59 }
0x1cae   :  { %v2609_v39 = vpop.eup %2608 }
0x1caf   :  { %1816 = vrot.lane.b32.xlu1 %v2609_v39, %s2660_s12 }
0x1d19   :  { %v1750_v19 = vpop.permute.xlu0 %1749 }
0x1d1a   :  { %v3213_v4 = vmul.f32 %v1750_v19, %v1733_v3 }
0x1d1c   :  { %v1829_v31 = vpack.c.bf16 %v3213_v4, %v3213_v4 }
0x1d1e   :  { %1831 = vrot.lane.b32.xlu2 %v1829_v31, %s2659_s2 }
0x1d21   :  { %v1817_v5 = vpop.permute.xlu1 %1816 }
0x1d22   :  { %v3218_v46 = vmul.f32 %v1817_v5, %v1800_v47 }
0x1d24   :  { %v1896_v50 = vpack.c.bf16 %v3218_v46, %v3218_v46 }
0x1d26   :  { %1898 = vrot.lane.b32.xlu0 %v1896_v50, %s2659_s2 }
0x1d78   :  { %v1832_v51 = vpop.permute.xlu2 %1831 }
0x1d79   :  { %2377 = vmatmul.msk.bf16.vlgmr.msra.gmra.mxu2 %vm60_vm0, %v1832_v51 }
0x1d98   :  { %v1899_v38 = vpop.permute.xlu0 %1898 }
0x1d99   :  { %2381 = vmatmul.msk.bf16.vlgmr.msra.gmra.mxu3 %vm60_vm0, %v1899_v38 }
0x1dfc   :  { %v1845_v55 = vpop.f32.mrf.mxu2 }
0x1dfd   :  { %v1849_v35 = vadd.f32 %v1845_v55, %v1828_v54 }
0x1dff   :  { %2610 = vtanh.f32 %v1849_v35  ;;  %v2378_v48 = vmul.f32 -1.442695, %v1849_v35 }
0x1e04   :  { %v1847_v58 = vpop.f32.mrf.mxu2 }
0x1e05   :  { %v2611_v60 = vpop.eup %2610 }
0x1e06   :  { %1872 = vrot.lane.b32.xlu1 %v2611_v60, %s2660_s12 }
0x1e1c   :  { %v1912_v7 = vpop.f32.mrf.mxu3 }
0x1e1d   :  { %v1916_v9 = vadd.f32 %v1912_v7, %v1895_v63 }
0x1e1f   :  { %2612 = vtanh.f32 %v1916_v9  ;;  %v2382_v17 = vmul.f32 -1.442695, %v1916_v9 }
0x1e20   :  { %2614 = vpow2.f32 %v2378_v48 }
0x1e21   :  { %2616 = vpow2.f32 %v2382_v17 }
0x1e24   :  { %v1914_v3 = vpop.f32.mrf.mxu3 }
0x1e25   :  { %v2613_v11 = vpop.eup %2612 }
0x1e26   :  { %1939 = vrot.lane.b32.xlu2 %v2613_v11, %s2660_s12  ;;  %v2615_v8 = vpop.eup %2614 }
0x1e27   :  { %v1853_v12 = vadd.f32 1.0, %v2615_v8  ;;  %v2617_v25 = vpop.eup %2616 }
0x1e28   :  { %v1920_v6 = vadd.f32 1.0, %v2617_v25 }
0x1e29   :  { %2618 = vrcp.f32 %v1853_v12  ;;  %v1865_v2 = vand.u32 2147483648, %v1853_v12  ;;  %vm1859_vm1 = vweird.f32 %v1853_v12  ;;  %v1863_v41 = vand.u32 2147483647, %v1853_v12 }
0x1e2a   :  { %2620 = vrcp.f32 %v1920_v6  ;;  %v1932_v51 = vand.u32 2147483648, %v1920_v6  ;;  %vm1926_vm5 = vweird.f32 %v1920_v6  ;;  %v1930_v38 = vand.u32 2147483647, %v1920_v6 }
0x1e2b   :  { %v1866_v39 = vor.u32 1.1754944e-38, %v1865_v2  ;;  %vm1864_vm3 = vcmp.eq.f32.partialorder %v1863_v41, 8.507059e+37 }
0x1e2c   :  { %v1933_v55 = vor.u32 1.1754944e-38, %v1932_v51  ;;  %vm1931_vm7 = vcmp.eq.f32.partialorder %v1930_v38, 8.507059e+37 }
0x1e2f   :  { %v2619_v53 = vpop.eup %2618 }
0x1e30   :  { %v1855_v32 = vmul.f32 %v2619_v53, %v1853_v12  ;;  %v2621_v33 = vpop.eup %2620  ;;  %vm1860_vm15 = vweird.f32 %v2619_v53 }
0x1e31   :  { %v1922_v34 = vmul.f32 %v2621_v33, %v1920_v6  ;;  %vm1861_vm2 = vmor %vm1859_vm1, %vm1860_vm15  ;;  %vm1927_vm4 = vweird.f32 %v2621_v33 }
0x1e32   :  { %v1856_v37 = vsub.f32 1.0, %v1855_v32  ;;  %vm1928_vm6 = vmor %vm1926_vm5, %vm1927_vm4 }
0x1e33   :  { %v1923_v23 = vsub.f32 1.0, %v1922_v34 }
0x1e34   :  { %v1857_v47 = vmul.f32 %v2619_v53, %v1856_v37 }
0x1e35   :  { %v1924_v43 = vmul.f32 %v2621_v33, %v1923_v23 }
0x1e36   :  { %v1858_v36 = vadd.f32 %v2619_v53, %v1857_v47 }
0x1e37   :  { %v1925_v50 = vadd.f32 %v2621_v33, %v1924_v43 }
0x1e38   :  { %v1862_v30 = vsel %vm1861_vm2, %v2619_v53, %v1858_v36  ;;  %v3262_v36 = vld [vmem:[%s3505_s1] sm:$0xff]  }
0x1e39   :  { %v1867_v31 = vsel %vm1864_vm3, %v1866_v39, %v1862_v30  ;;  %v1929_v54 = vsel %vm1928_vm6, %v2621_v33, %v1925_v50  ;;  %v1962_v33 = vunpack.c.h.bf16 %v3228_v24  ;;  %v2029_v23 = vunpack.c.h.bf16 %v3262_v36 }
0x1e3a   :  { %v1934_v58 = vsel %vm1931_vm7, %v1933_v55, %v1929_v54  ;;  %v1870_v63 = vmul.f32 %v1867_v31, %v3204_v40 }
0x1e3b   :  { %v1937_v3 = vmul.f32 %v1934_v58, %v3208_v59 }
0x1e78   :  { %v1873_v19 = vpop.permute.xlu1 %1872 }
0x1e79   :  { %v1875_v5 = vmul.f32 %v1873_v19, %v1867_v31 }
0x1e7b   :  { %1877 = vrot.lane.b32.xlu0 %v1875_v5, %s2659_s2 }
0x1e80   :  { %v1940_v35 = vpop.permute.xlu2 %1939 }
0x1e81   :  { %v1942_v60 = vmul.f32 %v1940_v35, %v1934_v58 }
0x1e83   :  { %1944 = vrot.lane.b32.xlu1 %v1942_v60, %s2659_s2 }
0x1eed   :  { %v1878_v7 = vpop.permute.xlu0 %1877 }
0x1eee   :  { %v3237_v9 = vadd.f32 %v1878_v7, %v1870_v63 }
0x1ef0   :  { %2622 = vtanh.f32 %v3237_v9 }
0x1ef5   :  { %v1945_v11 = vpop.permute.xlu1 %1944 }
0x1ef6   :  { %v2623_v48 = vpop.eup %2622  ;;  %v3241_v17 = vadd.f32 %v1945_v11, %v1937_v3 }
0x1ef7   :  { %1883 = vrot.lane.b32.xlu2 %v2623_v48, %s2660_s12 }
0x1ef8   :  { %2624 = vtanh.f32 %v3241_v17 }
0x1efe   :  { %v2625_v8 = vpop.eup %2624 }
0x1eff   :  { %1950 = vrot.lane.b32.xlu0 %v2625_v8, %s2660_s12 }
0x1f51   :  { %v1884_v12 = vpop.permute.xlu2 %1883 }
0x1f52   :  { %v3246_v40 = vmul.f32 %v1884_v12, %v1867_v31 }
0x1f54   :  { %v1963_v25 = vpack.c.bf16 %v3246_v40, %v3246_v40 }
0x1f56   :  { %1965 = vrot.lane.b32.xlu1 %v1963_v25, %s2659_s2 }
0x1f71   :  { %v1951_v59 = vpop.permute.xlu0 %1950 }
0x1f72   :  { %v3251_v6 = vmul.f32 %v1951_v59, %v1934_v58 }
0x1f74   :  { %v2030_v53 = vpack.c.bf16 %v3251_v6, %v3251_v6 }
0x1f76   :  { %2032 = vrot.lane.b32.xlu2 %v2030_v53, %s2659_s2 }
0x1fc8   :  { %v1966_v32 = vpop.permute.xlu1 %1965 }
0x1fc9   :  { %2385 = vmatmul.msk.bf16.vlgmr.msrb.gmra.mxu0 %vm60_vm0, %v1966_v32 }
0x1fd0   :  { %v2033_v37 = vpop.permute.xlu2 %2032 }
0x1fd1   :  { %2389 = vmatmul.msk.bf16.vlgmr.msrb.gmra.mxu1 %vm60_vm0, %v2033_v37 }
0x2046   :  { %v1979_v47 = vpop.f32.mrf.mxu0 }
0x2047   :  { %v1983_v34 = vadd.f32 %v1979_v47, %v1962_v33 }
0x2049   :  { %2626 = vtanh.f32 %v1983_v34  ;;  %v2386_v24 = vmul.f32 -1.442695, %v1983_v34 }
0x204e   :  { %v1981_v2 = vpop.f32.mrf.mxu0  ;;  %v2046_v41 = vpop.f32.mrf.mxu1 }
0x204f   :  { %v2627_v30 = vpop.eup %2626  ;;  %v2050_v43 = vadd.f32 %v2046_v41, %v2029_v23 }
0x2050   :  { %2006 = vrot.lane.b32.xlu0 %v2627_v30, %s2660_s12 }
0x2051   :  { %2628 = vtanh.f32 %v2050_v43  ;;  %v2390_v31 = vmul.f32 -1.442695, %v2050_v43 }
0x2052   :  { %2630 = vpow2.f32 %v2386_v24 }
0x2053   :  { %2632 = vpow2.f32 %v2390_v31 }
0x2056   :  { %v2048_v39 = vpop.f32.mrf.mxu1 }
0x2057   :  { %v2629_v19 = vpop.eup %2628 }
0x2058   :  { %2073 = vrot.lane.b32.xlu1 %v2629_v19, %s2660_s12  ;;  %v2631_v5 = vpop.eup %2630 }
0x2059   :  { %v1987_v50 = vadd.f32 1.0, %v2631_v5  ;;  %v2633_v51 = vpop.eup %2632 }
0x205a   :  { %v2054_v38 = vadd.f32 1.0, %v2633_v51 }
0x205b   :  { %2634 = vrcp.f32 %v1987_v50  ;;  %v1999_v11 = vand.u32 2147483648, %v1987_v50  ;;  %vm1993_vm9 = vweird.f32 %v1987_v50  ;;  %v1997_v48 = vand.u32 2147483647, %v1987_v50 }
0x205c   :  { %2636 = vrcp.f32 %v2054_v38  ;;  %v2066_v33 = vand.u32 2147483648, %v2054_v38  ;;  %vm2060_vm13 = vweird.f32 %v2054_v38  ;;  %v2064_v47 = vand.u32 2147483647, %v2054_v38 }
0x205d   :  { %v2000_v25 = vor.u32 1.1754944e-38, %v1999_v11  ;;  %vm1998_vm11 = vcmp.eq.f32.partialorder %v1997_v48, 8.507059e+37  ;;  %v2162_v48 = vunpack.c.l.bf16 %v3262_v36 }
0x205e   :  { %v2067_v23 = vor.u32 1.1754944e-38, %v2066_v33  ;;  %vm2065_vm15 = vcmp.eq.f32.partialorder %v2064_v47, 8.507059e+37 }
0x2061   :  { %v2635_v54 = vpop.eup %2634 }
0x2062   :  { %v1989_v55 = vmul.f32 %v2635_v54, %v1987_v50  ;;  %v2637_v58 = vpop.eup %2636  ;;  %vm1994_vm8 = vweird.f32 %v2635_v54 }
0x2063   :  { %v2056_v63 = vmul.f32 %v2637_v58, %v2054_v38  ;;  %vm1995_vm10 = vmor %vm1993_vm9, %vm1994_vm8  ;;  %vm2061_vm12 = vweird.f32 %v2637_v58 }
0x2064   :  { %v1990_v35 = vsub.f32 1.0, %v1989_v55  ;;  %vm2062_vm14 = vmor %vm2060_vm13, %vm2061_vm12 }
0x2065   :  { %v2057_v3 = vsub.f32 1.0, %v2056_v63  ;;  %v2392_v63 = vld [vmem:[%s3504_s0 + $0x3c] sm:$0xf] }
0x2066   :  { %v1991_v60 = vmul.f32 %v2635_v54, %v1990_v35 }
0x2067   :  { %v2058_v12 = vmul.f32 %v2637_v58, %v2057_v3 }
0x2068   :  { %v1992_v7 = vadd.f32 %v2635_v54, %v1991_v60 }
0x2069   :  { %v2059_v37 = vadd.f32 %v2637_v58, %v2058_v12 }
0x206a   :  { %v1996_v8 = vsel %vm1995_vm10, %v2635_v54, %v1992_v7  ;;  %v2096_v7 = vunpack.c.l.bf16 %v2392_v63 }
0x206b   :  { %v2001_v59 = vsel %vm1998_vm11, %v2000_v25, %v1996_v8  ;;  %v2063_v34 = vsel %vm2062_vm14, %v2637_v58, %v2059_v37 }
0x206c   :  { %v2068_v41 = vsel %vm2065_vm15, %v2067_v23, %v2063_v34  ;;  %v2004_v43 = vmul.f32 %v2001_v59, %v3237_v9 }
0x206d   :  { %v2071_v31 = vmul.f32 %v2068_v41, %v3241_v17 }
0x20c2   :  { %v2007_v53 = vpop.permute.xlu0 %2006 }
0x20c3   :  { %v2009_v32 = vmul.f32 %v2007_v53, %v2001_v59 }
0x20c5   :  { %2011 = vrot.lane.b32.xlu2 %v2009_v32, %s2659_s2 }
0x20ca   :  { %v2074_v2 = vpop.permute.xlu1 %2073 }
0x20cb   :  { %v2076_v30 = vmul.f32 %v2074_v2, %v2068_v41 }
0x20cd   :  { %2078 = vrot.lane.b32.xlu0 %v2076_v30, %s2659_s2 }
0x211f   :  { %v2012_v39 = vpop.permute.xlu2 %2011 }
0x2120   :  { %v3270_v19 = vadd.f32 %v2012_v39, %v2004_v43 }
0x2122   :  { %2638 = vtanh.f32 %v3270_v19 }
0x2128   :  { %v2639_v24 = vpop.eup %2638 }
0x2129   :  { %2017 = vrot.lane.b32.xlu1 %v2639_v24, %s2660_s12 }
0x213f   :  { %v2079_v5 = vpop.permute.xlu0 %2078 }
0x2140   :  { %v3275_v50 = vadd.f32 %v2079_v5, %v2071_v31 }
0x2142   :  { %2640 = vtanh.f32 %v3275_v50 }
0x2148   :  { %v2641_v51 = vpop.eup %2640 }
0x2149   :  { %2084 = vrot.lane.b32.xlu2 %v2641_v51, %s2660_s12 }
0x219b   :  { %v2018_v38 = vpop.permute.xlu1 %2017 }
0x219c   :  { %v2020_v9 = vmul.f32 %v2018_v38, %v2001_v59 }
0x219e   :  { %v2097_v54 = vpack.c.bf16 %v2020_v9, %v2020_v9 }
0x21a0   :  { %2099 = vrot.lane.b32.xlu0 %v2097_v54, %s2659_s2 }
0x21a3   :  { %v2085_v55 = vpop.permute.xlu2 %2084 }
0x21a4   :  { %v3280_v35 = vmul.f32 %v2085_v55, %v2068_v41 }
0x21a6   :  { %v2163_v58 = vpack.c.bf16 %v3280_v35, %v3280_v35 }
0x21a8   :  { %2165 = vrot.lane.b32.xlu1 %v2163_v58, %s2659_s2 }
0x2212   :  { %v2100_v17 = vpop.permute.xlu0 %2099 }
0x2213   :  { %2393 = vmatmul.msk.bf16.vlgmr.msrb.gmra.mxu2 %vm60_vm0, %v2100_v17 }
0x221a   :  { %v2166_v60 = vpop.permute.xlu1 %2165 }
0x221b   :  { %2396 = vmatmul.msk.bf16.vlgmr.msrb.gmra.mxu3 %vm60_vm0, %v2166_v60 }
0x2296   :  { %v2113_v3 = vpop.f32.mrf.mxu2 }
0x2297   :  { %v2117_v11 = vadd.f32 %v2113_v3, %v2096_v7 }
0x2299   :  { %2642 = vtanh.f32 %v2117_v11  ;;  %v2394_v36 = vmul.f32 -1.442695, %v2117_v11 }
0x229e   :  { %v2115_v8 = vpop.f32.mrf.mxu2  ;;  %v2179_v12 = vpop.f32.mrf.mxu3 }
0x229f   :  { %v2643_v25 = vpop.eup %2642  ;;  %v2183_v59 = vadd.f32 %v2179_v12, %v2162_v48 }
0x22a0   :  { %2140 = vrot.lane.b32.xlu2 %v2643_v25, %s2660_s12 }
0x22a1   :  { %2644 = vtanh.f32 %v2183_v59 }
0x22a2   :  { %2646 = vpow2.f32 %v2394_v36 }
0x22a6   :  { %v2181_v53 = vpop.f32.mrf.mxu3 }
0x22a7   :  { %v2645_v32 = vpop.eup %2644 }
0x22a8   :  { %2206 = vrot.lane.b32.xlu0 %v2645_v32, %s2660_s12  ;;  %v2647_v37 = vpop.eup %2646 }
0x22a9   :  { %v2121_v33 = vadd.f32 1.0, %v2647_v37 }
0x22ab   :  { %2648 = vrcp.f32 %v2121_v33  ;;  %vm2127_vm2 = vweird.f32 %v2121_v33  ;;  %v2131_v34 = vand.u32 2147483647, %v2121_v33 }
0x22ad   :  { %vm2132_vm4 = vcmp.eq.f32.partialorder %v2131_v34, 8.507059e+37 }
0x22b0   :  { %146 = vrot.lane.b32.xlu0 %v2773_v10, %s2659_s2 }
0x22b1   :  { %v2649_v10 = vpop.eup %2648 }
0x22b2   :  { %vm2128_vm1 = vweird.f32 %v2649_v10 }
0x22b3   :  { %vm2129_vm3 = vmor %vm2127_vm2, %vm2128_vm1 }
0x22b8   :  { %347 = vrot.lane.b32.xlu0 %v2815_v13, %s2659_s2  ;;  %v2123_v13 = vmul.f32 %v2649_v10, %v2121_v33 }
0x22c0   :  { %548 = vrot.lane.b32.xlu0 %v2884_v61, %s2659_s2  ;;  %v2124_v61 = vsub.f32 1.0, %v2123_v13 }
0x22c2   :  { %v2125_v47 = vmul.f32 %v2649_v10, %v2124_v61 }
0x22c8   :  { %749 = vrot.lane.b32.xlu0 %v2926_v27, %s2659_s2  ;;  %v2397_v27 = vmul.f32 -1.442695, %v2183_v59 }
0x22ca   :  { %2650 = vpow2.f32 %v2397_v27 }
0x22d0   :  { %816 = vrot.lane.b32.xlu0 %v2958_v14, %s2659_s2  ;;  %v2126_v14 = vadd.f32 %v2649_v10, %v2125_v47  ;;  %v2651_v23 = vpop.eup %2650 }
0x22d8   :  { %1017 = vrot.lane.b32.xlu0 %v3000_v42, %s2659_s2  ;;  %v2133_v42 = vand.u32 2147483648, %v2121_v33 }
0x22da   :  { %v2134_v2 = vor.u32 1.1754944e-38, %v2133_v42 }
0x22e0   :  { %1218 = vrot.lane.b32.xlu0 %v3069_v44, %s2659_s2  ;;  %v2130_v44 = vsel %vm2129_vm3, %v2649_v10, %v2126_v14 }
0x22e1   :  { %v3313_v30 = vsel %vm2132_vm4, %v2134_v2, %v2130_v44 }
0x22e2   :  { %v2138_v17 = vmul.f32 %v3313_v30, %v3270_v19 }
0x22e8   :  { %1419 = vrot.lane.b32.xlu0 %v3111_v22, %s2659_s2  ;;  %v2187_v22 = vadd.f32 1.0, %v2651_v23 }
0x22ea   :  { %2652 = vrcp.f32 %v2187_v22  ;;  %v2199_v5 = vand.u32 2147483648, %v2187_v22  ;;  %vm2193_vm6 = vweird.f32 %v2187_v22  ;;  %v2197_v51 = vand.u32 2147483647, %v2187_v22 }
0x22ec   :  { %vm2198_vm8 = vcmp.eq.f32.partialorder %v2197_v51, 8.507059e+37 }
0x22f0   :  { %1620 = vrot.lane.b32.xlu0 %v3180_v49, %s2659_s2  ;;  %v2653_v43 = vpop.eup %2652 }
0x22f1   :  { %v2189_v39 = vmul.f32 %v2653_v43, %v2187_v22  ;;  %vm2194_vm5 = vweird.f32 %v2653_v43 }
0x22f2   :  { %vm2195_vm7 = vmor %vm2193_vm6, %vm2194_vm5 }
0x22f3   :  { %v2190_v24 = vsub.f32 1.0, %v2189_v39 }
0x22f8   :  { %1821 = vrot.lane.b32.xlu0 %v3218_v46, %s2659_s2  ;;  %v2191_v46 = vmul.f32 %v2653_v43, %v2190_v24 }
0x22fa   :  { %v2141_v41 = vpop.permute.xlu2 %2140  ;;  %v2192_v31 = vadd.f32 %v2653_v43, %v2191_v46 }
0x22fb   :  { %v2143_v49 = vmul.f32 %v2141_v41, %v3313_v30 }
0x22fc   :  { %v2196_v38 = vsel %vm2195_vm7, %v2653_v43, %v2192_v31 }
0x22fd   :  { %2145 = vrot.lane.b32.xlu1 %v2143_v49, %s2659_s2 }
0x2300   :  { %2022 = vrot.lane.b32.xlu0 %v2020_v9, %s2659_s2  ;;  %v2200_v9 = vor.u32 1.1754944e-38, %v2199_v5 }
0x2302   :  { %v3324_v54 = vsel %vm2198_vm8, %v2200_v9, %v2196_v38 }
0x2303   :  { %v2204_v3 = vmul.f32 %v3324_v54, %v3275_v50 }
0x2305   :  { %213 = vrot.lane.b32.xlu1 %v2778_v15, %s2659_s2 }
0x230d   :  { %414 = vrot.lane.b32.xlu1 %v2847_v62, %s2659_s2 }
0x2315   :  { %615 = vrot.lane.b32.xlu1 %v2889_v18, %s2659_s2 }
0x231a   :  { %v2207_v15 = vpop.permute.xlu0 %2206 }
0x231b   :  { %v2209_v55 = vmul.f32 %v2207_v15, %v3324_v54 }
0x231d   :  { %883 = vrot.lane.b32.xlu1 %v2963_v20, %s2659_s2  ;;  %2211 = vrot.lane.b32.xlu2 %v2209_v55, %s2659_s2 }
0x2322   :  { %v147_v62 = vpop.permute.xlu0 %146 }
0x2323   :  { %149 = vst.msk [vmem:[%s3506_s4] sm:$0xff] %vm60_vm0, %v147_v62 }
0x2325   :  { %1084 = vrot.lane.b32.xlu1 %v3032_v21, %s2659_s2  ;;  %280 = vrot.lane.b32.xlu2 %v2810_v0, %s2659_s2 }
0x232a   :  { %v348_v18 = vpop.permute.xlu0 %347 }
0x232b   :  { %2287 = vst.msk [vmem:[%s3507_s5 + $0x70] sm:$0xff] %vm60_vm0, %v348_v18 }
0x232d   :  { %481 = vrot.lane.b32.xlu2 %v2852_v16, %s2659_s2 }
0x2332   :  { %v549_v20 = vpop.permute.xlu0 %548 }
0x2333   :  { %2299 = vst.msk [vmem:[%s3506_s4 + $0x18] sm:$0xff] %vm60_vm0, %v549_v20 }
0x2335   :  { %682 = vrot.lane.b32.xlu2 %v2921_v1, %s2659_s2 }
0x233a   :  { %v750_v21 = vpop.permute.xlu0 %749 }
0x233b   :  { %2311 = vst.msk [vmem:[%s3507_s5 + $0x58] sm:$0xff] %vm60_vm0, %v750_v21 }
0x233d   :  { %950 = vrot.lane.b32.xlu2 %v2995_v26, %s2659_s2 }
0x2342   :  { %v817_v0 = vpop.permute.xlu0 %816 }
0x2343   :  { %2315 = vst.msk [vmem:[%s3506_s4 + $0x28] sm:$0xff] %vm60_vm0, %v817_v0 }
0x2345   :  { %1151 = vrot.lane.b32.xlu2 %v3037_v52, %s2659_s2 }
0x234a   :  { %v1018_v16 = vpop.permute.xlu0 %1017 }
0x234b   :  { %2327 = vst.msk [vmem:[%s3507_s5 + $0x48] sm:$0xff] %vm60_vm0, %v1018_v16 }
0x2352   :  { %v1219_v1 = vpop.permute.xlu0 %1218 }
0x2353   :  { %2339 = vst.msk [vmem:[%s3506_s4 + $0x40] sm:$0xff] %vm60_vm0, %v1219_v1 }
0x235a   :  { %v1420_v26 = vpop.permute.xlu0 %1419 }
0x235b   :  { %2351 = vst.msk [vmem:[%s3507_s5 + $0x30] sm:$0xff] %vm60_vm0, %v1420_v26 }
0x2362   :  { %v1621_v58 = vpop.permute.xlu0 %1620 }
0x2363   :  { %2363 = vst.msk [vmem:[%s3506_s4 + $0x58] sm:$0xff] %vm60_vm0, %v1621_v58 }
0x236a   :  { %v1822_v52 = vpop.permute.xlu0 %1821 }
0x236b   :  { %2375 = vst.msk [vmem:[%s3507_s5 + $0x18] sm:$0xff] %vm60_vm0, %v1822_v52 }
0x236f   :  { %v2146_v60 = vpop.permute.xlu1 %2145 }
0x2370   :  { %v2148_v63 = vadd.f32 %v2146_v60, %v2138_v17 }
0x2372   :  { %2654 = vtanh.f32 %v2148_v63  ;;  %v2023_v7 = vpop.permute.xlu0 %2022 }
0x2373   :  { %2387 = vst.msk [vmem:[%s3506_s4 + $0x70] sm:$0xff] %vm60_vm0, %v2023_v7 }
0x2377   :  { %v214_v11 = vpop.permute.xlu1 %213  ;;  %v2212_v48 = vpop.permute.xlu2 %2211 }
0x2378   :  { %v2655_v8 = vpop.eup %2654  ;;  %2279 = vst.msk [vmem:[%s3507_s5 + $0x78] sm:$0xff] %vm60_vm0, %v214_v11  ;;  %v2214_v19 = vadd.f32 %v2212_v48, %v2204_v3 }
0x2379   :  { %2151 = vrot.lane.b32.xlu1 %v2655_v8, %s2660_s12 }
0x237a   :  { %2656 = vtanh.f32 %v2214_v19 }
0x237f   :  { %v415_v12 = vpop.permute.xlu1 %414  ;;  %v281_v25 = vpop.permute.xlu2 %280 }
0x2380   :  { %v2657_v59 = vpop.eup %2656  ;;  %2291 = vst.msk [vmem:[%s3506_s4 + $0x10] sm:$0xff] %vm60_vm0, %v415_v12 }
0x2381   :  { %2283 = vst.msk [vmem:[%s3506_s4 + $0x8] sm:$0xff] %vm60_vm0, %v281_v25  ;;  %1285 = vrot.lane.b32.xlu1 %v3074_v45, %s2659_s2  ;;  %2217 = vrot.lane.b32.xlu2 %v2657_v59, %s2660_s12 }
0x2387   :  { %v616_v50 = vpop.permute.xlu1 %615  ;;  %v482_v53 = vpop.permute.xlu2 %481 }
0x2388   :  { %2303 = vst.msk [vmem:[%s3507_s5 + $0x60] sm:$0xff] %vm60_vm0, %v616_v50 }
0x2389   :  { %2295 = vst.msk [vmem:[%s3507_s5 + $0x68] sm:$0xff] %vm60_vm0, %v482_v53  ;;  %1486 = vrot.lane.b32.xlu1 %v3143_v29, %s2659_s2  ;;  %1352 = vrot.lane.b32.xlu2 %v3106_v57, %s2659_s2 }
0x238f   :  { %v884_v45 = vpop.permute.xlu1 %883  ;;  %v683_v32 = vpop.permute.xlu2 %682 }
0x2390   :  { %2319 = vst.msk [vmem:[%s3507_s5 + $0x50] sm:$0xff] %vm60_vm0, %v884_v45 }
0x2391   :  { %2307 = vst.msk [vmem:[%s3506_s4 + $0x20] sm:$0xff] %vm60_vm0, %v683_v32  ;;  %1687 = vrot.lane.b32.xlu1 %v3185_v28, %s2659_s2  ;;  %1553 = vrot.lane.b32.xlu2 %v3148_v56, %s2659_s2 }
0x2397   :  { %v1085_v29 = vpop.permute.xlu1 %1084  ;;  %v951_v57 = vpop.permute.xlu2 %950 }
0x2398   :  { %2331 = vst.msk [vmem:[%s3506_s4 + $0x38] sm:$0xff] %vm60_vm0, %v1085_v29 }
0x2399   :  { %2323 = vst.msk [vmem:[%s3506_s4 + $0x30] sm:$0xff] %vm60_vm0, %v951_v57  ;;  %1888 = vrot.lane.b32.xlu1 %v3246_v40, %s2659_s2  ;;  %1754 = vrot.lane.b32.xlu2 %v3213_v4, %s2659_s2 }
0x239f   :  { %v1152_v28 = vpop.permute.xlu2 %1151 }
0x23a0   :  { %2335 = vst.msk [vmem:[%s3507_s5 + $0x40] sm:$0xff] %vm60_vm0, %v1152_v28 }
0x23a1   :  { %2089 = vrot.lane.b32.xlu1 %v3280_v35, %s2659_s2  ;;  %1955 = vrot.lane.b32.xlu2 %v3251_v6, %s2659_s2 }
0x23a9   :  { %2228 = vrot.lane.b32.xlu1 %v2148_v63, %s2661_s30 }
0x23db   :  { %v2218_v56 = vpop.permute.xlu2 %2217 }
0x23dc   :  { %v2220_v40 = vmul.f32 %v2218_v56, %v3324_v54 }
0x23de   :  { %2222 = vrot.lane.b32.xlu0 %v2220_v40, %s2659_s2 }
0x23e3   :  { %v1353_v4 = vpop.permute.xlu2 %1352 }
0x23e4   :  { %2347 = vst.msk [vmem:[%s3506_s4 + $0x48] sm:$0xff] %vm60_vm0, %v1353_v4 }
0x23eb   :  { %v2152_v36 = vpop.permute.xlu1 %2151  ;;  %v1554_v37 = vpop.permute.xlu2 %1553 }
0x23ec   :  { %v2154_v35 = vmul.f32 %v2152_v36, %v3313_v30  ;;  %2359 = vst.msk [vmem:[%s3507_s5 + $0x28] sm:$0xff] %vm60_vm0, %v1554_v37 }
0x23ee   :  { %2156 = vrot.lane.b32.xlu2 %v2154_v35, %s2659_s2 }
0x23f3   :  { %v1286_v6 = vpop.permute.xlu1 %1285  ;;  %v1755_v33 = vpop.permute.xlu2 %1754 }
0x23f4   :  { %2343 = vst.msk [vmem:[%s3507_s5 + $0x38] sm:$0xff] %vm60_vm0, %v1286_v6 }
0x23f5   :  { %2371 = vst.msk [vmem:[%s3506_s4 + $0x60] sm:$0xff] %vm60_vm0, %v1755_v33 }
0x23f6   :  { %2234 = vrot.lane.b32.xlu2 %v2214_v19, %s2661_s30 }
0x23fb   :  { %v1487_v10 = vpop.permute.xlu1 %1486  ;;  %v1956_v13 = vpop.permute.xlu2 %1955 }
0x23fc   :  { %2355 = vst.msk [vmem:[%s3506_s4 + $0x50] sm:$0xff] %vm60_vm0, %v1487_v10 }
0x23fd   :  { %2383 = vst.msk [vmem:[%s3507_s5 + $0x10] sm:$0xff] %vm60_vm0, %v1956_v13 }
0x2403   :  { %v1688_v61 = vpop.permute.xlu1 %1687 }
0x2404   :  { %2367 = vst.msk [vmem:[%s3507_s5 + $0x20] sm:$0xff] %vm60_vm0, %v1688_v61 }
0x240b   :  { %v1889_v27 = vpop.permute.xlu1 %1888 }
0x240c   :  { %2379 = vst.msk [vmem:[%s3506_s4 + $0x68] sm:$0xff] %vm60_vm0, %v1889_v27 }
0x2413   :  { %v2090_v47 = vpop.permute.xlu1 %2089 }
0x2414   :  { %2391 = vst.msk [vmem:[%s3507_s5 + $0x8] sm:$0xff] %vm60_vm0, %v2090_v47 }
0x241b   :  { %v2229_v14 = vpop.permute.xlu1 %2228 }
0x241c   :  { %2231 = vst.msk [vmem:[#allocation3] sm:$0xff] %vm60_vm0, %v2229_v14 }
0x2448   :  { %v2157_v42 = vpop.permute.xlu2 %2156 }
0x2449   :  { %2395 = vst.msk [vmem:[%s3506_s4 + $0x78] sm:$0xff] %vm60_vm0, %v2157_v42 }
0x244a   :  { %2226 = vst.msk [vmem:[#allocation2] sm:$0xff] %vm60_vm0, %v2157_v42 }
0x2450   :  { %v2235_v34 = vpop.permute.xlu2 %2234  ;;  %v2223_v23 = vpop.permute.xlu0 %2222 }
0x2451   :  { %2237 = vst.msk [vmem:[#allocation3 + $0x8] sm:$0xff] %vm60_vm0, %v2235_v34 }
0x2452   :  { %2225 = vst.msk [vmem:[%s3507_s5] sm:$0xff] %vm60_vm0, %v2223_v23 }
0x2453   :  { %2232 = vst.msk [vmem:[#allocation2 + $0x8] sm:$0xff] %vm60_vm0, %v2223_v23 }

// kernel: encoder_forward.15
= control target key start
LH: loop header
LB: loop body
LE: loop exit
PB: predicated region body
PF: predicated region fallthrough
CT: control target
= control target key end

     0   :  { %s263_s1 = inlined_call_operand.vmem [shape: f32[128,256], index: 1, kind: input, shape index: {}]   ;;  %s264_s0 = inlined_call_operand.vmem [shape: f32[16,128], index: 0, kind: input, shape index: {}]   ;;  %s265_s2 = inlined_call_operand.vmem [shape: f32[1,256], index: 2, kind: input, shape index: {}]   ;;  %s266_s3 = inlined_call_operand.vmem [shape: bf16[16,128], index: 3, kind: output, shape index: {0}]   ;;  %s267_s4 = inlined_call_operand.vmem [shape: bf16[16,128], index: 4, kind: output, shape index: {1}]  }
   0x1   :  { %v47_v0 = vld [vmem:[%s263_s1 + $0xe0] sm:$0xff]  ;;  %v49_v1 = vld [vmem:[%s263_s1 + $0xf0] sm:$0xff]  ;;  %v48_v2 = vld [vmem:[%s263_s1 + $0xe8] sm:$0xff] }
   0x2   :  { %v65_v3 = vpack.c.bf16 %v49_v1, %v47_v0  ;;  %v50_v4 = vld [vmem:[%s263_s1 + $0xf8] sm:$0xff]  ;;  %v43_v5 = vld [vmem:[%s263_s1 + $0xc0] sm:$0xff]  ;;  %v45_v6 = vld [vmem:[%s263_s1 + $0xd0] sm:$0xff] }
   0x3   :  { %v66_v7 = vpack.c.bf16 %v50_v4, %v48_v2  ;;  %v44_v8 = vld [vmem:[%s263_s1 + $0xc8] sm:$0xff]  ;;  %v46_v9 = vld [vmem:[%s263_s1 + $0xd8] sm:$0xff]  ;;  %v63_v10 = vpack.c.bf16 %v45_v6, %v43_v5  ;;  %v39_v12 = vld [vmem:[%s263_s1 + $0xa0] sm:$0xff] }
   0x4   :  { %73 = vmatpush.bf16.msra.mxu0 %v65_v3  ;;  %v64_v11 = vpack.c.bf16 %v46_v9, %v44_v8  ;;  %v41_v13 = vld [vmem:[%s263_s1 + $0xb0] sm:$0xff]  ;;  %v40_v14 = vld [vmem:[%s263_s1 + $0xa8] sm:$0xff]  ;;  %v42_v15 = vld [vmem:[%s263_s1 + $0xb8] sm:$0xff] }
   0x5   :  { %87 = vmatpush.bf16.msra.mxu1 %v66_v7  ;;  %v61_v16 = vpack.c.bf16 %v41_v13, %v39_v12  ;;  %v62_v17 = vpack.c.bf16 %v42_v15, %v40_v14  ;;  %v35_v18 = vld [vmem:[%s263_s1 + $0x80] sm:$0xff]  ;;  %v37_v19 = vld [vmem:[%s263_s1 + $0x90] sm:$0xff]  ;;  %v36_v20 = vld [vmem:[%s263_s1 + $0x88] sm:$0xff] }
   0x6   :  { %v38_v21 = vld [vmem:[%s263_s1 + $0x98] sm:$0xff]  ;;  %v59_v22 = vpack.c.bf16 %v37_v19, %v35_v18  ;;  %v31_v24 = vld [vmem:[%s263_s1 + $0x60] sm:$0xff]  ;;  %v33_v25 = vld [vmem:[%s263_s1 + $0x70] sm:$0xff] }
   0x7   :  { %v60_v23 = vpack.c.bf16 %v38_v21, %v36_v20  ;;  %v32_v26 = vld [vmem:[%s263_s1 + $0x68] sm:$0xff]  ;;  %v34_v27 = vld [vmem:[%s263_s1 + $0x78] sm:$0xff]  ;;  %v57_v28 = vpack.c.bf16 %v33_v25, %v31_v24  ;;  %v27_v30 = vld [vmem:[%s263_s1 + $0x40] sm:$0xff] }
   0x8   :  { %74 = vmatpush.bf16.msra.mxu0 %v63_v10  ;;  %v58_v29 = vpack.c.bf16 %v34_v27, %v32_v26  ;;  %v29_v31 = vld [vmem:[%s263_s1 + $0x50] sm:$0xff]  ;;  %v28_v32 = vld [vmem:[%s263_s1 + $0x48] sm:$0xff]  ;;  %v30_v33 = vld [vmem:[%s263_s1 + $0x58] sm:$0xff] }
   0x9   :  { %88 = vmatpush.bf16.msra.mxu1 %v64_v11  ;;  %v55_v34 = vpack.c.bf16 %v29_v31, %v27_v30  ;;  %v56_v35 = vpack.c.bf16 %v30_v33, %v28_v32  ;;  %v23_v36 = vld [vmem:[%s263_s1 + $0x20] sm:$0xff]  ;;  %v25_v37 = vld [vmem:[%s263_s1 + $0x30] sm:$0xff]  ;;  %v24_v38 = vld [vmem:[%s263_s1 + $0x28] sm:$0xff] }
   0xa   :  { %v26_v39 = vld [vmem:[%s263_s1 + $0x38] sm:$0xff]  ;;  %v53_v40 = vpack.c.bf16 %v25_v37, %v23_v36  ;;  %v19_v42 = vld [vmem:[%s263_s1] sm:$0xff]  ;;  %v21_v43 = vld [vmem:[%s263_s1 + $0x10] sm:$0xff] }
   0xb   :  { %v54_v41 = vpack.c.bf16 %v26_v39, %v24_v38  ;;  %v20_v44 = vld [vmem:[%s263_s1 + $0x8] sm:$0xff]  ;;  %v22_v45 = vld [vmem:[%s263_s1 + $0x18] sm:$0xff]  ;;  %v51_v46 = vpack.c.bf16 %v21_v43, %v19_v42  ;;  %v16_v47 = vld [vmem:[%s264_s0] sm:$0xff] }
   0xc   :  { %75 = vmatpush.bf16.msra.mxu0 %v61_v16  ;;  %v17_v48 = vld [vmem:[%s264_s0 + $0x8] sm:$0xff]  ;;  %v52_v49 = vpack.c.bf16 %v22_v45, %v20_v44  ;;  %v67_v53 = vld [vmem:[%s265_s2] sm:$0x3] }
   0xd   :  { %89 = vmatpush.bf16.msra.mxu1 %v62_v17  ;;  %v18_v50 = vpack.c.bf16 %v17_v48, %v16_v47  ;;  %v69_v54 = vperm.slane %v67_v53, 0  ;;  %v70_v55 = vperm.slane %v67_v53, 1 }
  0x10   :  { %76 = vmatpush.bf16.msra.mxu0 %v59_v22 }
  0x11   :  { %90 = vmatpush.bf16.msra.mxu1 %v60_v23 }
  0x14   :  { %77 = vmatpush.bf16.msra.mxu0 %v57_v28 }
  0x15   :  { %91 = vmatpush.bf16.msra.mxu1 %v58_v29 }
  0x18   :  { %78 = vmatpush.bf16.msra.mxu0 %v55_v34 }
  0x19   :  { %92 = vmatpush.bf16.msra.mxu1 %v56_v35 }
  0x1c   :  { %79 = vmatpush.bf16.msra.mxu0 %v53_v40 }
  0x1d   :  { %93 = vmatpush.bf16.msra.mxu1 %v54_v41 }
  0x20   :  { %80 = vmatpush.bf16.msra.mxu0 %v51_v46 }
  0x21   :  { %94 = vmatpush.bf16.msra.mxu1 %v52_v49 }
  0x23   :  { %81 = vmatmul.bf16.vlgmr.msra.gmra.mxu0 %v18_v50 }
  0x24   :  { %95 = vmatmul.bf16.vlgmr.msra.gmra.mxu1 %v18_v50 }
  0xa0   :  { %v82_v51 = vpop.f32.mrf.mxu0 }
  0xa1   :  { %v96_v52 = vpop.f32.mrf.mxu1  ;;  %v83_v57 = vadd.f32 %v82_v51, %v69_v54 }
  0xa2   :  { %v97_v60 = vadd.f32 %v96_v52, %v70_v55 }
  0xa8   :  { %v84_v56 = vpop.f32.mrf.mxu0 }
  0xa9   :  { %v85_v58 = vadd.f32 %v84_v56, %v69_v54  ;;  %v98_v59 = vpop.f32.mrf.mxu1 }
  0xaa   :  { %v99_v61 = vadd.f32 %v98_v59, %v70_v55 }
  0xab   :  { %v120_v62 = vpack.c.bf16 %v85_v58, %v83_v57 }
  0xac   :  { %v125_v63 = vpack.c.bf16 %v99_v61, %v97_v60 }
  0xad   :  { %121 = vst [vmem:[%s266_s3] sm:$0xff] %v120_v62  }
  0xae   :  { %126 = vst [vmem:[%s267_s4] sm:$0xff] %v125_v63  }

// kernel: encoder_forward.16
= control target key start
LH: loop header
LB: loop body
LE: loop exit
PB: predicated region body
PF: predicated region fallthrough
CT: control target
= control target key end

     0   :  { %vm60_vm0 = vcmask 261120   ;;  %v446_v3 = vmov 0.0   ;;  %s448_s12 = smov 64   ;;  %s449_s15 = smov 96   ;;  %s583_s2 = inlined_call_operand.vmem [shape: f32[32,128], index: 2, kind: input, shape index: {}]   ;;  %s584_s3 = inlined_call_operand.vmem [shape: f32[32,128], index: 3, kind: input, shape index: {}]   ;;  %s585_s0 = inlined_call_operand.vmem [shape: bf16[2,8,128], index: 0, kind: input, shape index: {}]   ;;  %s586_s1 = inlined_call_operand.vmem [shape: bf16[2,8,128], index: 1, kind: input, shape index: {}]   ;;  %s587_s4 = inlined_call_operand.vmem [shape: f32[2,8,32], index: 4, kind: output, shape index: {0}]   ;;  %s588_s5 = inlined_call_operand.vmem [shape: f32[2,8,32], index: 5, kind: output, shape index: {1}]  }
   0x1   :  { %v67_v0 = vld [vmem:[%s583_s2 + $0x10] sm:$0xff]  ;;  %v68_v1 = vld [vmem:[%s583_s2 + $0x18] sm:$0xff]  ;;  %61 = vst.msk [vmem:[#allocation2] sm:$0xff] %vm60_vm0, %v446_v3  ;;  %v65_v6 = vld [vmem:[%s583_s2] sm:$0xff] }
   0x2   :  { %v73_v2 = vld [vmem:[%s584_s3 + $0x10] sm:$0xff]  ;;  %v70_v4 = vpack.c.bf16 %v68_v1, %v67_v0  ;;  %v74_v5 = vld [vmem:[%s584_s3 + $0x18] sm:$0xff]  ;;  %v66_v7 = vld [vmem:[%s583_s2 + $0x8] sm:$0xff]  ;;  %62 = vst.msk [vmem:[#allocation2 + $0x8] sm:$0xff] %vm60_vm0, %v446_v3  ;;  %s447_s2 = smov 32  }
   0x3   :  { %v76_v8 = vpack.c.bf16 %v74_v5, %v73_v2  ;;  %v71_v9 = vld [vmem:[%s584_s3] sm:$0xff]  ;;  %v72_v10 = vld [vmem:[%s584_s3 + $0x8] sm:$0xff]  ;;  %63 = vst.msk [vmem:[#allocation3] sm:$0xff] %vm60_vm0, %v446_v3  ;;  %v69_v11 = vpack.c.bf16 %v66_v7, %v65_v6 }
   0x4   :  { %96 = vmatpush.bf16.msra.mxu0 %v70_v4  ;;  %64 = vst.msk [vmem:[#allocation3 + $0x8] sm:$0xff] %vm60_vm0, %v446_v3  ;;  %234 = vmatpush.bf16.msra.mxu2 %v70_v4  ;;  %v75_v12 = vpack.c.bf16 %v72_v10, %v71_v9  ;;  %v83_v19 = vld [vmem:[%s585_s0] sm:$0xf] }
   0x5   :  { %163 = vmatpush.bf16.msra.mxu1 %v76_v8  ;;  %300 = vmatpush.bf16.msra.mxu3 %v76_v8  ;;  %v84_v20 = vunpack.c.l.bf16 %v83_v19  ;;  %v518_v22 = vld [vmem:[%s586_s1] sm:$0xff]  }
   0x6   :  { %v152_v25 = vunpack.c.h.bf16 %v518_v22 }
   0x8   :  { %97 = vmatpush.bf16.msra.mxu0 %v69_v11  ;;  %v77_v13 = vld [vmem:[#allocation2] sm:$0xff]  ;;  %235 = vmatpush.bf16.msra.mxu2 %v69_v11 }
   0x9   :  { %164 = vmatpush.bf16.msra.mxu1 %v75_v12  ;;  %v85_v14 = vpack.c.bf16 %v77_v13, %v77_v13  ;;  %v80_v15 = vld [vmem:[#allocation2 + $0x8] sm:$0xff]  ;;  %301 = vmatpush.bf16.msra.mxu3 %v75_v12 }
   0xa   :  { %v153_v16 = vpack.c.bf16 %v80_v15, %v80_v15  ;;  %v78_v17 = vld [vmem:[#allocation3] sm:$0xff]  ;;  %v404_v15 = vld [vmem:[%s585_s0 + $0x4] sm:$0xf] }
   0xb   :  { %398 = vmatmul.msk.bf16.vlgmr.msra.gmra.mxu0 %vm60_vm0, %v85_v14  ;;  %125 = vrot.lane.b32.xlu1 %v78_v17, %s447_s2  ;;  %v82_v18 = vld [vmem:[#allocation3 + $0x8] sm:$0xff] }
   0xc   :  { %401 = vmatmul.msk.bf16.vlgmr.msra.gmra.mxu1 %vm60_vm0, %v153_v16  ;;  %v220_v16 = vunpack.c.l.bf16 %v404_v15 }
  0x13   :  { %192 = vrot.lane.b32.xlu1 %v82_v18, %s447_s2 }
  0x7d   :  { %v126_v61 = vpop.permute.xlu1 %125 }
  0x85   :  { %v193_v1 = vpop.permute.xlu1 %192 }
  0x88   :  { %v99_v21 = vpop.f32.mrf.mxu0 }
  0x89   :  { %v103_v23 = vadd.f32 %v99_v21, %v84_v20  ;;  %v166_v24 = vpop.f32.mrf.mxu1  ;;  %v286_v21 = vunpack.c.l.bf16 %v518_v22 }
  0x8a   :  { %v170_v26 = vadd.f32 %v166_v24, %v152_v25 }
  0x8b   :  { %414 = vtanh.f32 %v103_v23  ;;  %v399_v31 = vmul.f32 -1.442695, %v103_v23 }
  0x8c   :  { %416 = vtanh.f32 %v170_v26  ;;  %v402_v32 = vmul.f32 -1.442695, %v170_v26 }
  0x8d   :  { %418 = vpow2.f32 %v399_v31 }
  0x8e   :  { %420 = vpow2.f32 %v402_v32 }
  0x90   :  { %v101_v27 = vpop.f32.mrf.mxu0 }
  0x91   :  { %v415_v28 = vpop.eup %414  ;;  %v168_v29 = vpop.f32.mrf.mxu1 }
  0x92   :  { %130 = vrot.lane.b32.xlu0 %v415_v28, %s448_s12  ;;  %v417_v30 = vpop.eup %416 }
  0x93   :  { %v419_v33 = vpop.eup %418 }
  0x94   :  { %v107_v34 = vadd.f32 1.0, %v419_v33  ;;  %v421_v35 = vpop.eup %420 }
  0x95   :  { %v174_v36 = vadd.f32 1.0, %v421_v35 }
  0x96   :  { %422 = vrcp.f32 %v107_v34  ;;  %v119_v45 = vand.u32 2147483648, %v107_v34  ;;  %vm113_vm2 = vweird.f32 %v107_v34  ;;  %v117_v46 = vand.u32 2147483647, %v107_v34 }
  0x97   :  { %424 = vrcp.f32 %v174_v36  ;;  %vm180_vm5 = vweird.f32 %v174_v36  ;;  %v186_v54 = vand.u32 2147483648, %v174_v36  ;;  %v184_v55 = vand.u32 2147483647, %v174_v36 }
  0x98   :  { %v120_v49 = vor.u32 1.1754944e-38, %v119_v45  ;;  %vm118_vm4 = vcmp.eq.f32.partialorder %v117_v46, 8.507059e+37 }
  0x99   :  { %v187_v57 = vor.u32 1.1754944e-38, %v186_v54  ;;  %vm185_vm8 = vcmp.eq.f32.partialorder %v184_v55, 8.507059e+37 }
  0x9a   :  { %197 = vrot.lane.b32.xlu0 %v417_v30, %s448_s12 }
  0x9c   :  { %v423_v37 = vpop.eup %422 }
  0x9d   :  { %v109_v38 = vmul.f32 %v423_v37, %v107_v34  ;;  %v425_v40 = vpop.eup %424  ;;  %vm114_vm1 = vweird.f32 %v423_v37 }
  0x9e   :  { %v176_v42 = vmul.f32 %v425_v40, %v174_v36  ;;  %vm115_vm3 = vmor %vm113_vm2, %vm114_vm1  ;;  %vm181_vm6 = vweird.f32 %v425_v40 }
  0x9f   :  { %v110_v39 = vsub.f32 1.0, %v109_v38  ;;  %vm182_vm7 = vmor %vm180_vm5, %vm181_vm6 }
  0xa0   :  { %v177_v44 = vsub.f32 1.0, %v176_v42 }
  0xa1   :  { %v111_v41 = vmul.f32 %v423_v37, %v110_v39 }
  0xa2   :  { %v178_v48 = vmul.f32 %v425_v40, %v177_v44 }
  0xa3   :  { %v112_v43 = vadd.f32 %v423_v37, %v111_v41 }
  0xa4   :  { %v179_v52 = vadd.f32 %v425_v40, %v178_v48 }
  0xa5   :  { %v116_v47 = vsel %vm115_vm3, %v423_v37, %v112_v43 }
  0xa6   :  { %v121_v50 = vsel %vm118_vm4, %v120_v49, %v116_v47  ;;  %v183_v56 = vsel %vm182_vm7, %v425_v40, %v179_v52 }
  0xa7   :  { %v188_v58 = vsel %vm185_vm8, %v187_v57, %v183_v56  ;;  %v128_v62 = vmul.f32 %v126_v61, %v121_v50 }
  0xa8   :  { %v195_v2 = vmul.f32 %v193_v1, %v188_v58 }
 0x104   :  { %v131_v51 = vpop.permute.xlu0 %130 }
 0x105   :  { %v133_v53 = vmul.f32 %v131_v51, %v121_v50 }
 0x107   :  { %135 = vrot.lane.b32.xlu2 %v133_v53, %s447_s2 }
 0x10c   :  { %v198_v59 = vpop.permute.xlu0 %197 }
 0x10d   :  { %v200_v60 = vmul.f32 %v198_v59, %v188_v58 }
 0x10f   :  { %202 = vrot.lane.b32.xlu2 %v200_v60, %s447_s2 }
 0x161   :  { %v136_v63 = vpop.permute.xlu2 %135 }
 0x162   :  { %v525_v0 = vadd.f32 %v136_v63, %v128_v62 }
 0x164   :  { %426 = vtanh.f32 %v525_v0 }
 0x169   :  { %v203_v3 = vpop.permute.xlu2 %202 }
 0x16a   :  { %v427_v4 = vpop.eup %426  ;;  %v528_v5 = vadd.f32 %v203_v3, %v195_v2 }
 0x16b   :  { %141 = vrot.lane.b32.xlu0 %v427_v4, %s448_s12 }
 0x16c   :  { %428 = vtanh.f32 %v528_v5 }
 0x172   :  { %v429_v6 = vpop.eup %428 }
 0x173   :  { %208 = vrot.lane.b32.xlu1 %v429_v6, %s448_s12 }
 0x1dd   :  { %v142_v7 = vpop.permute.xlu0 %141 }
 0x1de   :  { %v533_v8 = vmul.f32 %v142_v7, %v121_v50 }
 0x1e0   :  { %v221_v9 = vpack.c.bf16 %v533_v8, %v533_v8 }
 0x1e2   :  { %223 = vrot.lane.b32.xlu2 %v221_v9, %s447_s2 }
 0x1e5   :  { %v209_v10 = vpop.permute.xlu1 %208 }
 0x1e6   :  { %v538_v11 = vmul.f32 %v209_v10, %v188_v58 }
 0x1e8   :  { %v287_v12 = vpack.c.bf16 %v538_v11, %v538_v11 }
 0x1ea   :  { %289 = vrot.lane.b32.xlu0 %v287_v12, %s447_s2 }
 0x23c   :  { %v224_v13 = vpop.permute.xlu2 %223 }
 0x23d   :  { %405 = vmatmul.msk.bf16.vlgmr.msra.gmra.mxu2 %vm60_vm0, %v224_v13 }
 0x25c   :  { %v290_v14 = vpop.permute.xlu0 %289 }
 0x25d   :  { %408 = vmatmul.msk.bf16.vlgmr.msra.gmra.mxu3 %vm60_vm0, %v290_v14 }
 0x2c0   :  { %v237_v17 = vpop.f32.mrf.mxu2 }
 0x2c1   :  { %v241_v18 = vadd.f32 %v237_v17, %v220_v16 }
 0x2c3   :  { %430 = vtanh.f32 %v241_v18  ;;  %v406_v27 = vmul.f32 -1.442695, %v241_v18 }
 0x2c8   :  { %v239_v19 = vpop.f32.mrf.mxu2 }
 0x2c9   :  { %v431_v20 = vpop.eup %430 }
 0x2ca   :  { %264 = vrot.lane.b32.xlu1 %v431_v20, %s448_s12 }
 0x2e0   :  { %v303_v23 = vpop.f32.mrf.mxu3 }
 0x2e1   :  { %v307_v24 = vadd.f32 %v303_v23, %v286_v21 }
 0x2e3   :  { %432 = vtanh.f32 %v307_v24  ;;  %v409_v28 = vmul.f32 -1.442695, %v307_v24 }
 0x2e4   :  { %434 = vpow2.f32 %v406_v27 }
 0x2e5   :  { %436 = vpow2.f32 %v409_v28 }
 0x2e8   :  { %v305_v25 = vpop.f32.mrf.mxu3 }
 0x2e9   :  { %v433_v26 = vpop.eup %432 }
 0x2ea   :  { %330 = vrot.lane.b32.xlu2 %v433_v26, %s448_s12  ;;  %v435_v29 = vpop.eup %434 }
 0x2eb   :  { %v245_v30 = vadd.f32 1.0, %v435_v29  ;;  %v437_v31 = vpop.eup %436 }
 0x2ec   :  { %v311_v32 = vadd.f32 1.0, %v437_v31 }
 0x2ed   :  { %438 = vrcp.f32 %v245_v30  ;;  %v257_v40 = vand.u32 2147483648, %v245_v30  ;;  %vm251_vm10 = vweird.f32 %v245_v30  ;;  %v255_v41 = vand.u32 2147483647, %v245_v30 }
 0x2ee   :  { %440 = vrcp.f32 %v311_v32  ;;  %v323_v49 = vand.u32 2147483648, %v311_v32  ;;  %vm317_vm14 = vweird.f32 %v311_v32  ;;  %v321_v50 = vand.u32 2147483647, %v311_v32 }
 0x2ef   :  { %v258_v44 = vor.u32 1.1754944e-38, %v257_v40  ;;  %vm256_vm12 = vcmp.eq.f32.partialorder %v255_v41, 8.507059e+37 }
 0x2f0   :  { %v324_v52 = vor.u32 1.1754944e-38, %v323_v49  ;;  %vm322_vm1 = vcmp.eq.f32.partialorder %v321_v50, 8.507059e+37 }
 0x2f3   :  { %v439_v33 = vpop.eup %438 }
 0x2f4   :  { %v247_v34 = vmul.f32 %v439_v33, %v245_v30  ;;  %v441_v35 = vpop.eup %440  ;;  %vm252_vm9 = vweird.f32 %v439_v33 }
 0x2f5   :  { %v313_v37 = vmul.f32 %v441_v35, %v311_v32  ;;  %vm253_vm11 = vmor %vm251_vm10, %vm252_vm9  ;;  %vm318_vm13 = vweird.f32 %v441_v35 }
 0x2f6   :  { %v248_v22 = vsub.f32 1.0, %v247_v34  ;;  %vm319_vm15 = vmor %vm317_vm14, %vm318_vm13 }
 0x2f7   :  { %v314_v39 = vsub.f32 1.0, %v313_v37 }
 0x2f8   :  { %v249_v36 = vmul.f32 %v439_v33, %v248_v22 }
 0x2f9   :  { %v315_v43 = vmul.f32 %v441_v35, %v314_v39 }
 0x2fa   :  { %v250_v38 = vadd.f32 %v439_v33, %v249_v36 }
 0x2fb   :  { %v316_v48 = vadd.f32 %v441_v35, %v315_v43 }
 0x2fc   :  { %v254_v42 = vsel %vm253_vm11, %v439_v33, %v250_v38 }
 0x2fd   :  { %v259_v46 = vsel %vm256_vm12, %v258_v44, %v254_v42  ;;  %v320_v51 = vsel %vm319_vm15, %v441_v35, %v316_v48 }
 0x2fe   :  { %v325_v54 = vsel %vm322_vm1, %v324_v52, %v320_v51  ;;  %v262_v56 = vmul.f32 %v259_v46, %v525_v0 }
 0x2ff   :  { %v328_v59 = vmul.f32 %v325_v54, %v528_v5 }
 0x33c   :  { %v265_v45 = vpop.permute.xlu1 %264 }
 0x33d   :  { %v267_v47 = vmul.f32 %v265_v45, %v259_v46 }
 0x33f   :  { %269 = vrot.lane.b32.xlu0 %v267_v47, %s447_s2 }
 0x344   :  { %v331_v53 = vpop.permute.xlu2 %330 }
 0x345   :  { %v333_v55 = vmul.f32 %v331_v53, %v325_v54 }
 0x347   :  { %335 = vrot.lane.b32.xlu1 %v333_v55, %s447_s2 }
 0x34f   :  { %146 = vrot.lane.b32.xlu1 %v533_v8, %s447_s2 }
 0x3b1   :  { %v270_v57 = vpop.permute.xlu0 %269 }
 0x3b2   :  { %v272_v58 = vadd.f32 %v270_v57, %v262_v56 }
 0x3b4   :  { %442 = vtanh.f32 %v272_v58 }
 0x3b9   :  { %v336_v60 = vpop.permute.xlu1 %335 }
 0x3ba   :  { %v443_v61 = vpop.eup %442  ;;  %v338_v62 = vadd.f32 %v336_v60, %v328_v59 }
 0x3bb   :  { %275 = vrot.lane.b32.xlu2 %v443_v61, %s448_s12 }
 0x3bc   :  { %444 = vtanh.f32 %v338_v62 }
 0x3c1   :  { %v147_v63 = vpop.permute.xlu1 %146 }
 0x3c2   :  { %v445_v1 = vpop.eup %444  ;;  %149 = vst.msk [vmem:[%s587_s4] sm:$0xff] %vm60_vm0, %v147_v63 }
 0x3c3   :  { %341 = vrot.lane.b32.xlu0 %v445_v1, %s448_s12  ;;  %213 = vrot.lane.b32.xlu2 %v538_v11, %s447_s2 }
 0x3cb   :  { %352 = vrot.lane.b32.xlu2 %v272_v58, %s449_s15 }
 0x415   :  { %v276_v0 = vpop.permute.xlu2 %275 }
 0x416   :  { %v278_v2 = vmul.f32 %v276_v0, %v259_v46 }
 0x418   :  { %280 = vrot.lane.b32.xlu0 %v278_v2, %s447_s2 }
 0x41d   :  { %v214_v3 = vpop.permute.xlu2 %213 }
 0x41e   :  { %403 = vst.msk [vmem:[%s588_s5 + $0x8] sm:$0xff] %vm60_vm0, %v214_v3 }
 0x420   :  { %358 = vrot.lane.b32.xlu0 %v338_v62, %s449_s15 }
 0x425   :  { %v353_v4 = vpop.permute.xlu2 %352 }
 0x426   :  { %355 = vst.msk [vmem:[#allocation3] sm:$0xff] %vm60_vm0, %v353_v4 }
 0x435   :  { %v342_v5 = vpop.permute.xlu0 %341 }
 0x436   :  { %v344_v6 = vmul.f32 %v342_v5, %v325_v54 }
 0x438   :  { %346 = vrot.lane.b32.xlu1 %v344_v6, %s447_s2 }
 0x48a   :  { %v281_v7 = vpop.permute.xlu0 %280 }
 0x48b   :  { %407 = vst.msk [vmem:[%s587_s4 + $0x8] sm:$0xff] %vm60_vm0, %v281_v7 }
 0x48c   :  { %350 = vst.msk [vmem:[#allocation2] sm:$0xff] %vm60_vm0, %v281_v7 }
 0x492   :  { %v359_v8 = vpop.permute.xlu0 %358 }
 0x493   :  { %361 = vst.msk [vmem:[#allocation3 + $0x8] sm:$0xff] %vm60_vm0, %v359_v8 }
 0x4aa   :  { %v347_v9 = vpop.permute.xlu1 %346 }
 0x4ab   :  { %349 = vst.msk [vmem:[%s588_s5] sm:$0xff] %vm60_vm0, %v347_v9 }
 0x4ac   :  { %356 = vst.msk [vmem:[#allocation2 + $0x8] sm:$0xff] %vm60_vm0, %v347_v9 }

// kernel: encoder_forward.17
= control target key start
LH: loop header
LB: loop body
LE: loop exit
PB: predicated region body
PF: predicated region fallthrough
CT: control target
= control target key end

     0   :  { %vm36_vm0 = vcmask 523264   ;;  %s175_s1 = inlined_call_operand.vmem [shape: f32[64,128], index: 1, kind: input, shape index: {}]   ;;  %s176_s2 = inlined_call_operand.vmem [shape: f32[1,128], index: 2, kind: input, shape index: {}]   ;;  %s177_s0 = inlined_call_operand.vmem [shape: f32[16,64], index: 0, kind: input, shape index: {}]   ;;  %s178_s3 = inlined_call_operand.vmem [shape: f32[16,64], index: 3, kind: output, shape index: {0}]   ;;  %s179_s4 = inlined_call_operand.vmem [shape: f32[16,64], index: 4, kind: output, shape index: {1}]  }
   0x1   :  { %v26_v0 = vld [vmem:[%s175_s1 + $0x30] sm:$0xff]  ;;  %v27_v1 = vld [vmem:[%s175_s1 + $0x38] sm:$0xff]  ;;  %v24_v2 = vld [vmem:[%s175_s1 + $0x20] sm:$0xff] }
   0x2   :  { %v31_v3 = vpack.c.bf16 %v27_v1, %v26_v0  ;;  %v25_v4 = vld [vmem:[%s175_s1 + $0x28] sm:$0xff]  ;;  %v22_v6 = vld [vmem:[%s175_s1 + $0x10] sm:$0xff]  ;;  %v23_v7 = vld [vmem:[%s175_s1 + $0x18] sm:$0xff] }
   0x3   :  { %v30_v5 = vpack.c.bf16 %v25_v4, %v24_v2  ;;  %v29_v8 = vpack.c.bf16 %v23_v7, %v22_v6  ;;  %v20_v9 = vld [vmem:[%s175_s1] sm:$0xff]  ;;  %v21_v10 = vld [vmem:[%s175_s1 + $0x8] sm:$0xff] }
   0x4   :  { %44 = vmatpush.bf16.msra.mxu0 %v31_v3  ;;  %v28_v11 = vpack.c.bf16 %v21_v10, %v20_v9  ;;  %v17_v12 = vld [vmem:[%s177_s0] sm:$0xff]  ;;  %v18_v13 = vld [vmem:[%s177_s0 + $0x8] sm:$0xff]  ;;  %s99_s0 = smov 64  }
   0x5   :  { %v19_v14 = vpack.c.bf16 %v18_v13, %v17_v12  ;;  %v94_v15 = vld [vmem:[%s176_s2] ss:$0 sm:$0xff] }
   0x8   :  { %45 = vmatpush.bf16.msra.mxu0 %v30_v5 }
   0xc   :  { %46 = vmatpush.bf16.msra.mxu0 %v29_v8 }
  0x10   :  { %47 = vmatpush.bf16.msra.mxu0 %v28_v11 }
  0x13   :  { %90 = vmatmul.msk.bf16.vlgmr.msra.gmra.mxu0 %vm36_vm0, %v19_v14 }
  0x90   :  { %v49_v16 = vpop.f32.mrf.mxu0 }
  0x91   :  { %v50_v17 = vadd.f32 %v94_v15, %v49_v16 }
  0x93   :  { %v56_v18 = vmin.f32 %v50_v17, 0.0  ;;  %vm54_vm1 = vcmp.gt.f32.partialorder %v50_v17, 0.0 }
  0x95   :  { %v58_v19 = vmul.f32 1.442695, %v56_v18 }
  0x97   :  { %95 = vpow2.f32 %v58_v19 }
  0x98   :  { %v51_v20 = vpop.f32.mrf.mxu0 }
  0x99   :  { %v52_v21 = vadd.f32 %v94_v15, %v51_v20 }
  0x9b   :  { %v57_v22 = vmin.f32 %v52_v21, 0.0  ;;  %vm55_vm2 = vcmp.gt.f32.partialorder %v52_v21, 0.0 }
  0x9d   :  { %v96_v23 = vpop.eup %95  ;;  %v60_v24 = vmul.f32 1.442695, %v57_v22 }
  0x9e   :  { %v91_v25 = vadd.f32 -1.0, %v96_v23 }
  0x9f   :  { %97 = vpow2.f32 %v60_v24 }
  0xa0   :  { %v64_v26 = vmul.f32 1.6732632, %v91_v25 }
  0xa2   :  { %v66_v27 = vsel %vm54_vm1, %v50_v17, %v64_v26 }
  0xa3   :  { %v68_v28 = vmul.f32 1.050701, %v66_v27 }
  0xa5   :  { %v98_v29 = vpop.eup %97  ;;  %74 = vrot.lane.b32.xlu0 %v68_v28, %s99_s0  ;;  %70 = vst.msk [vmem:[%s178_s3] sm:$0xff] %vm36_vm0, %v68_v28 }
  0xa6   :  { %v92_v30 = vadd.f32 -1.0, %v98_v29 }
  0xa8   :  { %v65_v31 = vmul.f32 1.6732632, %v92_v30 }
  0xaa   :  { %v67_v32 = vsel %vm55_vm2, %v52_v21, %v65_v31 }
  0xab   :  { %v69_v33 = vmul.f32 1.050701, %v67_v32 }
  0xad   :  { %71 = vst.msk [vmem:[%s178_s3 + $0x8] sm:$0xff] %vm36_vm0, %v69_v33  ;;  %76 = vrot.lane.b32.xlu0 %v69_v33, %s99_s0 }
 0x117   :  { %v75_v34 = vpop.permute.xlu0 %74 }
 0x118   :  { %80 = vst.msk [vmem:[%s179_s4] sm:$0xff] %vm36_vm0, %v75_v34 }
 0x11f   :  { %v77_v35 = vpop.permute.xlu0 %76 }
 0x120   :  { %81 = vst.msk [vmem:[%s179_s4 + $0x8] sm:$0xff] %vm36_vm0, %v77_v35 }

</bundles_post_ra>
